<compile_context>
chip_gen: v7x
topology: tpu7x:2x2x1
jax: 0.10.0
libtpu: 0.0.40
codegen_flags: <defaults>
</compile_context>

<pallas_src>
import functools

import jax
import jax.numpy as jnp
from jax.experimental import pallas as pl
from jax.experimental.pallas import tpu as pltpu

NUM_LAYERS = 3
LANE = 128                     # vreg lane width
SUBLANE = 8                    # vreg sublane count (f32)
MXU_DTYPE = jnp.bfloat16       # matmul-operand dtype (accumulation stays f32)
SMALL_F_MAX = 16               # compact-F (no lane padding) path threshold
UNROLL_SEQ = 16                # full static unroll of the time loop up to here


# ---------------------------------------------------------------------------
# small helpers
# ---------------------------------------------------------------------------
def _round_up(n, m):
    return ((n + m - 1) // m) * m


def _pad_to(a, shape):
    return jnp.pad(a, [(0, t - s) for s, t in zip(a.shape, shape)])


def _pad_gate_cols(w, H, Hp):
    """(..., 4H) -> (..., 4Hp): each PyTorch gate block (i,f,g,o) is moved to
    its own Hp-aligned slot so in-kernel gate slices are whole-vreg (128-lane)."""
    if Hp == H:
        return w
    pads = [(0, 0)] * (w.ndim - 1) + [(0, Hp - H)]
    return jnp.concatenate(
        [jnp.pad(w[..., g * H:(g + 1) * H], pads) for g in range(4)], axis=-1)


def _vmem_limit_bytes():
    """Generation-aware scoped-VMEM limit: ~3/4 of physical (v5e/v6e: 128 MiB,
    v7x: 64 MiB), capped at 100 MiB, v7x-safe 48 MiB fallback."""
    try:
        cap = int(pltpu.get_tpu_info().vmem_capacity_bytes)
    except Exception:
        cap = 64 * 1024 * 1024
    return min((cap * 3) // 4, 100 * 1024 * 1024)


def _pick_bb(B, S, Hp, vmem_limit):
    """Batch tile: fill the MXU M dimension (cap 128; >=2 tiles for large B so
    v7x's second TensorCore gets a 'parallel' grid slice), shrunk if the f32
    gx/hseq scratch would not fit the per-generation VMEM budget."""
    bb = min(_round_up(B, SUBLANE), 128)
    budget = vmem_limit // 2          # rest: weights + double-buffered IO blocks
    while bb > SUBLANE and S * bb * 5 * Hp * 4 > budget:   # gx_sc(4Hp)+hseq_sc(Hp)
        bb = _round_up(bb // 2, SUBLANE)
    return bb


# ---------------------------------------------------------------------------
# Pallas kernels
# ---------------------------------------------------------------------------
def fused_lstm_kernel(x_ref, wih0_ref, wih12_ref, whh_ref, b_ref,
                      wproj_ref, bproj_ref,
                      ctx_ref, hlast_ref, clast_ref,
                      hseq_sc, gx_sc, *, small_f):
    """3 stacked LSTM layers + H->F context projection for one batch tile.

    small_f=True  : x_ref (S,BB,F) compact, wih0_ref (F,1,4Hp) f32,
                    wproj_ref (F,1,Hp) f32 (transposed), bproj_ref (1,F),
                    ctx_ref (S,BB,F) compact.
    small_f=False : x_ref (S,BB,Fp) padded, wih0_ref (Fp,4Hp) bf16,
                    wproj_ref (Hp,Fp) bf16, bproj_ref (1,Fp), ctx_ref (S,BB,Fp).
    """
    S, BB, Fin = x_ref.shape
    Hp = whh_ref.shape[1]
    Fo = ctx_ref.shape[-1]
    SB = S * BB
    G = 4 * Hp
    cdt = whh_ref.dtype          # bf16 MXU-operand dtype

    # ---- layer-0 input projection, hoisted over the whole sequence --------
    if small_f:
        # x stays compact in HBM (true F lanes). Its projection is F
        # broadcast multiply-adds on the VPU/XLU (exact f32) instead of a
        # lane-padded MXU matmul: removes the Fp/F-times-inflated HBM traffic.
        xv = x_ref[...].astype(jnp.float32)                       # (S, BB, F)
        lane = jax.lax.broadcasted_iota(jnp.int32, (S, BB, Fin), 2)
        gx0 = jnp.zeros((S, BB, G), jnp.float32) + b_ref[0].reshape(1, 1, G)
        for f in range(Fin):
            xf = jnp.sum(jnp.where(lane == f, xv, 0.0), axis=-1, keepdims=True)
            gx0 = gx0 + xf * wih0_ref[f].reshape(1, 1, G)
        gx_sc[...] = gx0
    else:
        li0 = x_ref[...].reshape(SB, Fin).astype(cdt)
        gx0 = jnp.dot(li0, wih0_ref[...],
                      preferred_element_type=jnp.float32) + b_ref[0]
        gx_sc[...] = gx0.reshape(S, BB, G)

    for l in range(NUM_LAYERS):
        if l > 0:
            # hoisted input projection for layers 1/2: one big MXU matmul over
            # the whole sequence (previous layer's hidden seq lives in VMEM).
            layer_in = hseq_sc[...].reshape(SB, Hp).astype(cdt)
            gx = jnp.dot(layer_in, wih12_ref[l - 1],
                         preferred_element_type=jnp.float32) + b_ref[l]
            gx_sc[...] = gx.reshape(S, BB, G)

        whh = whh_ref[l]

        def step(t, carry, whh=whh):
            h, c = carry
            gates = gx_sc[t] + jnp.dot(h.astype(cdt), whh,
                                       preferred_element_type=jnp.float32)
            i = jax.nn.sigmoid(gates[:, 0 * Hp:1 * Hp])
            f = jax.nn.sigmoid(gates[:, 1 * Hp:2 * Hp])
            g = jnp.tanh(gates[:, 2 * Hp:3 * Hp])
            o = jax.nn.sigmoid(gates[:, 3 * Hp:4 * Hp])
            c_new = f * c + i * g
            h_new = o * jnp.tanh(c_new)
            hseq_sc[t] = h_new
            return h_new, c_new

        h = jnp.zeros((BB, Hp), jnp.float32)
        c = jnp.zeros((BB, Hp), jnp.float32)
        if S <= UNROLL_SEQ:
            # short sequences: full static unroll lets the scheduler overlap
            # the recurrent MXU matmul with EUP sigmoid/tanh + VPU gate math.
            for t in range(S):
                h, c = step(t, (h, c))
        else:
            # long sequences: partially-unrolled fori_loop (LLO visibility
            # without the vreg-spill cliff of a 3x S-step Python unroll).
            unroll = 4 if S % 4 == 0 else (2 if S % 2 == 0 else 1)
            h, c = jax.lax.fori_loop(0, S, step, (h, c), unroll=unroll)

        hlast_ref[l] = h
        clast_ref[l] = c

    # ---- per-timestep context projection H -> F ----------------------------
    if small_f:
        # compact ctx output: F lane-reductions over the hidden seq (exact f32),
        # assembled with one-hot lane masks; HBM write is true-F wide.
        hs = hseq_sc[...]                                          # (S, BB, Hp)
        onehot = jax.lax.broadcasted_iota(jnp.int32, (1, 1, Fo), 2)
        ctx = jnp.zeros((S, BB, Fo), jnp.float32)
        for f in range(Fo):
            col = jnp.sum(hs * wproj_ref[f].reshape(1, 1, Hp),
                          axis=-1, keepdims=True)                  # (S, BB, 1)
            ctx = ctx + col * jnp.where(onehot == f, 1.0, 0.0)
        ctx_ref[...] = ctx + bproj_ref[...].reshape(1, 1, Fo)
    else:
        layer_in = hseq_sc[...].reshape(SB, Hp).astype(cdt)
        proj = jnp.dot(layer_in, wproj_ref[...],
                       preferred_element_type=jnp.float32) + bproj_ref[...]
        ctx_ref[...] = proj.reshape(S, BB, Fo)


def fused_fc_kernel(ctx_ref, vin_ref, wfc_ref, bfc_ref, wv_ref, bv_ref,
                    fore_ref, var_ref):
    """Forecast FC and variance FC (stable softplus), one output-column tile.

    ctx_ref/vin_ref : (B, flat) bf16, pre-cast in the wrapper, VMEM-resident
                      across all tiles (no per-tile recompute of the cast/add).
    wfc/wv_ref      : (flat, TN) bf16 weight tiles streamed per grid step.
    """
    y_f = jnp.dot(ctx_ref[...], wfc_ref[...],
                  preferred_element_type=jnp.float32) + bfc_ref[...]
    fore_ref[...] = y_f.astype(fore_ref.dtype)

    y_v = jnp.dot(vin_ref[...], wv_ref[...],
                  preferred_element_type=jnp.float32) + bv_ref[...]
    var_ref[...] = (jnp.maximum(y_v, 0.0)
                    + jnp.log1p(jnp.exp(-jnp.abs(y_v)))).astype(var_ref.dtype)


# ---------------------------------------------------------------------------
# pallas_call wrappers (padding + BlockSpecs)
# ---------------------------------------------------------------------------
def _lstm_block(params, x, H, vmem_limit):
    """Fused 3-layer LSTM + projection. Returns padded
    (ctx_tm (S,Bp,Fo), h_n (3,Bp,Hp), c_n (3,Bp,Hp))."""
    B, S, F = x.shape
    Hp = _round_up(H, LANE)
    Fp = _round_up(F, LANE)
    small_f = F <= SMALL_F_MAX
    Fx = F if small_f else Fp       # x feature width in HBM
    Fo = F if small_f else Fp       # ctx output feature width in HBM

    BB = _pick_bb(B, S, Hp, vmem_limit)
    Bp = _round_up(B, BB)

    # time-major input; for small F only the batch dim is padded (no 32x
    # zero-padded f32 round trip through HBM).
    x_p = _pad_to(jnp.transpose(x, (1, 0, 2)).astype(jnp.float32), (S, Bp, Fx))

    def pad_w(w, rows):
        return _pad_to(_pad_gate_cols(w, H, Hp), (rows, 4 * Hp)).astype(MXU_DTYPE)

    if small_f:
        wih0_p = _pad_gate_cols(params["wih_0"], H, Hp).reshape(
            F, 1, 4 * Hp).astype(jnp.float32)
        wih0_spec = pl.BlockSpec((F, 1, 4 * Hp), lambda i: (0, 0, 0))
        wproj_p = _pad_to(params["w_proj"].T, (F, Hp)).reshape(
            F, 1, Hp).astype(jnp.float32)            # transposed, compact
        wproj_spec = pl.BlockSpec((F, 1, Hp), lambda i: (0, 0, 0))
        bproj_p = params["b_proj"].astype(jnp.float32)               # (1, F)
        bproj_spec = pl.BlockSpec((1, F), lambda i: (0, 0))
    else:
        wih0_p = pad_w(params["wih_0"], Fp)
        wih0_spec = pl.BlockSpec((Fp, 4 * Hp), lambda i: (0, 0))
        wproj_p = _pad_to(params["w_proj"], (Hp, Fp)).astype(MXU_DTYPE)
        wproj_spec = pl.BlockSpec((Hp, Fp), lambda i: (0, 0))
        bproj_p = _pad_to(params["b_proj"], (1, Fp)).astype(jnp.float32)
        bproj_spec = pl.BlockSpec((1, Fp), lambda i: (0, 0))

    wih12_p = jnp.stack([pad_w(params[f"wih_{l}"], Hp) for l in (1, 2)])
    whh_p = jnp.stack([pad_w(params[f"whh_{l}"], Hp) for l in range(NUM_LAYERS)])
    b_p = jnp.stack([_pad_gate_cols(params[f"b_{l}"], H, Hp)
                     for l in range(NUM_LAYERS)]).astype(jnp.float32)

    kernel = functools.partial(fused_lstm_kernel, small_f=small_f)
    ctx_tm, h_n, c_n = pl.pallas_call(
        kernel,
        out_shape=(
            jax.ShapeDtypeStruct((S, Bp, Fo), jnp.float32),
            jax.ShapeDtypeStruct((NUM_LAYERS, Bp, Hp), jnp.float32),
            jax.ShapeDtypeStruct((NUM_LAYERS, Bp, Hp), jnp.float32),
        ),
        grid=(Bp // BB,),
        in_specs=[
            pl.BlockSpec((S, BB, Fx), lambda i: (0, i, 0)),
            wih0_spec,
            # weights: full-array blocks with constant index maps -> DMA'd once
            # and VMEM-resident across the (parallel) batch-tile grid.
            pl.BlockSpec((2, Hp, 4 * Hp), lambda i: (0, 0, 0)),
            pl.BlockSpec((NUM_LAYERS, Hp, 4 * Hp), lambda i: (0, 0, 0)),
            pl.BlockSpec((NUM_LAYERS, 1, 4 * Hp), lambda i: (0, 0, 0)),
            wproj_spec,
            bproj_spec,
        ],
        out_specs=(
            pl.BlockSpec((S, BB, Fo), lambda i: (0, i, 0)),
            pl.BlockSpec((NUM_LAYERS, BB, Hp), lambda i: (0, i, 0)),
            pl.BlockSpec((NUM_LAYERS, BB, Hp), lambda i: (0, i, 0)),
        ),
        scratch_shapes=[
            pltpu.VMEM((S, BB, Hp), jnp.float32),       # inter-layer hidden seq
            pltpu.VMEM((S, BB, 4 * Hp), jnp.float32),   # hoisted x@Wih + b (f32)
        ],
        compiler_params=pltpu.CompilerParams(
            dimension_semantics=("parallel",),          # batch tiles -> 2 TCs on v7x
            vmem_limit_bytes=vmem_limit),
    )(x_p, wih0_p, wih12_p, whh_p, b_p, wproj_p, bproj_p)
    return ctx_tm, h_n, c_n


def _fc_block(ctx, orig_flat, w_fc, b_fc, w_v, b_v, vmem_limit):
    """Fused forecast + variance heads, tiled over output columns."""
    B, flat = ctx.shape
    fore = w_fc.shape[1]

    # output-tile width: up to 512 subject to the weight-streaming VMEM budget
    budget = vmem_limit // 2
    tn_cap = max(LANE, (budget // (8 * flat)) // LANE * LANE)  # 2 wts x 2 bufs x bf16
    TN = int(min(512, tn_cap, _round_up(fore, LANE)))
    fore_p = _round_up(fore, TN)
    n_tiles = fore_p // TN

    # hoisted: cast / reconstruct+original add done once (not per output tile)
    ctx_bf = ctx.astype(MXU_DTYPE)
    vin_bf = (ctx + orig_flat).astype(MXU_DTYPE)

    wfc_p = _pad_to(w_fc, (flat, fore_p)).astype(MXU_DTYPE)
    wv_p = _pad_to(w_v, (flat, fore_p)).astype(MXU_DTYPE)
    bfc_p = _pad_to(b_fc, (1, fore_p)).astype(jnp.float32)
    bv_p = _pad_to(b_v, (1, fore_p)).astype(jnp.float32)

    # deeper buffering on the streamed weight tiles when the grid is deep
    w_kw = {"pipeline_mode": pl.Buffered(3)} if n_tiles >= 3 else {}

    forecast_p, var_p = pl.pallas_call(
        fused_fc_kernel,
        out_shape=(jax.ShapeDtypeStruct((B, fore_p), jnp.float32),
                   jax.ShapeDtypeStruct((B, fore_p), jnp.float32)),
        grid=(n_tiles,),
        in_specs=[
            pl.BlockSpec((B, flat), lambda j: (0, 0)),    # activations resident
            pl.BlockSpec((B, flat), lambda j: (0, 0)),
            pl.BlockSpec((flat, TN), lambda j: (0, j), **w_kw),
            pl.BlockSpec((1, TN), lambda j: (0, j)),
            pl.BlockSpec((flat, TN), lambda j: (0, j), **w_kw),
            pl.BlockSpec((1, TN), lambda j: (0, j)),
        ],
        out_specs=(pl.BlockSpec((B, TN), lambda j: (0, j)),
                   pl.BlockSpec((B, TN), lambda j: (0, j))),
        compiler_params=pltpu.CompilerParams(
            dimension_semantics=("parallel",),
            vmem_limit_bytes=vmem_limit),
    )(ctx_bf, vin_bf, wfc_p, bfc_p, wv_p, bv_p)
    return forecast_p[:, :fore], var_p[:, :fore]


# ---------------------------------------------------------------------------
# parameters (deterministic, PyTorch-LSTM-style uniform init)
# ---------------------------------------------------------------------------
def init_params(key, seq_len, feature_num, ratio):
    H = int(seq_len * ratio)
    fore = int(seq_len * ratio) * feature_num
    flat = seq_len * feature_num
    k = 1.0 / jnp.sqrt(jnp.float32(H))

    def u(key, shape):
        return jax.random.uniform(key, shape, jnp.float32, minval=-k, maxval=k)

    params = {}
    keys = jax.random.split(key, 3 * NUM_LAYERS + 6)
    idx = 0
    for l in range(NUM_LAYERS):
        din = feature_num if l == 0 else H
        params[f"wih_{l}"] = u(keys[idx], (din, 4 * H)); idx += 1
        params[f"whh_{l}"] = u(keys[idx], (H, 4 * H)); idx += 1
        params[f"b_{l}"] = u(keys[idx], (1, 4 * H)); idx += 1     # b_ih + b_hh
    params["w_proj"] = u(keys[idx], (H, feature_num)); idx += 1
    params["b_proj"] = u(keys[idx], (1, feature_num)); idx += 1
    params["w_fc"] = u(keys[idx], (flat, fore)); idx += 1
    params["b_fc"] = u(keys[idx], (1, fore)); idx += 1
    params["w_v"] = u(keys[idx], (flat, fore)); idx += 1
    params["b_v"] = u(keys[idx], (1, fore)); idx += 1
    return params


# ---------------------------------------------------------------------------
# rnn_blocks forward
# ---------------------------------------------------------------------------
@functools.partial(jax.jit, static_argnames=("seq_len", "feature_num", "ratio"))
def rnn_blocks_forward(params, x, original_data, *, seq_len, feature_num, ratio):
    B, S, F = x.shape
    assert S == seq_len and F == feature_num
    H = int(seq_len * ratio)
    vmem_limit = _vmem_limit_bytes()

    ctx_tm, h_n, c_n = _lstm_block(params, x, H, vmem_limit)

    # un-pad; time-major -> batch-major; flatten per sample: (B, S*F)
    ctx = jnp.transpose(ctx_tm[:, :B, :F], (1, 0, 2)).reshape(B, S * F)
    hidden_cell = (h_n[:, :B, :H], c_n[:, :B, :H])

    reconstruct = ctx.reshape(x.shape)
    orig_flat = original_data.reshape(B, S * F)

    forecast, var = _fc_block(ctx, orig_flat,
                              params["w_fc"], params["b_fc"],
                              params["w_v"], params["b_v"], vmem_limit)
    forecast = forecast.reshape(B, -1, F)
    var = var.reshape(B, -1, F)
    return hidden_cell, ctx, reconstruct, forecast, var


# ---------------------------------------------------------------------------
# pure-JAX f32 reference (same assumed semantics) for a correctness check
# ---------------------------------------------------------------------------
def reference_forward(params, x, original_data, seq_len, feature_num, ratio):
    B, S, F = x.shape
    H = int(seq_len * ratio)

    def lstm_layer_ref(xs, wih, whh, b):
        def step(carry, x_t):
            h, c = carry
            g = x_t @ wih + h @ whh + b
            i = jax.nn.sigmoid(g[:, :H]); f = jax.nn.sigmoid(g[:, H:2 * H])
            gg = jnp.tanh(g[:, 2 * H:3 * H]); o = jax.nn.sigmoid(g[:, 3 * H:])
            c = f * c + i * gg
            h = o * jnp.tanh(c)
            return (h, c), h
        init = (jnp.zeros((B, H), jnp.float32), jnp.zeros((B, H), jnp.float32))
        (h, c), hs = jax.lax.scan(step, init, xs)
        return hs, h, c

    xs = jnp.transpose(x, (1, 0, 2))
    hfs, cfs, inp = [], [], xs
    for l in range(NUM_LAYERS):
        hs, h, c = lstm_layer_ref(inp, params[f"wih_{l}"], params[f"whh_{l}"],
                                  params[f"b_{l}"])
        hfs.append(h); cfs.append(c); inp = hs
    proj = inp.reshape(S * B, H) @ params["w_proj"] + params["b_proj"]
    ctx = jnp.transpose(proj.reshape(S, B, F), (1, 0, 2)).reshape(B, S * F)
    rec = ctx.reshape(x.shape)
    forecast = (ctx @ params["w_fc"] + params["b_fc"]).reshape(B, -1, F)
    y = (rec + original_data).reshape(B, S * F) @ params["w_v"] + params["b_v"]
    var = (jnp.maximum(y, 0.0) + jnp.log1p(jnp.exp(-jnp.abs(y)))).reshape(B, -1, F)
    return (jnp.stack(hfs), jnp.stack(cfs)), ctx, rec, forecast, var


# ---------------------------------------------------------------------------
if __name__ == "__main__":
    seq_len = 8
    feature_num = 4
    ratio = 4.0          # hidden H = int(seq_len * ratio) = 32
    batch = 2

    key = jax.random.PRNGKey(0)
    kp, kx, ko = jax.random.split(key, 3)
    params = init_params(kp, seq_len, feature_num, ratio)
    x = jax.random.normal(kx, (batch, seq_len, feature_num), jnp.float32)
    original_data = jax.random.normal(ko, (batch, seq_len, feature_num), jnp.float32)

    out = rnn_blocks_forward(params, x, original_data,
                             seq_len=seq_len, feature_num=feature_num, ratio=ratio)
    jax.block_until_ready(out)

    hidden_cell, ctx, reconstruct, forecast, var = out
    H = int(seq_len * ratio)
    assert hidden_cell[0].shape == (NUM_LAYERS, batch, H)
    assert hidden_cell[1].shape == (NUM_LAYERS, batch, H)
    assert ctx.shape == (batch, seq_len * feature_num)
    assert reconstruct.shape == x.shape
    assert forecast.shape == (batch, H, feature_num)
    assert var.shape == (batch, H, feature_num)

    # correctness vs f32 reference (tolerance covers bf16 MXU operands)
    (rh, rc), rctx, rrec, rfore, rvar = reference_forward(
        params, x, original_data, seq_len, feature_num, ratio)

    def _chk(name, a, b, tol=5e-2):
        err = float(jnp.max(jnp.abs(a - b)))
        assert err < tol, (name, err)

    _chk("h_n", hidden_cell[0], rh)
    _chk("c_n", hidden_cell[1], rc)
    _chk("ctx", ctx, rctx)
    _chk("reconstruct", reconstruct, rrec)
    _chk("forecast", forecast, rfore)
    _chk("var", var, rvar)

    print("KERNEL_OK")
</pallas_src>

<mosaic_0001>
module attributes {stable_mosaic.version = 11 : i64} {
  func.func @fused_fc_kernel(%arg0: i32, %arg1: memref<2x32xbf16, #tpu.memory_space<vmem>>, %arg2: memref<2x32xbf16, #tpu.memory_space<vmem>>, %arg3: memref<32x128xbf16, #tpu.memory_space<vmem>>, %arg4: memref<1x128xf32, #tpu.memory_space<vmem>>, %arg5: memref<32x128xbf16, #tpu.memory_space<vmem>>, %arg6: memref<1x128xf32, #tpu.memory_space<vmem>>, %arg7: memref<2x128xf32, #tpu.memory_space<vmem>>, %arg8: memref<2x128xf32, #tpu.memory_space<vmem>>) attributes {dimension_semantics = [#tpu.dimension_semantics<parallel>], iteration_bounds = array<i64: 1>, scalar_prefetch = 0 : i64, scratch_operands = 0 : i64, tpu.core_type = #tpu.core_type<tc>, window_params = [{pipeline_mode = #tpu.pipeline_mode<synchronous>, transform_indices = @transform_0, window_bounds = array<i64: 2, 32>}, {pipeline_mode = #tpu.pipeline_mode<synchronous>, transform_indices = @transform_1, window_bounds = array<i64: 2, 32>}, {transform_indices = @transform_2, window_bounds = array<i64: 32, 128>}, {transform_indices = @transform_3, window_bounds = array<i64: 1, 128>}, {transform_indices = @transform_4, window_bounds = array<i64: 32, 128>}, {transform_indices = @transform_5, window_bounds = array<i64: 1, 128>}, {transform_indices = @transform_6, window_bounds = array<i64: 2, 128>}, {transform_indices = @transform_7, window_bounds = array<i64: 2, 128>}]} {
    %c0 = arith.constant 0 : index
    %c0_0 = arith.constant 0 : index
    %0 = vector.load %arg1[%c0, %c0_0] : memref<2x32xbf16, #tpu.memory_space<vmem>>, vector<2x32xbf16>
    %c0_1 = arith.constant 0 : index
    %c0_2 = arith.constant 0 : index
    %1 = vector.load %arg3[%c0_1, %c0_2] : memref<32x128xbf16, #tpu.memory_space<vmem>>, vector<32x128xbf16>
    %cst = arith.constant dense<0.000000e+00> : vector<2x128xf32>
    %2 = tpu.matmul %0, %1, %cst {dimension_numbers = #tpu.dot_dimension_numbers<[1], [0], [0], [1], [0, 0, 1, 1], [], []>} : vector<2x32xbf16>, vector<32x128xbf16>, vector<2x128xf32> -> vector<2x128xf32>
    %c0_3 = arith.constant 0 : index
    %c0_4 = arith.constant 0 : index
    %3 = vector.load %arg4[%c0_3, %c0_4] : memref<1x128xf32, #tpu.memory_space<vmem>>, vector<1x128xf32>
    %4 = vector.broadcast %3 : vector<1x128xf32> to vector<2x128xf32>
    %5 = arith.addf %2, %4 : vector<2x128xf32>
    %c0_5 = arith.constant 0 : index
    %c0_6 = arith.constant 0 : index
    %6 = vector.load %arg7[%c0_5, %c0_6] : memref<2x128xf32, #tpu.memory_space<vmem>>, vector<2x128xf32>
    tpu.vector_store %arg7[%c0_5, %c0_6], %5 {strides = array<i32>} : memref<2x128xf32, #tpu.memory_space<vmem>>, vector<2x128xf32>,
    %c0_7 = arith.constant 0 : index
    %c0_8 = arith.constant 0 : index
    %7 = vector.load %arg2[%c0_7, %c0_8] : memref<2x32xbf16, #tpu.memory_space<vmem>>, vector<2x32xbf16>
    %c0_9 = arith.constant 0 : index
    %c0_10 = arith.constant 0 : index
    %8 = vector.load %arg5[%c0_9, %c0_10] : memref<32x128xbf16, #tpu.memory_space<vmem>>, vector<32x128xbf16>
    %cst_11 = arith.constant dense<0.000000e+00> : vector<2x128xf32>
    %9 = tpu.matmul %7, %8, %cst_11 {dimension_numbers = #tpu.dot_dimension_numbers<[1], [0], [0], [1], [0, 0, 1, 1], [], []>} : vector<2x32xbf16>, vector<32x128xbf16>, vector<2x128xf32> -> vector<2x128xf32>
    %c0_12 = arith.constant 0 : index
    %c0_13 = arith.constant 0 : index
    %10 = vector.load %arg6[%c0_12, %c0_13] : memref<1x128xf32, #tpu.memory_space<vmem>>, vector<1x128xf32>
    %11 = vector.broadcast %10 : vector<1x128xf32> to vector<2x128xf32>
    %12 = arith.addf %9, %11 : vector<2x128xf32>
    %cst_14 = arith.constant 0.000000e+00 : f32
    %13 = vector.broadcast %cst_14 : f32 to vector<2x128xf32>
    %14 = arith.maximumf %12, %13 : vector<2x128xf32>
    %15 = math.absf %12 : vector<2x128xf32>
    %cst_15 = arith.constant 0.000000e+00 : f32
    %16 = vector.broadcast %cst_15 : f32 to vector<2x128xf32>
    %17 = arith.subf %16, %15 : vector<2x128xf32>
    %18 = math.exp %17 : vector<2x128xf32>
    %19 = math.log1p %18 : vector<2x128xf32>
    %20 = arith.addf %14, %19 : vector<2x128xf32>
    %c0_16 = arith.constant 0 : index
    %c0_17 = arith.constant 0 : index
    %21 = vector.load %arg8[%c0_16, %c0_17] : memref<2x128xf32, #tpu.memory_space<vmem>>, vector<2x128xf32>
    tpu.vector_store %arg8[%c0_16, %c0_17], %20 {strides = array<i32>} : memref<2x128xf32, #tpu.memory_space<vmem>>, vector<2x128xf32>,
    return
  }
  func.func @transform_0(%arg0: i32) -> (i32, i32) {
    %c0_i32 = arith.constant 0 : i32
    %c0_i32_0 = arith.constant 0 : i32
    %c0_i32_1 = arith.constant 0 : i32
    return %c0_i32, %c0_i32_0 : i32, i32
  }
  func.func @transform_1(%arg0: i32) -> (i32, i32) {
    %c0_i32 = arith.constant 0 : i32
    %c0_i32_0 = arith.constant 0 : i32
    %c0_i32_1 = arith.constant 0 : i32
    return %c0_i32, %c0_i32_0 : i32, i32
  }
  func.func @transform_2(%arg0: i32) -> (i32, i32) {
    %c0_i32 = arith.constant 0 : i32
    %c0_i32_0 = arith.constant 0 : i32
    return %c0_i32, %arg0 : i32, i32
  }
  func.func @transform_3(%arg0: i32) -> (i32, i32) {
    %c0_i32 = arith.constant 0 : i32
    %c0_i32_0 = arith.constant 0 : i32
    return %c0_i32, %arg0 : i32, i32
  }
  func.func @transform_4(%arg0: i32) -> (i32, i32) {
    %c0_i32 = arith.constant 0 : i32
    %c0_i32_0 = arith.constant 0 : i32
    return %c0_i32, %arg0 : i32, i32
  }
  func.func @transform_5(%arg0: i32) -> (i32, i32) {
    %c0_i32 = arith.constant 0 : i32
    %c0_i32_0 = arith.constant 0 : i32
    return %c0_i32, %arg0 : i32, i32
  }
  func.func @transform_6(%arg0: i32) -> (i32, i32) {
    %c0_i32 = arith.constant 0 : i32
    %c0_i32_0 = arith.constant 0 : i32
    return %c0_i32, %arg0 : i32, i32
  }
  func.func @transform_7(%arg0: i32) -> (i32, i32) {
    %c0_i32 = arith.constant 0 : i32
    %c0_i32_0 = arith.constant 0 : i32
    return %c0_i32, %arg0 : i32, i32
  }
}

module attributes {stable_mosaic.version = 11 : i64} {
  func.func @fused_lstm_kernel(%arg0: i32, %arg1: memref<8x8x4xf32, #tpu.memory_space<vmem>>, %arg2: memref<4x1x512xf32, #tpu.memory_space<vmem>>, %arg3: memref<2x128x512xbf16, #tpu.memory_space<vmem>>, %arg4: memref<3x128x512xbf16, #tpu.memory_space<vmem>>, %arg5: memref<3x1x512xf32, #tpu.memory_space<vmem>>, %arg6: memref<4x1x128xf32, #tpu.memory_space<vmem>>, %arg7: memref<1x4xf32, #tpu.memory_space<vmem>>, %arg8: memref<8x8x4xf32, #tpu.memory_space<vmem>>, %arg9: memref<3x8x128xf32, #tpu.memory_space<vmem>>, %arg10: memref<3x8x128xf32, #tpu.memory_space<vmem>>, %arg11: memref<8x8x128xf32, #tpu.memory_space<vmem>>, %arg12: memref<8x8x512xf32, #tpu.memory_space<vmem>>) attributes {dimension_semantics = [#tpu.dimension_semantics<parallel>], iteration_bounds = array<i64: 1>, scalar_prefetch = 0 : i64, scratch_operands = 2 : i64, tpu.core_type = #tpu.core_type<tc>, window_params = [{transform_indices = @transform_0, window_bounds = array<i64: 8, 8, 4>}, {pipeline_mode = #tpu.pipeline_mode<synchronous>, transform_indices = @transform_1, window_bounds = array<i64: 4, 1, 512>}, {pipeline_mode = #tpu.pipeline_mode<synchronous>, transform_indices = @transform_2, window_bounds = array<i64: 2, 128, 512>}, {pipeline_mode = #tpu.pipeline_mode<synchronous>, transform_indices = @transform_3, window_bounds = array<i64: 3, 128, 512>}, {pipeline_mode = #tpu.pipeline_mode<synchronous>, transform_indices = @transform_4, window_bounds = array<i64: 3, 1, 512>}, {pipeline_mode = #tpu.pipeline_mode<synchronous>, transform_indices = @transform_5, window_bounds = array<i64: 4, 1, 128>}, {pipeline_mode = #tpu.pipeline_mode<synchronous>, transform_indices = @transform_6, window_bounds = array<i64: 1, 4>}, {transform_indices = @transform_7, window_bounds = array<i64: 8, 8, 4>}, {transform_indices = @transform_8, window_bounds = array<i64: 3, 8, 128>}, {transform_indices = @transform_9, window_bounds = array<i64: 3, 8, 128>}]} {
    %c0 = arith.constant 0 : index
    %c0_0 = arith.constant 0 : index
    %c0_1 = arith.constant 0 : index
    %0 = vector.load %arg1[%c0, %c0_0, %c0_1] : memref<8x8x4xf32, #tpu.memory_space<vmem>>, vector<8x8x4xf32>
    %1 = tpu.iota {dimensions = array<i32: 2>} : vector<8x8x4xi32>
    %cst = arith.constant 0.000000e+00 : f32
    %2 = vector.broadcast %cst : f32 to vector<8x8x512xf32>
    %c0_2 = arith.constant 0 : index
    %c0_3 = arith.constant 0 : index
    %c0_4 = arith.constant 0 : index
    %3 = vector.load %arg5[%c0_2, %c0_3, %c0_4] : memref<3x1x512xf32, #tpu.memory_space<vmem>>, vector<1x1x512xf32>
    %4 = vector.shape_cast %3 : vector<1x1x512xf32> to vector<1x512xf32>
    %5 = vector.shape_cast %4 : vector<1x512xf32> to vector<1x1x512xf32>
    %6 = vector.broadcast %5 : vector<1x1x512xf32> to vector<8x8x512xf32>
    %7 = arith.addf %2, %6 : vector<8x8x512xf32>
    %c0_i32 = arith.constant 0 : i32
    %8 = vector.broadcast %c0_i32 : i32 to vector<8x8x4xi32>
    %9 = arith.cmpi eq, %1, %8 : vector<8x8x4xi32>
    %cst_5 = arith.constant 0.000000e+00 : f32
    %10 = vector.broadcast %cst_5 : f32 to vector<8x8x4xf32>
    %11 = arith.select %9, %0, %10 : vector<8x8x4xi1>, vector<8x8x4xf32>
    %cst_6 = arith.constant dense<0.000000e+00> : vector<8x8xf32>
    %12 = vector.multi_reduction <add>, %11, %cst_6 [2] : vector<8x8x4xf32> to vector<8x8xf32>
    %13 = vector.shape_cast %12 : vector<8x8xf32> to vector<8x8x1xf32>
    %c0_7 = arith.constant 0 : index
    %c0_8 = arith.constant 0 : index
    %c0_9 = arith.constant 0 : index
    %14 = vector.load %arg2[%c0_7, %c0_8, %c0_9] : memref<4x1x512xf32, #tpu.memory_space<vmem>>, vector<1x1x512xf32>
    %15 = vector.shape_cast %14 : vector<1x1x512xf32> to vector<1x512xf32>
    %16 = vector.shape_cast %15 : vector<1x512xf32> to vector<1x1x512xf32>
    %17 = vector.broadcast %13 : vector<8x8x1xf32> to vector<8x8x512xf32>
    %18 = vector.broadcast %16 : vector<1x1x512xf32> to vector<8x8x512xf32>
    %19 = arith.mulf %17, %18 : vector<8x8x512xf32>
    %20 = arith.addf %7, %19 : vector<8x8x512xf32>
    %c1_i32 = arith.constant 1 : i32
    %21 = vector.broadcast %c1_i32 : i32 to vector<8x8x4xi32>
    %22 = arith.cmpi eq, %1, %21 : vector<8x8x4xi32>
    %cst_10 = arith.constant 0.000000e+00 : f32
    %23 = vector.broadcast %cst_10 : f32 to vector<8x8x4xf32>
    %24 = arith.select %22, %0, %23 : vector<8x8x4xi1>, vector<8x8x4xf32>
    %cst_11 = arith.constant dense<0.000000e+00> : vector<8x8xf32>
    %25 = vector.multi_reduction <add>, %24, %cst_11 [2] : vector<8x8x4xf32> to vector<8x8xf32>
    %26 = vector.shape_cast %25 : vector<8x8xf32> to vector<8x8x1xf32>
    %c1 = arith.constant 1 : index
    %c0_12 = arith.constant 0 : index
    %c0_13 = arith.constant 0 : index
    %27 = vector.load %arg2[%c1, %c0_12, %c0_13] : memref<4x1x512xf32, #tpu.memory_space<vmem>>, vector<1x1x512xf32>
    %28 = vector.shape_cast %27 : vector<1x1x512xf32> to vector<1x512xf32>
    %29 = vector.shape_cast %28 : vector<1x512xf32> to vector<1x1x512xf32>
    %30 = vector.broadcast %26 : vector<8x8x1xf32> to vector<8x8x512xf32>
    %31 = vector.broadcast %29 : vector<1x1x512xf32> to vector<8x8x512xf32>
    %32 = arith.mulf %30, %31 : vector<8x8x512xf32>
    %33 = arith.addf %20, %32 : vector<8x8x512xf32>
    %c2_i32 = arith.constant 2 : i32
    %34 = vector.broadcast %c2_i32 : i32 to vector<8x8x4xi32>
    %35 = arith.cmpi eq, %1, %34 : vector<8x8x4xi32>
    %cst_14 = arith.constant 0.000000e+00 : f32
    %36 = vector.broadcast %cst_14 : f32 to vector<8x8x4xf32>
    %37 = arith.select %35, %0, %36 : vector<8x8x4xi1>, vector<8x8x4xf32>
    %cst_15 = arith.constant dense<0.000000e+00> : vector<8x8xf32>
    %38 = vector.multi_reduction <add>, %37, %cst_15 [2] : vector<8x8x4xf32> to vector<8x8xf32>
    %39 = vector.shape_cast %38 : vector<8x8xf32> to vector<8x8x1xf32>
    %c2 = arith.constant 2 : index
    %c0_16 = arith.constant 0 : index
    %c0_17 = arith.constant 0 : index
    %40 = vector.load %arg2[%c2, %c0_16, %c0_17] : memref<4x1x512xf32, #tpu.memory_space<vmem>>, vector<1x1x512xf32>
    %41 = vector.shape_cast %40 : vector<1x1x512xf32> to vector<1x512xf32>
    %42 = vector.shape_cast %41 : vector<1x512xf32> to vector<1x1x512xf32>
    %43 = vector.broadcast %39 : vector<8x8x1xf32> to vector<8x8x512xf32>
    %44 = vector.broadcast %42 : vector<1x1x512xf32> to vector<8x8x512xf32>
    %45 = arith.mulf %43, %44 : vector<8x8x512xf32>
    %46 = arith.addf %33, %45 : vector<8x8x512xf32>
    %c3_i32 = arith.constant 3 : i32
    %47 = vector.broadcast %c3_i32 : i32 to vector<8x8x4xi32>
    %48 = arith.cmpi eq, %1, %47 : vector<8x8x4xi32>
    %cst_18 = arith.constant 0.000000e+00 : f32
    %49 = vector.broadcast %cst_18 : f32 to vector<8x8x4xf32>
    %50 = arith.select %48, %0, %49 : vector<8x8x4xi1>, vector<8x8x4xf32>
    %cst_19 = arith.constant dense<0.000000e+00> : vector<8x8xf32>
    %51 = vector.multi_reduction <add>, %50, %cst_19 [2] : vector<8x8x4xf32> to vector<8x8xf32>
    %52 = vector.shape_cast %51 : vector<8x8xf32> to vector<8x8x1xf32>
    %c3 = arith.constant 3 : index
    %c0_20 = arith.constant 0 : index
    %c0_21 = arith.constant 0 : index
    %53 = vector.load %arg2[%c3, %c0_20, %c0_21] : memref<4x1x512xf32, #tpu.memory_space<vmem>>, vector<1x1x512xf32>
    %54 = vector.shape_cast %53 : vector<1x1x512xf32> to vector<1x512xf32>
    %55 = vector.shape_cast %54 : vector<1x512xf32> to vector<1x1x512xf32>
    %56 = vector.broadcast %52 : vector<8x8x1xf32> to vector<8x8x512xf32>
    %57 = vector.broadcast %55 : vector<1x1x512xf32> to vector<8x8x512xf32>
    %58 = arith.mulf %56, %57 : vector<8x8x512xf32>
    %59 = arith.addf %46, %58 : vector<8x8x512xf32>
    %c0_22 = arith.constant 0 : index
    %c0_23 = arith.constant 0 : index
    %c0_24 = arith.constant 0 : index
    %60 = vector.load %arg12[%c0_22, %c0_23, %c0_24] : memref<8x8x512xf32, #tpu.memory_space<vmem>>, vector<8x8x512xf32>
    tpu.vector_store %arg12[%c0_22, %c0_23, %c0_24], %59 {strides = array<i32>} : memref<8x8x512xf32, #tpu.memory_space<vmem>>, vector<8x8x512xf32>,
    %c0_25 = arith.constant 0 : index
    %c0_26 = arith.constant 0 : index
    %c0_27 = arith.constant 0 : index
    %61 = vector.load %arg4[%c0_25, %c0_26, %c0_27] : memref<3x128x512xbf16, #tpu.memory_space<vmem>>, vector<1x128x512xbf16>
    %62 = vector.shape_cast %61 : vector<1x128x512xbf16> to vector<128x512xbf16>
    %cst_28 = arith.constant 0.000000e+00 : f32
    %63 = vector.broadcast %cst_28 : f32 to vector<8x128xf32>
    %cst_29 = arith.constant 0.000000e+00 : f32
    %64 = vector.broadcast %cst_29 : f32 to vector<8x128xf32>
    %c0_30 = arith.constant 0 : index
    %c0_31 = arith.constant 0 : index
    %c0_32 = arith.constant 0 : index
    %65 = vector.load %arg12[%c0_30, %c0_31, %c0_32] : memref<8x8x512xf32, #tpu.memory_space<vmem>>, vector<1x8x512xf32>
    %66 = vector.shape_cast %65 : vector<1x8x512xf32> to vector<8x512xf32>
    %67 = arith.truncf %63 : vector<8x128xf32> to vector<8x128xbf16>
    %cst_33 = arith.constant dense<0.000000e+00> : vector<8x512xf32>
    %68 = tpu.matmul %67, %62, %cst_33 {dimension_numbers = #tpu.dot_dimension_numbers<[1], [0], [0], [1], [0, 0, 1, 1], [], []>} : vector<8x128xbf16>, vector<128x512xbf16>, vector<8x512xf32> -> vector<8x512xf32>
    %69 = arith.addf %66, %68 : vector<8x512xf32>
    %70 = vector.extract_strided_slice %69 {offsets = [0, 0], sizes = [8, 128], strides = [1, 1]} : vector<8x512xf32> to vector<8x128xf32>
    %71 = arith.negf %70 : vector<8x128xf32>
    %72 = math.exp %71 : vector<8x128xf32>
    %cst_34 = arith.constant 1.000000e+00 : f32
    %73 = vector.broadcast %cst_34 : f32 to vector<8x128xf32>
    %74 = arith.addf %73, %72 : vector<8x128xf32>
    %75 = arith.divf %73, %74 : vector<8x128xf32>
    %76 = vector.extract_strided_slice %69 {offsets = [0, 128], sizes = [8, 128], strides = [1, 1]} : vector<8x512xf32> to vector<8x128xf32>
    %77 = arith.negf %76 : vector<8x128xf32>
    %78 = math.exp %77 : vector<8x128xf32>
    %cst_35 = arith.constant 1.000000e+00 : f32
    %79 = vector.broadcast %cst_35 : f32 to vector<8x128xf32>
    %80 = arith.addf %79, %78 : vector<8x128xf32>
    %81 = arith.divf %79, %80 : vector<8x128xf32>
    %82 = vector.extract_strided_slice %69 {offsets = [0, 256], sizes = [8, 128], strides = [1, 1]} : vector<8x512xf32> to vector<8x128xf32>
    %83 = math.tanh %82 : vector<8x128xf32>
    %84 = vector.extract_strided_slice %69 {offsets = [0, 384], sizes = [8, 128], strides = [1, 1]} : vector<8x512xf32> to vector<8x128xf32>
    %85 = arith.negf %84 : vector<8x128xf32>
    %86 = math.exp %85 : vector<8x128xf32>
    %cst_36 = arith.constant 1.000000e+00 : f32
    %87 = vector.broadcast %cst_36 : f32 to vector<8x128xf32>
    %88 = arith.addf %87, %86 : vector<8x128xf32>
    %89 = arith.divf %87, %88 : vector<8x128xf32>
    %90 = arith.mulf %81, %64 : vector<8x128xf32>
    %91 = arith.mulf %75, %83 : vector<8x128xf32>
    %92 = arith.addf %90, %91 : vector<8x128xf32>
    %93 = math.tanh %92 : vector<8x128xf32>
    %94 = arith.mulf %89, %93 : vector<8x128xf32>
    %c0_37 = arith.constant 0 : index
    %c0_38 = arith.constant 0 : index
    %c0_39 = arith.constant 0 : index
    %95 = vector.load %arg11[%c0_37, %c0_38, %c0_39] : memref<8x8x128xf32, #tpu.memory_space<vmem>>, vector<1x8x128xf32>
    %96 = vector.shape_cast %95 : vector<1x8x128xf32> to vector<8x128xf32>
    %97 = vector.shape_cast %94 : vector<8x128xf32> to vector<1x8x128xf32>
    tpu.vector_store %arg11[%c0_37, %c0_38, %c0_39], %97 {strides = array<i32>} : memref<8x8x128xf32, #tpu.memory_space<vmem>>, vector<1x8x128xf32>,
    %c1_40 = arith.constant 1 : index
    %c0_41 = arith.constant 0 : index
    %c0_42 = arith.constant 0 : index
    %98 = vector.load %arg12[%c1_40, %c0_41, %c0_42] : memref<8x8x512xf32, #tpu.memory_space<vmem>>, vector<1x8x512xf32>
    %99 = vector.shape_cast %98 : vector<1x8x512xf32> to vector<8x512xf32>
    %100 = arith.truncf %94 : vector<8x128xf32> to vector<8x128xbf16>
    %cst_43 = arith.constant dense<0.000000e+00> : vector<8x512xf32>
    %101 = tpu.matmul %100, %62, %cst_43 {dimension_numbers = #tpu.dot_dimension_numbers<[1], [0], [0], [1], [0, 0, 1, 1], [], []>} : vector<8x128xbf16>, vector<128x512xbf16>, vector<8x512xf32> -> vector<8x512xf32>
    %102 = arith.addf %99, %101 : vector<8x512xf32>
    %103 = vector.extract_strided_slice %102 {offsets = [0, 0], sizes = [8, 128], strides = [1, 1]} : vector<8x512xf32> to vector<8x128xf32>
    %104 = arith.negf %103 : vector<8x128xf32>
    %105 = math.exp %104 : vector<8x128xf32>
    %cst_44 = arith.constant 1.000000e+00 : f32
    %106 = vector.broadcast %cst_44 : f32 to vector<8x128xf32>
    %107 = arith.addf %106, %105 : vector<8x128xf32>
    %108 = arith.divf %106, %107 : vector<8x128xf32>
    %109 = vector.extract_strided_slice %102 {offsets = [0, 128], sizes = [8, 128], strides = [1, 1]} : vector<8x512xf32> to vector<8x128xf32>
    %110 = arith.negf %109 : vector<8x128xf32>
    %111 = math.exp %110 : vector<8x128xf32>
    %cst_45 = arith.constant 1.000000e+00 : f32
    %112 = vector.broadcast %cst_45 : f32 to vector<8x128xf32>
    %113 = arith.addf %112, %111 : vector<8x128xf32>
    %114 = arith.divf %112, %113 : vector<8x128xf32>
    %115 = vector.extract_strided_slice %102 {offsets = [0, 256], sizes = [8, 128], strides = [1, 1]} : vector<8x512xf32> to vector<8x128xf32>
    %116 = math.tanh %115 : vector<8x128xf32>
    %117 = vector.extract_strided_slice %102 {offsets = [0, 384], sizes = [8, 128], strides = [1, 1]} : vector<8x512xf32> to vector<8x128xf32>
    %118 = arith.negf %117 : vector<8x128xf32>
    %119 = math.exp %118 : vector<8x128xf32>
    %cst_46 = arith.constant 1.000000e+00 : f32
    %120 = vector.broadcast %cst_46 : f32 to vector<8x128xf32>
    %121 = arith.addf %120, %119 : vector<8x128xf32>
    %122 = arith.divf %120, %121 : vector<8x128xf32>
    %123 = arith.mulf %114, %92 : vector<8x128xf32>
    %124 = arith.mulf %108, %116 : vector<8x128xf32>
    %125 = arith.addf %123, %124 : vector<8x128xf32>
    %126 = math.tanh %125 : vector<8x128xf32>
    %127 = arith.mulf %122, %126 : vector<8x128xf32>
    %c1_47 = arith.constant 1 : index
    %c0_48 = arith.constant 0 : index
    %c0_49 = arith.constant 0 : index
    %128 = vector.load %arg11[%c1_47, %c0_48, %c0_49] : memref<8x8x128xf32, #tpu.memory_space<vmem>>, vector<1x8x128xf32>
    %129 = vector.shape_cast %128 : vector<1x8x128xf32> to vector<8x128xf32>
    %130 = vector.shape_cast %127 : vector<8x128xf32> to vector<1x8x128xf32>
    tpu.vector_store %arg11[%c1_47, %c0_48, %c0_49], %130 {strides = array<i32>} : memref<8x8x128xf32, #tpu.memory_space<vmem>>, vector<1x8x128xf32>,
    %c2_50 = arith.constant 2 : index
    %c0_51 = arith.constant 0 : index
    %c0_52 = arith.constant 0 : index
    %131 = vector.load %arg12[%c2_50, %c0_51, %c0_52] : memref<8x8x512xf32, #tpu.memory_space<vmem>>, vector<1x8x512xf32>
    %132 = vector.shape_cast %131 : vector<1x8x512xf32> to vector<8x512xf32>
    %133 = arith.truncf %127 : vector<8x128xf32> to vector<8x128xbf16>
    %cst_53 = arith.constant dense<0.000000e+00> : vector<8x512xf32>
    %134 = tpu.matmul %133, %62, %cst_53 {dimension_numbers = #tpu.dot_dimension_numbers<[1], [0], [0], [1], [0, 0, 1, 1], [], []>} : vector<8x128xbf16>, vector<128x512xbf16>, vector<8x512xf32> -> vector<8x512xf32>
    %135 = arith.addf %132, %134 : vector<8x512xf32>
    %136 = vector.extract_strided_slice %135 {offsets = [0, 0], sizes = [8, 128], strides = [1, 1]} : vector<8x512xf32> to vector<8x128xf32>
    %137 = arith.negf %136 : vector<8x128xf32>
    %138 = math.exp %137 : vector<8x128xf32>
    %cst_54 = arith.constant 1.000000e+00 : f32
    %139 = vector.broadcast %cst_54 : f32 to vector<8x128xf32>
    %140 = arith.addf %139, %138 : vector<8x128xf32>
    %141 = arith.divf %139, %140 : vector<8x128xf32>
    %142 = vector.extract_strided_slice %135 {offsets = [0, 128], sizes = [8, 128], strides = [1, 1]} : vector<8x512xf32> to vector<8x128xf32>
    %143 = arith.negf %142 : vector<8x128xf32>
    %144 = math.exp %143 : vector<8x128xf32>
    %cst_55 = arith.constant 1.000000e+00 : f32
    %145 = vector.broadcast %cst_55 : f32 to vector<8x128xf32>
    %146 = arith.addf %145, %144 : vector<8x128xf32>
    %147 = arith.divf %145, %146 : vector<8x128xf32>
    %148 = vector.extract_strided_slice %135 {offsets = [0, 256], sizes = [8, 128], strides = [1, 1]} : vector<8x512xf32> to vector<8x128xf32>
    %149 = math.tanh %148 : vector<8x128xf32>
    %150 = vector.extract_strided_slice %135 {offsets = [0, 384], sizes = [8, 128], strides = [1, 1]} : vector<8x512xf32> to vector<8x128xf32>
    %151 = arith.negf %150 : vector<8x128xf32>
    %152 = math.exp %151 : vector<8x128xf32>
    %cst_56 = arith.constant 1.000000e+00 : f32
    %153 = vector.broadcast %cst_56 : f32 to vector<8x128xf32>
    %154 = arith.addf %153, %152 : vector<8x128xf32>
    %155 = arith.divf %153, %154 : vector<8x128xf32>
    %156 = arith.mulf %147, %125 : vector<8x128xf32>
    %157 = arith.mulf %141, %149 : vector<8x128xf32>
    %158 = arith.addf %156, %157 : vector<8x128xf32>
    %159 = math.tanh %158 : vector<8x128xf32>
    %160 = arith.mulf %155, %159 : vector<8x128xf32>
    %c2_57 = arith.constant 2 : index
    %c0_58 = arith.constant 0 : index
    %c0_59 = arith.constant 0 : index
    %161 = vector.load %arg11[%c2_57, %c0_58, %c0_59] : memref<8x8x128xf32, #tpu.memory_space<vmem>>, vector<1x8x128xf32>
    %162 = vector.shape_cast %161 : vector<1x8x128xf32> to vector<8x128xf32>
    %163 = vector.shape_cast %160 : vector<8x128xf32> to vector<1x8x128xf32>
    tpu.vector_store %arg11[%c2_57, %c0_58, %c0_59], %163 {strides = array<i32>} : memref<8x8x128xf32, #tpu.memory_space<vmem>>, vector<1x8x128xf32>,
    %c3_60 = arith.constant 3 : index
    %c0_61 = arith.constant 0 : index
    %c0_62 = arith.constant 0 : index
    %164 = vector.load %arg12[%c3_60, %c0_61, %c0_62] : memref<8x8x512xf32, #tpu.memory_space<vmem>>, vector<1x8x512xf32>
    %165 = vector.shape_cast %164 : vector<1x8x512xf32> to vector<8x512xf32>
    %166 = arith.truncf %160 : vector<8x128xf32> to vector<8x128xbf16>
    %cst_63 = arith.constant dense<0.000000e+00> : vector<8x512xf32>
    %167 = tpu.matmul %166, %62, %cst_63 {dimension_numbers = #tpu.dot_dimension_numbers<[1], [0], [0], [1], [0, 0, 1, 1], [], []>} : vector<8x128xbf16>, vector<128x512xbf16>, vector<8x512xf32> -> vector<8x512xf32>
    %168 = arith.addf %165, %167 : vector<8x512xf32>
    %169 = vector.extract_strided_slice %168 {offsets = [0, 0], sizes = [8, 128], strides = [1, 1]} : vector<8x512xf32> to vector<8x128xf32>
    %170 = arith.negf %169 : vector<8x128xf32>
    %171 = math.exp %170 : vector<8x128xf32>
    %cst_64 = arith.constant 1.000000e+00 : f32
    %172 = vector.broadcast %cst_64 : f32 to vector<8x128xf32>
    %173 = arith.addf %172, %171 : vector<8x128xf32>
    %174 = arith.divf %172, %173 : vector<8x128xf32>
    %175 = vector.extract_strided_slice %168 {offsets = [0, 128], sizes = [8, 128], strides = [1, 1]} : vector<8x512xf32> to vector<8x128xf32>
    %176 = arith.negf %175 : vector<8x128xf32>
    %177 = math.exp %176 : vector<8x128xf32>
    %cst_65 = arith.constant 1.000000e+00 : f32
    %178 = vector.broadcast %cst_65 : f32 to vector<8x128xf32>
    %179 = arith.addf %178, %177 : vector<8x128xf32>
    %180 = arith.divf %178, %179 : vector<8x128xf32>
    %181 = vector.extract_strided_slice %168 {offsets = [0, 256], sizes = [8, 128], strides = [1, 1]} : vector<8x512xf32> to vector<8x128xf32>
    %182 = math.tanh %181 : vector<8x128xf32>
    %183 = vector.extract_strided_slice %168 {offsets = [0, 384], sizes = [8, 128], strides = [1, 1]} : vector<8x512xf32> to vector<8x128xf32>
    %184 = arith.negf %183 : vector<8x128xf32>
    %185 = math.exp %184 : vector<8x128xf32>
    %cst_66 = arith.constant 1.000000e+00 : f32
    %186 = vector.broadcast %cst_66 : f32 to vector<8x128xf32>
    %187 = arith.addf %186, %185 : vector<8x128xf32>
    %188 = arith.divf %186, %187 : vector<8x128xf32>
    %189 = arith.mulf %180, %158 : vector<8x128xf32>
    %190 = arith.mulf %174, %182 : vector<8x128xf32>
    %191 = arith.addf %189, %190 : vector<8x128xf32>
    %192 = math.tanh %191 : vector<8x128xf32>
    %193 = arith.mulf %188, %192 : vector<8x128xf32>
    %c3_67 = arith.constant 3 : index
    %c0_68 = arith.constant 0 : index
    %c0_69 = arith.constant 0 : index
    %194 = vector.load %arg11[%c3_67, %c0_68, %c0_69] : memref<8x8x128xf32, #tpu.memory_space<vmem>>, vector<1x8x128xf32>
    %195 = vector.shape_cast %194 : vector<1x8x128xf32> to vector<8x128xf32>
    %196 = vector.shape_cast %193 : vector<8x128xf32> to vector<1x8x128xf32>
    tpu.vector_store %arg11[%c3_67, %c0_68, %c0_69], %196 {strides = array<i32>} : memref<8x8x128xf32, #tpu.memory_space<vmem>>, vector<1x8x128xf32>,
    %c4 = arith.constant 4 : index
    %c0_70 = arith.constant 0 : index
    %c0_71 = arith.constant 0 : index
    %197 = vector.load %arg12[%c4, %c0_70, %c0_71] : memref<8x8x512xf32, #tpu.memory_space<vmem>>, vector<1x8x512xf32>
    %198 = vector.shape_cast %197 : vector<1x8x512xf32> to vector<8x512xf32>
    %199 = arith.truncf %193 : vector<8x128xf32> to vector<8x128xbf16>
    %cst_72 = arith.constant dense<0.000000e+00> : vector<8x512xf32>
    %200 = tpu.matmul %199, %62, %cst_72 {dimension_numbers = #tpu.dot_dimension_numbers<[1], [0], [0], [1], [0, 0, 1, 1], [], []>} : vector<8x128xbf16>, vector<128x512xbf16>, vector<8x512xf32> -> vector<8x512xf32>
    %201 = arith.addf %198, %200 : vector<8x512xf32>
    %202 = vector.extract_strided_slice %201 {offsets = [0, 0], sizes = [8, 128], strides = [1, 1]} : vector<8x512xf32> to vector<8x128xf32>
    %203 = arith.negf %202 : vector<8x128xf32>
    %204 = math.exp %203 : vector<8x128xf32>
    %cst_73 = arith.constant 1.000000e+00 : f32
    %205 = vector.broadcast %cst_73 : f32 to vector<8x128xf32>
    %206 = arith.addf %205, %204 : vector<8x128xf32>
    %207 = arith.divf %205, %206 : vector<8x128xf32>
    %208 = vector.extract_strided_slice %201 {offsets = [0, 128], sizes = [8, 128], strides = [1, 1]} : vector<8x512xf32> to vector<8x128xf32>
    %209 = arith.negf %208 : vector<8x128xf32>
    %210 = math.exp %209 : vector<8x128xf32>
    %cst_74 = arith.constant 1.000000e+00 : f32
    %211 = vector.broadcast %cst_74 : f32 to vector<8x128xf32>
    %212 = arith.addf %211, %210 : vector<8x128xf32>
    %213 = arith.divf %211, %212 : vector<8x128xf32>
    %214 = vector.extract_strided_slice %201 {offsets = [0, 256], sizes = [8, 128], strides = [1, 1]} : vector<8x512xf32> to vector<8x128xf32>
    %215 = math.tanh %214 : vector<8x128xf32>
    %216 = vector.extract_strided_slice %201 {offsets = [0, 384], sizes = [8, 128], strides = [1, 1]} : vector<8x512xf32> to vector<8x128xf32>
    %217 = arith.negf %216 : vector<8x128xf32>
    %218 = math.exp %217 : vector<8x128xf32>
    %cst_75 = arith.constant 1.000000e+00 : f32
    %219 = vector.broadcast %cst_75 : f32 to vector<8x128xf32>
    %220 = arith.addf %219, %218 : vector<8x128xf32>
    %221 = arith.divf %219, %220 : vector<8x128xf32>
    %222 = arith.mulf %213, %191 : vector<8x128xf32>
    %223 = arith.mulf %207, %215 : vector<8x128xf32>
    %224 = arith.addf %222, %223 : vector<8x128xf32>
    %225 = math.tanh %224 : vector<8x128xf32>
    %226 = arith.mulf %221, %225 : vector<8x128xf32>
    %c4_76 = arith.constant 4 : index
    %c0_77 = arith.constant 0 : index
    %c0_78 = arith.constant 0 : index
    %227 = vector.load %arg11[%c4_76, %c0_77, %c0_78] : memref<8x8x128xf32, #tpu.memory_space<vmem>>, vector<1x8x128xf32>
    %228 = vector.shape_cast %227 : vector<1x8x128xf32> to vector<8x128xf32>
    %229 = vector.shape_cast %226 : vector<8x128xf32> to vector<1x8x128xf32>
    tpu.vector_store %arg11[%c4_76, %c0_77, %c0_78], %229 {strides = array<i32>} : memref<8x8x128xf32, #tpu.memory_space<vmem>>, vector<1x8x128xf32>,
    %c5 = arith.constant 5 : index
    %c0_79 = arith.constant 0 : index
    %c0_80 = arith.constant 0 : index
    %230 = vector.load %arg12[%c5, %c0_79, %c0_80] : memref<8x8x512xf32, #tpu.memory_space<vmem>>, vector<1x8x512xf32>
    %231 = vector.shape_cast %230 : vector<1x8x512xf32> to vector<8x512xf32>
    %232 = arith.truncf %226 : vector<8x128xf32> to vector<8x128xbf16>
    %cst_81 = arith.constant dense<0.000000e+00> : vector<8x512xf32>
    %233 = tpu.matmul %232, %62, %cst_81 {dimension_numbers = #tpu.dot_dimension_numbers<[1], [0], [0], [1], [0, 0, 1, 1], [], []>} : vector<8x128xbf16>, vector<128x512xbf16>, vector<8x512xf32> -> vector<8x512xf32>
    %234 = arith.addf %231, %233 : vector<8x512xf32>
    %235 = vector.extract_strided_slice %234 {offsets = [0, 0], sizes = [8, 128], strides = [1, 1]} : vector<8x512xf32> to vector<8x128xf32>
    %236 = arith.negf %235 : vector<8x128xf32>
    %237 = math.exp %236 : vector<8x128xf32>
    %cst_82 = arith.constant 1.000000e+00 : f32
    %238 = vector.broadcast %cst_82 : f32 to vector<8x128xf32>
    %239 = arith.addf %238, %237 : vector<8x128xf32>
    %240 = arith.divf %238, %239 : vector<8x128xf32>
    %241 = vector.extract_strided_slice %234 {offsets = [0, 128], sizes = [8, 128], strides = [1, 1]} : vector<8x512xf32> to vector<8x128xf32>
    %242 = arith.negf %241 : vector<8x128xf32>
    %243 = math.exp %242 : vector<8x128xf32>
    %cst_83 = arith.constant 1.000000e+00 : f32
    %244 = vector.broadcast %cst_83 : f32 to vector<8x128xf32>
    %245 = arith.addf %244, %243 : vector<8x128xf32>
    %246 = arith.divf %244, %245 : vector<8x128xf32>
    %247 = vector.extract_strided_slice %234 {offsets = [0, 256], sizes = [8, 128], strides = [1, 1]} : vector<8x512xf32> to vector<8x128xf32>
    %248 = math.tanh %247 : vector<8x128xf32>
    %249 = vector.extract_strided_slice %234 {offsets = [0, 384], sizes = [8, 128], strides = [1, 1]} : vector<8x512xf32> to vector<8x128xf32>
    %250 = arith.negf %249 : vector<8x128xf32>
    %251 = math.exp %250 : vector<8x128xf32>
    %cst_84 = arith.constant 1.000000e+00 : f32
    %252 = vector.broadcast %cst_84 : f32 to vector<8x128xf32>
    %253 = arith.addf %252, %251 : vector<8x128xf32>
    %254 = arith.divf %252, %253 : vector<8x128xf32>
    %255 = arith.mulf %246, %224 : vector<8x128xf32>
    %256 = arith.mulf %240, %248 : vector<8x128xf32>
    %257 = arith.addf %255, %256 : vector<8x128xf32>
    %258 = math.tanh %257 : vector<8x128xf32>
    %259 = arith.mulf %254, %258 : vector<8x128xf32>
    %c5_85 = arith.constant 5 : index
    %c0_86 = arith.constant 0 : index
    %c0_87 = arith.constant 0 : index
    %260 = vector.load %arg11[%c5_85, %c0_86, %c0_87] : memref<8x8x128xf32, #tpu.memory_space<vmem>>, vector<1x8x128xf32>
    %261 = vector.shape_cast %260 : vector<1x8x128xf32> to vector<8x128xf32>
    %262 = vector.shape_cast %259 : vector<8x128xf32> to vector<1x8x128xf32>
    tpu.vector_store %arg11[%c5_85, %c0_86, %c0_87], %262 {strides = array<i32>} : memref<8x8x128xf32, #tpu.memory_space<vmem>>, vector<1x8x128xf32>,
    %c6 = arith.constant 6 : index
    %c0_88 = arith.constant 0 : index
    %c0_89 = arith.constant 0 : index
    %263 = vector.load %arg12[%c6, %c0_88, %c0_89] : memref<8x8x512xf32, #tpu.memory_space<vmem>>, vector<1x8x512xf32>
    %264 = vector.shape_cast %263 : vector<1x8x512xf32> to vector<8x512xf32>
    %265 = arith.truncf %259 : vector<8x128xf32> to vector<8x128xbf16>
    %cst_90 = arith.constant dense<0.000000e+00> : vector<8x512xf32>
    %266 = tpu.matmul %265, %62, %cst_90 {dimension_numbers = #tpu.dot_dimension_numbers<[1], [0], [0], [1], [0, 0, 1, 1], [], []>} : vector<8x128xbf16>, vector<128x512xbf16>, vector<8x512xf32> -> vector<8x512xf32>
    %267 = arith.addf %264, %266 : vector<8x512xf32>
    %268 = vector.extract_strided_slice %267 {offsets = [0, 0], sizes = [8, 128], strides = [1, 1]} : vector<8x512xf32> to vector<8x128xf32>
    %269 = arith.negf %268 : vector<8x128xf32>
    %270 = math.exp %269 : vector<8x128xf32>
    %cst_91 = arith.constant 1.000000e+00 : f32
    %271 = vector.broadcast %cst_91 : f32 to vector<8x128xf32>
    %272 = arith.addf %271, %270 : vector<8x128xf32>
    %273 = arith.divf %271, %272 : vector<8x128xf32>
    %274 = vector.extract_strided_slice %267 {offsets = [0, 128], sizes = [8, 128], strides = [1, 1]} : vector<8x512xf32> to vector<8x128xf32>
    %275 = arith.negf %274 : vector<8x128xf32>
    %276 = math.exp %275 : vector<8x128xf32>
    %cst_92 = arith.constant 1.000000e+00 : f32
    %277 = vector.broadcast %cst_92 : f32 to vector<8x128xf32>
    %278 = arith.addf %277, %276 : vector<8x128xf32>
    %279 = arith.divf %277, %278 : vector<8x128xf32>
    %280 = vector.extract_strided_slice %267 {offsets = [0, 256], sizes = [8, 128], strides = [1, 1]} : vector<8x512xf32> to vector<8x128xf32>
    %281 = math.tanh %280 : vector<8x128xf32>
    %282 = vector.extract_strided_slice %267 {offsets = [0, 384], sizes = [8, 128], strides = [1, 1]} : vector<8x512xf32> to vector<8x128xf32>
    %283 = arith.negf %282 : vector<8x128xf32>
    %284 = math.exp %283 : vector<8x128xf32>
    %cst_93 = arith.constant 1.000000e+00 : f32
    %285 = vector.broadcast %cst_93 : f32 to vector<8x128xf32>
    %286 = arith.addf %285, %284 : vector<8x128xf32>
    %287 = arith.divf %285, %286 : vector<8x128xf32>
    %288 = arith.mulf %279, %257 : vector<8x128xf32>
    %289 = arith.mulf %273, %281 : vector<8x128xf32>
    %290 = arith.addf %288, %289 : vector<8x128xf32>
    %291 = math.tanh %290 : vector<8x128xf32>
    %292 = arith.mulf %287, %291 : vector<8x128xf32>
    %c6_94 = arith.constant 6 : index
    %c0_95 = arith.constant 0 : index
    %c0_96 = arith.constant 0 : index
    %293 = vector.load %arg11[%c6_94, %c0_95, %c0_96] : memref<8x8x128xf32, #tpu.memory_space<vmem>>, vector<1x8x128xf32>
    %294 = vector.shape_cast %293 : vector<1x8x128xf32> to vector<8x128xf32>
    %295 = vector.shape_cast %292 : vector<8x128xf32> to vector<1x8x128xf32>
    tpu.vector_store %arg11[%c6_94, %c0_95, %c0_96], %295 {strides = array<i32>} : memref<8x8x128xf32, #tpu.memory_space<vmem>>, vector<1x8x128xf32>,
    %c7 = arith.constant 7 : index
    %c0_97 = arith.constant 0 : index
    %c0_98 = arith.constant 0 : index
    %296 = vector.load %arg12[%c7, %c0_97, %c0_98] : memref<8x8x512xf32, #tpu.memory_space<vmem>>, vector<1x8x512xf32>
    %297 = vector.shape_cast %296 : vector<1x8x512xf32> to vector<8x512xf32>
    %298 = arith.truncf %292 : vector<8x128xf32> to vector<8x128xbf16>
    %cst_99 = arith.constant dense<0.000000e+00> : vector<8x512xf32>
    %299 = tpu.matmul %298, %62, %cst_99 {dimension_numbers = #tpu.dot_dimension_numbers<[1], [0], [0], [1], [0, 0, 1, 1], [], []>} : vector<8x128xbf16>, vector<128x512xbf16>, vector<8x512xf32> -> vector<8x512xf32>
    %300 = arith.addf %297, %299 : vector<8x512xf32>
    %301 = vector.extract_strided_slice %300 {offsets = [0, 0], sizes = [8, 128], strides = [1, 1]} : vector<8x512xf32> to vector<8x128xf32>
    %302 = arith.negf %301 : vector<8x128xf32>
    %303 = math.exp %302 : vector<8x128xf32>
    %cst_100 = arith.constant 1.000000e+00 : f32
    %304 = vector.broadcast %cst_100 : f32 to vector<8x128xf32>
    %305 = arith.addf %304, %303 : vector<8x128xf32>
    %306 = arith.divf %304, %305 : vector<8x128xf32>
    %307 = vector.extract_strided_slice %300 {offsets = [0, 128], sizes = [8, 128], strides = [1, 1]} : vector<8x512xf32> to vector<8x128xf32>
    %308 = arith.negf %307 : vector<8x128xf32>
    %309 = math.exp %308 : vector<8x128xf32>
    %cst_101 = arith.constant 1.000000e+00 : f32
    %310 = vector.broadcast %cst_101 : f32 to vector<8x128xf32>
    %311 = arith.addf %310, %309 : vector<8x128xf32>
    %312 = arith.divf %310, %311 : vector<8x128xf32>
    %313 = vector.extract_strided_slice %300 {offsets = [0, 256], sizes = [8, 128], strides = [1, 1]} : vector<8x512xf32> to vector<8x128xf32>
    %314 = math.tanh %313 : vector<8x128xf32>
    %315 = vector.extract_strided_slice %300 {offsets = [0, 384], sizes = [8, 128], strides = [1, 1]} : vector<8x512xf32> to vector<8x128xf32>
    %316 = arith.negf %315 : vector<8x128xf32>
    %317 = math.exp %316 : vector<8x128xf32>
    %cst_102 = arith.constant 1.000000e+00 : f32
    %318 = vector.broadcast %cst_102 : f32 to vector<8x128xf32>
    %319 = arith.addf %318, %317 : vector<8x128xf32>
    %320 = arith.divf %318, %319 : vector<8x128xf32>
    %321 = arith.mulf %312, %290 : vector<8x128xf32>
    %322 = arith.mulf %306, %314 : vector<8x128xf32>
    %323 = arith.addf %321, %322 : vector<8x128xf32>
    %324 = math.tanh %323 : vector<8x128xf32>
    %325 = arith.mulf %320, %324 : vector<8x128xf32>
    %c7_103 = arith.constant 7 : index
    %c0_104 = arith.constant 0 : index
    %c0_105 = arith.constant 0 : index
    %326 = vector.load %arg11[%c7_103, %c0_104, %c0_105] : memref<8x8x128xf32, #tpu.memory_space<vmem>>, vector<1x8x128xf32>
    %327 = vector.shape_cast %326 : vector<1x8x128xf32> to vector<8x128xf32>
    %328 = vector.shape_cast %325 : vector<8x128xf32> to vector<1x8x128xf32>
    tpu.vector_store %arg11[%c7_103, %c0_104, %c0_105], %328 {strides = array<i32>} : memref<8x8x128xf32, #tpu.memory_space<vmem>>, vector<1x8x128xf32>,
    %c0_106 = arith.constant 0 : index
    %c0_107 = arith.constant 0 : index
    %c0_108 = arith.constant 0 : index
    %329 = vector.load %arg9[%c0_106, %c0_107, %c0_108] : memref<3x8x128xf32, #tpu.memory_space<vmem>>, vector<1x8x128xf32>
    %330 = vector.shape_cast %329 : vector<1x8x128xf32> to vector<8x128xf32>
    %331 = vector.shape_cast %325 : vector<8x128xf32> to vector<1x8x128xf32>
    tpu.vector_store %arg9[%c0_106, %c0_107, %c0_108], %331 {strides = array<i32>} : memref<3x8x128xf32, #tpu.memory_space<vmem>>, vector<1x8x128xf32>,
    %c0_109 = arith.constant 0 : index
    %c0_110 = arith.constant 0 : index
    %c0_111 = arith.constant 0 : index
    %332 = vector.load %arg10[%c0_109, %c0_110, %c0_111] : memref<3x8x128xf32, #tpu.memory_space<vmem>>, vector<1x8x128xf32>
    %333 = vector.shape_cast %332 : vector<1x8x128xf32> to vector<8x128xf32>
    %334 = vector.shape_cast %323 : vector<8x128xf32> to vector<1x8x128xf32>
    tpu.vector_store %arg10[%c0_109, %c0_110, %c0_111], %334 {strides = array<i32>} : memref<3x8x128xf32, #tpu.memory_space<vmem>>, vector<1x8x128xf32>,
    %c0_112 = arith.constant 0 : index
    %c0_113 = arith.constant 0 : index
    %c0_114 = arith.constant 0 : index
    %335 = vector.load %arg11[%c0_112, %c0_113, %c0_114] : memref<8x8x128xf32, #tpu.memory_space<vmem>>, vector<8x8x128xf32>
    %336 = vector.shape_cast %335 : vector<8x8x128xf32> to vector<64x128xf32>
    %337 = arith.truncf %336 : vector<64x128xf32> to vector<64x128xbf16>
    %c0_115 = arith.constant 0 : index
    %c0_116 = arith.constant 0 : index
    %c0_117 = arith.constant 0 : index
    %338 = vector.load %arg3[%c0_115, %c0_116, %c0_117] : memref<2x128x512xbf16, #tpu.memory_space<vmem>>, vector<1x128x512xbf16>
    %339 = vector.shape_cast %338 : vector<1x128x512xbf16> to vector<128x512xbf16>
    %cst_118 = arith.constant dense<0.000000e+00> : vector<64x512xf32>
    %340 = tpu.matmul %337, %339, %cst_118 {dimension_numbers = #tpu.dot_dimension_numbers<[1], [0], [0], [1], [0, 0, 1, 1], [], []>} : vector<64x128xbf16>, vector<128x512xbf16>, vector<64x512xf32> -> vector<64x512xf32>
    %c1_119 = arith.constant 1 : index
    %c0_120 = arith.constant 0 : index
    %c0_121 = arith.constant 0 : index
    %341 = vector.load %arg5[%c1_119, %c0_120, %c0_121] : memref<3x1x512xf32, #tpu.memory_space<vmem>>, vector<1x1x512xf32>
    %342 = vector.shape_cast %341 : vector<1x1x512xf32> to vector<1x512xf32>
    %343 = vector.broadcast %342 : vector<1x512xf32> to vector<64x512xf32>
    %344 = arith.addf %340, %343 : vector<64x512xf32>
    %345 = vector.shape_cast %344 : vector<64x512xf32> to vector<8x8x512xf32>
    %c0_122 = arith.constant 0 : index
    %c0_123 = arith.constant 0 : index
    %c0_124 = arith.constant 0 : index
    %346 = vector.load %arg12[%c0_122, %c0_123, %c0_124] : memref<8x8x512xf32, #tpu.memory_space<vmem>>, vector<8x8x512xf32>
    tpu.vector_store %arg12[%c0_122, %c0_123, %c0_124], %345 {strides = array<i32>} : memref<8x8x512xf32, #tpu.memory_space<vmem>>, vector<8x8x512xf32>,
    %c1_125 = arith.constant 1 : index
    %c0_126 = arith.constant 0 : index
    %c0_127 = arith.constant 0 : index
    %347 = vector.load %arg4[%c1_125, %c0_126, %c0_127] : memref<3x128x512xbf16, #tpu.memory_space<vmem>>, vector<1x128x512xbf16>
    %348 = vector.shape_cast %347 : vector<1x128x512xbf16> to vector<128x512xbf16>
    %cst_128 = arith.constant 0.000000e+00 : f32
    %349 = vector.broadcast %cst_128 : f32 to vector<8x128xf32>
    %cst_129 = arith.constant 0.000000e+00 : f32
    %350 = vector.broadcast %cst_129 : f32 to vector<8x128xf32>
    %c0_130 = arith.constant 0 : index
    %c0_131 = arith.constant 0 : index
    %c0_132 = arith.constant 0 : index
    %351 = vector.load %arg12[%c0_130, %c0_131, %c0_132] : memref<8x8x512xf32, #tpu.memory_space<vmem>>, vector<1x8x512xf32>
    %352 = vector.shape_cast %351 : vector<1x8x512xf32> to vector<8x512xf32>
    %353 = arith.truncf %349 : vector<8x128xf32> to vector<8x128xbf16>
    %cst_133 = arith.constant dense<0.000000e+00> : vector<8x512xf32>
    %354 = tpu.matmul %353, %348, %cst_133 {dimension_numbers = #tpu.dot_dimension_numbers<[1], [0], [0], [1], [0, 0, 1, 1], [], []>} : vector<8x128xbf16>, vector<128x512xbf16>, vector<8x512xf32> -> vector<8x512xf32>
    %355 = arith.addf %352, %354 : vector<8x512xf32>
    %356 = vector.extract_strided_slice %355 {offsets = [0, 0], sizes = [8, 128], strides = [1, 1]} : vector<8x512xf32> to vector<8x128xf32>
    %357 = arith.negf %356 : vector<8x128xf32>
    %358 = math.exp %357 : vector<8x128xf32>
    %cst_134 = arith.constant 1.000000e+00 : f32
    %359 = vector.broadcast %cst_134 : f32 to vector<8x128xf32>
    %360 = arith.addf %359, %358 : vector<8x128xf32>
    %361 = arith.divf %359, %360 : vector<8x128xf32>
    %362 = vector.extract_strided_slice %355 {offsets = [0, 128], sizes = [8, 128], strides = [1, 1]} : vector<8x512xf32> to vector<8x128xf32>
    %363 = arith.negf %362 : vector<8x128xf32>
    %364 = math.exp %363 : vector<8x128xf32>
    %cst_135 = arith.constant 1.000000e+00 : f32
    %365 = vector.broadcast %cst_135 : f32 to vector<8x128xf32>
    %366 = arith.addf %365, %364 : vector<8x128xf32>
    %367 = arith.divf %365, %366 : vector<8x128xf32>
    %368 = vector.extract_strided_slice %355 {offsets = [0, 256], sizes = [8, 128], strides = [1, 1]} : vector<8x512xf32> to vector<8x128xf32>
    %369 = math.tanh %368 : vector<8x128xf32>
    %370 = vector.extract_strided_slice %355 {offsets = [0, 384], sizes = [8, 128], strides = [1, 1]} : vector<8x512xf32> to vector<8x128xf32>
    %371 = arith.negf %370 : vector<8x128xf32>
    %372 = math.exp %371 : vector<8x128xf32>
    %cst_136 = arith.constant 1.000000e+00 : f32
    %373 = vector.broadcast %cst_136 : f32 to vector<8x128xf32>
    %374 = arith.addf %373, %372 : vector<8x128xf32>
    %375 = arith.divf %373, %374 : vector<8x128xf32>
    %376 = arith.mulf %367, %350 : vector<8x128xf32>
    %377 = arith.mulf %361, %369 : vector<8x128xf32>
    %378 = arith.addf %376, %377 : vector<8x128xf32>
    %379 = math.tanh %378 : vector<8x128xf32>
    %380 = arith.mulf %375, %379 : vector<8x128xf32>
    %c0_137 = arith.constant 0 : index
    %c0_138 = arith.constant 0 : index
    %c0_139 = arith.constant 0 : index
    %381 = vector.load %arg11[%c0_137, %c0_138, %c0_139] : memref<8x8x128xf32, #tpu.memory_space<vmem>>, vector<1x8x128xf32>
    %382 = vector.shape_cast %381 : vector<1x8x128xf32> to vector<8x128xf32>
    %383 = vector.shape_cast %380 : vector<8x128xf32> to vector<1x8x128xf32>
    tpu.vector_store %arg11[%c0_137, %c0_138, %c0_139], %383 {strides = array<i32>} : memref<8x8x128xf32, #tpu.memory_space<vmem>>, vector<1x8x128xf32>,
    %c1_140 = arith.constant 1 : index
    %c0_141 = arith.constant 0 : index
    %c0_142 = arith.constant 0 : index
    %384 = vector.load %arg12[%c1_140, %c0_141, %c0_142] : memref<8x8x512xf32, #tpu.memory_space<vmem>>, vector<1x8x512xf32>
    %385 = vector.shape_cast %384 : vector<1x8x512xf32> to vector<8x512xf32>
    %386 = arith.truncf %380 : vector<8x128xf32> to vector<8x128xbf16>
    %cst_143 = arith.constant dense<0.000000e+00> : vector<8x512xf32>
    %387 = tpu.matmul %386, %348, %cst_143 {dimension_numbers = #tpu.dot_dimension_numbers<[1], [0], [0], [1], [0, 0, 1, 1], [], []>} : vector<8x128xbf16>, vector<128x512xbf16>, vector<8x512xf32> -> vector<8x512xf32>
    %388 = arith.addf %385, %387 : vector<8x512xf32>
    %389 = vector.extract_strided_slice %388 {offsets = [0, 0], sizes = [8, 128], strides = [1, 1]} : vector<8x512xf32> to vector<8x128xf32>
    %390 = arith.negf %389 : vector<8x128xf32>
    %391 = math.exp %390 : vector<8x128xf32>
    %cst_144 = arith.constant 1.000000e+00 : f32
    %392 = vector.broadcast %cst_144 : f32 to vector<8x128xf32>
    %393 = arith.addf %392, %391 : vector<8x128xf32>
    %394 = arith.divf %392, %393 : vector<8x128xf32>
    %395 = vector.extract_strided_slice %388 {offsets = [0, 128], sizes = [8, 128], strides = [1, 1]} : vector<8x512xf32> to vector<8x128xf32>
    %396 = arith.negf %395 : vector<8x128xf32>
    %397 = math.exp %396 : vector<8x128xf32>
    %cst_145 = arith.constant 1.000000e+00 : f32
    %398 = vector.broadcast %cst_145 : f32 to vector<8x128xf32>
    %399 = arith.addf %398, %397 : vector<8x128xf32>
    %400 = arith.divf %398, %399 : vector<8x128xf32>
    %401 = vector.extract_strided_slice %388 {offsets = [0, 256], sizes = [8, 128], strides = [1, 1]} : vector<8x512xf32> to vector<8x128xf32>
    %402 = math.tanh %401 : vector<8x128xf32>
    %403 = vector.extract_strided_slice %388 {offsets = [0, 384], sizes = [8, 128], strides = [1, 1]} : vector<8x512xf32> to vector<8x128xf32>
    %404 = arith.negf %403 : vector<8x128xf32>
    %405 = math.exp %404 : vector<8x128xf32>
    %cst_146 = arith.constant 1.000000e+00 : f32
    %406 = vector.broadcast %cst_146 : f32 to vector<8x128xf32>
    %407 = arith.addf %406, %405 : vector<8x128xf32>
    %408 = arith.divf %406, %407 : vector<8x128xf32>
    %409 = arith.mulf %400, %378 : vector<8x128xf32>
    %410 = arith.mulf %394, %402 : vector<8x128xf32>
    %411 = arith.addf %409, %410 : vector<8x128xf32>
    %412 = math.tanh %411 : vector<8x128xf32>
    %413 = arith.mulf %408, %412 : vector<8x128xf32>
    %c1_147 = arith.constant 1 : index
    %c0_148 = arith.constant 0 : index
    %c0_149 = arith.constant 0 : index
    %414 = vector.load %arg11[%c1_147, %c0_148, %c0_149] : memref<8x8x128xf32, #tpu.memory_space<vmem>>, vector<1x8x128xf32>
    %415 = vector.shape_cast %414 : vector<1x8x128xf32> to vector<8x128xf32>
    %416 = vector.shape_cast %413 : vector<8x128xf32> to vector<1x8x128xf32>
    tpu.vector_store %arg11[%c1_147, %c0_148, %c0_149], %416 {strides = array<i32>} : memref<8x8x128xf32, #tpu.memory_space<vmem>>, vector<1x8x128xf32>,
    %c2_150 = arith.constant 2 : index
    %c0_151 = arith.constant 0 : index
    %c0_152 = arith.constant 0 : index
    %417 = vector.load %arg12[%c2_150, %c0_151, %c0_152] : memref<8x8x512xf32, #tpu.memory_space<vmem>>, vector<1x8x512xf32>
    %418 = vector.shape_cast %417 : vector<1x8x512xf32> to vector<8x512xf32>
    %419 = arith.truncf %413 : vector<8x128xf32> to vector<8x128xbf16>
    %cst_153 = arith.constant dense<0.000000e+00> : vector<8x512xf32>
    %420 = tpu.matmul %419, %348, %cst_153 {dimension_numbers = #tpu.dot_dimension_numbers<[1], [0], [0], [1], [0, 0, 1, 1], [], []>} : vector<8x128xbf16>, vector<128x512xbf16>, vector<8x512xf32> -> vector<8x512xf32>
    %421 = arith.addf %418, %420 : vector<8x512xf32>
    %422 = vector.extract_strided_slice %421 {offsets = [0, 0], sizes = [8, 128], strides = [1, 1]} : vector<8x512xf32> to vector<8x128xf32>
    %423 = arith.negf %422 : vector<8x128xf32>
    %424 = math.exp %423 : vector<8x128xf32>
    %cst_154 = arith.constant 1.000000e+00 : f32
    %425 = vector.broadcast %cst_154 : f32 to vector<8x128xf32>
    %426 = arith.addf %425, %424 : vector<8x128xf32>
    %427 = arith.divf %425, %426 : vector<8x128xf32>
    %428 = vector.extract_strided_slice %421 {offsets = [0, 128], sizes = [8, 128], strides = [1, 1]} : vector<8x512xf32> to vector<8x128xf32>
    %429 = arith.negf %428 : vector<8x128xf32>
    %430 = math.exp %429 : vector<8x128xf32>
    %cst_155 = arith.constant 1.000000e+00 : f32
    %431 = vector.broadcast %cst_155 : f32 to vector<8x128xf32>
    %432 = arith.addf %431, %430 : vector<8x128xf32>
    %433 = arith.divf %431, %432 : vector<8x128xf32>
    %434 = vector.extract_strided_slice %421 {offsets = [0, 256], sizes = [8, 128], strides = [1, 1]} : vector<8x512xf32> to vector<8x128xf32>
    %435 = math.tanh %434 : vector<8x128xf32>
    %436 = vector.extract_strided_slice %421 {offsets = [0, 384], sizes = [8, 128], strides = [1, 1]} : vector<8x512xf32> to vector<8x128xf32>
    %437 = arith.negf %436 : vector<8x128xf32>
    %438 = math.exp %437 : vector<8x128xf32>
    %cst_156 = arith.constant 1.000000e+00 : f32
    %439 = vector.broadcast %cst_156 : f32 to vector<8x128xf32>
    %440 = arith.addf %439, %438 : vector<8x128xf32>
    %441 = arith.divf %439, %440 : vector<8x128xf32>
    %442 = arith.mulf %433, %411 : vector<8x128xf32>
    %443 = arith.mulf %427, %435 : vector<8x128xf32>
    %444 = arith.addf %442, %443 : vector<8x128xf32>
    %445 = math.tanh %444 : vector<8x128xf32>
    %446 = arith.mulf %441, %445 : vector<8x128xf32>
    %c2_157 = arith.constant 2 : index
    %c0_158 = arith.constant 0 : index
    %c0_159 = arith.constant 0 : index
    %447 = vector.load %arg11[%c2_157, %c0_158, %c0_159] : memref<8x8x128xf32, #tpu.memory_space<vmem>>, vector<1x8x128xf32>
    %448 = vector.shape_cast %447 : vector<1x8x128xf32> to vector<8x128xf32>
    %449 = vector.shape_cast %446 : vector<8x128xf32> to vector<1x8x128xf32>
    tpu.vector_store %arg11[%c2_157, %c0_158, %c0_159], %449 {strides = array<i32>} : memref<8x8x128xf32, #tpu.memory_space<vmem>>, vector<1x8x128xf32>,
    %c3_160 = arith.constant 3 : index
    %c0_161 = arith.constant 0 : index
    %c0_162 = arith.constant 0 : index
    %450 = vector.load %arg12[%c3_160, %c0_161, %c0_162] : memref<8x8x512xf32, #tpu.memory_space<vmem>>, vector<1x8x512xf32>
    %451 = vector.shape_cast %450 : vector<1x8x512xf32> to vector<8x512xf32>
    %452 = arith.truncf %446 : vector<8x128xf32> to vector<8x128xbf16>
    %cst_163 = arith.constant dense<0.000000e+00> : vector<8x512xf32>
    %453 = tpu.matmul %452, %348, %cst_163 {dimension_numbers = #tpu.dot_dimension_numbers<[1], [0], [0], [1], [0, 0, 1, 1], [], []>} : vector<8x128xbf16>, vector<128x512xbf16>, vector<8x512xf32> -> vector<8x512xf32>
    %454 = arith.addf %451, %453 : vector<8x512xf32>
    %455 = vector.extract_strided_slice %454 {offsets = [0, 0], sizes = [8, 128], strides = [1, 1]} : vector<8x512xf32> to vector<8x128xf32>
    %456 = arith.negf %455 : vector<8x128xf32>
    %457 = math.exp %456 : vector<8x128xf32>
    %cst_164 = arith.constant 1.000000e+00 : f32
    %458 = vector.broadcast %cst_164 : f32 to vector<8x128xf32>
    %459 = arith.addf %458, %457 : vector<8x128xf32>
    %460 = arith.divf %458, %459 : vector<8x128xf32>
    %461 = vector.extract_strided_slice %454 {offsets = [0, 128], sizes = [8, 128], strides = [1, 1]} : vector<8x512xf32> to vector<8x128xf32>
    %462 = arith.negf %461 : vector<8x128xf32>
    %463 = math.exp %462 : vector<8x128xf32>
    %cst_165 = arith.constant 1.000000e+00 : f32
    %464 = vector.broadcast %cst_165 : f32 to vector<8x128xf32>
    %465 = arith.addf %464, %463 : vector<8x128xf32>
    %466 = arith.divf %464, %465 : vector<8x128xf32>
    %467 = vector.extract_strided_slice %454 {offsets = [0, 256], sizes = [8, 128], strides = [1, 1]} : vector<8x512xf32> to vector<8x128xf32>
    %468 = math.tanh %467 : vector<8x128xf32>
    %469 = vector.extract_strided_slice %454 {offsets = [0, 384], sizes = [8, 128], strides = [1, 1]} : vector<8x512xf32> to vector<8x128xf32>
    %470 = arith.negf %469 : vector<8x128xf32>
    %471 = math.exp %470 : vector<8x128xf32>
    %cst_166 = arith.constant 1.000000e+00 : f32
    %472 = vector.broadcast %cst_166 : f32 to vector<8x128xf32>
    %473 = arith.addf %472, %471 : vector<8x128xf32>
    %474 = arith.divf %472, %473 : vector<8x128xf32>
    %475 = arith.mulf %466, %444 : vector<8x128xf32>
    %476 = arith.mulf %460, %468 : vector<8x128xf32>
    %477 = arith.addf %475, %476 : vector<8x128xf32>
    %478 = math.tanh %477 : vector<8x128xf32>
    %479 = arith.mulf %474, %478 : vector<8x128xf32>
    %c3_167 = arith.constant 3 : index
    %c0_168 = arith.constant 0 : index
    %c0_169 = arith.constant 0 : index
    %480 = vector.load %arg11[%c3_167, %c0_168, %c0_169] : memref<8x8x128xf32, #tpu.memory_space<vmem>>, vector<1x8x128xf32>
    %481 = vector.shape_cast %480 : vector<1x8x128xf32> to vector<8x128xf32>
    %482 = vector.shape_cast %479 : vector<8x128xf32> to vector<1x8x128xf32>
    tpu.vector_store %arg11[%c3_167, %c0_168, %c0_169], %482 {strides = array<i32>} : memref<8x8x128xf32, #tpu.memory_space<vmem>>, vector<1x8x128xf32>,
    %c4_170 = arith.constant 4 : index
    %c0_171 = arith.constant 0 : index
    %c0_172 = arith.constant 0 : index
    %483 = vector.load %arg12[%c4_170, %c0_171, %c0_172] : memref<8x8x512xf32, #tpu.memory_space<vmem>>, vector<1x8x512xf32>
    %484 = vector.shape_cast %483 : vector<1x8x512xf32> to vector<8x512xf32>
    %485 = arith.truncf %479 : vector<8x128xf32> to vector<8x128xbf16>
    %cst_173 = arith.constant dense<0.000000e+00> : vector<8x512xf32>
    %486 = tpu.matmul %485, %348, %cst_173 {dimension_numbers = #tpu.dot_dimension_numbers<[1], [0], [0], [1], [0, 0, 1, 1], [], []>} : vector<8x128xbf16>, vector<128x512xbf16>, vector<8x512xf32> -> vector<8x512xf32>
    %487 = arith.addf %484, %486 : vector<8x512xf32>
    %488 = vector.extract_strided_slice %487 {offsets = [0, 0], sizes = [8, 128], strides = [1, 1]} : vector<8x512xf32> to vector<8x128xf32>
    %489 = arith.negf %488 : vector<8x128xf32>
    %490 = math.exp %489 : vector<8x128xf32>
    %cst_174 = arith.constant 1.000000e+00 : f32
    %491 = vector.broadcast %cst_174 : f32 to vector<8x128xf32>
    %492 = arith.addf %491, %490 : vector<8x128xf32>
    %493 = arith.divf %491, %492 : vector<8x128xf32>
    %494 = vector.extract_strided_slice %487 {offsets = [0, 128], sizes = [8, 128], strides = [1, 1]} : vector<8x512xf32> to vector<8x128xf32>
    %495 = arith.negf %494 : vector<8x128xf32>
    %496 = math.exp %495 : vector<8x128xf32>
    %cst_175 = arith.constant 1.000000e+00 : f32
    %497 = vector.broadcast %cst_175 : f32 to vector<8x128xf32>
    %498 = arith.addf %497, %496 : vector<8x128xf32>
    %499 = arith.divf %497, %498 : vector<8x128xf32>
    %500 = vector.extract_strided_slice %487 {offsets = [0, 256], sizes = [8, 128], strides = [1, 1]} : vector<8x512xf32> to vector<8x128xf32>
    %501 = math.tanh %500 : vector<8x128xf32>
    %502 = vector.extract_strided_slice %487 {offsets = [0, 384], sizes = [8, 128], strides = [1, 1]} : vector<8x512xf32> to vector<8x128xf32>
    %503 = arith.negf %502 : vector<8x128xf32>
    %504 = math.exp %503 : vector<8x128xf32>
    %cst_176 = arith.constant 1.000000e+00 : f32
    %505 = vector.broadcast %cst_176 : f32 to vector<8x128xf32>
    %506 = arith.addf %505, %504 : vector<8x128xf32>
    %507 = arith.divf %505, %506 : vector<8x128xf32>
    %508 = arith.mulf %499, %477 : vector<8x128xf32>
    %509 = arith.mulf %493, %501 : vector<8x128xf32>
    %510 = arith.addf %508, %509 : vector<8x128xf32>
    %511 = math.tanh %510 : vector<8x128xf32>
    %512 = arith.mulf %507, %511 : vector<8x128xf32>
    %c4_177 = arith.constant 4 : index
    %c0_178 = arith.constant 0 : index
    %c0_179 = arith.constant 0 : index
    %513 = vector.load %arg11[%c4_177, %c0_178, %c0_179] : memref<8x8x128xf32, #tpu.memory_space<vmem>>, vector<1x8x128xf32>
    %514 = vector.shape_cast %513 : vector<1x8x128xf32> to vector<8x128xf32>
    %515 = vector.shape_cast %512 : vector<8x128xf32> to vector<1x8x128xf32>
    tpu.vector_store %arg11[%c4_177, %c0_178, %c0_179], %515 {strides = array<i32>} : memref<8x8x128xf32, #tpu.memory_space<vmem>>, vector<1x8x128xf32>,
    %c5_180 = arith.constant 5 : index
    %c0_181 = arith.constant 0 : index
    %c0_182 = arith.constant 0 : index
    %516 = vector.load %arg12[%c5_180, %c0_181, %c0_182] : memref<8x8x512xf32, #tpu.memory_space<vmem>>, vector<1x8x512xf32>
    %517 = vector.shape_cast %516 : vector<1x8x512xf32> to vector<8x512xf32>
    %518 = arith.truncf %512 : vector<8x128xf32> to vector<8x128xbf16>
    %cst_183 = arith.constant dense<0.000000e+00> : vector<8x512xf32>
    %519 = tpu.matmul %518, %348, %cst_183 {dimension_numbers = #tpu.dot_dimension_numbers<[1], [0], [0], [1], [0, 0, 1, 1], [], []>} : vector<8x128xbf16>, vector<128x512xbf16>, vector<8x512xf32> -> vector<8x512xf32>
    %520 = arith.addf %517, %519 : vector<8x512xf32>
    %521 = vector.extract_strided_slice %520 {offsets = [0, 0], sizes = [8, 128], strides = [1, 1]} : vector<8x512xf32> to vector<8x128xf32>
    %522 = arith.negf %521 : vector<8x128xf32>
    %523 = math.exp %522 : vector<8x128xf32>
    %cst_184 = arith.constant 1.000000e+00 : f32
    %524 = vector.broadcast %cst_184 : f32 to vector<8x128xf32>
    %525 = arith.addf %524, %523 : vector<8x128xf32>
    %526 = arith.divf %524, %525 : vector<8x128xf32>
    %527 = vector.extract_strided_slice %520 {offsets = [0, 128], sizes = [8, 128], strides = [1, 1]} : vector<8x512xf32> to vector<8x128xf32>
    %528 = arith.negf %527 : vector<8x128xf32>
    %529 = math.exp %528 : vector<8x128xf32>
    %cst_185 = arith.constant 1.000000e+00 : f32
    %530 = vector.broadcast %cst_185 : f32 to vector<8x128xf32>
    %531 = arith.addf %530, %529 : vector<8x128xf32>
    %532 = arith.divf %530, %531 : vector<8x128xf32>
    %533 = vector.extract_strided_slice %520 {offsets = [0, 256], sizes = [8, 128], strides = [1, 1]} : vector<8x512xf32> to vector<8x128xf32>
    %534 = math.tanh %533 : vector<8x128xf32>
    %535 = vector.extract_strided_slice %520 {offsets = [0, 384], sizes = [8, 128], strides = [1, 1]} : vector<8x512xf32> to vector<8x128xf32>
    %536 = arith.negf %535 : vector<8x128xf32>
    %537 = math.exp %536 : vector<8x128xf32>
    %cst_186 = arith.constant 1.000000e+00 : f32
    %538 = vector.broadcast %cst_186 : f32 to vector<8x128xf32>
    %539 = arith.addf %538, %537 : vector<8x128xf32>
    %540 = arith.divf %538, %539 : vector<8x128xf32>
    %541 = arith.mulf %532, %510 : vector<8x128xf32>
    %542 = arith.mulf %526, %534 : vector<8x128xf32>
    %543 = arith.addf %541, %542 : vector<8x128xf32>
    %544 = math.tanh %543 : vector<8x128xf32>
    %545 = arith.mulf %540, %544 : vector<8x128xf32>
    %c5_187 = arith.constant 5 : index
    %c0_188 = arith.constant 0 : index
    %c0_189 = arith.constant 0 : index
    %546 = vector.load %arg11[%c5_187, %c0_188, %c0_189] : memref<8x8x128xf32, #tpu.memory_space<vmem>>, vector<1x8x128xf32>
    %547 = vector.shape_cast %546 : vector<1x8x128xf32> to vector<8x128xf32>
    %548 = vector.shape_cast %545 : vector<8x128xf32> to vector<1x8x128xf32>
    tpu.vector_store %arg11[%c5_187, %c0_188, %c0_189], %548 {strides = array<i32>} : memref<8x8x128xf32, #tpu.memory_space<vmem>>, vector<1x8x128xf32>,
    %c6_190 = arith.constant 6 : index
    %c0_191 = arith.constant 0 : index
    %c0_192 = arith.constant 0 : index
    %549 = vector.load %arg12[%c6_190, %c0_191, %c0_192] : memref<8x8x512xf32, #tpu.memory_space<vmem>>, vector<1x8x512xf32>
    %550 = vector.shape_cast %549 : vector<1x8x512xf32> to vector<8x512xf32>
    %551 = arith.truncf %545 : vector<8x128xf32> to vector<8x128xbf16>
    %cst_193 = arith.constant dense<0.000000e+00> : vector<8x512xf32>
    %552 = tpu.matmul %551, %348, %cst_193 {dimension_numbers = #tpu.dot_dimension_numbers<[1], [0], [0], [1], [0, 0, 1, 1], [], []>} : vector<8x128xbf16>, vector<128x512xbf16>, vector<8x512xf32> -> vector<8x512xf32>
    %553 = arith.addf %550, %552 : vector<8x512xf32>
    %554 = vector.extract_strided_slice %553 {offsets = [0, 0], sizes = [8, 128], strides = [1, 1]} : vector<8x512xf32> to vector<8x128xf32>
    %555 = arith.negf %554 : vector<8x128xf32>
    %556 = math.exp %555 : vector<8x128xf32>
    %cst_194 = arith.constant 1.000000e+00 : f32
    %557 = vector.broadcast %cst_194 : f32 to vector<8x128xf32>
    %558 = arith.addf %557, %556 : vector<8x128xf32>
    %559 = arith.divf %557, %558 : vector<8x128xf32>
    %560 = vector.extract_strided_slice %553 {offsets = [0, 128], sizes = [8, 128], strides = [1, 1]} : vector<8x512xf32> to vector<8x128xf32>
    %561 = arith.negf %560 : vector<8x128xf32>
    %562 = math.exp %561 : vector<8x128xf32>
    %cst_195 = arith.constant 1.000000e+00 : f32
    %563 = vector.broadcast %cst_195 : f32 to vector<8x128xf32>
    %564 = arith.addf %563, %562 : vector<8x128xf32>
    %565 = arith.divf %563, %564 : vector<8x128xf32>
    %566 = vector.extract_strided_slice %553 {offsets = [0, 256], sizes = [8, 128], strides = [1, 1]} : vector<8x512xf32> to vector<8x128xf32>
    %567 = math.tanh %566 : vector<8x128xf32>
    %568 = vector.extract_strided_slice %553 {offsets = [0, 384], sizes = [8, 128], strides = [1, 1]} : vector<8x512xf32> to vector<8x128xf32>
    %569 = arith.negf %568 : vector<8x128xf32>
    %570 = math.exp %569 : vector<8x128xf32>
    %cst_196 = arith.constant 1.000000e+00 : f32
    %571 = vector.broadcast %cst_196 : f32 to vector<8x128xf32>
    %572 = arith.addf %571, %570 : vector<8x128xf32>
    %573 = arith.divf %571, %572 : vector<8x128xf32>
    %574 = arith.mulf %565, %543 : vector<8x128xf32>
    %575 = arith.mulf %559, %567 : vector<8x128xf32>
    %576 = arith.addf %574, %575 : vector<8x128xf32>
    %577 = math.tanh %576 : vector<8x128xf32>
    %578 = arith.mulf %573, %577 : vector<8x128xf32>
    %c6_197 = arith.constant 6 : index
    %c0_198 = arith.constant 0 : index
    %c0_199 = arith.constant 0 : index
    %579 = vector.load %arg11[%c6_197, %c0_198, %c0_199] : memref<8x8x128xf32, #tpu.memory_space<vmem>>, vector<1x8x128xf32>
    %580 = vector.shape_cast %579 : vector<1x8x128xf32> to vector<8x128xf32>
    %581 = vector.shape_cast %578 : vector<8x128xf32> to vector<1x8x128xf32>
    tpu.vector_store %arg11[%c6_197, %c0_198, %c0_199], %581 {strides = array<i32>} : memref<8x8x128xf32, #tpu.memory_space<vmem>>, vector<1x8x128xf32>,
    %c7_200 = arith.constant 7 : index
    %c0_201 = arith.constant 0 : index
    %c0_202 = arith.constant 0 : index
    %582 = vector.load %arg12[%c7_200, %c0_201, %c0_202] : memref<8x8x512xf32, #tpu.memory_space<vmem>>, vector<1x8x512xf32>
    %583 = vector.shape_cast %582 : vector<1x8x512xf32> to vector<8x512xf32>
    %584 = arith.truncf %578 : vector<8x128xf32> to vector<8x128xbf16>
    %cst_203 = arith.constant dense<0.000000e+00> : vector<8x512xf32>
    %585 = tpu.matmul %584, %348, %cst_203 {dimension_numbers = #tpu.dot_dimension_numbers<[1], [0], [0], [1], [0, 0, 1, 1], [], []>} : vector<8x128xbf16>, vector<128x512xbf16>, vector<8x512xf32> -> vector<8x512xf32>
    %586 = arith.addf %583, %585 : vector<8x512xf32>
    %587 = vector.extract_strided_slice %586 {offsets = [0, 0], sizes = [8, 128], strides = [1, 1]} : vector<8x512xf32> to vector<8x128xf32>
    %588 = arith.negf %587 : vector<8x128xf32>
    %589 = math.exp %588 : vector<8x128xf32>
    %cst_204 = arith.constant 1.000000e+00 : f32
    %590 = vector.broadcast %cst_204 : f32 to vector<8x128xf32>
    %591 = arith.addf %590, %589 : vector<8x128xf32>
    %592 = arith.divf %590, %591 : vector<8x128xf32>
    %593 = vector.extract_strided_slice %586 {offsets = [0, 128], sizes = [8, 128], strides = [1, 1]} : vector<8x512xf32> to vector<8x128xf32>
    %594 = arith.negf %593 : vector<8x128xf32>
    %595 = math.exp %594 : vector<8x128xf32>
    %cst_205 = arith.constant 1.000000e+00 : f32
    %596 = vector.broadcast %cst_205 : f32 to vector<8x128xf32>
    %597 = arith.addf %596, %595 : vector<8x128xf32>
    %598 = arith.divf %596, %597 : vector<8x128xf32>
    %599 = vector.extract_strided_slice %586 {offsets = [0, 256], sizes = [8, 128], strides = [1, 1]} : vector<8x512xf32> to vector<8x128xf32>
    %600 = math.tanh %599 : vector<8x128xf32>
    %601 = vector.extract_strided_slice %586 {offsets = [0, 384], sizes = [8, 128], strides = [1, 1]} : vector<8x512xf32> to vector<8x128xf32>
    %602 = arith.negf %601 : vector<8x128xf32>
    %603 = math.exp %602 : vector<8x128xf32>
    %cst_206 = arith.constant 1.000000e+00 : f32
    %604 = vector.broadcast %cst_206 : f32 to vector<8x128xf32>
    %605 = arith.addf %604, %603 : vector<8x128xf32>
    %606 = arith.divf %604, %605 : vector<8x128xf32>
    %607 = arith.mulf %598, %576 : vector<8x128xf32>
    %608 = arith.mulf %592, %600 : vector<8x128xf32>
    %609 = arith.addf %607, %608 : vector<8x128xf32>
    %610 = math.tanh %609 : vector<8x128xf32>
    %611 = arith.mulf %606, %610 : vector<8x128xf32>
    %c7_207 = arith.constant 7 : index
    %c0_208 = arith.constant 0 : index
    %c0_209 = arith.constant 0 : index
    %612 = vector.load %arg11[%c7_207, %c0_208, %c0_209] : memref<8x8x128xf32, #tpu.memory_space<vmem>>, vector<1x8x128xf32>
    %613 = vector.shape_cast %612 : vector<1x8x128xf32> to vector<8x128xf32>
    %614 = vector.shape_cast %611 : vector<8x128xf32> to vector<1x8x128xf32>
    tpu.vector_store %arg11[%c7_207, %c0_208, %c0_209], %614 {strides = array<i32>} : memref<8x8x128xf32, #tpu.memory_space<vmem>>, vector<1x8x128xf32>,
    %c1_210 = arith.constant 1 : index
    %c0_211 = arith.constant 0 : index
    %c0_212 = arith.constant 0 : index
    %615 = vector.load %arg9[%c1_210, %c0_211, %c0_212] : memref<3x8x128xf32, #tpu.memory_space<vmem>>, vector<1x8x128xf32>
    %616 = vector.shape_cast %615 : vector<1x8x128xf32> to vector<8x128xf32>
    %617 = vector.shape_cast %611 : vector<8x128xf32> to vector<1x8x128xf32>
    tpu.vector_store %arg9[%c1_210, %c0_211, %c0_212], %617 {strides = array<i32>} : memref<3x8x128xf32, #tpu.memory_space<vmem>>, vector<1x8x128xf32>,
    %c1_213 = arith.constant 1 : index
    %c0_214 = arith.constant 0 : index
    %c0_215 = arith.constant 0 : index
    %618 = vector.load %arg10[%c1_213, %c0_214, %c0_215] : memref<3x8x128xf32, #tpu.memory_space<vmem>>, vector<1x8x128xf32>
    %619 = vector.shape_cast %618 : vector<1x8x128xf32> to vector<8x128xf32>
    %620 = vector.shape_cast %609 : vector<8x128xf32> to vector<1x8x128xf32>
    tpu.vector_store %arg10[%c1_213, %c0_214, %c0_215], %620 {strides = array<i32>} : memref<3x8x128xf32, #tpu.memory_space<vmem>>, vector<1x8x128xf32>,
    %c0_216 = arith.constant 0 : index
    %c0_217 = arith.constant 0 : index
    %c0_218 = arith.constant 0 : index
    %621 = vector.load %arg11[%c0_216, %c0_217, %c0_218] : memref<8x8x128xf32, #tpu.memory_space<vmem>>, vector<8x8x128xf32>
    %622 = vector.shape_cast %621 : vector<8x8x128xf32> to vector<64x128xf32>
    %623 = arith.truncf %622 : vector<64x128xf32> to vector<64x128xbf16>
    %c1_219 = arith.constant 1 : index
    %c0_220 = arith.constant 0 : index
    %c0_221 = arith.constant 0 : index
    %624 = vector.load %arg3[%c1_219, %c0_220, %c0_221] : memref<2x128x512xbf16, #tpu.memory_space<vmem>>, vector<1x128x512xbf16>
    %625 = vector.shape_cast %624 : vector<1x128x512xbf16> to vector<128x512xbf16>
    %cst_222 = arith.constant dense<0.000000e+00> : vector<64x512xf32>
    %626 = tpu.matmul %623, %625, %cst_222 {dimension_numbers = #tpu.dot_dimension_numbers<[1], [0], [0], [1], [0, 0, 1, 1], [], []>} : vector<64x128xbf16>, vector<128x512xbf16>, vector<64x512xf32> -> vector<64x512xf32>
    %c2_223 = arith.constant 2 : index
    %c0_224 = arith.constant 0 : index
    %c0_225 = arith.constant 0 : index
    %627 = vector.load %arg5[%c2_223, %c0_224, %c0_225] : memref<3x1x512xf32, #tpu.memory_space<vmem>>, vector<1x1x512xf32>
    %628 = vector.shape_cast %627 : vector<1x1x512xf32> to vector<1x512xf32>
    %629 = vector.broadcast %628 : vector<1x512xf32> to vector<64x512xf32>
    %630 = arith.addf %626, %629 : vector<64x512xf32>
    %631 = vector.shape_cast %630 : vector<64x512xf32> to vector<8x8x512xf32>
    %c0_226 = arith.constant 0 : index
    %c0_227 = arith.constant 0 : index
    %c0_228 = arith.constant 0 : index
    %632 = vector.load %arg12[%c0_226, %c0_227, %c0_228] : memref<8x8x512xf32, #tpu.memory_space<vmem>>, vector<8x8x512xf32>
    tpu.vector_store %arg12[%c0_226, %c0_227, %c0_228], %631 {strides = array<i32>} : memref<8x8x512xf32, #tpu.memory_space<vmem>>, vector<8x8x512xf32>,
    %c2_229 = arith.constant 2 : index
    %c0_230 = arith.constant 0 : index
    %c0_231 = arith.constant 0 : index
    %633 = vector.load %arg4[%c2_229, %c0_230, %c0_231] : memref<3x128x512xbf16, #tpu.memory_space<vmem>>, vector<1x128x512xbf16>
    %634 = vector.shape_cast %633 : vector<1x128x512xbf16> to vector<128x512xbf16>
    %cst_232 = arith.constant 0.000000e+00 : f32
    %635 = vector.broadcast %cst_232 : f32 to vector<8x128xf32>
    %cst_233 = arith.constant 0.000000e+00 : f32
    %636 = vector.broadcast %cst_233 : f32 to vector<8x128xf32>
    %c0_234 = arith.constant 0 : index
    %c0_235 = arith.constant 0 : index
    %c0_236 = arith.constant 0 : index
    %637 = vector.load %arg12[%c0_234, %c0_235, %c0_236] : memref<8x8x512xf32, #tpu.memory_space<vmem>>, vector<1x8x512xf32>
    %638 = vector.shape_cast %637 : vector<1x8x512xf32> to vector<8x512xf32>
    %639 = arith.truncf %635 : vector<8x128xf32> to vector<8x128xbf16>
    %cst_237 = arith.constant dense<0.000000e+00> : vector<8x512xf32>
    %640 = tpu.matmul %639, %634, %cst_237 {dimension_numbers = #tpu.dot_dimension_numbers<[1], [0], [0], [1], [0, 0, 1, 1], [], []>} : vector<8x128xbf16>, vector<128x512xbf16>, vector<8x512xf32> -> vector<8x512xf32>
    %641 = arith.addf %638, %640 : vector<8x512xf32>
    %642 = vector.extract_strided_slice %641 {offsets = [0, 0], sizes = [8, 128], strides = [1, 1]} : vector<8x512xf32> to vector<8x128xf32>
    %643 = arith.negf %642 : vector<8x128xf32>
    %644 = math.exp %643 : vector<8x128xf32>
    %cst_238 = arith.constant 1.000000e+00 : f32
    %645 = vector.broadcast %cst_238 : f32 to vector<8x128xf32>
    %646 = arith.addf %645, %644 : vector<8x128xf32>
    %647 = arith.divf %645, %646 : vector<8x128xf32>
    %648 = vector.extract_strided_slice %641 {offsets = [0, 128], sizes = [8, 128], strides = [1, 1]} : vector<8x512xf32> to vector<8x128xf32>
    %649 = arith.negf %648 : vector<8x128xf32>
    %650 = math.exp %649 : vector<8x128xf32>
    %cst_239 = arith.constant 1.000000e+00 : f32
    %651 = vector.broadcast %cst_239 : f32 to vector<8x128xf32>
    %652 = arith.addf %651, %650 : vector<8x128xf32>
    %653 = arith.divf %651, %652 : vector<8x128xf32>
    %654 = vector.extract_strided_slice %641 {offsets = [0, 256], sizes = [8, 128], strides = [1, 1]} : vector<8x512xf32> to vector<8x128xf32>
    %655 = math.tanh %654 : vector<8x128xf32>
    %656 = vector.extract_strided_slice %641 {offsets = [0, 384], sizes = [8, 128], strides = [1, 1]} : vector<8x512xf32> to vector<8x128xf32>
    %657 = arith.negf %656 : vector<8x128xf32>
    %658 = math.exp %657 : vector<8x128xf32>
    %cst_240 = arith.constant 1.000000e+00 : f32
    %659 = vector.broadcast %cst_240 : f32 to vector<8x128xf32>
    %660 = arith.addf %659, %658 : vector<8x128xf32>
    %661 = arith.divf %659, %660 : vector<8x128xf32>
    %662 = arith.mulf %653, %636 : vector<8x128xf32>
    %663 = arith.mulf %647, %655 : vector<8x128xf32>
    %664 = arith.addf %662, %663 : vector<8x128xf32>
    %665 = math.tanh %664 : vector<8x128xf32>
    %666 = arith.mulf %661, %665 : vector<8x128xf32>
    %c0_241 = arith.constant 0 : index
    %c0_242 = arith.constant 0 : index
    %c0_243 = arith.constant 0 : index
    %667 = vector.load %arg11[%c0_241, %c0_242, %c0_243] : memref<8x8x128xf32, #tpu.memory_space<vmem>>, vector<1x8x128xf32>
    %668 = vector.shape_cast %667 : vector<1x8x128xf32> to vector<8x128xf32>
    %669 = vector.shape_cast %666 : vector<8x128xf32> to vector<1x8x128xf32>
    tpu.vector_store %arg11[%c0_241, %c0_242, %c0_243], %669 {strides = array<i32>} : memref<8x8x128xf32, #tpu.memory_space<vmem>>, vector<1x8x128xf32>,
    %c1_244 = arith.constant 1 : index
    %c0_245 = arith.constant 0 : index
    %c0_246 = arith.constant 0 : index
    %670 = vector.load %arg12[%c1_244, %c0_245, %c0_246] : memref<8x8x512xf32, #tpu.memory_space<vmem>>, vector<1x8x512xf32>
    %671 = vector.shape_cast %670 : vector<1x8x512xf32> to vector<8x512xf32>
    %672 = arith.truncf %666 : vector<8x128xf32> to vector<8x128xbf16>
    %cst_247 = arith.constant dense<0.000000e+00> : vector<8x512xf32>
    %673 = tpu.matmul %672, %634, %cst_247 {dimension_numbers = #tpu.dot_dimension_numbers<[1], [0], [0], [1], [0, 0, 1, 1], [], []>} : vector<8x128xbf16>, vector<128x512xbf16>, vector<8x512xf32> -> vector<8x512xf32>
    %674 = arith.addf %671, %673 : vector<8x512xf32>
    %675 = vector.extract_strided_slice %674 {offsets = [0, 0], sizes = [8, 128], strides = [1, 1]} : vector<8x512xf32> to vector<8x128xf32>
    %676 = arith.negf %675 : vector<8x128xf32>
    %677 = math.exp %676 : vector<8x128xf32>
    %cst_248 = arith.constant 1.000000e+00 : f32
    %678 = vector.broadcast %cst_248 : f32 to vector<8x128xf32>
    %679 = arith.addf %678, %677 : vector<8x128xf32>
    %680 = arith.divf %678, %679 : vector<8x128xf32>
    %681 = vector.extract_strided_slice %674 {offsets = [0, 128], sizes = [8, 128], strides = [1, 1]} : vector<8x512xf32> to vector<8x128xf32>
    %682 = arith.negf %681 : vector<8x128xf32>
    %683 = math.exp %682 : vector<8x128xf32>
    %cst_249 = arith.constant 1.000000e+00 : f32
    %684 = vector.broadcast %cst_249 : f32 to vector<8x128xf32>
    %685 = arith.addf %684, %683 : vector<8x128xf32>
    %686 = arith.divf %684, %685 : vector<8x128xf32>
    %687 = vector.extract_strided_slice %674 {offsets = [0, 256], sizes = [8, 128], strides = [1, 1]} : vector<8x512xf32> to vector<8x128xf32>
    %688 = math.tanh %687 : vector<8x128xf32>
    %689 = vector.extract_strided_slice %674 {offsets = [0, 384], sizes = [8, 128], strides = [1, 1]} : vector<8x512xf32> to vector<8x128xf32>
    %690 = arith.negf %689 : vector<8x128xf32>
    %691 = math.exp %690 : vector<8x128xf32>
    %cst_250 = arith.constant 1.000000e+00 : f32
    %692 = vector.broadcast %cst_250 : f32 to vector<8x128xf32>
    %693 = arith.addf %692, %691 : vector<8x128xf32>
    %694 = arith.divf %692, %693 : vector<8x128xf32>
    %695 = arith.mulf %686, %664 : vector<8x128xf32>
    %696 = arith.mulf %680, %688 : vector<8x128xf32>
    %697 = arith.addf %695, %696 : vector<8x128xf32>
    %698 = math.tanh %697 : vector<8x128xf32>
    %699 = arith.mulf %694, %698 : vector<8x128xf32>
    %c1_251 = arith.constant 1 : index
    %c0_252 = arith.constant 0 : index
    %c0_253 = arith.constant 0 : index
    %700 = vector.load %arg11[%c1_251, %c0_252, %c0_253] : memref<8x8x128xf32, #tpu.memory_space<vmem>>, vector<1x8x128xf32>
    %701 = vector.shape_cast %700 : vector<1x8x128xf32> to vector<8x128xf32>
    %702 = vector.shape_cast %699 : vector<8x128xf32> to vector<1x8x128xf32>
    tpu.vector_store %arg11[%c1_251, %c0_252, %c0_253], %702 {strides = array<i32>} : memref<8x8x128xf32, #tpu.memory_space<vmem>>, vector<1x8x128xf32>,
    %c2_254 = arith.constant 2 : index
    %c0_255 = arith.constant 0 : index
    %c0_256 = arith.constant 0 : index
    %703 = vector.load %arg12[%c2_254, %c0_255, %c0_256] : memref<8x8x512xf32, #tpu.memory_space<vmem>>, vector<1x8x512xf32>
    %704 = vector.shape_cast %703 : vector<1x8x512xf32> to vector<8x512xf32>
    %705 = arith.truncf %699 : vector<8x128xf32> to vector<8x128xbf16>
    %cst_257 = arith.constant dense<0.000000e+00> : vector<8x512xf32>
    %706 = tpu.matmul %705, %634, %cst_257 {dimension_numbers = #tpu.dot_dimension_numbers<[1], [0], [0], [1], [0, 0, 1, 1], [], []>} : vector<8x128xbf16>, vector<128x512xbf16>, vector<8x512xf32> -> vector<8x512xf32>
    %707 = arith.addf %704, %706 : vector<8x512xf32>
    %708 = vector.extract_strided_slice %707 {offsets = [0, 0], sizes = [8, 128], strides = [1, 1]} : vector<8x512xf32> to vector<8x128xf32>
    %709 = arith.negf %708 : vector<8x128xf32>
    %710 = math.exp %709 : vector<8x128xf32>
    %cst_258 = arith.constant 1.000000e+00 : f32
    %711 = vector.broadcast %cst_258 : f32 to vector<8x128xf32>
    %712 = arith.addf %711, %710 : vector<8x128xf32>
    %713 = arith.divf %711, %712 : vector<8x128xf32>
    %714 = vector.extract_strided_slice %707 {offsets = [0, 128], sizes = [8, 128], strides = [1, 1]} : vector<8x512xf32> to vector<8x128xf32>
    %715 = arith.negf %714 : vector<8x128xf32>
    %716 = math.exp %715 : vector<8x128xf32>
    %cst_259 = arith.constant 1.000000e+00 : f32
    %717 = vector.broadcast %cst_259 : f32 to vector<8x128xf32>
    %718 = arith.addf %717, %716 : vector<8x128xf32>
    %719 = arith.divf %717, %718 : vector<8x128xf32>
    %720 = vector.extract_strided_slice %707 {offsets = [0, 256], sizes = [8, 128], strides = [1, 1]} : vector<8x512xf32> to vector<8x128xf32>
    %721 = math.tanh %720 : vector<8x128xf32>
    %722 = vector.extract_strided_slice %707 {offsets = [0, 384], sizes = [8, 128], strides = [1, 1]} : vector<8x512xf32> to vector<8x128xf32>
    %723 = arith.negf %722 : vector<8x128xf32>
    %724 = math.exp %723 : vector<8x128xf32>
    %cst_260 = arith.constant 1.000000e+00 : f32
    %725 = vector.broadcast %cst_260 : f32 to vector<8x128xf32>
    %726 = arith.addf %725, %724 : vector<8x128xf32>
    %727 = arith.divf %725, %726 : vector<8x128xf32>
    %728 = arith.mulf %719, %697 : vector<8x128xf32>
    %729 = arith.mulf %713, %721 : vector<8x128xf32>
    %730 = arith.addf %728, %729 : vector<8x128xf32>
    %731 = math.tanh %730 : vector<8x128xf32>
    %732 = arith.mulf %727, %731 : vector<8x128xf32>
    %c2_261 = arith.constant 2 : index
    %c0_262 = arith.constant 0 : index
    %c0_263 = arith.constant 0 : index
    %733 = vector.load %arg11[%c2_261, %c0_262, %c0_263] : memref<8x8x128xf32, #tpu.memory_space<vmem>>, vector<1x8x128xf32>
    %734 = vector.shape_cast %733 : vector<1x8x128xf32> to vector<8x128xf32>
    %735 = vector.shape_cast %732 : vector<8x128xf32> to vector<1x8x128xf32>
    tpu.vector_store %arg11[%c2_261, %c0_262, %c0_263], %735 {strides = array<i32>} : memref<8x8x128xf32, #tpu.memory_space<vmem>>, vector<1x8x128xf32>,
    %c3_264 = arith.constant 3 : index
    %c0_265 = arith.constant 0 : index
    %c0_266 = arith.constant 0 : index
    %736 = vector.load %arg12[%c3_264, %c0_265, %c0_266] : memref<8x8x512xf32, #tpu.memory_space<vmem>>, vector<1x8x512xf32>
    %737 = vector.shape_cast %736 : vector<1x8x512xf32> to vector<8x512xf32>
    %738 = arith.truncf %732 : vector<8x128xf32> to vector<8x128xbf16>
    %cst_267 = arith.constant dense<0.000000e+00> : vector<8x512xf32>
    %739 = tpu.matmul %738, %634, %cst_267 {dimension_numbers = #tpu.dot_dimension_numbers<[1], [0], [0], [1], [0, 0, 1, 1], [], []>} : vector<8x128xbf16>, vector<128x512xbf16>, vector<8x512xf32> -> vector<8x512xf32>
    %740 = arith.addf %737, %739 : vector<8x512xf32>
    %741 = vector.extract_strided_slice %740 {offsets = [0, 0], sizes = [8, 128], strides = [1, 1]} : vector<8x512xf32> to vector<8x128xf32>
    %742 = arith.negf %741 : vector<8x128xf32>
    %743 = math.exp %742 : vector<8x128xf32>
    %cst_268 = arith.constant 1.000000e+00 : f32
    %744 = vector.broadcast %cst_268 : f32 to vector<8x128xf32>
    %745 = arith.addf %744, %743 : vector<8x128xf32>
    %746 = arith.divf %744, %745 : vector<8x128xf32>
    %747 = vector.extract_strided_slice %740 {offsets = [0, 128], sizes = [8, 128], strides = [1, 1]} : vector<8x512xf32> to vector<8x128xf32>
    %748 = arith.negf %747 : vector<8x128xf32>
    %749 = math.exp %748 : vector<8x128xf32>
    %cst_269 = arith.constant 1.000000e+00 : f32
    %750 = vector.broadcast %cst_269 : f32 to vector<8x128xf32>
    %751 = arith.addf %750, %749 : vector<8x128xf32>
    %752 = arith.divf %750, %751 : vector<8x128xf32>
    %753 = vector.extract_strided_slice %740 {offsets = [0, 256], sizes = [8, 128], strides = [1, 1]} : vector<8x512xf32> to vector<8x128xf32>
    %754 = math.tanh %753 : vector<8x128xf32>
    %755 = vector.extract_strided_slice %740 {offsets = [0, 384], sizes = [8, 128], strides = [1, 1]} : vector<8x512xf32> to vector<8x128xf32>
    %756 = arith.negf %755 : vector<8x128xf32>
    %757 = math.exp %756 : vector<8x128xf32>
    %cst_270 = arith.constant 1.000000e+00 : f32
    %758 = vector.broadcast %cst_270 : f32 to vector<8x128xf32>
    %759 = arith.addf %758, %757 : vector<8x128xf32>
    %760 = arith.divf %758, %759 : vector<8x128xf32>
    %761 = arith.mulf %752, %730 : vector<8x128xf32>
    %762 = arith.mulf %746, %754 : vector<8x128xf32>
    %763 = arith.addf %761, %762 : vector<8x128xf32>
    %764 = math.tanh %763 : vector<8x128xf32>
    %765 = arith.mulf %760, %764 : vector<8x128xf32>
    %c3_271 = arith.constant 3 : index
    %c0_272 = arith.constant 0 : index
    %c0_273 = arith.constant 0 : index
    %766 = vector.load %arg11[%c3_271, %c0_272, %c0_273] : memref<8x8x128xf32, #tpu.memory_space<vmem>>, vector<1x8x128xf32>
    %767 = vector.shape_cast %766 : vector<1x8x128xf32> to vector<8x128xf32>
    %768 = vector.shape_cast %765 : vector<8x128xf32> to vector<1x8x128xf32>
    tpu.vector_store %arg11[%c3_271, %c0_272, %c0_273], %768 {strides = array<i32>} : memref<8x8x128xf32, #tpu.memory_space<vmem>>, vector<1x8x128xf32>,
    %c4_274 = arith.constant 4 : index
    %c0_275 = arith.constant 0 : index
    %c0_276 = arith.constant 0 : index
    %769 = vector.load %arg12[%c4_274, %c0_275, %c0_276] : memref<8x8x512xf32, #tpu.memory_space<vmem>>, vector<1x8x512xf32>
    %770 = vector.shape_cast %769 : vector<1x8x512xf32> to vector<8x512xf32>
    %771 = arith.truncf %765 : vector<8x128xf32> to vector<8x128xbf16>
    %cst_277 = arith.constant dense<0.000000e+00> : vector<8x512xf32>
    %772 = tpu.matmul %771, %634, %cst_277 {dimension_numbers = #tpu.dot_dimension_numbers<[1], [0], [0], [1], [0, 0, 1, 1], [], []>} : vector<8x128xbf16>, vector<128x512xbf16>, vector<8x512xf32> -> vector<8x512xf32>
    %773 = arith.addf %770, %772 : vector<8x512xf32>
    %774 = vector.extract_strided_slice %773 {offsets = [0, 0], sizes = [8, 128], strides = [1, 1]} : vector<8x512xf32> to vector<8x128xf32>
    %775 = arith.negf %774 : vector<8x128xf32>
    %776 = math.exp %775 : vector<8x128xf32>
    %cst_278 = arith.constant 1.000000e+00 : f32
    %777 = vector.broadcast %cst_278 : f32 to vector<8x128xf32>
    %778 = arith.addf %777, %776 : vector<8x128xf32>
    %779 = arith.divf %777, %778 : vector<8x128xf32>
    %780 = vector.extract_strided_slice %773 {offsets = [0, 128], sizes = [8, 128], strides = [1, 1]} : vector<8x512xf32> to vector<8x128xf32>
    %781 = arith.negf %780 : vector<8x128xf32>
    %782 = math.exp %781 : vector<8x128xf32>
    %cst_279 = arith.constant 1.000000e+00 : f32
    %783 = vector.broadcast %cst_279 : f32 to vector<8x128xf32>
    %784 = arith.addf %783, %782 : vector<8x128xf32>
    %785 = arith.divf %783, %784 : vector<8x128xf32>
    %786 = vector.extract_strided_slice %773 {offsets = [0, 256], sizes = [8, 128], strides = [1, 1]} : vector<8x512xf32> to vector<8x128xf32>
    %787 = math.tanh %786 : vector<8x128xf32>
    %788 = vector.extract_strided_slice %773 {offsets = [0, 384], sizes = [8, 128], strides = [1, 1]} : vector<8x512xf32> to vector<8x128xf32>
    %789 = arith.negf %788 : vector<8x128xf32>
    %790 = math.exp %789 : vector<8x128xf32>
    %cst_280 = arith.constant 1.000000e+00 : f32
    %791 = vector.broadcast %cst_280 : f32 to vector<8x128xf32>
    %792 = arith.addf %791, %790 : vector<8x128xf32>
    %793 = arith.divf %791, %792 : vector<8x128xf32>
    %794 = arith.mulf %785, %763 : vector<8x128xf32>
    %795 = arith.mulf %779, %787 : vector<8x128xf32>
    %796 = arith.addf %794, %795 : vector<8x128xf32>
    %797 = math.tanh %796 : vector<8x128xf32>
    %798 = arith.mulf %793, %797 : vector<8x128xf32>
    %c4_281 = arith.constant 4 : index
    %c0_282 = arith.constant 0 : index
    %c0_283 = arith.constant 0 : index
    %799 = vector.load %arg11[%c4_281, %c0_282, %c0_283] : memref<8x8x128xf32, #tpu.memory_space<vmem>>, vector<1x8x128xf32>
    %800 = vector.shape_cast %799 : vector<1x8x128xf32> to vector<8x128xf32>
    %801 = vector.shape_cast %798 : vector<8x128xf32> to vector<1x8x128xf32>
    tpu.vector_store %arg11[%c4_281, %c0_282, %c0_283], %801 {strides = array<i32>} : memref<8x8x128xf32, #tpu.memory_space<vmem>>, vector<1x8x128xf32>,
    %c5_284 = arith.constant 5 : index
    %c0_285 = arith.constant 0 : index
    %c0_286 = arith.constant 0 : index
    %802 = vector.load %arg12[%c5_284, %c0_285, %c0_286] : memref<8x8x512xf32, #tpu.memory_space<vmem>>, vector<1x8x512xf32>
    %803 = vector.shape_cast %802 : vector<1x8x512xf32> to vector<8x512xf32>
    %804 = arith.truncf %798 : vector<8x128xf32> to vector<8x128xbf16>
    %cst_287 = arith.constant dense<0.000000e+00> : vector<8x512xf32>
    %805 = tpu.matmul %804, %634, %cst_287 {dimension_numbers = #tpu.dot_dimension_numbers<[1], [0], [0], [1], [0, 0, 1, 1], [], []>} : vector<8x128xbf16>, vector<128x512xbf16>, vector<8x512xf32> -> vector<8x512xf32>
    %806 = arith.addf %803, %805 : vector<8x512xf32>
    %807 = vector.extract_strided_slice %806 {offsets = [0, 0], sizes = [8, 128], strides = [1, 1]} : vector<8x512xf32> to vector<8x128xf32>
    %808 = arith.negf %807 : vector<8x128xf32>
    %809 = math.exp %808 : vector<8x128xf32>
    %cst_288 = arith.constant 1.000000e+00 : f32
    %810 = vector.broadcast %cst_288 : f32 to vector<8x128xf32>
    %811 = arith.addf %810, %809 : vector<8x128xf32>
    %812 = arith.divf %810, %811 : vector<8x128xf32>
    %813 = vector.extract_strided_slice %806 {offsets = [0, 128], sizes = [8, 128], strides = [1, 1]} : vector<8x512xf32> to vector<8x128xf32>
    %814 = arith.negf %813 : vector<8x128xf32>
    %815 = math.exp %814 : vector<8x128xf32>
    %cst_289 = arith.constant 1.000000e+00 : f32
    %816 = vector.broadcast %cst_289 : f32 to vector<8x128xf32>
    %817 = arith.addf %816, %815 : vector<8x128xf32>
    %818 = arith.divf %816, %817 : vector<8x128xf32>
    %819 = vector.extract_strided_slice %806 {offsets = [0, 256], sizes = [8, 128], strides = [1, 1]} : vector<8x512xf32> to vector<8x128xf32>
    %820 = math.tanh %819 : vector<8x128xf32>
    %821 = vector.extract_strided_slice %806 {offsets = [0, 384], sizes = [8, 128], strides = [1, 1]} : vector<8x512xf32> to vector<8x128xf32>
    %822 = arith.negf %821 : vector<8x128xf32>
    %823 = math.exp %822 : vector<8x128xf32>
    %cst_290 = arith.constant 1.000000e+00 : f32
    %824 = vector.broadcast %cst_290 : f32 to vector<8x128xf32>
    %825 = arith.addf %824, %823 : vector<8x128xf32>
    %826 = arith.divf %824, %825 : vector<8x128xf32>
    %827 = arith.mulf %818, %796 : vector<8x128xf32>
    %828 = arith.mulf %812, %820 : vector<8x128xf32>
    %829 = arith.addf %827, %828 : vector<8x128xf32>
    %830 = math.tanh %829 : vector<8x128xf32>
    %831 = arith.mulf %826, %830 : vector<8x128xf32>
    %c5_291 = arith.constant 5 : index
    %c0_292 = arith.constant 0 : index
    %c0_293 = arith.constant 0 : index
    %832 = vector.load %arg11[%c5_291, %c0_292, %c0_293] : memref<8x8x128xf32, #tpu.memory_space<vmem>>, vector<1x8x128xf32>
    %833 = vector.shape_cast %832 : vector<1x8x128xf32> to vector<8x128xf32>
    %834 = vector.shape_cast %831 : vector<8x128xf32> to vector<1x8x128xf32>
    tpu.vector_store %arg11[%c5_291, %c0_292, %c0_293], %834 {strides = array<i32>} : memref<8x8x128xf32, #tpu.memory_space<vmem>>, vector<1x8x128xf32>,
    %c6_294 = arith.constant 6 : index
    %c0_295 = arith.constant 0 : index
    %c0_296 = arith.constant 0 : index
    %835 = vector.load %arg12[%c6_294, %c0_295, %c0_296] : memref<8x8x512xf32, #tpu.memory_space<vmem>>, vector<1x8x512xf32>
    %836 = vector.shape_cast %835 : vector<1x8x512xf32> to vector<8x512xf32>
    %837 = arith.truncf %831 : vector<8x128xf32> to vector<8x128xbf16>
    %cst_297 = arith.constant dense<0.000000e+00> : vector<8x512xf32>
    %838 = tpu.matmul %837, %634, %cst_297 {dimension_numbers = #tpu.dot_dimension_numbers<[1], [0], [0], [1], [0, 0, 1, 1], [], []>} : vector<8x128xbf16>, vector<128x512xbf16>, vector<8x512xf32> -> vector<8x512xf32>
    %839 = arith.addf %836, %838 : vector<8x512xf32>
    %840 = vector.extract_strided_slice %839 {offsets = [0, 0], sizes = [8, 128], strides = [1, 1]} : vector<8x512xf32> to vector<8x128xf32>
    %841 = arith.negf %840 : vector<8x128xf32>
    %842 = math.exp %841 : vector<8x128xf32>
    %cst_298 = arith.constant 1.000000e+00 : f32
    %843 = vector.broadcast %cst_298 : f32 to vector<8x128xf32>
    %844 = arith.addf %843, %842 : vector<8x128xf32>
    %845 = arith.divf %843, %844 : vector<8x128xf32>
    %846 = vector.extract_strided_slice %839 {offsets = [0, 128], sizes = [8, 128], strides = [1, 1]} : vector<8x512xf32> to vector<8x128xf32>
    %847 = arith.negf %846 : vector<8x128xf32>
    %848 = math.exp %847 : vector<8x128xf32>
    %cst_299 = arith.constant 1.000000e+00 : f32
    %849 = vector.broadcast %cst_299 : f32 to vector<8x128xf32>
    %850 = arith.addf %849, %848 : vector<8x128xf32>
    %851 = arith.divf %849, %850 : vector<8x128xf32>
    %852 = vector.extract_strided_slice %839 {offsets = [0, 256], sizes = [8, 128], strides = [1, 1]} : vector<8x512xf32> to vector<8x128xf32>
    %853 = math.tanh %852 : vector<8x128xf32>
    %854 = vector.extract_strided_slice %839 {offsets = [0, 384], sizes = [8, 128], strides = [1, 1]} : vector<8x512xf32> to vector<8x128xf32>
    %855 = arith.negf %854 : vector<8x128xf32>
    %856 = math.exp %855 : vector<8x128xf32>
    %cst_300 = arith.constant 1.000000e+00 : f32
    %857 = vector.broadcast %cst_300 : f32 to vector<8x128xf32>
    %858 = arith.addf %857, %856 : vector<8x128xf32>
    %859 = arith.divf %857, %858 : vector<8x128xf32>
    %860 = arith.mulf %851, %829 : vector<8x128xf32>
    %861 = arith.mulf %845, %853 : vector<8x128xf32>
    %862 = arith.addf %860, %861 : vector<8x128xf32>
    %863 = math.tanh %862 : vector<8x128xf32>
    %864 = arith.mulf %859, %863 : vector<8x128xf32>
    %c6_301 = arith.constant 6 : index
    %c0_302 = arith.constant 0 : index
    %c0_303 = arith.constant 0 : index
    %865 = vector.load %arg11[%c6_301, %c0_302, %c0_303] : memref<8x8x128xf32, #tpu.memory_space<vmem>>, vector<1x8x128xf32>
    %866 = vector.shape_cast %865 : vector<1x8x128xf32> to vector<8x128xf32>
    %867 = vector.shape_cast %864 : vector<8x128xf32> to vector<1x8x128xf32>
    tpu.vector_store %arg11[%c6_301, %c0_302, %c0_303], %867 {strides = array<i32>} : memref<8x8x128xf32, #tpu.memory_space<vmem>>, vector<1x8x128xf32>,
    %c7_304 = arith.constant 7 : index
    %c0_305 = arith.constant 0 : index
    %c0_306 = arith.constant 0 : index
    %868 = vector.load %arg12[%c7_304, %c0_305, %c0_306] : memref<8x8x512xf32, #tpu.memory_space<vmem>>, vector<1x8x512xf32>
    %869 = vector.shape_cast %868 : vector<1x8x512xf32> to vector<8x512xf32>
    %870 = arith.truncf %864 : vector<8x128xf32> to vector<8x128xbf16>
    %cst_307 = arith.constant dense<0.000000e+00> : vector<8x512xf32>
    %871 = tpu.matmul %870, %634, %cst_307 {dimension_numbers = #tpu.dot_dimension_numbers<[1], [0], [0], [1], [0, 0, 1, 1], [], []>} : vector<8x128xbf16>, vector<128x512xbf16>, vector<8x512xf32> -> vector<8x512xf32>
    %872 = arith.addf %869, %871 : vector<8x512xf32>
    %873 = vector.extract_strided_slice %872 {offsets = [0, 0], sizes = [8, 128], strides = [1, 1]} : vector<8x512xf32> to vector<8x128xf32>
    %874 = arith.negf %873 : vector<8x128xf32>
    %875 = math.exp %874 : vector<8x128xf32>
    %cst_308 = arith.constant 1.000000e+00 : f32
    %876 = vector.broadcast %cst_308 : f32 to vector<8x128xf32>
    %877 = arith.addf %876, %875 : vector<8x128xf32>
    %878 = arith.divf %876, %877 : vector<8x128xf32>
    %879 = vector.extract_strided_slice %872 {offsets = [0, 128], sizes = [8, 128], strides = [1, 1]} : vector<8x512xf32> to vector<8x128xf32>
    %880 = arith.negf %879 : vector<8x128xf32>
    %881 = math.exp %880 : vector<8x128xf32>
    %cst_309 = arith.constant 1.000000e+00 : f32
    %882 = vector.broadcast %cst_309 : f32 to vector<8x128xf32>
    %883 = arith.addf %882, %881 : vector<8x128xf32>
    %884 = arith.divf %882, %883 : vector<8x128xf32>
    %885 = vector.extract_strided_slice %872 {offsets = [0, 256], sizes = [8, 128], strides = [1, 1]} : vector<8x512xf32> to vector<8x128xf32>
    %886 = math.tanh %885 : vector<8x128xf32>
    %887 = vector.extract_strided_slice %872 {offsets = [0, 384], sizes = [8, 128], strides = [1, 1]} : vector<8x512xf32> to vector<8x128xf32>
    %888 = arith.negf %887 : vector<8x128xf32>
    %889 = math.exp %888 : vector<8x128xf32>
    %cst_310 = arith.constant 1.000000e+00 : f32
    %890 = vector.broadcast %cst_310 : f32 to vector<8x128xf32>
    %891 = arith.addf %890, %889 : vector<8x128xf32>
    %892 = arith.divf %890, %891 : vector<8x128xf32>
    %893 = arith.mulf %884, %862 : vector<8x128xf32>
    %894 = arith.mulf %878, %886 : vector<8x128xf32>
    %895 = arith.addf %893, %894 : vector<8x128xf32>
    %896 = math.tanh %895 : vector<8x128xf32>
    %897 = arith.mulf %892, %896 : vector<8x128xf32>
    %c7_311 = arith.constant 7 : index
    %c0_312 = arith.constant 0 : index
    %c0_313 = arith.constant 0 : index
    %898 = vector.load %arg11[%c7_311, %c0_312, %c0_313] : memref<8x8x128xf32, #tpu.memory_space<vmem>>, vector<1x8x128xf32>
    %899 = vector.shape_cast %898 : vector<1x8x128xf32> to vector<8x128xf32>
    %900 = vector.shape_cast %897 : vector<8x128xf32> to vector<1x8x128xf32>
    tpu.vector_store %arg11[%c7_311, %c0_312, %c0_313], %900 {strides = array<i32>} : memref<8x8x128xf32, #tpu.memory_space<vmem>>, vector<1x8x128xf32>,
    %c2_314 = arith.constant 2 : index
    %c0_315 = arith.constant 0 : index
    %c0_316 = arith.constant 0 : index
    %901 = vector.load %arg9[%c2_314, %c0_315, %c0_316] : memref<3x8x128xf32, #tpu.memory_space<vmem>>, vector<1x8x128xf32>
    %902 = vector.shape_cast %901 : vector<1x8x128xf32> to vector<8x128xf32>
    %903 = vector.shape_cast %897 : vector<8x128xf32> to vector<1x8x128xf32>
    tpu.vector_store %arg9[%c2_314, %c0_315, %c0_316], %903 {strides = array<i32>} : memref<3x8x128xf32, #tpu.memory_space<vmem>>, vector<1x8x128xf32>,
    %c2_317 = arith.constant 2 : index
    %c0_318 = arith.constant 0 : index
    %c0_319 = arith.constant 0 : index
    %904 = vector.load %arg10[%c2_317, %c0_318, %c0_319] : memref<3x8x128xf32, #tpu.memory_space<vmem>>, vector<1x8x128xf32>
    %905 = vector.shape_cast %904 : vector<1x8x128xf32> to vector<8x128xf32>
    %906 = vector.shape_cast %895 : vector<8x128xf32> to vector<1x8x128xf32>
    tpu.vector_store %arg10[%c2_317, %c0_318, %c0_319], %906 {strides = array<i32>} : memref<3x8x128xf32, #tpu.memory_space<vmem>>, vector<1x8x128xf32>,
    %c0_320 = arith.constant 0 : index
    %c0_321 = arith.constant 0 : index
    %c0_322 = arith.constant 0 : index
    %907 = vector.load %arg11[%c0_320, %c0_321, %c0_322] : memref<8x8x128xf32, #tpu.memory_space<vmem>>, vector<8x8x128xf32>
    %908 = tpu.iota {dimensions = array<i32: 2>} : vector<1x1x4xi32>
    %cst_323 = arith.constant 0.000000e+00 : f32
    %909 = vector.broadcast %cst_323 : f32 to vector<8x8x4xf32>
    %c0_324 = arith.constant 0 : index
    %c0_325 = arith.constant 0 : index
    %c0_326 = arith.constant 0 : index
    %910 = vector.load %arg6[%c0_324, %c0_325, %c0_326] : memref<4x1x128xf32, #tpu.memory_space<vmem>>, vector<1x1x128xf32>
    %911 = vector.shape_cast %910 : vector<1x1x128xf32> to vector<1x128xf32>
    %912 = vector.shape_cast %911 : vector<1x128xf32> to vector<1x1x128xf32>
    %913 = vector.broadcast %912 : vector<1x1x128xf32> to vector<8x8x128xf32>
    %914 = arith.mulf %907, %913 : vector<8x8x128xf32>
    %cst_327 = arith.constant dense<0.000000e+00> : vector<8x8xf32>
    %915 = vector.multi_reduction <add>, %914, %cst_327 [2] : vector<8x8x128xf32> to vector<8x8xf32>
    %916 = vector.shape_cast %915 : vector<8x8xf32> to vector<8x8x1xf32>
    %c0_i32_328 = arith.constant 0 : i32
    %917 = vector.broadcast %c0_i32_328 : i32 to vector<1x1x4xi32>
    %918 = arith.cmpi eq, %908, %917 : vector<1x1x4xi32>
    %cst_329 = arith.constant 1.000000e+00 : f32
    %cst_330 = arith.constant 0.000000e+00 : f32
    %919 = vector.broadcast %cst_329 : f32 to vector<1x1x4xf32>
    %920 = vector.broadcast %cst_330 : f32 to vector<1x1x4xf32>
    %921 = arith.select %918, %919, %920 : vector<1x1x4xi1>, vector<1x1x4xf32>
    %922 = vector.broadcast %916 : vector<8x8x1xf32> to vector<8x8x4xf32>
    %923 = vector.broadcast %921 : vector<1x1x4xf32> to vector<8x8x4xf32>
    %924 = arith.mulf %922, %923 : vector<8x8x4xf32>
    %925 = arith.addf %909, %924 : vector<8x8x4xf32>
    %c1_331 = arith.constant 1 : index
    %c0_332 = arith.constant 0 : index
    %c0_333 = arith.constant 0 : index
    %926 = vector.load %arg6[%c1_331, %c0_332, %c0_333] : memref<4x1x128xf32, #tpu.memory_space<vmem>>, vector<1x1x128xf32>
    %927 = vector.shape_cast %926 : vector<1x1x128xf32> to vector<1x128xf32>
    %928 = vector.shape_cast %927 : vector<1x128xf32> to vector<1x1x128xf32>
    %929 = vector.broadcast %928 : vector<1x1x128xf32> to vector<8x8x128xf32>
    %930 = arith.mulf %907, %929 : vector<8x8x128xf32>
    %cst_334 = arith.constant dense<0.000000e+00> : vector<8x8xf32>
    %931 = vector.multi_reduction <add>, %930, %cst_334 [2] : vector<8x8x128xf32> to vector<8x8xf32>
    %932 = vector.shape_cast %931 : vector<8x8xf32> to vector<8x8x1xf32>
    %c1_i32_335 = arith.constant 1 : i32
    %933 = vector.broadcast %c1_i32_335 : i32 to vector<1x1x4xi32>
    %934 = arith.cmpi eq, %908, %933 : vector<1x1x4xi32>
    %cst_336 = arith.constant 1.000000e+00 : f32
    %cst_337 = arith.constant 0.000000e+00 : f32
    %935 = vector.broadcast %cst_336 : f32 to vector<1x1x4xf32>
    %936 = vector.broadcast %cst_337 : f32 to vector<1x1x4xf32>
    %937 = arith.select %934, %935, %936 : vector<1x1x4xi1>, vector<1x1x4xf32>
    %938 = vector.broadcast %932 : vector<8x8x1xf32> to vector<8x8x4xf32>
    %939 = vector.broadcast %937 : vector<1x1x4xf32> to vector<8x8x4xf32>
    %940 = arith.mulf %938, %939 : vector<8x8x4xf32>
    %941 = arith.addf %925, %940 : vector<8x8x4xf32>
    %c2_338 = arith.constant 2 : index
    %c0_339 = arith.constant 0 : index
    %c0_340 = arith.constant 0 : index
    %942 = vector.load %arg6[%c2_338, %c0_339, %c0_340] : memref<4x1x128xf32, #tpu.memory_space<vmem>>, vector<1x1x128xf32>
    %943 = vector.shape_cast %942 : vector<1x1x128xf32> to vector<1x128xf32>
    %944 = vector.shape_cast %943 : vector<1x128xf32> to vector<1x1x128xf32>
    %945 = vector.broadcast %944 : vector<1x1x128xf32> to vector<8x8x128xf32>
    %946 = arith.mulf %907, %945 : vector<8x8x128xf32>
    %cst_341 = arith.constant dense<0.000000e+00> : vector<8x8xf32>
    %947 = vector.multi_reduction <add>, %946, %cst_341 [2] : vector<8x8x128xf32> to vector<8x8xf32>
    %948 = vector.shape_cast %947 : vector<8x8xf32> to vector<8x8x1xf32>
    %c2_i32_342 = arith.constant 2 : i32
    %949 = vector.broadcast %c2_i32_342 : i32 to vector<1x1x4xi32>
    %950 = arith.cmpi eq, %908, %949 : vector<1x1x4xi32>
    %cst_343 = arith.constant 1.000000e+00 : f32
    %cst_344 = arith.constant 0.000000e+00 : f32
    %951 = vector.broadcast %cst_343 : f32 to vector<1x1x4xf32>
    %952 = vector.broadcast %cst_344 : f32 to vector<1x1x4xf32>
    %953 = arith.select %950, %951, %952 : vector<1x1x4xi1>, vector<1x1x4xf32>
    %954 = vector.broadcast %948 : vector<8x8x1xf32> to vector<8x8x4xf32>
    %955 = vector.broadcast %953 : vector<1x1x4xf32> to vector<8x8x4xf32>
    %956 = arith.mulf %954, %955 : vector<8x8x4xf32>
    %957 = arith.addf %941, %956 : vector<8x8x4xf32>
    %c3_345 = arith.constant 3 : index
    %c0_346 = arith.constant 0 : index
    %c0_347 = arith.constant 0 : index
    %958 = vector.load %arg6[%c3_345, %c0_346, %c0_347] : memref<4x1x128xf32, #tpu.memory_space<vmem>>, vector<1x1x128xf32>
    %959 = vector.shape_cast %958 : vector<1x1x128xf32> to vector<1x128xf32>
    %960 = vector.shape_cast %959 : vector<1x128xf32> to vector<1x1x128xf32>
    %961 = vector.broadcast %960 : vector<1x1x128xf32> to vector<8x8x128xf32>
    %962 = arith.mulf %907, %961 : vector<8x8x128xf32>
    %cst_348 = arith.constant dense<0.000000e+00> : vector<8x8xf32>
    %963 = vector.multi_reduction <add>, %962, %cst_348 [2] : vector<8x8x128xf32> to vector<8x8xf32>
    %964 = vector.shape_cast %963 : vector<8x8xf32> to vector<8x8x1xf32>
    %c3_i32_349 = arith.constant 3 : i32
    %965 = vector.broadcast %c3_i32_349 : i32 to vector<1x1x4xi32>
    %966 = arith.cmpi eq, %908, %965 : vector<1x1x4xi32>
    %cst_350 = arith.constant 1.000000e+00 : f32
    %cst_351 = arith.constant 0.000000e+00 : f32
    %967 = vector.broadcast %cst_350 : f32 to vector<1x1x4xf32>
    %968 = vector.broadcast %cst_351 : f32 to vector<1x1x4xf32>
    %969 = arith.select %966, %967, %968 : vector<1x1x4xi1>, vector<1x1x4xf32>
    %970 = vector.broadcast %964 : vector<8x8x1xf32> to vector<8x8x4xf32>
    %971 = vector.broadcast %969 : vector<1x1x4xf32> to vector<8x8x4xf32>
    %972 = arith.mulf %970, %971 : vector<8x8x4xf32>
    %973 = arith.addf %957, %972 : vector<8x8x4xf32>
    %c0_352 = arith.constant 0 : index
    %c0_353 = arith.constant 0 : index
    %974 = vector.load %arg7[%c0_352, %c0_353] : memref<1x4xf32, #tpu.memory_space<vmem>>, vector<1x4xf32>
    %975 = vector.shape_cast %974 : vector<1x4xf32> to vector<1x1x4xf32>
    %976 = vector.broadcast %975 : vector<1x1x4xf32> to vector<8x8x4xf32>
    %977 = arith.addf %973, %976 : vector<8x8x4xf32>
    %c0_354 = arith.constant 0 : index
    %c0_355 = arith.constant 0 : index
    %c0_356 = arith.constant 0 : index
    %978 = vector.load %arg8[%c0_354, %c0_355, %c0_356] : memref<8x8x4xf32, #tpu.memory_space<vmem>>, vector<8x8x4xf32>
    tpu.vector_store %arg8[%c0_354, %c0_355, %c0_356], %977 {strides = array<i32>} : memref<8x8x4xf32, #tpu.memory_space<vmem>>, vector<8x8x4xf32>,
    return
  }
  func.func @transform_0(%arg0: i32) -> (i32, i32, i32) {
    %c0_i32 = arith.constant 0 : i32
    %c0_i32_0 = arith.constant 0 : i32
    %c0_i32_1 = arith.constant 0 : i32
    return %c0_i32, %arg0, %c0_i32_0 : i32, i32, i32
  }
  func.func @transform_1(%arg0: i32) -> (i32, i32, i32) {
    %c0_i32 = arith.constant 0 : i32
    %c0_i32_0 = arith.constant 0 : i32
    %c0_i32_1 = arith.constant 0 : i32
    %c0_i32_2 = arith.constant 0 : i32
    return %c0_i32, %c0_i32_0, %c0_i32_1 : i32, i32, i32
  }
  func.func @transform_2(%arg0: i32) -> (i32, i32, i32) {
    %c0_i32 = arith.constant 0 : i32
    %c0_i32_0 = arith.constant 0 : i32
    %c0_i32_1 = arith.constant 0 : i32
    %c0_i32_2 = arith.constant 0 : i32
    return %c0_i32, %c0_i32_0, %c0_i32_1 : i32, i32, i32
  }
  func.func @transform_3(%arg0: i32) -> (i32, i32, i32) {
    %c0_i32 = arith.constant 0 : i32
    %c0_i32_0 = arith.constant 0 : i32
    %c0_i32_1 = arith.constant 0 : i32
    %c0_i32_2 = arith.constant 0 : i32
    return %c0_i32, %c0_i32_0, %c0_i32_1 : i32, i32, i32
  }
  func.func @transform_4(%arg0: i32) -> (i32, i32, i32) {
    %c0_i32 = arith.constant 0 : i32
    %c0_i32_0 = arith.constant 0 : i32
    %c0_i32_1 = arith.constant 0 : i32
    %c0_i32_2 = arith.constant 0 : i32
    return %c0_i32, %c0_i32_0, %c0_i32_1 : i32, i32, i32
  }
  func.func @transform_5(%arg0: i32) -> (i32, i32, i32) {
    %c0_i32 = arith.constant 0 : i32
    %c0_i32_0 = arith.constant 0 : i32
    %c0_i32_1 = arith.constant 0 : i32
    %c0_i32_2 = arith.constant 0 : i32
    return %c0_i32, %c0_i32_0, %c0_i32_1 : i32, i32, i32
  }
  func.func @transform_6(%arg0: i32) -> (i32, i32) {
    %c0_i32 = arith.constant 0 : i32
    %c0_i32_0 = arith.constant 0 : i32
    %c0_i32_1 = arith.constant 0 : i32
    return %c0_i32, %c0_i32_0 : i32, i32
  }
  func.func @transform_7(%arg0: i32) -> (i32, i32, i32) {
    %c0_i32 = arith.constant 0 : i32
    %c0_i32_0 = arith.constant 0 : i32
    %c0_i32_1 = arith.constant 0 : i32
    return %c0_i32, %arg0, %c0_i32_0 : i32, i32, i32
  }
  func.func @transform_8(%arg0: i32) -> (i32, i32, i32) {
    %c0_i32 = arith.constant 0 : i32
    %c0_i32_0 = arith.constant 0 : i32
    %c0_i32_1 = arith.constant 0 : i32
    return %c0_i32, %arg0, %c0_i32_0 : i32, i32, i32
  }
  func.func @transform_9(%arg0: i32) -> (i32, i32, i32) {
    %c0_i32 = arith.constant 0 : i32
    %c0_i32_0 = arith.constant 0 : i32
    %c0_i32_1 = arith.constant 0 : i32
    return %c0_i32, %arg0, %c0_i32_0 : i32, i32, i32
  }
}

</mosaic_0001>

<bundles_post_ra>
// kernel: rnn_blocks_forward.3
= control target key start
LH: loop header
LB: loop body
LE: loop exit
PB: predicated region body
PF: predicated region fallthrough
CT: control target
= control target key end

     0   :  { %v226_v0 = vmov 0.0   ;;  %vm227_vm0 = vmmov 0   ;;  %vm50_vm1 = vcmask 261120   ;;  %s298_s4 = inlined_call_operand.vmem [shape: bf16[32,128], index: 4, kind: input, shape index: {}]   ;;  %s299_s2 = inlined_call_operand.vmem [shape: bf16[32,128], index: 2, kind: input, shape index: {}]   ;;  %s300_s1 = inlined_call_operand.vmem [shape: bf16[2,32], index: 1, kind: input, shape index: {}]   ;;  %s301_s0 = inlined_call_operand.vmem [shape: bf16[2,32], index: 0, kind: input, shape index: {}]   ;;  %s302_s5 = inlined_call_operand.vmem [shape: f32[1,128], index: 5, kind: input, shape index: {}]   ;;  %s303_s3 = inlined_call_operand.vmem [shape: f32[1,128], index: 3, kind: input, shape index: {}]   ;;  %s304_s6 = inlined_call_operand.vmem [shape: f32[2,128], index: 6, kind: output, shape index: {0}]   ;;  %s305_s7 = inlined_call_operand.vmem [shape: f32[2,128], index: 7, kind: output, shape index: {1}]  }
   0x1   :  { %208 = vmatprep.subr.bf16.mxu1 %v226_v0  ;;  %v218_v1 = vld [vmem:[%s298_s4] sm:$0xff]   ;;  %212 = vmatprep.mubr.msk.bf16.mxu1 %vm227_vm0, %v226_v0  ;;  %v219_v2 = vld [vmem:[%s298_s4 + $0x8] sm:$0xff]  }
   0x2   :  { %200 = vmatprep.subr.bf16.mxu0 %v226_v0  ;;  %204 = vmatprep.mubr.msk.bf16.mxu0 %vm227_vm0, %v226_v0  ;;  %v220_v3 = vld [vmem:[%s299_s2] sm:$0xff]   ;;  %v221_v4 = vld [vmem:[%s299_s2 + $0x8] sm:$0xff]  }
   0x3   :  { %209 = vmatpush3.bf16.msra.mxu1 %v218_v1  ;;  %201 = vmatpush3.bf16.msra.mxu0 %v220_v3  ;;  %v95_v5 = vld [vmem:[%s300_s1] sm:$0x1] }
   0x4   :  { %210 = vmatprep.subr.bf16.mxu1 %v226_v0  ;;  %202 = vmatprep.subr.bf16.mxu0 %v226_v0  ;;  %v26_v6 = vld [vmem:[%s301_s0] sm:$0x1] }
   0x5   :  { %v190_v7 = vld [vmem:[%s302_s5] ss:$0 sm:$0xff] }
   0x6   :  { %v186_v11 = vld [vmem:[%s303_s3] ss:$0 sm:$0xff] }
   0x7   :  { %211 = vmatpush3.bf16.msra.mxu1 %v219_v2  ;;  %203 = vmatpush3.bf16.msra.mxu0 %v221_v4 }
   0xa   :  { %213 = vmatmul.mubr.msk.bf16.vlgmr.msra.gmra.mrb[0].mxu1 %vm50_vm1, %v95_v5  ;;  %205 = vmatmul.mubr.msk.bf16.vlgmr.msra.gmra.mrb[0].mxu0 %vm50_vm1, %v26_v6 }
  0xdd   :  { %v156_v8 = vpop.f32.mrb[0].mxu1  ;;  %v88_v15 = vpop.f32.mrb[0].mxu0 }
  0xde   :  { %v157_v9 = vadd.f32 %v190_v7, %v156_v8  ;;  %v214_v10 = vpop.f32.mrb[1].mxu1  ;;  %v89_v16 = vadd.f32 %v186_v11, %v88_v15  ;;  %v206_v17 = vpop.f32.mrb[1].mxu0 }
  0xdf   :  { %v159_v12 = vpop.f32.mrb[2].mxu1  ;;  %v91_v19 = vpop.f32.mrb[2].mxu0 }
  0xe0   :  { %v163_v13 = vand.u32 2147483647, %v157_v9  ;;  %v215_v14 = vpop.f32.mrb[3].mxu1  ;;  %94 = vst [vmem:[%s304_s6] sm:$0x3] %v89_v16  ;;  %v207_v20 = vpop.f32.mrb[3].mxu0  ;;  %v162_v30 = vmax.f32 %v157_v9, 0.0 }
  0xe2   :  { %v164_v18 = vsub.f32 0.0, %v163_v13 }
  0xe4   :  { %v165_v21 = vmul.f32 1.442695, %v164_v18 }
  0xe6   :  { %222 = vpow2.f32 %v165_v21 }
  0xf0   :  { %v223_v22 = vpop.eup %222 }
  0xf1   :  { %v167_v23 = vadd.f32 1.0, %v223_v22  ;;  %v170_v24 = vmul.f32 -0.5, %v223_v22  ;;  %v173_v26 = vand.u32 2147483647, %v223_v22 }
  0xf3   :  { %224 = vlog2.f32 %v167_v23  ;;  %v171_v25 = vadd.f32 1.0, %v170_v24  ;;  %vm174_vm2 = vcmp.lt.f32.partialorder %v173_v26, 0.0004427343 }
  0xf5   :  { %v172_v29 = vmul.f32 %v223_v22, %v171_v25 }
  0xfd   :  { %v225_v27 = vpop.eup %224 }
  0xfe   :  { %v169_v28 = vmul.f32 0.6931472, %v225_v27 }
 0x100   :  { %v175_v31 = vsel %vm174_vm2, %v172_v29, %v169_v28 }
 0x101   :  { %v176_v32 = vadd.f32 %v175_v31, %v162_v30 }
 0x103   :  { %177 = vst [vmem:[%s305_s7] sm:$0x3] %v176_v32 }

// kernel: rnn_blocks_forward.2
= control target key start
LH: loop header
LB: loop body
LE: loop exit
PB: predicated region body
PF: predicated region fallthrough
CT: control target
= control target key end

     0   :  { %v9133_v1 = vmov 0   ;;  %v38_v16 = vlaneseq  ;;  %vm75_vm1 = vcmask 31744   ;;  %s9123_s3 = inlined_call_operand.vmem [shape: bf16[3,128,512], index: 3, kind: input, shape index: {}]   ;;  %s9124_s0 = inlined_call_operand.vmem [shape: f32[8,8,4], index: 0, kind: input, shape index: {}]   ;;  %s9125_s1 = inlined_call_operand.vmem [shape: f32[4,1,512], index: 1, kind: input, shape index: {}]   ;;  %s9126_s4 = inlined_call_operand.vmem [shape: f32[3,1,512], index: 4, kind: input, shape index: {}]   ;;  %s9127_s2 = inlined_call_operand.vmem [shape: bf16[2,128,512], index: 2, kind: input, shape index: {}]   ;;  %s9128_s9 = inlined_call_operand.vmem [shape: f32[3,8,128], index: 9, kind: output, shape index: {2}]   ;;  %s9129_s8 = inlined_call_operand.vmem [shape: f32[3,8,128], index: 8, kind: output, shape index: {1}]   ;;  %s9130_s5 = inlined_call_operand.vmem [shape: f32[4,1,128], index: 5, kind: input, shape index: {}]   ;;  %s9131_s6 = inlined_call_operand.vmem [shape: f32[1,4], index: 6, kind: input, shape index: {}]   ;;  %s9132_s7 = inlined_call_operand.vmem [shape: f32[8,8,4], index: 7, kind: output, shape index: {0}]  }
   0x1   :  { %v6137_v0 = vld [vmem:[%s9123_s3 + $0x4] ss:$16 sps:$4 sm:$0xff]   ;;  %806 = vmatprep.mubr.bf16.mxu0 %v9133_v1  ;;  %847 = vmatprep.mubr.bf16.mxu1 %v9133_v1  ;;  %v6144_v2 = vld [vmem:[%s9123_s3 + $0xc] ss:$16 sps:$4 sm:$0xff]   ;;  %v6150_v3 = vld [vmem:[%s9123_s3] ss:$16 sps:$4 sm:$0xff]  }
   0x2   :  { %9241 = vst [vmem:[#allocation4_spill] sm:$0xff] %v6137_v0  ;;  %9242 = vst [vmem:[#allocation5_spill] sm:$0xff] %v6144_v2  ;;  %774 = vmatprep.subr.bf16.mxu0 %v6137_v0  ;;  %v6155_v4 = vld [vmem:[%s9123_s3 + $0x8] ss:$16 sps:$4 sm:$0xff]   ;;  %815 = vmatprep.subr.bf16.mxu1 %v6144_v2  ;;  %v6161_v5 = vld [vmem:[%s9123_s3 + $0x24] ss:$16 sps:$4 sm:$0xff]  }
   0x3   :  { %775 = vmatpush1.bf16.msra.mxu0 %v6150_v3  ;;  %816 = vmatpush1.bf16.msra.mxu1 %v6155_v4  ;;  %v6168_v6 = vld [vmem:[%s9123_s3 + $0x2c] ss:$16 sps:$4 sm:$0xff]   ;;  %v6173_v7 = vld [vmem:[%s9123_s3 + $0x20] ss:$16 sps:$4 sm:$0xff]   ;;  %v6179_v8 = vld [vmem:[%s9123_s3 + $0x28] ss:$16 sps:$4 sm:$0xff]  }
   0x4   :  { %776 = vmatprep.subr.bf16.mxu0 %v6161_v5  ;;  %817 = vmatprep.subr.bf16.mxu1 %v6168_v6  ;;  %v6185_v9 = vld [vmem:[%s9123_s3 + $0x44] ss:$16 sps:$4 sm:$0xff]   ;;  %v6190_v10 = vld [vmem:[%s9123_s3 + $0x4c] ss:$16 sps:$4 sm:$0xff]   ;;  %v6195_v11 = vld [vmem:[%s9123_s3 + $0x40] ss:$16 sps:$4 sm:$0xff]  }
   0x5   :  { %v6200_v12 = vld [vmem:[%s9123_s3 + $0x48] ss:$16 sps:$4 sm:$0xff]   ;;  %v6207_v13 = vld [vmem:[%s9123_s3 + $0x64] ss:$16 sps:$4 sm:$0xff]   ;;  %v6214_v14 = vld [vmem:[%s9123_s3 + $0x6c] ss:$16 sps:$4 sm:$0xff]  }
   0x6   :  { %v6219_v15 = vld [vmem:[%s9123_s3 + $0x60] ss:$16 sps:$4 sm:$0xff]   ;;  %v6226_v17 = vld [vmem:[%s9123_s3 + $0x68] ss:$16 sps:$4 sm:$0xff]   ;;  %v6231_v18 = vld [vmem:[%s9123_s3 + $0x84] ss:$16 sps:$4 sm:$0xff]  }
   0x7   :  { %777 = vmatpush1.bf16.msra.mxu0 %v6173_v7  ;;  %818 = vmatpush1.bf16.msra.mxu1 %v6179_v8  ;;  %v6238_v19 = vld [vmem:[%s9123_s3 + $0x8c] ss:$16 sps:$4 sm:$0xff]   ;;  %v6243_v20 = vld [vmem:[%s9123_s3 + $0x80] ss:$16 sps:$4 sm:$0xff]   ;;  %v6248_v21 = vld [vmem:[%s9123_s3 + $0x88] ss:$16 sps:$4 sm:$0xff]  }
   0x8   :  { %778 = vmatprep.subr.bf16.mxu0 %v6185_v9  ;;  %819 = vmatprep.subr.bf16.mxu1 %v6190_v10  ;;  %v6251_v22 = vand.u32 127, %v38_v16  ;;  %v6258_v23 = vld [vmem:[%s9123_s3 + $0xa4] ss:$16 sps:$4 sm:$0xff]   ;;  %v6265_v24 = vld [vmem:[%s9123_s3 + $0xac] ss:$16 sps:$4 sm:$0xff]   ;;  %v43_v53 = vshrl.u32 %v38_v16, 7 }
   0x9   :  { %v6274_v25 = vld [vmem:[%s9123_s3 + $0xa0] ss:$16 sps:$4 sm:$0xff]   ;;  %v6279_v26 = vld [vmem:[%s9123_s3 + $0xa8] ss:$16 sps:$4 sm:$0xff]   ;;  %v6287_v27 = vld [vmem:[%s9123_s3 + $0xc4] ss:$16 sps:$4 sm:$0xff]  }
   0xa   :  { %9243 = vst [vmem:[#allocation6_spill] sm:$0xff] %v6251_v22  ;;  %vm66_vm0 = vcmp.eq.s32.totalorder %v6251_v22, 0  ;;  %vm306_vm2 = vcmp.eq.s32.totalorder %v6251_v22, 2  ;;  %vm186_vm3 = vcmp.eq.s32.totalorder %v6251_v22, 1  ;;  %v6292_v28 = vld [vmem:[%s9123_s3 + $0xcc] ss:$16 sps:$4 sm:$0xff]  }
   0xb   :  { %779 = vmatpush1.bf16.msra.mxu0 %v6195_v11  ;;  %820 = vmatpush1.bf16.msra.mxu1 %v6200_v12  ;;  %v30_v29 = vld [vmem:[%s9124_s0] sm:$0xff]  ;;  %vm426_vm4 = vcmp.eq.s32.totalorder %v6251_v22, 3  ;;  %v6306_v31 = vld [vmem:[%s9123_s3 + $0xc8] ss:$16 sps:$4 sm:$0xff]   ;;  %v6320_v35 = vld [vmem:[%s9123_s3 + $0xec] ss:$16 sps:$4 sm:$0xff]  }
   0xc   :  { %780 = vmatprep.subr.bf16.mxu0 %v6207_v13  ;;  %821 = vmatprep.subr.bf16.mxu1 %v6214_v14  ;;  %v6301_v30 = vld [vmem:[%s9123_s3 + $0xc0] ss:$16 sps:$4 sm:$0xff]   ;;  %v67_v32 = vsel %vm66_vm0, %v30_v29, 0.0  ;;  %v307_v33 = vsel %vm306_vm2, %v30_v29, 0.0  ;;  %v6315_v34 = vld [vmem:[%s9123_s3 + $0xe4] ss:$16 sps:$4 sm:$0xff]  }
   0xd   :  { %v76_v36 = vsel %vm75_vm1, %v67_v32, 0.0  ;;  %v315_v37 = vsel %vm75_vm1, %v307_v33, 0.0  ;;  %v187_v38 = vsel %vm186_vm3, %v30_v29, 0.0  ;;  %v427_v39 = vsel %vm426_vm4, %v30_v29, 0.0  ;;  %v6335_v40 = vld [vmem:[%s9123_s3 + $0xe0] ss:$16 sps:$4 sm:$0xff]  }
   0xe   :  { %v6340_v41 = vld [vmem:[%s9123_s3 + $0xe8] ss:$16 sps:$4 sm:$0xff]   ;;  %77 = vadd.xlane.f32.xlu0 %v76_v36  ;;  %316 = vadd.xlane.f32.xlu1 %v315_v37  ;;  %v195_v42 = vsel %vm75_vm1, %v187_v38, 0.0  ;;  %v435_v43 = vsel %vm75_vm1, %v427_v39, 0.0  ;;  %v6404_v54 = vsub.s32 0, %v43_v53  ;;  %v6409_v56 = vsub.s32 1, %v43_v53 }
   0xf   :  { %781 = vmatpush1.bf16.msra.mxu0 %v6219_v15  ;;  %822 = vmatpush1.bf16.msra.mxu1 %v6226_v17  ;;  %9244 = vst [vmem:[#allocation7_spill] sm:$0xff] %v6340_v41  ;;  %v31_v44 = vld [vmem:[%s9124_s0 + $0x8] sm:$0xff]  ;;  %v100_v55 = vld [vmem:[%s9125_s1] sm:$0xf]  ;;  %v5010_v60 = vld [vmem:[%s9125_s1 + $0x4] sm:$0xf] }
  0x10   :  { %782 = vmatprep.subr.bf16.mxu0 %v6231_v18  ;;  %823 = vmatprep.subr.bf16.mxu1 %v6238_v19  ;;  %v68_v45 = vsel %vm66_vm0, %v31_v44, 0.0  ;;  %v188_v46 = vsel %vm186_vm3, %v31_v44, 0.0  ;;  %v308_v47 = vsel %vm306_vm2, %v31_v44, 0.0  ;;  %v428_v50 = vsel %vm426_vm4, %v31_v44, 0.0  ;;  %9245 = vst [vmem:[#allocation8_spill] sm:$0xff] %v6404_v54  ;;  %9246 = vst [vmem:[#allocation9_spill] sm:$0xff] %v6409_v56 }
  0x11   :  { %v79_v48 = vsel %vm75_vm1, %v68_v45, 0.0  ;;  %v198_v49 = vsel %vm75_vm1, %v188_v46, 0.0  ;;  %v318_v51 = vsel %vm75_vm1, %v308_v47, 0.0  ;;  %v438_v52 = vsel %vm75_vm1, %v428_v50, 0.0  ;;  %v40_v59 = vld [vmem:[%s9126_s4] sm:$0xf] }
  0x12   :  { %196 = vadd.xlane.f32.xlu0 %v195_v42  ;;  %436 = vadd.xlane.f32.xlu1 %v435_v43  ;;  %v6412_v58 = vrot.slane %v100_v55, %v6404_v54  ;;  %v6421_v61 = vrot.slane %v100_v55, %v6409_v56  ;;  %v6424_v62 = vrot.slane %v40_v59, %v6404_v54  ;;  %v6430_v29 = vsub.s32 3, %v43_v53  ;;  %v5011_v32 = vld [vmem:[%s9125_s1 + $0x8] sm:$0xf]  ;;  %v5012_v47 = vld [vmem:[%s9125_s1 + $0xc] sm:$0xf] }
  0x13   :  { %783 = vmatpush1.bf16.msra.mxu0 %v6243_v20  ;;  %824 = vmatpush1.bf16.msra.mxu1 %v6248_v21  ;;  %v6428_v16 = vrot.slane %v5010_v60, %v6404_v54  ;;  %v6436_v36 = vrot.slane %v40_v59, %v6409_v56  ;;  %v6440_v39 = vrot.slane %v5010_v60, %v6409_v56  ;;  %v6442_v42 = vsub.s32 2, %v43_v53 }
  0x14   :  { %784 = vmatprep.subr.bf16.mxu0 %v6258_v23  ;;  %825 = vmatprep.subr.bf16.mxu1 %v6265_v24  ;;  %9247 = vst [vmem:[#allocation10_spill] sm:$0xff] %v6412_v58  ;;  %9248 = vst [vmem:[#allocation11_spill] sm:$0xff] %v6421_v61  ;;  %v6446_v44 = vrot.slane %v5011_v32, %v6404_v54  ;;  %v6450_v46 = vrot.slane %v100_v55, %v6430_v29 }
  0x15   :  { %9249 = vst [vmem:[#allocation12_spill] sm:$0xff] %v6424_v62  ;;  %9250 = vst [vmem:[#allocation13_spill] sm:$0xff] %v6428_v16 }
  0x16   :  { %80 = vadd.xlane.f32.xlu0 %v79_v48  ;;  %199 = vadd.xlane.f32.xlu1 %v198_v49  ;;  %9251 = vst [vmem:[#allocation14_spill] sm:$0xff] %v6430_v29  ;;  %9252 = vst [vmem:[#allocation15_spill] sm:$0xff] %v6436_v36  ;;  %v6457_v49 = vrot.slane %v5011_v32, %v6409_v56 }
  0x17   :  { %785 = vmatpush1.bf16.msra.mxu0 %v6274_v25  ;;  %826 = vmatpush1.bf16.msra.mxu1 %v6279_v26  ;;  %9253 = vst [vmem:[#allocation16_spill] sm:$0xff] %v6440_v39  ;;  %9254 = vst [vmem:[#allocation17_spill] sm:$0xff] %v6442_v42 }
  0x18   :  { %786 = vmatprep.subr.bf16.mxu0 %v6287_v27  ;;  %827 = vmatprep.subr.bf16.mxu1 %v6292_v28  ;;  %9255 = vst [vmem:[#allocation18_spill] sm:$0xff] %v6446_v44  ;;  %9256 = vst [vmem:[#allocation19_spill] sm:$0xff] %v6450_v46 }
  0x19   :  { %9257 = vst [vmem:[#allocation20_spill] sm:$0xff] %v6457_v49 }
  0x1a   :  { %319 = vadd.xlane.f32.xlu0 %v318_v51  ;;  %439 = vadd.xlane.f32.xlu1 %v438_v52  ;;  %v6461_v51 = vrot.slane %v100_v55, %v6442_v42 }
  0x1b   :  { %787 = vmatpush1.bf16.msra.mxu0 %v6301_v30  ;;  %828 = vmatpush1.bf16.msra.mxu1 %v6306_v31 }
  0x1c   :  { %788 = vmatprep.subr.bf16.mxu0 %v6315_v34  ;;  %829 = vmatprep.subr.bf16.mxu1 %v6320_v35  ;;  %9258 = vst [vmem:[#allocation21_spill] sm:$0xff] %v6461_v51 }
  0x1f   :  { %789 = vmatpush1.bf16.msra.mxu0 %v6335_v40  ;;  %830 = vmatpush1.bf16.msra.mxu1 %v6340_v41 }
  0x20   :  { %891 = vmatprep.subr.bf16.mxu0 %v6137_v0  ;;  %932 = vmatprep.subr.bf16.mxu1 %v6144_v2 }
  0x22   :  { %807 = vmatmul.mubr.bf16.vlgmr.msra.gmra.mrb[0].mxu0 %v9133_v1  ;;  %848 = vmatmul.mubr.bf16.vlgmr.msra.gmra.mrb[0].mxu1 %v9133_v1 }
  0x23   :  { %892 = vmatpush1.bf16.msra.mxu0 %v6150_v3  ;;  %933 = vmatpush1.bf16.msra.mxu1 %v6155_v4 }
  0x24   :  { %893 = vmatprep.subr.bf16.mxu0 %v6161_v5  ;;  %934 = vmatprep.subr.bf16.mxu1 %v6168_v6 }
  0x25   :  { %923 = vmatprep.mubr.bf16.mxu0 %v9133_v1  ;;  %964 = vmatprep.mubr.bf16.mxu1 %v9133_v1  ;;  %v6468_v1 = vrot.slane %v40_v59, %v6430_v29 }
  0x27   :  { %894 = vmatpush1.bf16.msra.mxu0 %v6173_v7  ;;  %935 = vmatpush1.bf16.msra.mxu1 %v6179_v8  ;;  %9260 = vst [vmem:[#allocation23_spill] sm:$0xff] %v6468_v1 }
  0x28   :  { %895 = vmatprep.subr.bf16.mxu0 %v6185_v9  ;;  %936 = vmatprep.subr.bf16.mxu1 %v6190_v10 }
  0x2b   :  { %896 = vmatpush1.bf16.msra.mxu0 %v6195_v11  ;;  %937 = vmatpush1.bf16.msra.mxu1 %v6200_v12 }
  0x2c   :  { %897 = vmatprep.subr.bf16.mxu0 %v6207_v13  ;;  %938 = vmatprep.subr.bf16.mxu1 %v6214_v14 }
  0x2f   :  { %898 = vmatpush1.bf16.msra.mxu0 %v6219_v15  ;;  %939 = vmatpush1.bf16.msra.mxu1 %v6226_v17 }
  0x30   :  { %899 = vmatprep.subr.bf16.mxu0 %v6231_v18  ;;  %940 = vmatprep.subr.bf16.mxu1 %v6238_v19 }
  0x33   :  { %900 = vmatpush1.bf16.msra.mxu0 %v6243_v20  ;;  %941 = vmatpush1.bf16.msra.mxu1 %v6248_v21 }
  0x34   :  { %901 = vmatprep.subr.bf16.mxu0 %v6258_v23  ;;  %942 = vmatprep.subr.bf16.mxu1 %v6265_v24 }
  0x37   :  { %902 = vmatpush1.bf16.msra.mxu0 %v6274_v25  ;;  %943 = vmatpush1.bf16.msra.mxu1 %v6279_v26 }
  0x38   :  { %903 = vmatprep.subr.bf16.mxu0 %v6287_v27  ;;  %944 = vmatprep.subr.bf16.mxu1 %v6292_v28 }
  0x3b   :  { %904 = vmatpush1.bf16.msra.mxu0 %v6301_v30  ;;  %945 = vmatpush1.bf16.msra.mxu1 %v6306_v31 }
  0x3c   :  { %905 = vmatprep.subr.bf16.mxu0 %v6315_v34  ;;  %946 = vmatprep.subr.bf16.mxu1 %v6320_v35 }
  0x3f   :  { %906 = vmatpush1.bf16.msra.mxu0 %v6335_v40  ;;  %947 = vmatpush1.bf16.msra.mxu1 %v6340_v41 }
  0x40   :  { %1009 = vmatprep.subr.bf16.mxu0 %v6137_v0  ;;  %1050 = vmatprep.subr.bf16.mxu1 %v6144_v2 }
  0x9b   :  { %v78_v57 = vpop.xlane.xlu0 %77  ;;  %v317_v38 = vpop.xlane.xlu1 %316 }
  0x9c   :  { %v122_v63 = vmul.f32 %v6412_v58, %v78_v57  ;;  %v123_v37 = vmul.f32 %v6421_v61, %v78_v57  ;;  %v362_v52 = vmul.f32 %v6446_v44, %v317_v38  ;;  %v363_v55 = vmul.f32 %v6457_v49, %v317_v38 }
  0x9d   :  { %v6488_v58 = vrot.slane %v5011_v32, %v6430_v29 }
  0x9e   :  { %v154_v43 = vadd.f32 %v122_v63, %v6424_v62  ;;  %v155_v48 = vadd.f32 %v123_v37, %v6436_v36  ;;  %v6465_v63 = vrot.slane %v5012_v47, %v6404_v54  ;;  %v6472_v37 = vrot.slane %v5010_v60, %v6430_v29 }
  0x9f   :  { %v197_v33 = vpop.xlane.xlu0 %196  ;;  %v437_v36 = vpop.xlane.xlu1 %436  ;;  %v6483_v54 = vrot.slane %v5010_v60, %v6442_v42  ;;  %9265 = vst [vmem:[#allocation28_spill] sm:$0xff] %v6488_v58 }
  0xa0   :  { %v242_v45 = vmul.f32 %v6428_v16, %v197_v33  ;;  %v243_v50 = vmul.f32 %v6440_v39, %v197_v33  ;;  %9259 = vst [vmem:[#allocation22_spill] sm:$0xff] %v6465_v63  ;;  %v125_v16 = vmul.f32 %v6450_v46, %v78_v57  ;;  %9261 = vst [vmem:[#allocation24_spill] sm:$0xff] %v6472_v37 }
  0xa1   :  { %v6475_v39 = vrot.slane %v40_v59, %v6442_v42  ;;  %9264 = vst [vmem:[#allocation27_spill] sm:$0xff] %v6483_v54  ;;  %v482_v46 = vmul.f32 %v6465_v63, %v437_v36  ;;  %v245_v59 = vmul.f32 %v6472_v37, %v197_v33  ;;  %v244_v60 = vmul.f32 %v6483_v54, %v197_v33 }
  0xa2   :  { %v274_v53 = vadd.f32 %v242_v45, %v154_v43  ;;  %v275_v62 = vadd.f32 %v243_v50, %v155_v48  ;;  %v6479_v43 = vrot.slane %v5012_v47, %v6409_v56  ;;  %v124_v45 = vmul.f32 %v6461_v51, %v78_v57 }
  0xa3   :  { %9262 = vst [vmem:[#allocation25_spill] sm:$0xff] %v6475_v39  ;;  %v157_v61 = vadd.f32 %v125_v16, %v6468_v1  ;;  %v6494_v57 = vrot.slane %v5011_v32, %v6442_v42  ;;  %v6499_v16 = vrot.slane %v5012_v47, %v6430_v29 }
  0xa4   :  { %9263 = vst [vmem:[#allocation26_spill] sm:$0xff] %v6479_v43  ;;  %v394_v44 = vadd.f32 %v362_v52, %v274_v53  ;;  %v395_v49 = vadd.f32 %v363_v55, %v275_v62  ;;  %v483_v48 = vmul.f32 %v6479_v43, %v437_v36  ;;  %v156_v50 = vadd.f32 %v124_v45, %v6475_v39 }
  0xa5   :  { %v365_v53 = vmul.f32 %v6488_v58, %v317_v38  ;;  %v277_v56 = vadd.f32 %v245_v59, %v157_v61  ;;  %v364_v62 = vmul.f32 %v6494_v57, %v317_v38  ;;  %v6503_v45 = vrot.slane %v5012_v47, %v6442_v42  ;;  %v9277_v42 = vld [vmem:[#allocation23_spill] sm:$0xff] }
  0xa6   :  { %v514_v52 = vadd.f32 %v482_v46, %v394_v44  ;;  %v515_v37 = vadd.f32 %v483_v48, %v395_v49  ;;  %v276_v43 = vadd.f32 %v244_v60, %v156_v50  ;;  %v485_v46 = vmul.f32 %v6499_v16, %v437_v36 }
  0xa7   :  { %v397_v44 = vadd.f32 %v365_v53, %v277_v56  ;;  %v484_v38 = vmul.f32 %v6503_v45, %v437_v36 }
  0xa8   :  { %v396_v49 = vadd.f32 %v364_v62, %v276_v43 }
  0xaa   :  { %v516_v48 = vadd.f32 %v484_v38, %v396_v49 }
  0xab   :  { %v9281_v22 = vld [vmem:[#allocation26_spill] sm:$0xff] }
  0xf5   :  { %v808_v63 = vpop.f32.mrb[0].mxu0  ;;  %v849_v51 = vpop.f32.mrb[0].mxu1 }
  0xf6   :  { %v856_v55 = vadd.f32 %v808_v63, %v514_v52  ;;  %v810_v32 = vpop.f32.mrb[1].mxu0  ;;  %v851_v39 = vpop.f32.mrb[1].mxu1  ;;  %v517_v63 = vadd.f32 %v485_v46, %v397_v44  ;;  %v858_v60 = vadd.f32 %v849_v51, %v516_v48  ;;  %v9267_v44 = vmov 0   ;;  %v32_v46 = vld [vmem:[%s9124_s0 + $0x10] sm:$0xff] }
  0xf7   :  { %v857_v33 = vadd.f32 %v810_v32, %v515_v37  ;;  %v812_v61 = vpop.f32.mrb[2].mxu0  ;;  %v853_v59 = vpop.f32.mrb[2].mxu1  ;;  %v309_v49 = vsel %vm306_vm2, %v32_v46, 0.0  ;;  %v429_v38 = vsel %vm426_vm4, %v32_v46, 0.0 }
  0xf8   :  { %v5045_v29 = vmul.f32 -1.442695, %v856_v55  ;;  %v813_v54 = vpop.f32.mrb[3].mxu0  ;;  %v854_v58 = vpop.f32.mrb[3].mxu1  ;;  %v859_v47 = vadd.f32 %v851_v39, %v517_v63  ;;  %v69_v61 = vsel %vm66_vm0, %v32_v46, 0.0  ;;  %v189_v59 = vsel %vm186_vm3, %v32_v46, 0.0 }
  0xf9   :  { %v5046_v1 = vmul.f32 -1.442695, %v857_v33  ;;  %v82_v63 = vsel %vm75_vm1, %v69_v61, 0.0  ;;  %v321_v48 = vsel %vm75_vm1, %v309_v49, 0.0  ;;  %v9274_v46 = vld [vmem:[#allocation19_spill] sm:$0xff] }
  0xfa   :  { %5597 = vpow2.f32 %v5045_v29  ;;  %v5047_v50 = vmul.f32 -1.442695, %v859_v47  ;;  %v201_v47 = vsel %vm75_vm1, %v189_v59, 0.0  ;;  %83 = vadd.xlane.f32.xlu0 %v82_v63  ;;  %v9275_v59 = vld [vmem:[#allocation18_spill] sm:$0xff]  ;;  %v9276_v63 = vld [vmem:[#allocation20_spill] sm:$0xff] }
  0xfb   :  { %5599 = vpow2.f32 %v5046_v1  ;;  %202 = vadd.xlane.f32.xlu1 %v201_v47 }
  0xfc   :  { %5601 = vpow2.f32 %v5047_v50  ;;  %v441_v50 = vsel %vm75_vm1, %v429_v38, 0.0 }
  0xfd   :  { %5603 = vtanh.f32 %v858_v60  ;;  %v81_v60 = vpop.xlane.xlu0 %80 }
  0xfe   :  { %322 = vadd.xlane.f32.xlu0 %v321_v48  ;;  %v129_v61 = vmul.f32 %v9274_v46, %v81_v60  ;;  %v9282_v46 = vld [vmem:[#allocation28_spill] sm:$0xff] }
  0xff   :  { %442 = vadd.xlane.f32.xlu1 %v441_v50 }
 0x104   :  { %v5598_v37 = vpop.eup %5597 }
 0x105   :  { %v5600_v56 = vpop.eup %5599  ;;  %v863_v52 = vadd.f32 1.0, %v5598_v37  ;;  %v9268_v37 = vld [vmem:[#allocation10_spill] sm:$0xff] }
 0x106   :  { %v869_v53 = vadd.f32 1.0, %v5600_v56  ;;  %v5602_v54 = vpop.eup %5601  ;;  %v126_v56 = vmul.f32 %v9268_v37, %v81_v60 }
 0x107   :  { %5605 = vrcp.f32 %v863_v52  ;;  %v5604_v58 = vpop.eup %5603  ;;  %v876_v36 = vadd.f32 1.0, %v5602_v54  ;;  %v9269_v52 = vld [vmem:[#allocation11_spill] sm:$0xff]  ;;  %v200_v54 = vpop.xlane.xlu1 %199 }
 0x108   :  { %5607 = vrcp.f32 %v869_v53  ;;  %v127_v53 = vmul.f32 %v9269_v52, %v81_v60  ;;  %v9278_v52 = vld [vmem:[#allocation24_spill] sm:$0xff] }
 0x109   :  { %5609 = vrcp.f32 %v876_v36  ;;  %v9272_v36 = vld [vmem:[#allocation15_spill] sm:$0xff] }
 0x10b   :  { %v440_v48 = vpop.xlane.xlu1 %439 }
 0x111   :  { %v5606_v29 = vpop.eup %5605 }
 0x112   :  { %v5608_v43 = vpop.eup %5607  ;;  %v880_v62 = vmul.f32 %v5606_v29, %v5604_v58  ;;  %v9270_v58 = vld [vmem:[#allocation12_spill] sm:$0xff] }
 0x113   :  { %v879_v1 = vmul.f32 0.0, %v5608_v43  ;;  %v5610_v39 = vpop.eup %5609  ;;  %v158_v29 = vadd.f32 %v126_v56, %v9270_v58  ;;  %v9271_v43 = vld [vmem:[#allocation13_spill] sm:$0xff]  ;;  %v249_v56 = vmul.f32 %v9278_v52, %v200_v54 }
 0x114   :  { %v9279_v58 = vld [vmem:[#allocation21_spill] sm:$0xff] }
 0x115   :  { %v6507_v55 = vadd.f32 %v880_v62, %v879_v1  ;;  %v246_v62 = vmul.f32 %v9271_v43, %v200_v54  ;;  %v159_v1 = vadd.f32 %v127_v53, %v9272_v36  ;;  %v128_v43 = vmul.f32 %v9279_v58, %v81_v60  ;;  %v9280_v53 = vld [vmem:[#allocation22_spill] sm:$0xff] }
 0x116   :  { %v486_v36 = vmul.f32 %v9280_v53, %v440_v48  ;;  %v489_v60 = vmul.f32 %v6499_v16, %v440_v48 }
 0x117   :  { %5611 = vtanh.f32 %v6507_v55  ;;  %v278_v38 = vadd.f32 %v246_v62, %v158_v29  ;;  %v9283_v29 = vld [vmem:[#allocation25_spill] sm:$0xff] }
 0x118   :  { %v160_v62 = vadd.f32 %v128_v43, %v9283_v29 }
 0x121   :  { %v5612_v51 = vpop.eup %5611 }
 0x122   :  { %v6510_v32 = vmul.f32 %v5612_v51, %v5610_v39  ;;  %v9273_v39 = vld [vmem:[#allocation16_spill] sm:$0xff] }
 0x123   :  { %v247_v51 = vmul.f32 %v9273_v39, %v200_v54 }
 0x124   :  { %9266 = vst [vmem:[#allocation29_spill] sm:$0xff] %v6510_v32  ;;  %v890_v33 = vpack.c.bf16 %v6510_v32, %v6510_v32  ;;  %v161_v32 = vadd.f32 %v129_v61, %v9277_v42 }
 0x125   :  { %v279_v50 = vadd.f32 %v247_v51, %v159_v1 }
 0x126   :  { %924 = vmatmul.mubr.bf16.vlgmr.msra.gmra.mrb[4].mxu0 %v890_v33  ;;  %965 = vmatmul.mubr.bf16.vlgmr.msra.gmra.mrb[4].mxu1 %v890_v33  ;;  %v320_v33 = vpop.xlane.xlu0 %319 }
 0x127   :  { %1010 = vmatpush1.bf16.msra.mxu0 %v6150_v3  ;;  %1051 = vmatpush1.bf16.msra.mxu1 %v6155_v4  ;;  %v366_v49 = vmul.f32 %v9275_v59, %v320_v33  ;;  %v367_v47 = vmul.f32 %v9276_v63, %v320_v33  ;;  %v281_v59 = vadd.f32 %v249_v56, %v161_v32  ;;  %v9284_v63 = vld [vmem:[#allocation27_spill] sm:$0xff] }
 0x128   :  { %1011 = vmatprep.subr.bf16.mxu0 %v6161_v5  ;;  %1052 = vmatprep.subr.bf16.mxu1 %v6168_v6 }
 0x129   :  { %1041 = vmatprep.mubr.bf16.mxu0 %v9267_v44  ;;  %1082 = vmatprep.mubr.bf16.mxu1 %v9267_v44  ;;  %v398_v37 = vadd.f32 %v366_v49, %v278_v38  ;;  %v399_v39 = vadd.f32 %v367_v47, %v279_v50  ;;  %v368_v49 = vmul.f32 %v6494_v57, %v320_v33 }
 0x12b   :  { %1012 = vmatpush1.bf16.msra.mxu0 %v6173_v7  ;;  %1053 = vmatpush1.bf16.msra.mxu1 %v6179_v8  ;;  %v518_v1 = vadd.f32 %v486_v36, %v398_v37 }
 0x12c   :  { %1013 = vmatprep.subr.bf16.mxu0 %v6185_v9  ;;  %1054 = vmatprep.subr.bf16.mxu1 %v6190_v10 }
 0x12f   :  { %1014 = vmatpush1.bf16.msra.mxu0 %v6195_v11  ;;  %1055 = vmatpush1.bf16.msra.mxu1 %v6200_v12 }
 0x130   :  { %1015 = vmatprep.subr.bf16.mxu0 %v6207_v13  ;;  %1056 = vmatprep.subr.bf16.mxu1 %v6214_v14 }
 0x133   :  { %1016 = vmatpush1.bf16.msra.mxu0 %v6219_v15  ;;  %1057 = vmatpush1.bf16.msra.mxu1 %v6226_v17 }
 0x134   :  { %1017 = vmatprep.subr.bf16.mxu0 %v6231_v18  ;;  %1058 = vmatprep.subr.bf16.mxu1 %v6238_v19 }
 0x137   :  { %1018 = vmatpush1.bf16.msra.mxu0 %v6243_v20  ;;  %1059 = vmatpush1.bf16.msra.mxu1 %v6248_v21 }
 0x138   :  { %1019 = vmatprep.subr.bf16.mxu0 %v6258_v23  ;;  %1060 = vmatprep.subr.bf16.mxu1 %v6265_v24 }
 0x13b   :  { %1020 = vmatpush1.bf16.msra.mxu0 %v6274_v25  ;;  %1061 = vmatpush1.bf16.msra.mxu1 %v6279_v26 }
 0x13c   :  { %1021 = vmatprep.subr.bf16.mxu0 %v6287_v27  ;;  %1062 = vmatprep.subr.bf16.mxu1 %v6292_v28 }
 0x13f   :  { %1022 = vmatpush1.bf16.msra.mxu0 %v6301_v30  ;;  %1063 = vmatpush1.bf16.msra.mxu1 %v6306_v31 }
 0x140   :  { %1023 = vmatprep.subr.bf16.mxu0 %v6315_v34  ;;  %1064 = vmatprep.subr.bf16.mxu1 %v6320_v35 }
 0x143   :  { %1024 = vmatpush1.bf16.msra.mxu0 %v6335_v40  ;;  %1065 = vmatpush1.bf16.msra.mxu1 %v6340_v41  ;;  %v248_v41 = vmul.f32 %v9284_v63, %v200_v54 }
 0x144   :  { %1127 = vmatprep.subr.bf16.mxu0 %v6137_v0  ;;  %1168 = vmatprep.subr.bf16.mxu1 %v6144_v2  ;;  %v487_v2 = vmul.f32 %v9281_v22, %v440_v48  ;;  %v369_v0 = vmul.f32 %v9282_v46, %v320_v33 }
 0x145   :  { %v280_v47 = vadd.f32 %v248_v41, %v160_v62 }
 0x146   :  { %v519_v51 = vadd.f32 %v487_v2, %v399_v39  ;;  %v401_v52 = vadd.f32 %v369_v0, %v281_v59  ;;  %v488_v0 = vmul.f32 %v6503_v45, %v440_v48 }
 0x147   :  { %v400_v2 = vadd.f32 %v368_v49, %v280_v47 }
 0x148   :  { %v521_v37 = vadd.f32 %v489_v60, %v401_v52 }
 0x149   :  { %v520_v39 = vadd.f32 %v488_v0, %v400_v2 }
 0x1f9   :  { %v925_v61 = vpop.f32.mrb[4].mxu0  ;;  %v966_v42 = vpop.f32.mrb[4].mxu1 }
 0x1fa   :  { %v973_v38 = vadd.f32 %v925_v61, %v518_v1  ;;  %v927_v50 = vpop.f32.mrb[5].mxu0  ;;  %v968_v22 = vpop.f32.mrb[5].mxu1  ;;  %v975_v59 = vadd.f32 %v966_v42, %v520_v39 }
 0x1fb   :  { %v974_v53 = vadd.f32 %v927_v50, %v519_v51  ;;  %v929_v46 = vpop.f32.mrb[6].mxu0  ;;  %v970_v32 = vpop.f32.mrb[6].mxu1  ;;  %v976_v36 = vadd.f32 %v968_v22, %v521_v37 }
 0x1fc   :  { %v5048_v56 = vmul.f32 -1.442695, %v973_v38  ;;  %v930_v43 = vpop.f32.mrb[7].mxu0  ;;  %v971_v29 = vpop.f32.mrb[7].mxu1  ;;  %v9297_v32 = vld [vmem:[#allocation18_spill] sm:$0xff] }
 0x1fd   :  { %v5049_v54 = vmul.f32 -1.442695, %v974_v53  ;;  %v5050_v33 = vmul.f32 -1.442695, %v976_v36  ;;  %v9299_v36 = vld [vmem:[#allocation23_spill] sm:$0xff] }
 0x1fe   :  { %5613 = vpow2.f32 %v5048_v56 }
 0x1ff   :  { %5615 = vpow2.f32 %v5049_v54  ;;  %v9298_v54 = vld [vmem:[#allocation20_spill] sm:$0xff] }
 0x200   :  { %5617 = vpow2.f32 %v5050_v33  ;;  %v9300_v33 = vld [vmem:[#allocation24_spill] sm:$0xff] }
 0x201   :  { %5619 = vtanh.f32 %v975_v59 }
 0x208   :  { %v5614_v41 = vpop.eup %5613 }
 0x209   :  { %v5616_v62 = vpop.eup %5615  ;;  %v980_v1 = vadd.f32 1.0, %v5614_v41 }
 0x20a   :  { %v986_v46 = vadd.f32 1.0, %v5616_v62  ;;  %v5618_v29 = vpop.eup %5617 }
 0x20b   :  { %5621 = vrcp.f32 %v980_v1  ;;  %v5620_v53 = vpop.eup %5619  ;;  %v993_v60 = vadd.f32 1.0, %v5618_v29  ;;  %v9301_v1 = vld [vmem:[#allocation22_spill] sm:$0xff] }
 0x20c   :  { %5623 = vrcp.f32 %v986_v46 }
 0x20d   :  { %5625 = vrcp.f32 %v993_v60 }
 0x215   :  { %v5622_v52 = vpop.eup %5621 }
 0x216   :  { %v5624_v51 = vpop.eup %5623  ;;  %v997_v61 = vmul.f32 %v5622_v52, %v5620_v53  ;;  %v9302_v53 = vld [vmem:[#allocation26_spill] sm:$0xff] }
 0x217   :  { %v996_v48 = vmul.f32 %v5624_v51, %v6507_v55  ;;  %v5626_v42 = vpop.eup %5625  ;;  %v9296_v55 = vld [vmem:[#allocation19_spill] sm:$0xff]  ;;  %v9303_v51 = vld [vmem:[#allocation28_spill] sm:$0xff] }
 0x219   :  { %v6584_v22 = vadd.f32 %v997_v61, %v996_v48  ;;  %v9304_v48 = vld [vmem:[#allocation25_spill] sm:$0xff] }
 0x21b   :  { %5627 = vtanh.f32 %v6584_v22 }
 0x225   :  { %v5628_v49 = vpop.eup %5627 }
 0x226   :  { %v6587_v38 = vmul.f32 %v5628_v49, %v5626_v42 }
 0x228   :  { %9285 = vst [vmem:[#allocation21_spill] sm:$0xff] %v6587_v38  ;;  %v1008_v47 = vpack.c.bf16 %v6587_v38, %v6587_v38 }
 0x22a   :  { %1042 = vmatmul.mubr.bf16.vlgmr.msra.gmra.mrb[8].mxu0 %v1008_v47  ;;  %1083 = vmatmul.mubr.bf16.vlgmr.msra.gmra.mrb[8].mxu1 %v1008_v47 }
 0x22b   :  { %1128 = vmatpush1.bf16.msra.mxu0 %v6150_v3  ;;  %1169 = vmatpush1.bf16.msra.mxu1 %v6155_v4  ;;  %v9286_v3 = vld [vmem:[#allocation7_spill] sm:$0xff]  ;;  %v9287_v4 = vld [vmem:[#allocation4_spill] sm:$0xff] }
 0x22c   :  { %1129 = vmatprep.subr.bf16.mxu0 %v6161_v5  ;;  %1170 = vmatprep.subr.bf16.mxu1 %v6168_v6  ;;  %v9288_v5 = vld [vmem:[#allocation5_spill] sm:$0xff]  ;;  %v33_v6 = vld [vmem:[%s9124_s0 + $0x18] sm:$0xff] }
 0x22d   :  { %1159 = vmatprep.mubr.bf16.mxu0 %v9267_v44  ;;  %1200 = vmatprep.mubr.bf16.mxu1 %v9267_v44 }
 0x22f   :  { %1130 = vmatpush1.bf16.msra.mxu0 %v6173_v7  ;;  %1171 = vmatpush1.bf16.msra.mxu1 %v6179_v8  ;;  %v70_v8 = vsel %vm66_vm0, %v33_v6, 0.0 }
 0x230   :  { %1131 = vmatprep.subr.bf16.mxu0 %v6185_v9  ;;  %1172 = vmatprep.subr.bf16.mxu1 %v6190_v10  ;;  %v190_v9 = vsel %vm186_vm3, %v33_v6, 0.0  ;;  %v310_v10 = vsel %vm306_vm2, %v33_v6, 0.0 }
 0x233   :  { %1132 = vmatpush1.bf16.msra.mxu0 %v6195_v11  ;;  %1173 = vmatpush1.bf16.msra.mxu1 %v6200_v12  ;;  %v430_v11 = vsel %vm426_vm4, %v33_v6, 0.0  ;;  %v85_v12 = vsel %vm75_vm1, %v70_v8, 0.0 }
 0x234   :  { %1133 = vmatprep.subr.bf16.mxu0 %v6207_v13  ;;  %1174 = vmatprep.subr.bf16.mxu1 %v6214_v14  ;;  %v204_v13 = vsel %vm75_vm1, %v190_v9, 0.0  ;;  %v324_v14 = vsel %vm75_vm1, %v310_v10, 0.0 }
 0x235   :  { %86 = vadd.xlane.f32.xlu0 %v85_v12  ;;  %205 = vadd.xlane.f32.xlu1 %v204_v13 }
 0x237   :  { %1134 = vmatpush1.bf16.msra.mxu0 %v6219_v15  ;;  %1175 = vmatpush1.bf16.msra.mxu1 %v6226_v17  ;;  %v444_v15 = vsel %vm75_vm1, %v430_v11, 0.0  ;;  %v84_v17 = vpop.xlane.xlu0 %83 }
 0x238   :  { %1135 = vmatprep.subr.bf16.mxu0 %v6231_v18  ;;  %1176 = vmatprep.subr.bf16.mxu1 %v6238_v19  ;;  %v9290_v18 = vld [vmem:[#allocation10_spill] sm:$0xff]  ;;  %v133_v50 = vmul.f32 %v9296_v55, %v84_v17  ;;  %v132_v41 = vmul.f32 %v9279_v58, %v84_v17 }
 0x239   :  { %325 = vadd.xlane.f32.xlu0 %v324_v14  ;;  %445 = vadd.xlane.f32.xlu1 %v444_v15  ;;  %v130_v19 = vmul.f32 %v9290_v18, %v84_v17 }
 0x23a   :  { %v165_v39 = vadd.f32 %v133_v50, %v9299_v36  ;;  %v164_v42 = vadd.f32 %v132_v41, %v9304_v48 }
 0x23b   :  { %1136 = vmatpush1.bf16.msra.mxu0 %v6243_v20  ;;  %1177 = vmatpush1.bf16.msra.mxu1 %v6248_v21  ;;  %v9291_v20 = vld [vmem:[#allocation11_spill] sm:$0xff] }
 0x23c   :  { %1137 = vmatprep.subr.bf16.mxu0 %v6258_v23  ;;  %1178 = vmatprep.subr.bf16.mxu1 %v6265_v24  ;;  %v131_v21 = vmul.f32 %v9291_v20, %v84_v17  ;;  %v203_v23 = vpop.xlane.xlu1 %202  ;;  %v9292_v24 = vld [vmem:[#allocation12_spill] sm:$0xff] }
 0x23d   :  { %v253_v59 = vmul.f32 %v9300_v33, %v203_v23  ;;  %v252_v49 = vmul.f32 %v9284_v63, %v203_v23 }
 0x23f   :  { %1138 = vmatpush1.bf16.msra.mxu0 %v6274_v25  ;;  %1179 = vmatpush1.bf16.msra.mxu1 %v6279_v26  ;;  %v162_v25 = vadd.f32 %v130_v19, %v9292_v24  ;;  %v9293_v26 = vld [vmem:[#allocation13_spill] sm:$0xff]  ;;  %v285_v60 = vadd.f32 %v253_v59, %v165_v39  ;;  %v284_v12 = vadd.f32 %v252_v49, %v164_v42 }
 0x240   :  { %1139 = vmatprep.subr.bf16.mxu0 %v6287_v27  ;;  %1180 = vmatprep.subr.bf16.mxu1 %v6292_v28  ;;  %v250_v27 = vmul.f32 %v9293_v26, %v203_v23  ;;  %v9294_v28 = vld [vmem:[#allocation15_spill] sm:$0xff]  ;;  %v443_v2 = vpop.xlane.xlu1 %442 }
 0x241   :  { %v490_v46 = vmul.f32 %v9301_v1, %v443_v2  ;;  %v491_v52 = vmul.f32 %v9302_v53, %v443_v2  ;;  %v493_v9 = vmul.f32 %v6499_v16, %v443_v2  ;;  %v492_v50 = vmul.f32 %v6503_v45, %v443_v2 }
 0x242   :  { %v282_v43 = vadd.f32 %v250_v27, %v162_v25 }
 0x243   :  { %1140 = vmatpush1.bf16.msra.mxu0 %v6301_v30  ;;  %1181 = vmatpush1.bf16.msra.mxu1 %v6306_v31  ;;  %v163_v30 = vadd.f32 %v131_v21, %v9294_v28  ;;  %v9295_v31 = vld [vmem:[#allocation16_spill] sm:$0xff] }
 0x244   :  { %1141 = vmatprep.subr.bf16.mxu0 %v6315_v34  ;;  %1182 = vmatprep.subr.bf16.mxu1 %v6320_v35  ;;  %v251_v34 = vmul.f32 %v9295_v31, %v203_v23  ;;  %v323_v35 = vpop.xlane.xlu0 %322 }
 0x245   :  { %v370_v56 = vmul.f32 %v9297_v32, %v323_v35  ;;  %v371_v37 = vmul.f32 %v9298_v54, %v323_v35  ;;  %v373_v61 = vmul.f32 %v9303_v51, %v323_v35  ;;  %v372_v10 = vmul.f32 %v6494_v57, %v323_v35 }
 0x246   :  { %v283_v0 = vadd.f32 %v251_v34, %v163_v30 }
 0x247   :  { %1142 = vmatpush1.bf16.msra.mxu0 %v6335_v40  ;;  %1183 = vmatpush1.bf16.msra.mxu1 %v9286_v3  ;;  %v402_v62 = vadd.f32 %v370_v56, %v282_v43  ;;  %v405_v8 = vadd.f32 %v373_v61, %v285_v60  ;;  %v404_v34 = vadd.f32 %v372_v10, %v284_v12  ;;  %v6697_v10 = vld [vmem:[%s9123_s3 + $0x20] ss:$16 sps:$4 sm:$0xff]   ;;  %v6709_v12 = vld [vmem:[%s9123_s3 + $0x44] ss:$16 sps:$4 sm:$0xff]  }
 0x248   :  { %1245 = vmatprep.subr.bf16.mxu0 %v9287_v4  ;;  %1286 = vmatprep.subr.bf16.mxu1 %v9288_v5  ;;  %v403_v29 = vadd.f32 %v371_v37, %v283_v0 }
 0x249   :  { %v522_v47 = vadd.f32 %v490_v46, %v402_v62  ;;  %v525_v30 = vadd.f32 %v493_v9, %v405_v8  ;;  %v524_v43 = vadd.f32 %v492_v50, %v404_v34  ;;  %v6683_v8 = vld [vmem:[%s9123_s3 + $0x24] ss:$16 sps:$4 sm:$0xff]   ;;  %v6689_v9 = vld [vmem:[%s9123_s3 + $0x2c] ss:$16 sps:$4 sm:$0xff]   ;;  %v6775_v34 = vld [vmem:[%s9123_s3 + $0x88] ss:$16 sps:$4 sm:$0xff]  }
 0x24a   :  { %v523_v4 = vadd.f32 %v491_v52, %v403_v29  ;;  %v6781_v50 = vld [vmem:[%s9123_s3 + $0xa4] ss:$16 sps:$4 sm:$0xff]  }
 0x2fd   :  { %v1043_v5 = vpop.f32.mrb[8].mxu0  ;;  %v1084_v6 = vpop.f32.mrb[8].mxu1 }
 0x2fe   :  { %v1091_v11 = vadd.f32 %v1043_v5, %v522_v47  ;;  %v1045_v13 = vpop.f32.mrb[9].mxu0  ;;  %v1086_v14 = vpop.f32.mrb[9].mxu1  ;;  %v1093_v37 = vadd.f32 %v1084_v6, %v524_v43  ;;  %v6671_v6 = vld [vmem:[%s9123_s3] ss:$16 sps:$4 sm:$0xff]  }
 0x2ff   :  { %v1092_v15 = vadd.f32 %v1045_v13, %v523_v4  ;;  %v1047_v17 = vpop.f32.mrb[10].mxu0  ;;  %v1088_v19 = vpop.f32.mrb[10].mxu1  ;;  %v1094_v56 = vadd.f32 %v1086_v14, %v525_v30  ;;  %v6715_v13 = vld [vmem:[%s9123_s3 + $0x4c] ss:$16 sps:$4 sm:$0xff]   ;;  %v6721_v14 = vld [vmem:[%s9123_s3 + $0x40] ss:$16 sps:$4 sm:$0xff]  }
 0x300   :  { %v5051_v21 = vmul.f32 -1.442695, %v1091_v11  ;;  %v1048_v25 = vpop.f32.mrb[11].mxu0  ;;  %v1089_v27 = vpop.f32.mrb[11].mxu1  ;;  %v6703_v11 = vld [vmem:[%s9123_s3 + $0x28] ss:$16 sps:$4 sm:$0xff]  }
 0x301   :  { %v5052_v23 = vmul.f32 -1.442695, %v1092_v15  ;;  %v5053_v35 = vmul.f32 -1.442695, %v1094_v56  ;;  %v6727_v15 = vld [vmem:[%s9123_s3 + $0x48] ss:$16 sps:$4 sm:$0xff]  }
 0x302   :  { %5629 = vpow2.f32 %v5051_v21  ;;  %v6733_v17 = vld [vmem:[%s9123_s3 + $0x64] ss:$16 sps:$4 sm:$0xff]   ;;  %v6739_v19 = vld [vmem:[%s9123_s3 + $0x6c] ss:$16 sps:$4 sm:$0xff]   ;;  %v6745_v21 = vld [vmem:[%s9123_s3 + $0x60] ss:$16 sps:$4 sm:$0xff]  }
 0x303   :  { %5631 = vpow2.f32 %v5052_v23  ;;  %v6751_v25 = vld [vmem:[%s9123_s3 + $0x68] ss:$16 sps:$4 sm:$0xff]   ;;  %v6757_v27 = vld [vmem:[%s9123_s3 + $0x84] ss:$16 sps:$4 sm:$0xff]   ;;  %v6763_v23 = vld [vmem:[%s9123_s3 + $0x8c] ss:$16 sps:$4 sm:$0xff]  }
 0x304   :  { %5633 = vpow2.f32 %v5053_v35  ;;  %v6769_v30 = vld [vmem:[%s9123_s3 + $0x80] ss:$16 sps:$4 sm:$0xff]   ;;  %v6787_v56 = vld [vmem:[%s9123_s3 + $0xac] ss:$16 sps:$4 sm:$0xff]   ;;  %v6799_v35 = vld [vmem:[%s9123_s3 + $0xa8] ss:$16 sps:$4 sm:$0xff]  }
 0x305   :  { %5635 = vtanh.f32 %v1093_v37  ;;  %v6793_v43 = vld [vmem:[%s9123_s3 + $0xa0] ss:$16 sps:$4 sm:$0xff]   ;;  %v6805_v37 = vld [vmem:[%s9123_s3 + $0xc4] ss:$16 sps:$4 sm:$0xff]  }
 0x30c   :  { %v5630_v0 = vpop.eup %5629 }
 0x30d   :  { %v5632_v39 = vpop.eup %5631  ;;  %v1098_v59 = vadd.f32 1.0, %v5630_v0  ;;  %v6811_v0 = vld [vmem:[%s9123_s3 + $0xcc] ss:$16 sps:$4 sm:$0xff]  }
 0x30e   :  { %v1104_v41 = vadd.f32 1.0, %v5632_v39  ;;  %v5634_v62 = vpop.eup %5633  ;;  %v6817_v39 = vld [vmem:[%s9123_s3 + $0xc0] ss:$16 sps:$4 sm:$0xff]  }
 0x30f   :  { %5637 = vrcp.f32 %v1098_v59  ;;  %v5636_v46 = vpop.eup %5635  ;;  %v1111_v60 = vadd.f32 1.0, %v5634_v62  ;;  %v6823_v59 = vld [vmem:[%s9123_s3 + $0xc8] ss:$16 sps:$4 sm:$0xff]   ;;  %v6835_v62 = vld [vmem:[%s9123_s3 + $0xec] ss:$16 sps:$4 sm:$0xff]  }
 0x310   :  { %5639 = vrcp.f32 %v1104_v41  ;;  %v6829_v41 = vld [vmem:[%s9123_s3 + $0xe4] ss:$16 sps:$4 sm:$0xff]  }
 0x311   :  { %5641 = vrcp.f32 %v1111_v60 }
 0x319   :  { %v5638_v29 = vpop.eup %5637 }
 0x31a   :  { %v5640_v52 = vpop.eup %5639  ;;  %v1115_v61 = vmul.f32 %v5638_v29, %v5636_v46  ;;  %v6843_v46 = vld [vmem:[%s9123_s3 + $0x4] ss:$16 sps:$4 sm:$0xff]   ;;  %v6849_v29 = vld [vmem:[%s9123_s3 + $0xc] ss:$16 sps:$4 sm:$0xff]  }
 0x31b   :  { %v1114_v2 = vmul.f32 %v5640_v52, %v6584_v22  ;;  %v5642_v49 = vpop.eup %5641  ;;  %v6677_v22 = vld [vmem:[%s9123_s3 + $0x8] ss:$16 sps:$4 sm:$0xff]   ;;  %9306 = vst [vmem:[#allocation7_spill] sm:$0xff] %v6843_v46  ;;  %9307 = vst [vmem:[#allocation4_spill] sm:$0xff] %v6849_v29 }
 0x31d   :  { %v6661_v42 = vadd.f32 %v1115_v61, %v1114_v2 }
 0x31f   :  { %5643 = vtanh.f32 %v6661_v42 }
 0x329   :  { %v5644_v47 = vpop.eup %5643 }
 0x32a   :  { %v6664_v4 = vmul.f32 %v5644_v47, %v5642_v49 }
 0x32c   :  { %9305 = vst [vmem:[#allocation27_spill] sm:$0xff] %v6664_v4  ;;  %v1126_v5 = vpack.c.bf16 %v6664_v4, %v6664_v4  ;;  %v87_v4 = vpop.xlane.xlu0 %86 }
 0x32d   :  { %v134_v38 = vmul.f32 %v9290_v18, %v87_v4 }
 0x32e   :  { %1160 = vmatmul.mubr.bf16.vlgmr.msra.gmra.mrb[12].mxu0 %v1126_v5  ;;  %1201 = vmatmul.mubr.bf16.vlgmr.msra.gmra.mrb[12].mxu1 %v1126_v5 }
 0x32f   :  { %1246 = vmatpush1.bf16.msra.mxu0 %v6671_v6  ;;  %1287 = vmatpush1.bf16.msra.mxu1 %v6677_v22 }
 0x330   :  { %1247 = vmatprep.subr.bf16.mxu0 %v6683_v8  ;;  %1288 = vmatprep.subr.bf16.mxu1 %v6689_v9 }
 0x331   :  { %1277 = vmatprep.mubr.bf16.mxu0 %v9267_v44  ;;  %1318 = vmatprep.mubr.bf16.mxu1 %v9267_v44 }
 0x333   :  { %1248 = vmatpush1.bf16.msra.mxu0 %v6697_v10  ;;  %1289 = vmatpush1.bf16.msra.mxu1 %v6703_v11 }
 0x334   :  { %1249 = vmatprep.subr.bf16.mxu0 %v6709_v12  ;;  %1290 = vmatprep.subr.bf16.mxu1 %v6715_v13 }
 0x337   :  { %1250 = vmatpush1.bf16.msra.mxu0 %v6721_v14  ;;  %1291 = vmatpush1.bf16.msra.mxu1 %v6727_v15 }
 0x338   :  { %1251 = vmatprep.subr.bf16.mxu0 %v6733_v17  ;;  %1292 = vmatprep.subr.bf16.mxu1 %v6739_v19 }
 0x33b   :  { %1252 = vmatpush1.bf16.msra.mxu0 %v6745_v21  ;;  %1293 = vmatpush1.bf16.msra.mxu1 %v6751_v25 }
 0x33c   :  { %1253 = vmatprep.subr.bf16.mxu0 %v6757_v27  ;;  %1294 = vmatprep.subr.bf16.mxu1 %v6763_v23 }
 0x33f   :  { %1254 = vmatpush1.bf16.msra.mxu0 %v6769_v30  ;;  %1295 = vmatpush1.bf16.msra.mxu1 %v6775_v34 }
 0x340   :  { %1255 = vmatprep.subr.bf16.mxu0 %v6781_v50  ;;  %1296 = vmatprep.subr.bf16.mxu1 %v6787_v56 }
 0x343   :  { %1256 = vmatpush1.bf16.msra.mxu0 %v6793_v43  ;;  %1297 = vmatpush1.bf16.msra.mxu1 %v6799_v35 }
 0x344   :  { %1257 = vmatprep.subr.bf16.mxu0 %v6805_v37  ;;  %1298 = vmatprep.subr.bf16.mxu1 %v6811_v0 }
 0x347   :  { %1258 = vmatpush1.bf16.msra.mxu0 %v6817_v39  ;;  %1299 = vmatpush1.bf16.msra.mxu1 %v6823_v59 }
 0x348   :  { %1259 = vmatprep.subr.bf16.mxu0 %v6829_v41  ;;  %1300 = vmatprep.subr.bf16.mxu1 %v6835_v62 }
 0x34b   :  { %1260 = vmatpush1.bf16.msra.mxu0 %v6335_v40  ;;  %1301 = vmatpush1.bf16.msra.mxu1 %v9286_v3  ;;  %v34_v40 = vld [vmem:[%s9124_s0 + $0x20] sm:$0xff] }
 0x34c   :  { %1363 = vmatprep.subr.bf16.mxu0 %v6843_v46  ;;  %1404 = vmatprep.subr.bf16.mxu1 %v6849_v29  ;;  %v71_v3 = vsel %vm66_vm0, %v34_v40, 0.0  ;;  %v191_v52 = vsel %vm186_vm3, %v34_v40, 0.0  ;;  %v311_v61 = vsel %vm306_vm2, %v34_v40, 0.0  ;;  %v431_v60 = vsel %vm426_vm4, %v34_v40, 0.0  ;;  %v206_v46 = vpop.xlane.xlu1 %205 }
 0x34d   :  { %v88_v2 = vsel %vm75_vm1, %v71_v3, 0.0  ;;  %v207_v49 = vsel %vm75_vm1, %v191_v52, 0.0  ;;  %v327_v47 = vsel %vm75_vm1, %v311_v61, 0.0  ;;  %v447_v5 = vsel %vm75_vm1, %v431_v60, 0.0 }
 0x34e   :  { %89 = vadd.xlane.f32.xlu0 %v88_v2  ;;  %208 = vadd.xlane.f32.xlu1 %v207_v49  ;;  %v135_v29 = vmul.f32 %v9291_v20, %v87_v4  ;;  %v166_v40 = vadd.f32 %v134_v38, %v9292_v24  ;;  %v254_v3 = vmul.f32 %v9293_v26, %v206_v46  ;;  %v326_v49 = vpop.xlane.xlu0 %325 }
 0x34f   :  { %v255_v2 = vmul.f32 %v9295_v31, %v206_v46  ;;  %v137_v61 = vmul.f32 %v9296_v55, %v87_v4  ;;  %v374_v60 = vmul.f32 %v9297_v32, %v326_v49  ;;  %v257_v38 = vmul.f32 %v9300_v33, %v206_v46 }
 0x350   :  { %v167_v52 = vadd.f32 %v135_v29, %v9294_v28  ;;  %v446_v18 = vpop.xlane.xlu1 %445  ;;  %v136_v26 = vmul.f32 %v9279_v58, %v87_v4  ;;  %v377_v55 = vmul.f32 %v9303_v51, %v326_v49 }
 0x351   :  { %v169_v20 = vadd.f32 %v137_v61, %v9299_v36  ;;  %v494_v29 = vmul.f32 %v9301_v1, %v446_v18  ;;  %v495_v28 = vmul.f32 %v9302_v53, %v446_v18  ;;  %v497_v4 = vmul.f32 %v6499_v16, %v446_v18 }
 0x352   :  { %328 = vadd.xlane.f32.xlu0 %v327_v47  ;;  %448 = vadd.xlane.f32.xlu1 %v447_v5  ;;  %v286_v47 = vadd.f32 %v254_v3, %v166_v40  ;;  %v375_v5 = vmul.f32 %v9298_v54, %v326_v49  ;;  %v287_v7 = vadd.f32 %v255_v2, %v167_v52 }
 0x353   :  { %v289_v32 = vadd.f32 %v257_v38, %v169_v20  ;;  %v168_v40 = vadd.f32 %v136_v26, %v9304_v48  ;;  %v256_v3 = vmul.f32 %v9284_v63, %v206_v46 }
 0x354   :  { %v406_v24 = vadd.f32 %v374_v60, %v286_v47  ;;  %v407_v31 = vadd.f32 %v375_v5, %v287_v7  ;;  %v376_v60 = vmul.f32 %v6494_v57, %v326_v49 }
 0x355   :  { %v409_v33 = vadd.f32 %v377_v55, %v289_v32  ;;  %v288_v7 = vadd.f32 %v256_v3, %v168_v40 }
 0x356   :  { %v526_v52 = vadd.f32 %v494_v29, %v406_v24  ;;  %v527_v2 = vadd.f32 %v495_v28, %v407_v31  ;;  %v496_v31 = vmul.f32 %v6503_v45, %v446_v18 }
 0x357   :  { %v529_v24 = vadd.f32 %v497_v4, %v409_v33  ;;  %v408_v28 = vadd.f32 %v376_v60, %v288_v7 }
 0x359   :  { %v528_v32 = vadd.f32 %v496_v31, %v408_v28 }
 0x401   :  { %v1161_v61 = vpop.f32.mrb[12].mxu0  ;;  %v1202_v36 = vpop.f32.mrb[12].mxu1 }
 0x402   :  { %v1209_v47 = vadd.f32 %v1161_v61, %v526_v52  ;;  %v1163_v5 = vpop.f32.mrb[13].mxu0  ;;  %v1204_v53 = vpop.f32.mrb[13].mxu1  ;;  %v1211_v29 = vadd.f32 %v1202_v36, %v528_v32 }
 0x403   :  { %v1210_v1 = vadd.f32 %v1163_v5, %v527_v2  ;;  %v1165_v51 = vpop.f32.mrb[14].mxu0  ;;  %v1206_v20 = vpop.f32.mrb[14].mxu1  ;;  %v1212_v55 = vadd.f32 %v1204_v53, %v529_v24  ;;  %v6934_v5 = vld [vmem:[%s9123_s3 + $0xe8] ss:$16 sps:$4 sm:$0xff]  }
 0x404   :  { %v5054_v38 = vmul.f32 -1.442695, %v1209_v47  ;;  %v1166_v26 = vpop.f32.mrb[15].mxu0  ;;  %v1207_v48 = vpop.f32.mrb[15].mxu1  ;;  %9309 = vst [vmem:[#allocation30_spill] sm:$0xff] %v6934_v5  ;;  %v9310_v20 = vld [vmem:[#allocation7_spill] sm:$0xff] }
 0x405   :  { %v5055_v46 = vmul.f32 -1.442695, %v1210_v1  ;;  %v5056_v49 = vmul.f32 -1.442695, %v1212_v55  ;;  %v35_v26 = vld [vmem:[%s9124_s0 + $0x28] sm:$0xff] }
 0x406   :  { %5645 = vpow2.f32 %v5054_v38  ;;  %v9311_v38 = vld [vmem:[#allocation4_spill] sm:$0xff]  ;;  %v72_v24 = vsel %vm66_vm0, %v35_v26, 0.0  ;;  %v192_v28 = vsel %vm186_vm3, %v35_v26, 0.0  ;;  %v312_v31 = vsel %vm306_vm2, %v35_v26, 0.0 }
 0x407   :  { %5647 = vpow2.f32 %v5055_v46  ;;  %v432_v55 = vsel %vm426_vm4, %v35_v26, 0.0  ;;  %v91_v32 = vsel %vm75_vm1, %v72_v24, 0.0  ;;  %v9322_v46 = vld [vmem:[#allocation24_spill] sm:$0xff] }
 0x408   :  { %5649 = vpow2.f32 %v5056_v49  ;;  %v210_v49 = vsel %vm75_vm1, %v192_v28, 0.0  ;;  %92 = vadd.xlane.f32.xlu0 %v91_v32  ;;  %v9319_v28 = vld [vmem:[#allocation19_spill] sm:$0xff] }
 0x409   :  { %5651 = vtanh.f32 %v1211_v29  ;;  %211 = vadd.xlane.f32.xlu1 %v210_v49  ;;  %v330_v29 = vsel %vm75_vm1, %v312_v31, 0.0 }
 0x40c   :  { %331 = vadd.xlane.f32.xlu0 %v330_v29 }
 0x410   :  { %v5646_v40 = vpop.eup %5645 }
 0x411   :  { %v5648_v3 = vpop.eup %5647  ;;  %v1216_v52 = vadd.f32 1.0, %v5646_v40  ;;  %v450_v40 = vsel %vm75_vm1, %v432_v55, 0.0  ;;  %v9320_v55 = vld [vmem:[#allocation18_spill] sm:$0xff] }
 0x412   :  { %v1222_v51 = vadd.f32 1.0, %v5648_v3  ;;  %v5650_v48 = vpop.eup %5649  ;;  %451 = vadd.xlane.f32.xlu1 %v450_v40  ;;  %v90_v3 = vpop.xlane.xlu0 %89 }
 0x413   :  { %5653 = vrcp.f32 %v1216_v52  ;;  %v5652_v1 = vpop.eup %5651  ;;  %v1229_v4 = vadd.f32 1.0, %v5650_v48  ;;  %v9313_v52 = vld [vmem:[#allocation10_spill] sm:$0xff]  ;;  %v9314_v48 = vld [vmem:[#allocation11_spill] sm:$0xff]  ;;  %v141_v31 = vmul.f32 %v9319_v28, %v90_v3  ;;  %v9325_v28 = vld [vmem:[#allocation28_spill] sm:$0xff] }
 0x414   :  { %5655 = vrcp.f32 %v1222_v51  ;;  %v138_v51 = vmul.f32 %v9313_v52, %v90_v3 }
 0x415   :  { %5657 = vrcp.f32 %v1229_v4  ;;  %v9316_v4 = vld [vmem:[#allocation13_spill] sm:$0xff] }
 0x416   :  { %v329_v24 = vpop.xlane.xlu0 %328 }
 0x417   :  { %v378_v32 = vmul.f32 %v9320_v55, %v329_v24  ;;  %v379_v29 = vmul.f32 %v9298_v54, %v329_v24 }
 0x41d   :  { %v5654_v33 = vpop.eup %5653 }
 0x41e   :  { %v5656_v2 = vpop.eup %5655  ;;  %v1233_v61 = vmul.f32 %v5654_v33, %v5652_v1  ;;  %v139_v1 = vmul.f32 %v9314_v48, %v90_v3  ;;  %v209_v33 = vpop.xlane.xlu1 %208  ;;  %v9321_v48 = vld [vmem:[#allocation23_spill] sm:$0xff] }
 0x41f   :  { %v1232_v18 = vmul.f32 %v5656_v2, %v6661_v42  ;;  %v5658_v36 = vpop.eup %5657  ;;  %v6928_v42 = vld [vmem:[%s9123_s3 + $0xe0] ss:$16 sps:$4 sm:$0xff]   ;;  %v173_v52 = vadd.f32 %v141_v31, %v9321_v48  ;;  %v260_v54 = vmul.f32 %v9284_v63, %v209_v33 }
 0x420   :  { %v9315_v2 = vld [vmem:[#allocation12_spill] sm:$0xff] }
 0x421   :  { %v6888_v53 = vadd.f32 %v1233_v61, %v1232_v18  ;;  %v170_v61 = vadd.f32 %v138_v51, %v9315_v2  ;;  %v258_v18 = vmul.f32 %v9316_v4, %v209_v33  ;;  %v261_v51 = vmul.f32 %v9322_v46, %v209_v33 }
 0x422   :  { %v449_v40 = vpop.xlane.xlu1 %448  ;;  %v140_v4 = vmul.f32 %v9279_v58, %v90_v3 }
 0x423   :  { %5659 = vtanh.f32 %v6888_v53  ;;  %v290_v49 = vadd.f32 %v258_v18, %v170_v61  ;;  %v293_v55 = vadd.f32 %v261_v51, %v173_v52  ;;  %v9326_v61 = vld [vmem:[#allocation25_spill] sm:$0xff]  ;;  %v501_v3 = vmul.f32 %v6499_v16, %v449_v40 }
 0x424   :  { %v172_v18 = vadd.f32 %v140_v4, %v9326_v61 }
 0x425   :  { %v410_v2 = vadd.f32 %v378_v32, %v290_v49  ;;  %v380_v32 = vmul.f32 %v6494_v57, %v329_v24 }
 0x42d   :  { %v5660_v60 = vpop.eup %5659 }
 0x42e   :  { %v6891_v47 = vmul.f32 %v5660_v60, %v5658_v36  ;;  %v9317_v36 = vld [vmem:[#allocation15_spill] sm:$0xff] }
 0x42f   :  { %v171_v60 = vadd.f32 %v139_v1, %v9317_v36  ;;  %v9323_v1 = vld [vmem:[#allocation22_spill] sm:$0xff] }
 0x430   :  { %9308 = vst [vmem:[#allocation5_spill] sm:$0xff] %v6891_v47  ;;  %v1244_v7 = vpack.c.bf16 %v6891_v47, %v6891_v47  ;;  %v498_v36 = vmul.f32 %v9323_v1, %v449_v40 }
 0x432   :  { %1278 = vmatmul.mubr.bf16.vlgmr.msra.gmra.mrb[16].mxu0 %v1244_v7  ;;  %1319 = vmatmul.mubr.bf16.vlgmr.msra.gmra.mrb[16].mxu1 %v1244_v7  ;;  %v9318_v7 = vld [vmem:[#allocation16_spill] sm:$0xff] }
 0x433   :  { %1364 = vmatpush1.bf16.msra.mxu0 %v6671_v6  ;;  %1405 = vmatpush1.bf16.msra.mxu1 %v6677_v22  ;;  %v259_v26 = vmul.f32 %v9318_v7, %v209_v33 }
 0x434   :  { %1365 = vmatprep.subr.bf16.mxu0 %v6683_v8  ;;  %1406 = vmatprep.subr.bf16.mxu1 %v6689_v9 }
 0x435   :  { %1395 = vmatprep.mubr.bf16.mxu0 %v9267_v44  ;;  %1436 = vmatprep.mubr.bf16.mxu1 %v9267_v44  ;;  %v291_v47 = vadd.f32 %v259_v26, %v171_v60  ;;  %v530_v60 = vadd.f32 %v498_v36, %v410_v2 }
 0x437   :  { %1366 = vmatpush1.bf16.msra.mxu0 %v6697_v10  ;;  %1407 = vmatpush1.bf16.msra.mxu1 %v6703_v11  ;;  %v411_v7 = vadd.f32 %v379_v29, %v291_v47  ;;  %v292_v47 = vadd.f32 %v260_v54, %v172_v18 }
 0x438   :  { %1367 = vmatprep.subr.bf16.mxu0 %v6709_v12  ;;  %1408 = vmatprep.subr.bf16.mxu1 %v6715_v13 }
 0x43b   :  { %1368 = vmatpush1.bf16.msra.mxu0 %v6721_v14  ;;  %1409 = vmatpush1.bf16.msra.mxu1 %v6727_v15 }
 0x43c   :  { %1369 = vmatprep.subr.bf16.mxu0 %v6733_v17  ;;  %1410 = vmatprep.subr.bf16.mxu1 %v6739_v19 }
 0x43f   :  { %1370 = vmatpush1.bf16.msra.mxu0 %v6745_v21  ;;  %1411 = vmatpush1.bf16.msra.mxu1 %v6751_v25 }
 0x440   :  { %1371 = vmatprep.subr.bf16.mxu0 %v6757_v27  ;;  %1412 = vmatprep.subr.bf16.mxu1 %v6763_v23 }
 0x443   :  { %1372 = vmatpush1.bf16.msra.mxu0 %v6769_v30  ;;  %1413 = vmatpush1.bf16.msra.mxu1 %v6775_v34 }
 0x444   :  { %1373 = vmatprep.subr.bf16.mxu0 %v6781_v50  ;;  %1414 = vmatprep.subr.bf16.mxu1 %v6787_v56 }
 0x447   :  { %1374 = vmatpush1.bf16.msra.mxu0 %v6793_v43  ;;  %1415 = vmatpush1.bf16.msra.mxu1 %v6799_v35 }
 0x448   :  { %1375 = vmatprep.subr.bf16.mxu0 %v6805_v37  ;;  %1416 = vmatprep.subr.bf16.mxu1 %v6811_v0 }
 0x44b   :  { %1376 = vmatpush1.bf16.msra.mxu0 %v6817_v39  ;;  %1417 = vmatpush1.bf16.msra.mxu1 %v6823_v59 }
 0x44c   :  { %1377 = vmatprep.subr.bf16.mxu0 %v6829_v41  ;;  %1418 = vmatprep.subr.bf16.mxu1 %v6835_v62 }
 0x44f   :  { %1378 = vmatpush1.bf16.msra.mxu0 %v6928_v42  ;;  %1419 = vmatpush1.bf16.msra.mxu1 %v6934_v5  ;;  %v381_v5 = vmul.f32 %v9325_v28, %v329_v24 }
 0x450   :  { %1481 = vmatprep.subr.bf16.mxu0 %v9310_v20  ;;  %1522 = vmatprep.subr.bf16.mxu1 %v9311_v38  ;;  %v9324_v38 = vld [vmem:[#allocation26_spill] sm:$0xff] }
 0x451   :  { %v499_v20 = vmul.f32 %v9324_v38, %v449_v40  ;;  %v413_v46 = vadd.f32 %v381_v5, %v293_v55  ;;  %v500_v5 = vmul.f32 %v6503_v45, %v449_v40 }
 0x453   :  { %v531_v26 = vadd.f32 %v499_v20, %v411_v7  ;;  %v533_v2 = vadd.f32 %v501_v3, %v413_v46  ;;  %v412_v20 = vadd.f32 %v380_v32, %v292_v47 }
 0x455   :  { %v532_v7 = vadd.f32 %v500_v5, %v412_v20 }
 0x505   :  { %v1279_v31 = vpop.f32.mrb[16].mxu0  ;;  %v1320_v48 = vpop.f32.mrb[16].mxu1 }
 0x506   :  { %v1327_v49 = vadd.f32 %v1279_v31, %v530_v60  ;;  %v1281_v29 = vpop.f32.mrb[17].mxu0  ;;  %v1322_v38 = vpop.f32.mrb[17].mxu1  ;;  %v1329_v55 = vadd.f32 %v1320_v48, %v532_v7 }
 0x507   :  { %v1328_v1 = vadd.f32 %v1281_v29, %v531_v26  ;;  %v1283_v28 = vpop.f32.mrb[18].mxu0  ;;  %v1324_v52 = vpop.f32.mrb[18].mxu1  ;;  %v1330_v36 = vadd.f32 %v1322_v38, %v533_v2  ;;  %v9329_v29 = vld [vmem:[#allocation7_spill] sm:$0xff] }
 0x508   :  { %v5057_v51 = vmul.f32 -1.442695, %v1327_v49  ;;  %v1284_v4 = vpop.f32.mrb[19].mxu0  ;;  %v1325_v61 = vpop.f32.mrb[19].mxu1  ;;  %v9330_v52 = vld [vmem:[#allocation4_spill] sm:$0xff] }
 0x509   :  { %v5058_v33 = vmul.f32 -1.442695, %v1328_v1  ;;  %v5059_v24 = vmul.f32 -1.442695, %v1330_v36 }
 0x50a   :  { %5661 = vpow2.f32 %v5057_v51  ;;  %v36_v51 = vld [vmem:[%s9124_s0 + $0x30] sm:$0xff] }
 0x50b   :  { %5663 = vpow2.f32 %v5058_v33  ;;  %v73_v33 = vsel %vm66_vm0, %v36_v51, 0.0  ;;  %v193_v2 = vsel %vm186_vm3, %v36_v51, 0.0  ;;  %v313_v20 = vsel %vm306_vm2, %v36_v51, 0.0 }
 0x50c   :  { %5665 = vpow2.f32 %v5059_v24  ;;  %v433_v5 = vsel %vm426_vm4, %v36_v51, 0.0  ;;  %v94_v36 = vsel %vm75_vm1, %v73_v33, 0.0  ;;  %v213_v7 = vsel %vm75_vm1, %v193_v2, 0.0  ;;  %v9339_v33 = vld [vmem:[#allocation18_spill] sm:$0xff] }
 0x50d   :  { %5667 = vtanh.f32 %v1329_v55  ;;  %95 = vadd.xlane.f32.xlu0 %v94_v36  ;;  %214 = vadd.xlane.f32.xlu1 %v213_v7  ;;  %v333_v24 = vsel %vm75_vm1, %v313_v20, 0.0  ;;  %v453_v55 = vsel %vm75_vm1, %v433_v5, 0.0  ;;  %v9340_v5 = vld [vmem:[#allocation20_spill] sm:$0xff] }
 0x511   :  { %334 = vadd.xlane.f32.xlu0 %v333_v24  ;;  %454 = vadd.xlane.f32.xlu1 %v453_v55  ;;  %v9341_v55 = vld [vmem:[#allocation23_spill] sm:$0xff] }
 0x514   :  { %v5662_v54 = vpop.eup %5661 }
 0x515   :  { %v5664_v18 = vpop.eup %5663  ;;  %v1334_v60 = vadd.f32 1.0, %v5662_v54  ;;  %v93_v54 = vpop.xlane.xlu0 %92 }
 0x516   :  { %v1340_v28 = vadd.f32 1.0, %v5664_v18  ;;  %v5666_v61 = vpop.eup %5665  ;;  %v9332_v18 = vld [vmem:[#allocation10_spill] sm:$0xff] }
 0x517   :  { %5669 = vrcp.f32 %v1334_v60  ;;  %v5668_v1 = vpop.eup %5667  ;;  %v1347_v3 = vadd.f32 1.0, %v5666_v61  ;;  %v142_v60 = vmul.f32 %v9332_v18, %v93_v54  ;;  %v9344_v18 = vld [vmem:[#allocation26_spill] sm:$0xff] }
 0x518   :  { %5671 = vrcp.f32 %v1340_v28  ;;  %v9333_v28 = vld [vmem:[#allocation11_spill] sm:$0xff] }
 0x519   :  { %5673 = vrcp.f32 %v1347_v3  ;;  %v143_v61 = vmul.f32 %v9333_v28, %v93_v54  ;;  %v9342_v28 = vld [vmem:[#allocation24_spill] sm:$0xff] }
 0x521   :  { %v5670_v46 = vpop.eup %5669 }
 0x522   :  { %v5672_v26 = vpop.eup %5671  ;;  %v1351_v31 = vmul.f32 %v5670_v46, %v5668_v1  ;;  %v212_v1 = vpop.xlane.xlu1 %211  ;;  %v9334_v46 = vld [vmem:[#allocation12_spill] sm:$0xff] }
 0x523   :  { %v1350_v40 = vmul.f32 %v5672_v26, %v6888_v53  ;;  %v5674_v48 = vpop.eup %5673  ;;  %v9328_v53 = vld [vmem:[#allocation30_spill] sm:$0xff]  ;;  %v174_v26 = vadd.f32 %v142_v60, %v9334_v46  ;;  %v265_v60 = vmul.f32 %v9342_v28, %v212_v1 }
 0x525   :  { %v6975_v38 = vadd.f32 %v1351_v31, %v1350_v40  ;;  %v9335_v31 = vld [vmem:[#allocation13_spill] sm:$0xff]  ;;  %v9336_v40 = vld [vmem:[#allocation15_spill] sm:$0xff] }
 0x526   :  { %v262_v3 = vmul.f32 %v9335_v31, %v212_v1  ;;  %v452_v7 = vpop.xlane.xlu1 %451  ;;  %v144_v31 = vmul.f32 %v9279_v58, %v93_v54 }
 0x527   :  { %5675 = vtanh.f32 %v6975_v38  ;;  %v503_v4 = vmul.f32 %v9344_v18, %v452_v7 }
 0x528   :  { %v294_v20 = vadd.f32 %v262_v3, %v174_v26  ;;  %v9346_v26 = vld [vmem:[#allocation25_spill] sm:$0xff] }
 0x529   :  { %v176_v3 = vadd.f32 %v144_v31, %v9346_v26 }
 0x531   :  { %v5676_v32 = vpop.eup %5675 }
 0x532   :  { %v6978_v49 = vmul.f32 %v5676_v32, %v5674_v48  ;;  %v175_v48 = vadd.f32 %v143_v61, %v9336_v40  ;;  %v9337_v32 = vld [vmem:[#allocation16_spill] sm:$0xff]  ;;  %v9343_v61 = vld [vmem:[#allocation22_spill] sm:$0xff] }
 0x533   :  { %v502_v40 = vmul.f32 %v9343_v61, %v452_v7 }
 0x534   :  { %9327 = vst [vmem:[#allocation31_spill] sm:$0xff] %v6978_v49  ;;  %v1362_v47 = vpack.c.bf16 %v6978_v49, %v6978_v49 }
 0x536   :  { %1396 = vmatmul.mubr.bf16.vlgmr.msra.gmra.mrb[20].mxu0 %v1362_v47  ;;  %1437 = vmatmul.mubr.bf16.vlgmr.msra.gmra.mrb[20].mxu1 %v1362_v47  ;;  %v263_v47 = vmul.f32 %v9337_v32, %v212_v1 }
 0x537   :  { %1482 = vmatpush1.bf16.msra.mxu0 %v6671_v6  ;;  %1523 = vmatpush1.bf16.msra.mxu1 %v6677_v22 }
 0x538   :  { %1483 = vmatprep.subr.bf16.mxu0 %v6683_v8  ;;  %1524 = vmatprep.subr.bf16.mxu1 %v6689_v9  ;;  %v295_v24 = vadd.f32 %v263_v47, %v175_v48 }
 0x539   :  { %1513 = vmatprep.mubr.bf16.mxu0 %v9267_v44  ;;  %1554 = vmatprep.mubr.bf16.mxu1 %v9267_v44 }
 0x53b   :  { %1484 = vmatpush1.bf16.msra.mxu0 %v6697_v10  ;;  %1525 = vmatpush1.bf16.msra.mxu1 %v6703_v11 }
 0x53c   :  { %1485 = vmatprep.subr.bf16.mxu0 %v6709_v12  ;;  %1526 = vmatprep.subr.bf16.mxu1 %v6715_v13 }
 0x53f   :  { %1486 = vmatpush1.bf16.msra.mxu0 %v6721_v14  ;;  %1527 = vmatpush1.bf16.msra.mxu1 %v6727_v15 }
 0x540   :  { %1487 = vmatprep.subr.bf16.mxu0 %v6733_v17  ;;  %1528 = vmatprep.subr.bf16.mxu1 %v6739_v19 }
 0x543   :  { %1488 = vmatpush1.bf16.msra.mxu0 %v6745_v21  ;;  %1529 = vmatpush1.bf16.msra.mxu1 %v6751_v25 }
 0x544   :  { %1489 = vmatprep.subr.bf16.mxu0 %v6757_v27  ;;  %1530 = vmatprep.subr.bf16.mxu1 %v6763_v23 }
 0x547   :  { %1490 = vmatpush1.bf16.msra.mxu0 %v6769_v30  ;;  %1531 = vmatpush1.bf16.msra.mxu1 %v6775_v34 }
 0x548   :  { %1491 = vmatprep.subr.bf16.mxu0 %v6781_v50  ;;  %1532 = vmatprep.subr.bf16.mxu1 %v6787_v56 }
 0x54b   :  { %1492 = vmatpush1.bf16.msra.mxu0 %v6793_v43  ;;  %1533 = vmatpush1.bf16.msra.mxu1 %v6799_v35 }
 0x54c   :  { %1493 = vmatprep.subr.bf16.mxu0 %v6805_v37  ;;  %1534 = vmatprep.subr.bf16.mxu1 %v6811_v0 }
 0x54f   :  { %1494 = vmatpush1.bf16.msra.mxu0 %v6817_v39  ;;  %1535 = vmatpush1.bf16.msra.mxu1 %v6823_v59 }
 0x550   :  { %1495 = vmatprep.subr.bf16.mxu0 %v6829_v41  ;;  %1536 = vmatprep.subr.bf16.mxu1 %v6835_v62 }
 0x553   :  { %1496 = vmatpush1.bf16.msra.mxu0 %v6928_v42  ;;  %1537 = vmatpush1.bf16.msra.mxu1 %v9328_v53 }
 0x554   :  { %1599 = vmatprep.subr.bf16.mxu0 %v9329_v29  ;;  %1640 = vmatprep.subr.bf16.mxu1 %v9330_v52  ;;  %v332_v29 = vpop.xlane.xlu0 %331  ;;  %v9338_v52 = vld [vmem:[#allocation19_spill] sm:$0xff] }
 0x555   :  { %v145_v51 = vmul.f32 %v9338_v52, %v93_v54  ;;  %v382_v2 = vmul.f32 %v9339_v33, %v332_v29  ;;  %v383_v36 = vmul.f32 %v9340_v5, %v332_v29  ;;  %v9345_v52 = vld [vmem:[#allocation28_spill] sm:$0xff]  ;;  %v264_v5 = vmul.f32 %v9284_v63, %v212_v1 }
 0x556   :  { %v385_v53 = vmul.f32 %v9345_v52, %v332_v29  ;;  %v505_v54 = vmul.f32 %v6499_v16, %v452_v7 }
 0x557   :  { %v177_v49 = vadd.f32 %v145_v51, %v9341_v55  ;;  %v414_v46 = vadd.f32 %v382_v2, %v294_v20  ;;  %v415_v32 = vadd.f32 %v383_v36, %v295_v24  ;;  %v384_v2 = vmul.f32 %v6494_v57, %v332_v29 }
 0x558   :  { %v296_v36 = vadd.f32 %v264_v5, %v176_v3 }
 0x559   :  { %v297_v33 = vadd.f32 %v265_v60, %v177_v49  ;;  %v534_v48 = vadd.f32 %v502_v40, %v414_v46  ;;  %v535_v47 = vadd.f32 %v503_v4, %v415_v32 }
 0x55a   :  { %v416_v4 = vadd.f32 %v384_v2, %v296_v36 }
 0x55b   :  { %v417_v28 = vadd.f32 %v385_v53, %v297_v33  ;;  %v504_v53 = vmul.f32 %v6503_v45, %v452_v7 }
 0x55d   :  { %v537_v46 = vadd.f32 %v505_v54, %v417_v28  ;;  %v536_v32 = vadd.f32 %v504_v53, %v416_v4  ;;  %v9358_v53 = vld [vmem:[#allocation23_spill] sm:$0xff] }
 0x609   :  { %v1397_v51 = vpop.f32.mrb[20].mxu0  ;;  %v1438_v55 = vpop.f32.mrb[20].mxu1 }
 0x60a   :  { %v1445_v20 = vadd.f32 %v1397_v51, %v534_v48  ;;  %v1399_v24 = vpop.f32.mrb[21].mxu0  ;;  %v1440_v18 = vpop.f32.mrb[21].mxu1  ;;  %v1447_v33 = vadd.f32 %v1438_v55, %v536_v32  ;;  %v9359_v32 = vld [vmem:[#allocation24_spill] sm:$0xff] }
 0x60b   :  { %v1446_v61 = vadd.f32 %v1399_v24, %v535_v47  ;;  %v1401_v52 = vpop.f32.mrb[22].mxu0  ;;  %v1442_v49 = vpop.f32.mrb[22].mxu1  ;;  %v1448_v40 = vadd.f32 %v1440_v18, %v537_v46  ;;  %v9356_v24 = vld [vmem:[#allocation18_spill] sm:$0xff] }
 0x60c   :  { %v5060_v60 = vmul.f32 -1.442695, %v1445_v20  ;;  %v1402_v31 = vpop.f32.mrb[23].mxu0  ;;  %v1443_v26 = vpop.f32.mrb[23].mxu1 }
 0x60d   :  { %v5061_v1 = vmul.f32 -1.442695, %v1446_v61  ;;  %v5062_v29 = vmul.f32 -1.442695, %v1448_v40  ;;  %v9357_v31 = vld [vmem:[#allocation20_spill] sm:$0xff] }
 0x60e   :  { %5677 = vpow2.f32 %v5060_v60 }
 0x60f   :  { %5679 = vpow2.f32 %v5061_v1 }
 0x610   :  { %5681 = vpow2.f32 %v5062_v29 }
 0x611   :  { %5683 = vtanh.f32 %v1447_v33 }
 0x618   :  { %v5678_v5 = vpop.eup %5677 }
 0x619   :  { %v5680_v3 = vpop.eup %5679  ;;  %v1452_v48 = vadd.f32 1.0, %v5678_v5 }
 0x61a   :  { %v1458_v52 = vadd.f32 1.0, %v5680_v3  ;;  %v5682_v26 = vpop.eup %5681  ;;  %v9360_v3 = vld [vmem:[#allocation22_spill] sm:$0xff] }
 0x61b   :  { %5685 = vrcp.f32 %v1452_v48  ;;  %v5684_v61 = vpop.eup %5683  ;;  %v1465_v54 = vadd.f32 1.0, %v5682_v26  ;;  %v9361_v26 = vld [vmem:[#allocation26_spill] sm:$0xff] }
 0x61c   :  { %5687 = vrcp.f32 %v1458_v52 }
 0x61d   :  { %5689 = vrcp.f32 %v1465_v54  ;;  %v9363_v54 = vld [vmem:[#allocation25_spill] sm:$0xff] }
 0x625   :  { %v5686_v28 = vpop.eup %5685 }
 0x626   :  { %v5688_v47 = vpop.eup %5687  ;;  %v1469_v51 = vmul.f32 %v5686_v28, %v5684_v61  ;;  %v9362_v28 = vld [vmem:[#allocation28_spill] sm:$0xff] }
 0x627   :  { %v1468_v7 = vmul.f32 %v5688_v47, %v6975_v38  ;;  %v5690_v55 = vpop.eup %5689 }
 0x629   :  { %v7052_v18 = vadd.f32 %v1469_v51, %v1468_v7 }
 0x62b   :  { %5691 = vtanh.f32 %v7052_v18 }
 0x635   :  { %v5692_v2 = vpop.eup %5691 }
 0x636   :  { %v7055_v20 = vmul.f32 %v5692_v2, %v5690_v55 }
 0x638   :  { %v1480_v36 = vpack.c.bf16 %v7055_v20, %v7055_v20 }
 0x63a   :  { %1514 = vmatmul.mubr.bf16.vlgmr.msra.gmra.mrb[24].mxu0 %v1480_v36  ;;  %1555 = vmatmul.mubr.bf16.vlgmr.msra.gmra.mrb[24].mxu1 %v1480_v36 }
 0x63b   :  { %1600 = vmatpush1.bf16.msra.mxu0 %v6671_v6  ;;  %1641 = vmatpush1.bf16.msra.mxu1 %v6677_v22  ;;  %v9347_v6 = vld [vmem:[#allocation30_spill] sm:$0xff] }
 0x63c   :  { %1601 = vmatprep.subr.bf16.mxu0 %v6683_v8  ;;  %1642 = vmatprep.subr.bf16.mxu1 %v6689_v9  ;;  %v5407_v22 = vld [vmem:[%s9127_s2 + $0x4] ss:$16 sps:$4 sm:$0xff]   ;;  %v5410_v8 = vld [vmem:[%s9127_s2 + $0xc] ss:$16 sps:$4 sm:$0xff]  }
 0x63d   :  { %1631 = vmatprep.mubr.bf16.mxu0 %v9267_v44  ;;  %1672 = vmatprep.mubr.bf16.mxu1 %v9267_v44  ;;  %v37_v9 = vld [vmem:[%s9124_s0 + $0x38] sm:$0xff] }
 0x63f   :  { %1602 = vmatpush1.bf16.msra.mxu0 %v6697_v10  ;;  %1643 = vmatpush1.bf16.msra.mxu1 %v6703_v11  ;;  %v74_v11 = vsel %vm66_vm0, %v37_v9, 0.0 }
 0x640   :  { %1603 = vmatprep.subr.bf16.mxu0 %v6709_v12  ;;  %1644 = vmatprep.subr.bf16.mxu1 %v6715_v13  ;;  %v194_v12 = vsel %vm186_vm3, %v37_v9, 0.0  ;;  %v314_v13 = vsel %vm306_vm2, %v37_v9, 0.0 }
 0x643   :  { %1604 = vmatpush1.bf16.msra.mxu0 %v6721_v14  ;;  %1645 = vmatpush1.bf16.msra.mxu1 %v6727_v15  ;;  %v434_v14 = vsel %vm426_vm4, %v37_v9, 0.0  ;;  %v97_v15 = vsel %vm75_vm1, %v74_v11, 0.0 }
 0x644   :  { %1605 = vmatprep.subr.bf16.mxu0 %v6733_v17  ;;  %1646 = vmatprep.subr.bf16.mxu1 %v6739_v19  ;;  %v216_v17 = vsel %vm75_vm1, %v194_v12, 0.0  ;;  %v336_v19 = vsel %vm75_vm1, %v314_v13, 0.0 }
 0x645   :  { %98 = vadd.xlane.f32.xlu0 %v97_v15  ;;  %217 = vadd.xlane.f32.xlu1 %v216_v17 }
 0x647   :  { %1606 = vmatpush1.bf16.msra.mxu0 %v6745_v21  ;;  %1647 = vmatpush1.bf16.msra.mxu1 %v6751_v25  ;;  %v456_v21 = vsel %vm75_vm1, %v434_v14, 0.0  ;;  %v96_v25 = vpop.xlane.xlu0 %95 }
 0x648   :  { %1607 = vmatprep.subr.bf16.mxu0 %v6757_v27  ;;  %1648 = vmatprep.subr.bf16.mxu1 %v6763_v23  ;;  %v9349_v27 = vld [vmem:[#allocation10_spill] sm:$0xff]  ;;  %v148_v33 = vmul.f32 %v9279_v58, %v96_v25 }
 0x649   :  { %337 = vadd.xlane.f32.xlu0 %v336_v19  ;;  %457 = vadd.xlane.f32.xlu1 %v456_v21  ;;  %v146_v23 = vmul.f32 %v9349_v27, %v96_v25 }
 0x64a   :  { %v180_v7 = vadd.f32 %v148_v33, %v9363_v54 }
 0x64b   :  { %1608 = vmatpush1.bf16.msra.mxu0 %v6769_v30  ;;  %1649 = vmatpush1.bf16.msra.mxu1 %v6775_v34  ;;  %v9350_v30 = vld [vmem:[#allocation11_spill] sm:$0xff] }
 0x64c   :  { %1609 = vmatprep.subr.bf16.mxu0 %v6781_v50  ;;  %1650 = vmatprep.subr.bf16.mxu1 %v6787_v56  ;;  %v147_v34 = vmul.f32 %v9350_v30, %v96_v25  ;;  %v215_v50 = vpop.xlane.xlu1 %214  ;;  %v9351_v56 = vld [vmem:[#allocation12_spill] sm:$0xff] }
 0x64d   :  { %v269_v29 = vmul.f32 %v9359_v32, %v215_v50  ;;  %v268_v55 = vmul.f32 %v9284_v63, %v215_v50 }
 0x64f   :  { %1610 = vmatpush1.bf16.msra.mxu0 %v6793_v43  ;;  %1651 = vmatpush1.bf16.msra.mxu1 %v6799_v35  ;;  %v178_v43 = vadd.f32 %v146_v23, %v9351_v56  ;;  %v9352_v35 = vld [vmem:[#allocation13_spill] sm:$0xff]  ;;  %v300_v13 = vadd.f32 %v268_v55, %v180_v7 }
 0x650   :  { %1611 = vmatprep.subr.bf16.mxu0 %v6805_v37  ;;  %1652 = vmatprep.subr.bf16.mxu1 %v6811_v0  ;;  %v266_v37 = vmul.f32 %v9352_v35, %v215_v50  ;;  %v9353_v0 = vld [vmem:[#allocation15_spill] sm:$0xff]  ;;  %v455_v46 = vpop.xlane.xlu1 %454 }
 0x651   :  { %v506_v48 = vmul.f32 %v9360_v3, %v455_v46  ;;  %v507_v61 = vmul.f32 %v9361_v26, %v455_v46  ;;  %v509_v9 = vmul.f32 %v6499_v16, %v455_v46 }
 0x652   :  { %v298_v60 = vadd.f32 %v266_v37, %v178_v43 }
 0x653   :  { %1612 = vmatpush1.bf16.msra.mxu0 %v6817_v39  ;;  %1653 = vmatpush1.bf16.msra.mxu1 %v6823_v59  ;;  %v179_v39 = vadd.f32 %v147_v34, %v9353_v0  ;;  %v9354_v59 = vld [vmem:[#allocation16_spill] sm:$0xff] }
 0x654   :  { %1613 = vmatprep.subr.bf16.mxu0 %v6829_v41  ;;  %1654 = vmatprep.subr.bf16.mxu1 %v6835_v62  ;;  %v267_v41 = vmul.f32 %v9354_v59, %v215_v50  ;;  %v335_v62 = vpop.xlane.xlu0 %334 }
 0x655   :  { %v386_v49 = vmul.f32 %v9356_v24, %v335_v62  ;;  %v387_v1 = vmul.f32 %v9357_v31, %v335_v62  ;;  %v389_v47 = vmul.f32 %v9362_v28, %v335_v62  ;;  %v388_v11 = vmul.f32 %v6494_v57, %v335_v62 }
 0x656   :  { %v299_v4 = vadd.f32 %v267_v41, %v179_v39  ;;  %v508_v39 = vmul.f32 %v6503_v45, %v455_v46 }
 0x657   :  { %1614 = vmatpush1.bf16.msra.mxu0 %v6928_v42  ;;  %1655 = vmatpush1.bf16.msra.mxu1 %v9347_v6  ;;  %v9355_v42 = vld [vmem:[#allocation19_spill] sm:$0xff]  ;;  %v418_v5 = vadd.f32 %v386_v49, %v298_v60  ;;  %v420_v37 = vadd.f32 %v388_v11, %v300_v13  ;;  %v5419_v11 = vld [vmem:[%s9127_s2 + $0x44] ss:$16 sps:$4 sm:$0xff]   ;;  %v5417_v13 = vld [vmem:[%s9127_s2 + $0x40] ss:$16 sps:$4 sm:$0xff]  }
 0x658   :  { %1940 = vmatprep.subr.bf16.mxu0 %v5407_v22  ;;  %2013 = vmatprep.subr.bf16.mxu1 %v5410_v8  ;;  %v149_v38 = vmul.f32 %v9355_v42, %v96_v25  ;;  %v419_v52 = vadd.f32 %v387_v1, %v299_v4 }
 0x659   :  { %v538_v2 = vadd.f32 %v506_v48, %v418_v5 }
 0x65a   :  { %v181_v40 = vadd.f32 %v149_v38, %v9358_v53  ;;  %v539_v36 = vadd.f32 %v507_v61, %v419_v52  ;;  %v540_v38 = vadd.f32 %v508_v39, %v420_v37  ;;  %v5440_v37 = vld [vmem:[%s9127_s2 + $0xac] ss:$16 sps:$4 sm:$0xff]   ;;  %v5435_v39 = vld [vmem:[%s9127_s2 + $0xa0] ss:$16 sps:$4 sm:$0xff]  }
 0x65c   :  { %v301_v51 = vadd.f32 %v269_v29, %v181_v40 }
 0x65e   :  { %v421_v8 = vadd.f32 %v389_v47, %v301_v51 }
 0x660   :  { %v541_v43 = vadd.f32 %v509_v9, %v421_v8  ;;  %v5411_v8 = vld [vmem:[%s9127_s2 + $0x20] ss:$16 sps:$4 sm:$0xff]   ;;  %v5414_v9 = vld [vmem:[%s9127_s2 + $0x28] ss:$16 sps:$4 sm:$0xff]  }
 0x70d   :  { %v1515_v6 = vpop.f32.mrb[24].mxu0  ;;  %v1556_v22 = vpop.f32.mrb[24].mxu1 }
 0x70e   :  { %v1563_v12 = vadd.f32 %v1515_v6, %v538_v2  ;;  %v1517_v14 = vpop.f32.mrb[25].mxu0  ;;  %v1558_v15 = vpop.f32.mrb[25].mxu1  ;;  %v1565_v49 = vadd.f32 %v1556_v22, %v540_v38  ;;  %v5405_v2 = vld [vmem:[%s9127_s2] ss:$16 sps:$4 sm:$0xff]   ;;  %v5413_v6 = vld [vmem:[%s9127_s2 + $0x24] ss:$16 sps:$4 sm:$0xff]  }
 0x70f   :  { %v1564_v17 = vadd.f32 %v1517_v14, %v539_v36  ;;  %v1519_v19 = vpop.f32.mrb[26].mxu0  ;;  %v1560_v21 = vpop.f32.mrb[26].mxu1  ;;  %v1566_v41 = vadd.f32 %v1558_v15, %v541_v43  ;;  %v5408_v36 = vld [vmem:[%s9127_s2 + $0x8] ss:$16 sps:$4 sm:$0xff]   ;;  %v5416_v22 = vld [vmem:[%s9127_s2 + $0x2c] ss:$16 sps:$4 sm:$0xff]  }
 0x710   :  { %v5063_v25 = vmul.f32 -1.442695, %v1563_v12  ;;  %v1520_v23 = vpop.f32.mrb[27].mxu0  ;;  %v1561_v34 = vpop.f32.mrb[27].mxu1  ;;  %v5422_v12 = vld [vmem:[%s9127_s2 + $0x4c] ss:$16 sps:$4 sm:$0xff]  }
 0x711   :  { %v5064_v50 = vmul.f32 -1.442695, %v1564_v17  ;;  %v5065_v62 = vmul.f32 -1.442695, %v1566_v41  ;;  %v5420_v14 = vld [vmem:[%s9127_s2 + $0x48] ss:$16 sps:$4 sm:$0xff]  }
 0x712   :  { %5693 = vpow2.f32 %v5063_v25  ;;  %v5425_v15 = vld [vmem:[%s9127_s2 + $0x64] ss:$16 sps:$4 sm:$0xff]   ;;  %v5428_v17 = vld [vmem:[%s9127_s2 + $0x6c] ss:$16 sps:$4 sm:$0xff]   ;;  %v5423_v19 = vld [vmem:[%s9127_s2 + $0x60] ss:$16 sps:$4 sm:$0xff]  }
 0x713   :  { %5695 = vpow2.f32 %v5064_v50  ;;  %v5426_v21 = vld [vmem:[%s9127_s2 + $0x68] ss:$16 sps:$4 sm:$0xff]   ;;  %v5431_v25 = vld [vmem:[%s9127_s2 + $0x84] ss:$16 sps:$4 sm:$0xff]   ;;  %v5434_v23 = vld [vmem:[%s9127_s2 + $0x8c] ss:$16 sps:$4 sm:$0xff]  }
 0x714   :  { %5697 = vpow2.f32 %v5065_v62  ;;  %v5429_v34 = vld [vmem:[%s9127_s2 + $0x80] ss:$16 sps:$4 sm:$0xff]   ;;  %v5432_v50 = vld [vmem:[%s9127_s2 + $0x88] ss:$16 sps:$4 sm:$0xff]   ;;  %v5437_v43 = vld [vmem:[%s9127_s2 + $0xa4] ss:$16 sps:$4 sm:$0xff]  }
 0x715   :  { %5699 = vtanh.f32 %v1565_v49  ;;  %v5438_v41 = vld [vmem:[%s9127_s2 + $0xa8] ss:$16 sps:$4 sm:$0xff]   ;;  %v5443_v38 = vld [vmem:[%s9127_s2 + $0xc4] ss:$16 sps:$4 sm:$0xff]   ;;  %v5446_v62 = vld [vmem:[%s9127_s2 + $0xcc] ss:$16 sps:$4 sm:$0xff]  }
 0x716   :  { %v5441_v49 = vld [vmem:[%s9127_s2 + $0xc0] ss:$16 sps:$4 sm:$0xff]  }
 0x71c   :  { %v5694_v60 = vpop.eup %5693 }
 0x71d   :  { %v5696_v1 = vpop.eup %5695  ;;  %v1570_v4 = vadd.f32 1.0, %v5694_v60  ;;  %v5444_v60 = vld [vmem:[%s9127_s2 + $0xc8] ss:$16 sps:$4 sm:$0xff]  }
 0x71e   :  { %v1576_v40 = vadd.f32 1.0, %v5696_v1  ;;  %v5698_v29 = vpop.eup %5697  ;;  %v5449_v1 = vld [vmem:[%s9127_s2 + $0xe4] ss:$16 sps:$4 sm:$0xff]  }
 0x71f   :  { %5701 = vrcp.f32 %v1570_v4  ;;  %v5700_v33 = vpop.eup %5699  ;;  %v1583_v61 = vadd.f32 1.0, %v5698_v29  ;;  %v5452_v4 = vld [vmem:[%s9127_s2 + $0xec] ss:$16 sps:$4 sm:$0xff]   ;;  %v5450_v29 = vld [vmem:[%s9127_s2 + $0xe8] ss:$16 sps:$4 sm:$0xff]  }
 0x720   :  { %5703 = vrcp.f32 %v1576_v40  ;;  %v5447_v40 = vld [vmem:[%s9127_s2 + $0xe0] ss:$16 sps:$4 sm:$0xff]  }
 0x721   :  { %5705 = vrcp.f32 %v1583_v61  ;;  %v9367_v61 = vld [vmem:[#allocation5_spill] sm:$0xff] }
 0x729   :  { %v5702_v5 = vpop.eup %5701 }
 0x72a   :  { %v5704_v48 = vpop.eup %5703  ;;  %v1587_v52 = vmul.f32 %v5702_v5, %v5700_v33  ;;  %v9364_v33 = vld [vmem:[#allocation29_spill] sm:$0xff] }
 0x72b   :  { %v1586_v46 = vmul.f32 %v5704_v48, %v7052_v18  ;;  %v5706_v51 = vpop.eup %5705  ;;  %v9365_v5 = vld [vmem:[#allocation21_spill] sm:$0xff] }
 0x72c   :  { %v1721_v48 = vpack.c.bf16 %v9365_v5, %v9364_v33  ;;  %v99_v33 = vpop.xlane.xlu0 %98 }
 0x72d   :  { %v7133_v47 = vadd.f32 %v1587_v52, %v1586_v46  ;;  %v9366_v52 = vld [vmem:[#allocation27_spill] sm:$0xff]  ;;  %v150_v5 = vmul.f32 %v9349_v27, %v99_v33 }
 0x72e   :  { %v1722_v46 = vpack.c.bf16 %v9367_v61, %v9366_v52  ;;  %v218_v52 = vpop.xlane.xlu1 %217 }
 0x72f   :  { %5707 = vtanh.f32 %v7133_v47  ;;  %v182_v61 = vadd.f32 %v150_v5, %v9351_v56  ;;  %v273_v56 = vmul.f32 %v9359_v32, %v218_v52 }
 0x730   :  { %v338_v10 = vpop.xlane.xlu0 %337 }
 0x732   :  { %v458_v27 = vpop.xlane.xlu1 %457 }
 0x739   :  { %v5708_v7 = vpop.eup %5707 }
 0x73a   :  { %v7136_v55 = vmul.f32 %v5708_v7, %v5706_v51  ;;  %v9368_v51 = vld [vmem:[#allocation31_spill] sm:$0xff] }
 0x73b   :  { %v1723_v7 = vpack.c.bf16 %v7055_v20, %v9368_v51  ;;  %v7257_v20 = vld [vmem:[%s9123_s3 + $0x100] ss:$16 sps:$4 sm:$0xff]  }
 0x73c   :  { %v1598_v18 = vpack.c.bf16 %v7136_v55, %v7136_v55 }
 0x73e   :  { %1632 = vmatmul.mubr.bf16.vlgmr.msra.gmra.mrb[28].mxu0 %v1598_v18  ;;  %1673 = vmatmul.mubr.bf16.vlgmr.msra.gmra.mrb[28].mxu1 %v1598_v18  ;;  %v7262_v18 = vld [vmem:[%s9123_s3 + $0x108] ss:$16 sps:$4 sm:$0xff]  }
 0x73f   :  { %1941 = vmatpush1.bf16.msra.mxu0 %v5405_v2  ;;  %2014 = vmatpush1.bf16.msra.mxu1 %v5408_v36  ;;  %v7247_v2 = vld [vmem:[%s9123_s3 + $0x104] ss:$16 sps:$4 sm:$0xff]   ;;  %v7252_v36 = vld [vmem:[%s9123_s3 + $0x10c] ss:$16 sps:$4 sm:$0xff]  }
 0x740   :  { %1942 = vmatprep.subr.bf16.mxu0 %v5413_v6  ;;  %2015 = vmatprep.subr.bf16.mxu1 %v5416_v22  ;;  %9369 = vst [vmem:[#allocation7_spill] sm:$0xff] %v7247_v2  ;;  %9370 = vst [vmem:[#allocation4_spill] sm:$0xff] %v7252_v36  ;;  %v7271_v6 = vld [vmem:[%s9123_s3 + $0x124] ss:$16 sps:$4 sm:$0xff]   ;;  %v7276_v22 = vld [vmem:[%s9123_s3 + $0x12c] ss:$16 sps:$4 sm:$0xff]  }
 0x741   :  { %1972 = vmatprep.mubr.bf16.mxu0 %v9267_v44  ;;  %2045 = vmatprep.mubr.bf16.mxu1 %v9267_v44 }
 0x743   :  { %1943 = vmatpush1.bf16.msra.mxu0 %v5411_v8  ;;  %2016 = vmatpush1.bf16.msra.mxu1 %v5414_v9  ;;  %v7281_v8 = vld [vmem:[%s9123_s3 + $0x120] ss:$16 sps:$4 sm:$0xff]   ;;  %v7286_v9 = vld [vmem:[%s9123_s3 + $0x128] ss:$16 sps:$4 sm:$0xff]  }
 0x744   :  { %1944 = vmatprep.subr.bf16.mxu0 %v5419_v11  ;;  %2017 = vmatprep.subr.bf16.mxu1 %v5422_v12  ;;  %v7295_v11 = vld [vmem:[%s9123_s3 + $0x144] ss:$16 sps:$4 sm:$0xff]   ;;  %v7300_v12 = vld [vmem:[%s9123_s3 + $0x14c] ss:$16 sps:$4 sm:$0xff]  }
 0x747   :  { %1945 = vmatpush1.bf16.msra.mxu0 %v5417_v13  ;;  %2018 = vmatpush1.bf16.msra.mxu1 %v5420_v14  ;;  %v7305_v13 = vld [vmem:[%s9123_s3 + $0x140] ss:$16 sps:$4 sm:$0xff]   ;;  %v7310_v14 = vld [vmem:[%s9123_s3 + $0x148] ss:$16 sps:$4 sm:$0xff]  }
 0x748   :  { %1946 = vmatprep.subr.bf16.mxu0 %v5425_v15  ;;  %2019 = vmatprep.subr.bf16.mxu1 %v5428_v17  ;;  %v7319_v15 = vld [vmem:[%s9123_s3 + $0x164] ss:$16 sps:$4 sm:$0xff]   ;;  %v7324_v17 = vld [vmem:[%s9123_s3 + $0x160] ss:$16 sps:$4 sm:$0xff]  }
 0x74b   :  { %1947 = vmatpush1.bf16.msra.mxu0 %v5423_v19  ;;  %2020 = vmatpush1.bf16.msra.mxu1 %v5426_v21  ;;  %v7329_v19 = vld [vmem:[%s9123_s3 + $0x16c] ss:$16 sps:$4 sm:$0xff]   ;;  %v7334_v21 = vld [vmem:[%s9123_s3 + $0x168] ss:$16 sps:$4 sm:$0xff]  }
 0x74c   :  { %1948 = vmatprep.subr.bf16.mxu0 %v5431_v25  ;;  %2021 = vmatprep.subr.bf16.mxu1 %v5434_v23  ;;  %v7343_v25 = vld [vmem:[%s9123_s3 + $0x184] ss:$16 sps:$4 sm:$0xff]   ;;  %v7348_v23 = vld [vmem:[%s9123_s3 + $0x18c] ss:$16 sps:$4 sm:$0xff]  }
 0x74f   :  { %1949 = vmatpush1.bf16.msra.mxu0 %v5429_v34  ;;  %2022 = vmatpush1.bf16.msra.mxu1 %v5432_v50  ;;  %v7353_v34 = vld [vmem:[%s9123_s3 + $0x180] ss:$16 sps:$4 sm:$0xff]   ;;  %v7358_v50 = vld [vmem:[%s9123_s3 + $0x188] ss:$16 sps:$4 sm:$0xff]  }
 0x750   :  { %1950 = vmatprep.subr.bf16.mxu0 %v5437_v43  ;;  %2023 = vmatprep.subr.bf16.mxu1 %v5440_v37  ;;  %v7367_v43 = vld [vmem:[%s9123_s3 + $0x1a4] ss:$16 sps:$4 sm:$0xff]   ;;  %v7372_v37 = vld [vmem:[%s9123_s3 + $0x1a0] ss:$16 sps:$4 sm:$0xff]  }
 0x753   :  { %1951 = vmatpush1.bf16.msra.mxu0 %v5435_v39  ;;  %2024 = vmatpush1.bf16.msra.mxu1 %v5438_v41  ;;  %v7377_v39 = vld [vmem:[%s9123_s3 + $0x1ac] ss:$16 sps:$4 sm:$0xff]   ;;  %v7382_v41 = vld [vmem:[%s9123_s3 + $0x1a8] ss:$16 sps:$4 sm:$0xff]  }
 0x754   :  { %1952 = vmatprep.subr.bf16.mxu0 %v5443_v38  ;;  %2025 = vmatprep.subr.bf16.mxu1 %v5446_v62  ;;  %v7391_v38 = vld [vmem:[%s9123_s3 + $0x1c4] ss:$16 sps:$4 sm:$0xff]   ;;  %v7396_v62 = vld [vmem:[%s9123_s3 + $0x1cc] ss:$16 sps:$4 sm:$0xff]  }
 0x757   :  { %1953 = vmatpush1.bf16.msra.mxu0 %v5441_v49  ;;  %2026 = vmatpush1.bf16.msra.mxu1 %v5444_v60  ;;  %v7401_v49 = vld [vmem:[%s9123_s3 + $0x1c0] ss:$16 sps:$4 sm:$0xff]   ;;  %v7406_v60 = vld [vmem:[%s9123_s3 + $0x1c8] ss:$16 sps:$4 sm:$0xff]  }
 0x758   :  { %1954 = vmatprep.subr.bf16.mxu0 %v5449_v1  ;;  %2027 = vmatprep.subr.bf16.mxu1 %v5452_v4  ;;  %v7415_v1 = vld [vmem:[%s9123_s3 + $0x1e4] ss:$16 sps:$4 sm:$0xff]   ;;  %v7420_v4 = vld [vmem:[%s9123_s3 + $0x1e0] ss:$16 sps:$4 sm:$0xff]  }
 0x759   :  { %9371 = vst [vmem:[#allocation30_spill] sm:$0xff] %v7420_v4 }
 0x75b   :  { %1955 = vmatpush1.bf16.msra.mxu0 %v5447_v40  ;;  %2028 = vmatpush1.bf16.msra.mxu1 %v5450_v29  ;;  %v7425_v40 = vld [vmem:[%s9123_s3 + $0x1ec] ss:$16 sps:$4 sm:$0xff]   ;;  %v7430_v29 = vld [vmem:[%s9123_s3 + $0x1e8] ss:$16 sps:$4 sm:$0xff]  }
 0x75c   :  { %2315 = vmatprep.subr.bf16.mxu0 %v7247_v2  ;;  %2356 = vmatprep.subr.bf16.mxu1 %v7252_v36  ;;  %9372 = vst [vmem:[#allocation10_spill] sm:$0xff] %v7425_v40  ;;  %9373 = vst [vmem:[#allocation11_spill] sm:$0xff] %v7430_v29 }
 0x75e   :  { %1973 = vmatmul.mubr.bf16.vlgmr.msra.gmra.mrb[32].mxu0 %v1721_v48  ;;  %2046 = vmatmul.mubr.bf16.vlgmr.msra.gmra.mrb[32].mxu1 %v1721_v48  ;;  %v151_v48 = vmul.f32 %v9350_v30, %v99_v33 }
 0x75f   :  { %1982 = vmatprep.mubr.bf16.mxu0 %v9267_v44  ;;  %2055 = vmatprep.mubr.bf16.mxu1 %v9267_v44 }
 0x760   :  { %2316 = vmatpush1.bf16.msra.mxu0 %v7257_v20  ;;  %2357 = vmatpush1.bf16.msra.mxu1 %v7262_v18  ;;  %v183_v51 = vadd.f32 %v151_v48, %v9353_v0  ;;  %v510_v0 = vmul.f32 %v9360_v3, %v458_v27  ;;  %v511_v48 = vmul.f32 %v9361_v26, %v458_v27 }
 0x761   :  { %2317 = vmatprep.subr.bf16.mxu0 %v7271_v6  ;;  %2358 = vmatprep.subr.bf16.mxu1 %v7276_v22 }
 0x764   :  { %2318 = vmatpush1.bf16.msra.mxu0 %v7281_v8  ;;  %2359 = vmatpush1.bf16.msra.mxu1 %v7286_v9 }
 0x765   :  { %2319 = vmatprep.subr.bf16.mxu0 %v7295_v11  ;;  %2360 = vmatprep.subr.bf16.mxu1 %v7300_v12 }
 0x766   :  { %1983 = vmatmul.mubr.bf16.gmra.mrb[36].mxu0 %v1722_v46  ;;  %2056 = vmatmul.mubr.bf16.gmra.mrb[36].mxu1 %v1722_v46  ;;  %v270_v46 = vmul.f32 %v9352_v35, %v218_v52  ;;  %v152_v35 = vmul.f32 %v9279_v58, %v99_v33  ;;  %v513_v58 = vmul.f32 %v6499_v16, %v458_v27 }
 0x767   :  { %1992 = vmatprep.mubr.bf16.mxu0 %v9267_v44  ;;  %2065 = vmatprep.mubr.bf16.mxu1 %v9267_v44 }
 0x768   :  { %2320 = vmatpush1.bf16.msra.mxu0 %v7305_v13  ;;  %2361 = vmatpush1.bf16.msra.mxu1 %v7310_v14 }
 0x769   :  { %2321 = vmatprep.subr.bf16.mxu0 %v7319_v15  ;;  %2362 = vmatprep.subr.bf16.mxu1 %v7329_v19 }
 0x76c   :  { %2322 = vmatpush1.bf16.msra.mxu0 %v7324_v17  ;;  %2363 = vmatpush1.bf16.msra.mxu1 %v7334_v21 }
 0x76d   :  { %2323 = vmatprep.subr.bf16.mxu0 %v7343_v25  ;;  %2364 = vmatprep.subr.bf16.mxu1 %v7348_v23 }
 0x76e   :  { %1993 = vmatmul.mubr.bf16.gmra.mrb[40].mxu0 %v1723_v7  ;;  %2066 = vmatmul.mubr.bf16.gmra.mrb[40].mxu1 %v1723_v7  ;;  %v271_v7 = vmul.f32 %v9354_v59, %v218_v52 }
 0x76f   :  { %2002 = vmatprep.mubr.bf16.mxu0 %v9267_v44  ;;  %2075 = vmatprep.mubr.bf16.mxu1 %v9267_v44 }
 0x770   :  { %2324 = vmatpush1.bf16.msra.mxu0 %v7353_v34  ;;  %2365 = vmatpush1.bf16.msra.mxu1 %v7358_v50 }
 0x771   :  { %2325 = vmatprep.subr.bf16.mxu0 %v7367_v43  ;;  %2366 = vmatprep.subr.bf16.mxu1 %v7377_v39 }
 0x774   :  { %2326 = vmatpush1.bf16.msra.mxu0 %v7372_v37  ;;  %2367 = vmatpush1.bf16.msra.mxu1 %v7382_v41 }
 0x775   :  { %2327 = vmatprep.subr.bf16.mxu0 %v7391_v38  ;;  %2368 = vmatprep.subr.bf16.mxu1 %v7396_v62 }
 0x778   :  { %2328 = vmatpush1.bf16.msra.mxu0 %v7401_v49  ;;  %2369 = vmatpush1.bf16.msra.mxu1 %v7406_v60 }
 0x779   :  { %2329 = vmatprep.subr.bf16.mxu0 %v7415_v1  ;;  %2370 = vmatprep.subr.bf16.mxu1 %v7425_v40  ;;  %v303_v40 = vadd.f32 %v271_v7, %v183_v51 }
 0x77c   :  { %2330 = vmatpush1.bf16.msra.mxu0 %v7420_v4  ;;  %2371 = vmatpush1.bf16.msra.mxu1 %v7430_v29  ;;  %v153_v29 = vmul.f32 %v9355_v42, %v99_v33  ;;  %v391_v4 = vmul.f32 %v9357_v31, %v338_v10  ;;  %v393_v42 = vmul.f32 %v9362_v28, %v338_v10 }
 0x77d   :  { %2431 = vmatprep.subr.bf16.mxu0 %v7247_v2  ;;  %2472 = vmatprep.subr.bf16.mxu1 %v7252_v36  ;;  %v390_v2 = vmul.f32 %v9356_v24, %v338_v10  ;;  %v302_v36 = vadd.f32 %v270_v46, %v182_v61  ;;  %v184_v61 = vadd.f32 %v152_v35, %v9363_v54 }
 0x77e   :  { %v185_v30 = vadd.f32 %v153_v29, %v9358_v53  ;;  %v423_v59 = vadd.f32 %v391_v4, %v303_v40  ;;  %v272_v31 = vmul.f32 %v9284_v63, %v218_v52  ;;  %v512_v35 = vmul.f32 %v6503_v45, %v458_v27 }
 0x77f   :  { %v422_v5 = vadd.f32 %v390_v2, %v302_v36  ;;  %v392_v2 = vmul.f32 %v6494_v57, %v338_v10 }
 0x780   :  { %v305_v24 = vadd.f32 %v273_v56, %v185_v30  ;;  %v543_v51 = vadd.f32 %v511_v48, %v423_v59  ;;  %v304_v36 = vadd.f32 %v272_v31, %v184_v61 }
 0x781   :  { %v542_v46 = vadd.f32 %v510_v0, %v422_v5 }
 0x782   :  { %v425_v32 = vadd.f32 %v393_v42, %v305_v24  ;;  %v424_v56 = vadd.f32 %v392_v2, %v304_v36 }
 0x784   :  { %v545_v52 = vadd.f32 %v513_v58, %v425_v32  ;;  %v544_v5 = vadd.f32 %v512_v35, %v424_v56 }
 0x811   :  { %v1633_v53 = vpop.f32.mrb[28].mxu0  ;;  %v1674_v29 = vpop.f32.mrb[28].mxu1 }
 0x812   :  { %v1681_v3 = vadd.f32 %v1633_v53, %v542_v46  ;;  %v1635_v4 = vpop.f32.mrb[29].mxu0  ;;  %v1676_v26 = vpop.f32.mrb[29].mxu1  ;;  %v1683_v10 = vadd.f32 %v1674_v29, %v544_v5 }
 0x813   :  { %v1682_v40 = vadd.f32 %v1635_v4, %v543_v51  ;;  %v1637_v28 = vpop.f32.mrb[30].mxu0  ;;  %v1678_v33 = vpop.f32.mrb[30].mxu1  ;;  %v1684_v16 = vadd.f32 %v1676_v26, %v545_v52 }
 0x814   :  { %v5066_v7 = vmul.f32 -1.442695, %v1681_v3  ;;  %v1638_v54 = vpop.f32.mrb[31].mxu0  ;;  %v1679_v30 = vpop.f32.mrb[31].mxu1 }
 0x815   :  { %v5067_v63 = vmul.f32 -1.442695, %v1682_v40  ;;  %v5068_v57 = vmul.f32 -1.442695, %v1684_v16 }
 0x816   :  { %5709 = vpow2.f32 %v5066_v7 }
 0x817   :  { %5711 = vpow2.f32 %v5067_v63 }
 0x818   :  { %5713 = vpow2.f32 %v5068_v57 }
 0x819   :  { %5715 = vtanh.f32 %v1683_v10 }
 0x820   :  { %v5710_v0 = vpop.eup %5709 }
 0x821   :  { %v5712_v59 = vpop.eup %5711  ;;  %v1688_v48 = vadd.f32 1.0, %v5710_v0 }
 0x822   :  { %v1694_v42 = vadd.f32 1.0, %v5712_v59  ;;  %v5714_v24 = vpop.eup %5713 }
 0x823   :  { %5717 = vrcp.f32 %v1688_v48  ;;  %v5716_v61 = vpop.eup %5715  ;;  %v1701_v53 = vadd.f32 1.0, %v5714_v24  ;;  %v9389_v24 = vld [vmem:[#allocation10_spill] sm:$0xff] }
 0x824   :  { %5719 = vrcp.f32 %v1694_v42 }
 0x825   :  { %5721 = vrcp.f32 %v1701_v53  ;;  %v5069_v53 = vld [vmem:[%s9126_s4 + $0x4] sm:$0xf] }
 0x82d   :  { %v5718_v31 = vpop.eup %5717 }
 0x82e   :  { %v5720_v46 = vpop.eup %5719  ;;  %v1705_v51 = vmul.f32 %v5718_v31, %v5716_v61  ;;  %v9390_v61 = vld [vmem:[#allocation30_spill] sm:$0xff]  ;;  %v9391_v31 = vld [vmem:[#allocation11_spill] sm:$0xff] }
 0x82f   :  { %v1704_v45 = vmul.f32 %v5720_v46, %v7133_v47  ;;  %v5722_v30 = vpop.eup %5721  ;;  %v9392_v46 = vld [vmem:[#allocation7_spill] sm:$0xff] }
 0x831   :  { %v1706_v27 = vadd.f32 %v1705_v51, %v1704_v45  ;;  %v7459_v32 = vpop.f32.mrb[32].mxu0  ;;  %v7461_v29 = vpop.f32.mrb[32].mxu1  ;;  %v9393_v51 = vld [vmem:[#allocation4_spill] sm:$0xff] }
 0x832   :  { %v7463_v58 = vpop.f32.mrb[33].mxu0  ;;  %v7465_v2 = vpop.f32.mrb[33].mxu1 }
 0x833   :  { %1712 = vst [vmem:[%s9128_s9] sm:$0xff] %v1706_v27  ;;  %v7470_v3 = vpop.f32.mrb[34].mxu0  ;;  %v7472_v36 = vpop.f32.mrb[34].mxu1  ;;  %5723 = vtanh.f32 %v1706_v27 }
 0x834   :  { %v7474_v47 = vpop.f32.mrb[35].mxu0  ;;  %v7476_v4 = vpop.f32.mrb[35].mxu1 }
 0x839   :  { %v7478_v26 = vpop.f32.mrb[36].mxu0  ;;  %v7480_v40 = vpop.f32.mrb[36].mxu1 }
 0x83a   :  { %9374 = vst [vmem:[#allocation12_spill] sm:$0xff] %v7480_v40  ;;  %v7482_v28 = vpop.f32.mrb[37].mxu0  ;;  %v7484_v33 = vpop.f32.mrb[37].mxu1 }
 0x83b   :  { %9375 = vst [vmem:[#allocation13_spill] sm:$0xff] %v7482_v28  ;;  %9376 = vst [vmem:[#allocation15_spill] sm:$0xff] %v7484_v33  ;;  %v7486_v7 = vpop.f32.mrb[38].mxu0  ;;  %v7488_v54 = vpop.f32.mrb[38].mxu1 }
 0x83c   :  { %9377 = vst [vmem:[#allocation16_spill] sm:$0xff] %v7486_v7  ;;  %9378 = vst [vmem:[#allocation19_spill] sm:$0xff] %v7488_v54  ;;  %v7490_v63 = vpop.f32.mrb[39].mxu0  ;;  %v7492_v52 = vpop.f32.mrb[39].mxu1 }
 0x83d   :  { %9379 = vst [vmem:[#allocation18_spill] sm:$0xff] %v7490_v63  ;;  %9380 = vst [vmem:[#allocation20_spill] sm:$0xff] %v7492_v52  ;;  %v5724_v56 = vpop.eup %5723 }
 0x83e   :  { %v1708_v35 = vmul.f32 %v5724_v56, %v5722_v30 }
 0x840   :  { %1711 = vst [vmem:[%s9129_s8] sm:$0xff] %v1708_v35  ;;  %v1724_v16 = vpack.c.bf16 %v1708_v35, %v7136_v55 }
 0x841   :  { %v7498_v5 = vpop.f32.mrb[40].mxu0  ;;  %v7500_v57 = vpop.f32.mrb[40].mxu1 }
 0x842   :  { %9381 = vst [vmem:[#allocation23_spill] sm:$0xff] %v7498_v5  ;;  %9382 = vst [vmem:[#allocation24_spill] sm:$0xff] %v7500_v57  ;;  %v7502_v10 = vpop.f32.mrb[41].mxu0  ;;  %v7504_v0 = vpop.f32.mrb[41].mxu1  ;;  %2003 = vmatmul.mubr.bf16.gmra.mrb[44].mxu0 %v1724_v16  ;;  %2076 = vmatmul.mubr.bf16.gmra.mrb[44].mxu1 %v1724_v16 }
 0x843   :  { %9383 = vst [vmem:[#allocation22_spill] sm:$0xff] %v7502_v10  ;;  %9384 = vst [vmem:[#allocation26_spill] sm:$0xff] %v7504_v0  ;;  %v7506_v59 = vpop.f32.mrb[42].mxu0  ;;  %v7508_v48 = vpop.f32.mrb[42].mxu1  ;;  %2347 = vmatprep.mubr.bf16.mxu0 %v9267_v44  ;;  %2388 = vmatprep.mubr.bf16.mxu1 %v9267_v44 }
 0x844   :  { %9385 = vst [vmem:[#allocation28_spill] sm:$0xff] %v7506_v59  ;;  %9386 = vst [vmem:[#allocation25_spill] sm:$0xff] %v7508_v48  ;;  %v7512_v42 = vpop.f32.mrb[43].mxu0  ;;  %v7514_v55 = vpop.f32.mrb[43].mxu1  ;;  %v9401_v48 = vld [vmem:[#allocation17_spill] sm:$0xff] }
 0x845   :  { %9387 = vst [vmem:[#allocation29_spill] sm:$0xff] %v7512_v42  ;;  %9388 = vst [vmem:[#allocation21_spill] sm:$0xff] %v7514_v55  ;;  %v9400_v55 = vld [vmem:[#allocation8_spill] sm:$0xff]  ;;  %v7571_v59 = vrot.slane %v5069_v53, %v9401_v48 }
 0x846   :  { %v7568_v42 = vrot.slane %v5069_v53, %v9400_v55 }
 0x847   :  { %v2048_v55 = vadd.f32 %v7461_v29, %v7571_v59 }
 0x84a   :  { %2348 = vmatmul.mubr.bf16.vlgmr.msra.gmra.mrb[48].mxu0 %v9267_v44  ;;  %2389 = vmatmul.mubr.bf16.vlgmr.msra.gmra.mrb[48].mxu1 %v9267_v44 }
 0x84b   :  { %2432 = vmatpush1.bf16.msra.mxu0 %v7257_v20  ;;  %2473 = vmatpush1.bf16.msra.mxu1 %v7262_v18 }
 0x84c   :  { %2433 = vmatprep.subr.bf16.mxu0 %v7271_v6  ;;  %2474 = vmatprep.subr.bf16.mxu1 %v7276_v22 }
 0x84d   :  { %2463 = vmatprep.mubr.bf16.mxu0 %v9267_v44  ;;  %2504 = vmatprep.mubr.bf16.mxu1 %v9267_v44 }
 0x84f   :  { %2434 = vmatpush1.bf16.msra.mxu0 %v7281_v8  ;;  %2475 = vmatpush1.bf16.msra.mxu1 %v7286_v9 }
 0x850   :  { %2435 = vmatprep.subr.bf16.mxu0 %v7295_v11  ;;  %2476 = vmatprep.subr.bf16.mxu1 %v7300_v12 }
 0x853   :  { %2436 = vmatpush1.bf16.msra.mxu0 %v7305_v13  ;;  %2477 = vmatpush1.bf16.msra.mxu1 %v7310_v14 }
 0x854   :  { %2437 = vmatprep.subr.bf16.mxu0 %v7319_v15  ;;  %2478 = vmatprep.subr.bf16.mxu1 %v7329_v19 }
 0x857   :  { %2438 = vmatpush1.bf16.msra.mxu0 %v7324_v17  ;;  %2479 = vmatpush1.bf16.msra.mxu1 %v7334_v21 }
 0x858   :  { %2439 = vmatprep.subr.bf16.mxu0 %v7343_v25  ;;  %2480 = vmatprep.subr.bf16.mxu1 %v7348_v23 }
 0x85b   :  { %2440 = vmatpush1.bf16.msra.mxu0 %v7353_v34  ;;  %2481 = vmatpush1.bf16.msra.mxu1 %v7358_v50 }
 0x85c   :  { %2441 = vmatprep.subr.bf16.mxu0 %v7367_v43  ;;  %2482 = vmatprep.subr.bf16.mxu1 %v7377_v39 }
 0x85f   :  { %2442 = vmatpush1.bf16.msra.mxu0 %v7372_v37  ;;  %2483 = vmatpush1.bf16.msra.mxu1 %v7382_v41 }
 0x860   :  { %2443 = vmatprep.subr.bf16.mxu0 %v7391_v38  ;;  %2484 = vmatprep.subr.bf16.mxu1 %v7396_v62 }
 0x863   :  { %2444 = vmatpush1.bf16.msra.mxu0 %v7401_v49  ;;  %2485 = vmatpush1.bf16.msra.mxu1 %v7406_v60 }
 0x864   :  { %2445 = vmatprep.subr.bf16.mxu0 %v7415_v1  ;;  %2486 = vmatprep.subr.bf16.mxu1 %v9389_v24 }
 0x867   :  { %2446 = vmatpush1.bf16.msra.mxu0 %v9390_v61  ;;  %2487 = vmatpush1.bf16.msra.mxu1 %v9391_v31 }
 0x868   :  { %2547 = vmatprep.subr.bf16.mxu0 %v9392_v46  ;;  %2588 = vmatprep.subr.bf16.mxu1 %v9393_v51 }
 0x915   :  { %v7555_v45 = vpop.f32.mrb[44].mxu0  ;;  %v7557_v27 = vpop.f32.mrb[44].mxu1 }
 0x916   :  { %9394 = vst [vmem:[#allocation27_spill] sm:$0xff] %v7555_v45  ;;  %9395 = vst [vmem:[#allocation5_spill] sm:$0xff] %v7557_v27  ;;  %v7559_v30 = vpop.f32.mrb[45].mxu0  ;;  %v7561_v56 = vpop.f32.mrb[45].mxu1  ;;  %v9404_v45 = vld [vmem:[#allocation9_spill] sm:$0xff] }
 0x917   :  { %9396 = vst [vmem:[#allocation31_spill] sm:$0xff] %v7559_v30  ;;  %9397 = vst [vmem:[#allocation10_spill] sm:$0xff] %v7561_v56  ;;  %v7563_v35 = vpop.f32.mrb[46].mxu0  ;;  %v7565_v16 = vpop.f32.mrb[46].mxu1  ;;  %v7578_v27 = vrot.slane %v5069_v53, %v9404_v45  ;;  %v9405_v30 = vld [vmem:[#allocation14_spill] sm:$0xff] }
 0x918   :  { %9398 = vst [vmem:[#allocation30_spill] sm:$0xff] %v7563_v35  ;;  %9399 = vst [vmem:[#allocation11_spill] sm:$0xff] %v7565_v16  ;;  %v7573_v0 = vpop.f32.mrb[47].mxu0  ;;  %v7575_v10 = vpop.f32.mrb[47].mxu1  ;;  %v7581_v57 = vrot.slane %v5069_v53, %v9405_v30  ;;  %v1975_v35 = vadd.f32 %v7459_v32, %v7568_v42 }
 0x919   :  { %9402 = vst [vmem:[#allocation7_spill] sm:$0xff] %v7573_v0  ;;  %9403 = vst [vmem:[#allocation4_spill] sm:$0xff] %v7575_v10  ;;  %v1977_v48 = vadd.f32 %v7463_v58, %v7578_v27 }
 0x91a   :  { %v2050_v0 = vadd.f32 %v7465_v2, %v7581_v57 }
 0x91d   :  { %v2349_v16 = vpop.f32.mrb[48].mxu0  ;;  %v2390_v10 = vpop.f32.mrb[48].mxu1 }
 0x91e   :  { %v2397_v56 = vadd.f32 %v2349_v16, %v1975_v35  ;;  %v2399_v45 = vadd.f32 %v2390_v10, %v2048_v55  ;;  %v2351_v5 = vpop.f32.mrb[49].mxu0  ;;  %v2392_v52 = vpop.f32.mrb[49].mxu1  ;;  %v2054_v16 = vadd.f32 %v7476_v4, %v7581_v57 }
 0x91f   :  { %v2398_v53 = vadd.f32 %v2351_v5, %v1977_v48  ;;  %v2400_v30 = vadd.f32 %v2392_v52, %v2050_v0  ;;  %v2353_v63 = vpop.f32.mrb[50].mxu0  ;;  %v2394_v54 = vpop.f32.mrb[50].mxu1 }
 0x920   :  { %v5166_v32 = vmul.f32 -1.442695, %v2397_v56  ;;  %v2354_v7 = vpop.f32.mrb[51].mxu0  ;;  %v2395_v33 = vpop.f32.mrb[51].mxu1  ;;  %v1981_v56 = vadd.f32 %v7474_v47, %v7578_v27 }
 0x921   :  { %v5167_v29 = vmul.f32 -1.442695, %v2398_v53  ;;  %v5168_v58 = vmul.f32 -1.442695, %v2400_v30  ;;  %v2052_v30 = vadd.f32 %v7472_v36, %v7571_v59 }
 0x922   :  { %5725 = vpow2.f32 %v5166_v32 }
 0x923   :  { %5727 = vpow2.f32 %v5167_v29 }
 0x924   :  { %5729 = vpow2.f32 %v5168_v58 }
 0x925   :  { %5731 = vtanh.f32 %v2399_v45  ;;  %v1979_v45 = vadd.f32 %v7470_v3, %v7568_v42 }
 0x92c   :  { %v5726_v28 = vpop.eup %5725 }
 0x92d   :  { %v5728_v40 = vpop.eup %5727  ;;  %v2404_v2 = vadd.f32 1.0, %v5726_v28 }
 0x92e   :  { %v2410_v35 = vadd.f32 1.0, %v5728_v40  ;;  %v5730_v10 = vpop.eup %5729 }
 0x92f   :  { %5733 = vrcp.f32 %v2404_v2  ;;  %v5732_v5 = vpop.eup %5731  ;;  %v2417_v0 = vadd.f32 1.0, %v5730_v10 }
 0x930   :  { %5735 = vrcp.f32 %v2410_v35 }
 0x931   :  { %5737 = vrcp.f32 %v2417_v0 }
 0x939   :  { %v5734_v52 = vpop.eup %5733 }
 0x93a   :  { %v5736_v63 = vpop.eup %5735  ;;  %v2421_v54 = vmul.f32 %v5734_v52, %v5732_v5 }
 0x93b   :  { %v2420_v7 = vmul.f32 0.0, %v5736_v63  ;;  %v5738_v48 = vpop.eup %5737 }
 0x93d   :  { %v7591_v33 = vadd.f32 %v2421_v54, %v2420_v7 }
 0x93f   :  { %5739 = vtanh.f32 %v7591_v33 }
 0x949   :  { %v5740_v55 = vpop.eup %5739 }
 0x94a   :  { %v7594_v28 = vmul.f32 %v5740_v55, %v5738_v48 }
 0x94c   :  { %v2430_v40 = vpack.c.bf16 %v7594_v28, %v7594_v28 }
 0x94e   :  { %2464 = vmatmul.mubr.bf16.vlgmr.msra.gmra.mrb[52].mxu0 %v2430_v40  ;;  %2505 = vmatmul.mubr.bf16.vlgmr.msra.gmra.mrb[52].mxu1 %v2430_v40 }
 0x94f   :  { %2548 = vmatpush1.bf16.msra.mxu0 %v7257_v20  ;;  %2589 = vmatpush1.bf16.msra.mxu1 %v7262_v18 }
 0x950   :  { %2549 = vmatprep.subr.bf16.mxu0 %v7271_v6  ;;  %2590 = vmatprep.subr.bf16.mxu1 %v7276_v22 }
 0x951   :  { %2579 = vmatprep.mubr.bf16.mxu0 %v9267_v44  ;;  %2620 = vmatprep.mubr.bf16.mxu1 %v9267_v44 }
 0x953   :  { %2550 = vmatpush1.bf16.msra.mxu0 %v7281_v8  ;;  %2591 = vmatpush1.bf16.msra.mxu1 %v7286_v9 }
 0x954   :  { %2551 = vmatprep.subr.bf16.mxu0 %v7295_v11  ;;  %2592 = vmatprep.subr.bf16.mxu1 %v7300_v12 }
 0x957   :  { %2552 = vmatpush1.bf16.msra.mxu0 %v7305_v13  ;;  %2593 = vmatpush1.bf16.msra.mxu1 %v7310_v14 }
 0x958   :  { %2553 = vmatprep.subr.bf16.mxu0 %v7319_v15  ;;  %2594 = vmatprep.subr.bf16.mxu1 %v7329_v19 }
 0x95b   :  { %2554 = vmatpush1.bf16.msra.mxu0 %v7324_v17  ;;  %2595 = vmatpush1.bf16.msra.mxu1 %v7334_v21 }
 0x95c   :  { %2555 = vmatprep.subr.bf16.mxu0 %v7343_v25  ;;  %2596 = vmatprep.subr.bf16.mxu1 %v7348_v23 }
 0x95f   :  { %2556 = vmatpush1.bf16.msra.mxu0 %v7353_v34  ;;  %2597 = vmatpush1.bf16.msra.mxu1 %v7358_v50 }
 0x960   :  { %2557 = vmatprep.subr.bf16.mxu0 %v7367_v43  ;;  %2598 = vmatprep.subr.bf16.mxu1 %v7377_v39 }
 0x963   :  { %2558 = vmatpush1.bf16.msra.mxu0 %v7372_v37  ;;  %2599 = vmatpush1.bf16.msra.mxu1 %v7382_v41 }
 0x964   :  { %2559 = vmatprep.subr.bf16.mxu0 %v7391_v38  ;;  %2600 = vmatprep.subr.bf16.mxu1 %v7396_v62 }
 0x967   :  { %2560 = vmatpush1.bf16.msra.mxu0 %v7401_v49  ;;  %2601 = vmatpush1.bf16.msra.mxu1 %v7406_v60 }
 0x968   :  { %2561 = vmatprep.subr.bf16.mxu0 %v7415_v1  ;;  %2602 = vmatprep.subr.bf16.mxu1 %v9389_v24 }
 0x96b   :  { %2562 = vmatpush1.bf16.msra.mxu0 %v9390_v61  ;;  %2603 = vmatpush1.bf16.msra.mxu1 %v9391_v31 }
 0x96c   :  { %2663 = vmatprep.subr.bf16.mxu0 %v9392_v46  ;;  %2704 = vmatprep.subr.bf16.mxu1 %v9393_v51 }
 0xa21   :  { %v2465_v53 = vpop.f32.mrb[52].mxu0  ;;  %v2506_v32 = vpop.f32.mrb[52].mxu1 }
 0xa22   :  { %v2513_v29 = vadd.f32 %v2465_v53, %v1979_v45  ;;  %v2515_v58 = vadd.f32 %v2506_v32, %v2052_v30  ;;  %v2467_v2 = vpop.f32.mrb[53].mxu0  ;;  %v2508_v35 = vpop.f32.mrb[53].mxu1 }
 0xa23   :  { %v2514_v10 = vadd.f32 %v2467_v2, %v1981_v56  ;;  %v2516_v5 = vadd.f32 %v2508_v35, %v2054_v16  ;;  %v2469_v52 = vpop.f32.mrb[54].mxu0  ;;  %v2510_v63 = vpop.f32.mrb[54].mxu1 }
 0xa24   :  { %v5169_v3 = vmul.f32 -1.442695, %v2513_v29  ;;  %v2470_v54 = vpop.f32.mrb[55].mxu0  ;;  %v2511_v0 = vpop.f32.mrb[55].mxu1  ;;  %v9407_v63 = vld [vmem:[#allocation13_spill] sm:$0xff] }
 0xa25   :  { %v5170_v36 = vmul.f32 -1.442695, %v2514_v10  ;;  %v5171_v47 = vmul.f32 -1.442695, %v2516_v5  ;;  %v9406_v5 = vld [vmem:[#allocation12_spill] sm:$0xff]  ;;  %v9408_v54 = vld [vmem:[#allocation15_spill] sm:$0xff] }
 0xa26   :  { %5741 = vpow2.f32 %v5169_v3  ;;  %v2058_v52 = vadd.f32 %v9406_v5, %v7571_v59  ;;  %v1987_v3 = vadd.f32 %v9407_v63, %v7578_v27  ;;  %v2060_v0 = vadd.f32 %v9408_v54, %v7581_v57 }
 0xa27   :  { %5743 = vpow2.f32 %v5170_v36 }
 0xa28   :  { %5745 = vpow2.f32 %v5171_v47 }
 0xa29   :  { %5747 = vtanh.f32 %v2515_v58 }
 0xa30   :  { %v5742_v7 = vpop.eup %5741 }
 0xa31   :  { %v5744_v48 = vpop.eup %5743  ;;  %v2520_v4 = vadd.f32 1.0, %v5742_v7 }
 0xa32   :  { %v2526_v55 = vadd.f32 1.0, %v5744_v48  ;;  %v5746_v40 = vpop.eup %5745 }
 0xa33   :  { %5749 = vrcp.f32 %v2520_v4  ;;  %v5748_v45 = vpop.eup %5747  ;;  %v2533_v53 = vadd.f32 1.0, %v5746_v40 }
 0xa34   :  { %5751 = vrcp.f32 %v2526_v55 }
 0xa35   :  { %5753 = vrcp.f32 %v2533_v53 }
 0xa3d   :  { %v5750_v30 = vpop.eup %5749 }
 0xa3e   :  { %v5752_v56 = vpop.eup %5751  ;;  %v2537_v16 = vmul.f32 %v5750_v30, %v5748_v45 }
 0xa3f   :  { %v2536_v32 = vmul.f32 %v5752_v56, %v7591_v33  ;;  %v5754_v2 = vpop.eup %5753  ;;  %v1985_v33 = vadd.f32 %v7478_v26, %v7568_v42 }
 0xa41   :  { %v7641_v29 = vadd.f32 %v2537_v16, %v2536_v32 }
 0xa43   :  { %5755 = vtanh.f32 %v7641_v29 }
 0xa4d   :  { %v5756_v35 = vpop.eup %5755 }
 0xa4e   :  { %v7644_v10 = vmul.f32 %v5756_v35, %v5754_v2 }
 0xa50   :  { %v2546_v58 = vpack.c.bf16 %v7644_v10, %v7644_v10 }
 0xa52   :  { %2580 = vmatmul.mubr.bf16.vlgmr.msra.gmra.mrb[56].mxu0 %v2546_v58  ;;  %2621 = vmatmul.mubr.bf16.vlgmr.msra.gmra.mrb[56].mxu1 %v2546_v58 }
 0xa53   :  { %2664 = vmatpush1.bf16.msra.mxu0 %v7257_v20  ;;  %2705 = vmatpush1.bf16.msra.mxu1 %v7262_v18 }
 0xa54   :  { %2665 = vmatprep.subr.bf16.mxu0 %v7271_v6  ;;  %2706 = vmatprep.subr.bf16.mxu1 %v7276_v22 }
 0xa55   :  { %2695 = vmatprep.mubr.bf16.mxu0 %v9267_v44  ;;  %2736 = vmatprep.mubr.bf16.mxu1 %v9267_v44 }
 0xa57   :  { %2666 = vmatpush1.bf16.msra.mxu0 %v7281_v8  ;;  %2707 = vmatpush1.bf16.msra.mxu1 %v7286_v9 }
 0xa58   :  { %2667 = vmatprep.subr.bf16.mxu0 %v7295_v11  ;;  %2708 = vmatprep.subr.bf16.mxu1 %v7300_v12 }
 0xa5b   :  { %2668 = vmatpush1.bf16.msra.mxu0 %v7305_v13  ;;  %2709 = vmatpush1.bf16.msra.mxu1 %v7310_v14 }
 0xa5c   :  { %2669 = vmatprep.subr.bf16.mxu0 %v7319_v15  ;;  %2710 = vmatprep.subr.bf16.mxu1 %v7329_v19 }
 0xa5f   :  { %2670 = vmatpush1.bf16.msra.mxu0 %v7324_v17  ;;  %2711 = vmatpush1.bf16.msra.mxu1 %v7334_v21 }
 0xa60   :  { %2671 = vmatprep.subr.bf16.mxu0 %v7343_v25  ;;  %2712 = vmatprep.subr.bf16.mxu1 %v7348_v23 }
 0xa63   :  { %2672 = vmatpush1.bf16.msra.mxu0 %v7353_v34  ;;  %2713 = vmatpush1.bf16.msra.mxu1 %v7358_v50 }
 0xa64   :  { %2673 = vmatprep.subr.bf16.mxu0 %v7367_v43  ;;  %2714 = vmatprep.subr.bf16.mxu1 %v7377_v39 }
 0xa67   :  { %2674 = vmatpush1.bf16.msra.mxu0 %v7372_v37  ;;  %2715 = vmatpush1.bf16.msra.mxu1 %v7382_v41 }
 0xa68   :  { %2675 = vmatprep.subr.bf16.mxu0 %v7391_v38  ;;  %2716 = vmatprep.subr.bf16.mxu1 %v7396_v62 }
 0xa6b   :  { %2676 = vmatpush1.bf16.msra.mxu0 %v7401_v49  ;;  %2717 = vmatpush1.bf16.msra.mxu1 %v7406_v60 }
 0xa6c   :  { %2677 = vmatprep.subr.bf16.mxu0 %v7415_v1  ;;  %2718 = vmatprep.subr.bf16.mxu1 %v9389_v24 }
 0xa6f   :  { %2678 = vmatpush1.bf16.msra.mxu0 %v9390_v61  ;;  %2719 = vmatpush1.bf16.msra.mxu1 %v9391_v31 }
 0xa70   :  { %2779 = vmatprep.subr.bf16.mxu0 %v9392_v46  ;;  %2820 = vmatprep.subr.bf16.mxu1 %v9393_v51 }
 0xb25   :  { %v2581_v36 = vpop.f32.mrb[56].mxu0  ;;  %v2622_v47 = vpop.f32.mrb[56].mxu1 }
 0xb26   :  { %v2629_v7 = vadd.f32 %v2581_v36, %v1985_v33  ;;  %v2631_v48 = vadd.f32 %v2622_v47, %v2058_v52  ;;  %v2583_v4 = vpop.f32.mrb[57].mxu0  ;;  %v2624_v55 = vpop.f32.mrb[57].mxu1 }
 0xb27   :  { %v2630_v40 = vadd.f32 %v2583_v4, %v1987_v3  ;;  %v2632_v45 = vadd.f32 %v2624_v55, %v2060_v0  ;;  %v2585_v30 = vpop.f32.mrb[58].mxu0  ;;  %v2626_v56 = vpop.f32.mrb[58].mxu1 }
 0xb28   :  { %v5172_v26 = vmul.f32 -1.442695, %v2629_v7  ;;  %v2586_v16 = vpop.f32.mrb[59].mxu0  ;;  %v2627_v53 = vpop.f32.mrb[59].mxu1  ;;  %v9410_v30 = vld [vmem:[#allocation19_spill] sm:$0xff] }
 0xb29   :  { %v5173_v32 = vmul.f32 -1.442695, %v2630_v40  ;;  %v5174_v2 = vmul.f32 -1.442695, %v2632_v45  ;;  %v2062_v56 = vadd.f32 %v9410_v30, %v7571_v59  ;;  %v9412_v53 = vld [vmem:[#allocation20_spill] sm:$0xff] }
 0xb2a   :  { %5757 = vpow2.f32 %v5172_v26  ;;  %v9411_v26 = vld [vmem:[#allocation18_spill] sm:$0xff] }
 0xb2b   :  { %5759 = vpow2.f32 %v5173_v32  ;;  %v1991_v16 = vadd.f32 %v9411_v26, %v7578_v27  ;;  %v2064_v32 = vadd.f32 %v9412_v53, %v7581_v57 }
 0xb2c   :  { %5761 = vpow2.f32 %v5174_v2 }
 0xb2d   :  { %5763 = vtanh.f32 %v2631_v48 }
 0xb34   :  { %v5758_v35 = vpop.eup %5757 }
 0xb35   :  { %v5760_v58 = vpop.eup %5759  ;;  %v2636_v5 = vadd.f32 1.0, %v5758_v35 }
 0xb36   :  { %v2642_v33 = vadd.f32 1.0, %v5760_v58  ;;  %v5762_v52 = vpop.eup %5761 }
 0xb37   :  { %5765 = vrcp.f32 %v2636_v5  ;;  %v5764_v63 = vpop.eup %5763  ;;  %v2649_v36 = vadd.f32 1.0, %v5762_v52 }
 0xb38   :  { %5767 = vrcp.f32 %v2642_v33 }
 0xb39   :  { %5769 = vrcp.f32 %v2649_v36 }
 0xb41   :  { %v5766_v3 = vpop.eup %5765 }
 0xb42   :  { %v5768_v54 = vpop.eup %5767  ;;  %v2653_v0 = vmul.f32 %v5766_v3, %v5764_v63 }
 0xb43   :  { %v2652_v47 = vmul.f32 %v5768_v54, %v7641_v29  ;;  %v5770_v4 = vpop.eup %5769  ;;  %v9409_v29 = vld [vmem:[#allocation16_spill] sm:$0xff] }
 0xb44   :  { %v1989_v45 = vadd.f32 %v9409_v29, %v7568_v42 }
 0xb45   :  { %v7691_v7 = vadd.f32 %v2653_v0, %v2652_v47 }
 0xb47   :  { %5771 = vtanh.f32 %v7691_v7 }
 0xb51   :  { %v5772_v55 = vpop.eup %5771 }
 0xb52   :  { %v7694_v40 = vmul.f32 %v5772_v55, %v5770_v4 }
 0xb54   :  { %v2662_v48 = vpack.c.bf16 %v7694_v40, %v7694_v40 }
 0xb56   :  { %2696 = vmatmul.mubr.bf16.vlgmr.msra.gmra.mrb[60].mxu0 %v2662_v48  ;;  %2737 = vmatmul.mubr.bf16.vlgmr.msra.gmra.mrb[60].mxu1 %v2662_v48 }
 0xb57   :  { %2780 = vmatpush1.bf16.msra.mxu0 %v7257_v20  ;;  %2821 = vmatpush1.bf16.msra.mxu1 %v7262_v18 }
 0xb58   :  { %2781 = vmatprep.subr.bf16.mxu0 %v7271_v6  ;;  %2822 = vmatprep.subr.bf16.mxu1 %v7276_v22 }
 0xb59   :  { %2811 = vmatprep.mubr.bf16.mxu0 %v9267_v44  ;;  %2852 = vmatprep.mubr.bf16.mxu1 %v9267_v44 }
 0xb5b   :  { %2782 = vmatpush1.bf16.msra.mxu0 %v7281_v8  ;;  %2823 = vmatpush1.bf16.msra.mxu1 %v7286_v9 }
 0xb5c   :  { %2783 = vmatprep.subr.bf16.mxu0 %v7295_v11  ;;  %2824 = vmatprep.subr.bf16.mxu1 %v7300_v12 }
 0xb5f   :  { %2784 = vmatpush1.bf16.msra.mxu0 %v7305_v13  ;;  %2825 = vmatpush1.bf16.msra.mxu1 %v7310_v14 }
 0xb60   :  { %2785 = vmatprep.subr.bf16.mxu0 %v7319_v15  ;;  %2826 = vmatprep.subr.bf16.mxu1 %v7329_v19 }
 0xb63   :  { %2786 = vmatpush1.bf16.msra.mxu0 %v7324_v17  ;;  %2827 = vmatpush1.bf16.msra.mxu1 %v7334_v21 }
 0xb64   :  { %2787 = vmatprep.subr.bf16.mxu0 %v7343_v25  ;;  %2828 = vmatprep.subr.bf16.mxu1 %v7348_v23 }
 0xb67   :  { %2788 = vmatpush1.bf16.msra.mxu0 %v7353_v34  ;;  %2829 = vmatpush1.bf16.msra.mxu1 %v7358_v50 }
 0xb68   :  { %2789 = vmatprep.subr.bf16.mxu0 %v7367_v43  ;;  %2830 = vmatprep.subr.bf16.mxu1 %v7377_v39 }
 0xb6b   :  { %2790 = vmatpush1.bf16.msra.mxu0 %v7372_v37  ;;  %2831 = vmatpush1.bf16.msra.mxu1 %v7382_v41 }
 0xb6c   :  { %2791 = vmatprep.subr.bf16.mxu0 %v7391_v38  ;;  %2832 = vmatprep.subr.bf16.mxu1 %v7396_v62 }
 0xb6f   :  { %2792 = vmatpush1.bf16.msra.mxu0 %v7401_v49  ;;  %2833 = vmatpush1.bf16.msra.mxu1 %v7406_v60 }
 0xb70   :  { %2793 = vmatprep.subr.bf16.mxu0 %v7415_v1  ;;  %2834 = vmatprep.subr.bf16.mxu1 %v9389_v24 }
 0xb73   :  { %2794 = vmatpush1.bf16.msra.mxu0 %v9390_v61  ;;  %2835 = vmatpush1.bf16.msra.mxu1 %v9391_v31 }
 0xb74   :  { %2895 = vmatprep.subr.bf16.mxu0 %v9392_v46  ;;  %2936 = vmatprep.subr.bf16.mxu1 %v9393_v51 }
 0xc29   :  { %v2697_v2 = vpop.f32.mrb[60].mxu0  ;;  %v2738_v35 = vpop.f32.mrb[60].mxu1 }
 0xc2a   :  { %v2745_v58 = vadd.f32 %v2697_v2, %v1989_v45  ;;  %v2747_v5 = vadd.f32 %v2738_v35, %v2062_v56  ;;  %v2699_v33 = vpop.f32.mrb[61].mxu0  ;;  %v2740_v46 = vpop.f32.mrb[61].mxu1 }
 0xc2b   :  { %v2746_v52 = vadd.f32 %v2699_v33, %v1991_v16  ;;  %v2748_v51 = vadd.f32 %v2740_v46, %v2064_v32  ;;  %v2701_v63 = vpop.f32.mrb[62].mxu0  ;;  %v2742_v3 = vpop.f32.mrb[62].mxu1 }
 0xc2c   :  { %v5175_v54 = vmul.f32 -1.442695, %v2745_v58  ;;  %v2702_v0 = vpop.f32.mrb[63].mxu0  ;;  %v2743_v36 = vpop.f32.mrb[63].mxu1 }
 0xc2d   :  { %v5176_v47 = vmul.f32 -1.442695, %v2746_v52  ;;  %v5177_v4 = vmul.f32 -1.442695, %v2748_v51 }
 0xc2e   :  { %5773 = vpow2.f32 %v5175_v54 }
 0xc2f   :  { %5775 = vpow2.f32 %v5176_v47 }
 0xc30   :  { %5777 = vpow2.f32 %v5177_v4 }
 0xc31   :  { %5779 = vtanh.f32 %v2747_v5 }
 0xc38   :  { %v5774_v55 = vpop.eup %5773 }
 0xc39   :  { %v5776_v48 = vpop.eup %5775  ;;  %v2752_v29 = vadd.f32 1.0, %v5774_v55 }
 0xc3a   :  { %v2758_v45 = vadd.f32 1.0, %v5776_v48  ;;  %v5778_v30 = vpop.eup %5777  ;;  %v7811_v48 = vld [vmem:[%s9123_s3 + $0x100] ss:$16 sps:$4 sm:$0xff]  }
 0xc3b   :  { %5781 = vrcp.f32 %v2752_v29  ;;  %v5780_v56 = vpop.eup %5779  ;;  %v2765_v32 = vadd.f32 1.0, %v5778_v30  ;;  %v7817_v29 = vld [vmem:[%s9123_s3 + $0x108] ss:$16 sps:$4 sm:$0xff]   ;;  %v7829_v30 = vld [vmem:[%s9123_s3 + $0x12c] ss:$16 sps:$4 sm:$0xff]  }
 0xc3c   :  { %5783 = vrcp.f32 %v2758_v45  ;;  %v7823_v45 = vld [vmem:[%s9123_s3 + $0x124] ss:$16 sps:$4 sm:$0xff]  }
 0xc3d   :  { %5785 = vrcp.f32 %v2765_v32  ;;  %v7861_v32 = vld [vmem:[%s9123_s3 + $0x140] ss:$16 sps:$4 sm:$0xff]  }
 0xc45   :  { %v5782_v26 = vpop.eup %5781 }
 0xc46   :  { %v5784_v16 = vpop.eup %5783  ;;  %v2769_v53 = vmul.f32 %v5782_v26, %v5780_v56  ;;  %v7837_v56 = vld [vmem:[%s9123_s3 + $0x120] ss:$16 sps:$4 sm:$0xff]   ;;  %v7843_v26 = vld [vmem:[%s9123_s3 + $0x128] ss:$16 sps:$4 sm:$0xff]  }
 0xc47   :  { %v2768_v2 = vmul.f32 %v5784_v16, %v7691_v7  ;;  %v5786_v58 = vpop.eup %5785  ;;  %v7849_v16 = vld [vmem:[%s9123_s3 + $0x144] ss:$16 sps:$4 sm:$0xff]  }
 0xc49   :  { %v7741_v35 = vadd.f32 %v2769_v53, %v2768_v2  ;;  %v7855_v53 = vld [vmem:[%s9123_s3 + $0x14c] ss:$16 sps:$4 sm:$0xff]   ;;  %v7867_v2 = vld [vmem:[%s9123_s3 + $0x148] ss:$16 sps:$4 sm:$0xff]  }
 0xc4b   :  { %5787 = vtanh.f32 %v7741_v35 }
 0xc55   :  { %v5788_v33 = vpop.eup %5787 }
 0xc56   :  { %v7744_v46 = vmul.f32 %v5788_v33, %v5786_v58  ;;  %v7879_v58 = vld [vmem:[%s9123_s3 + $0x16c] ss:$16 sps:$4 sm:$0xff]   ;;  %v7885_v33 = vld [vmem:[%s9123_s3 + $0x160] ss:$16 sps:$4 sm:$0xff]  }
 0xc58   :  { %v2778_v5 = vpack.c.bf16 %v7744_v46, %v7744_v46 }
 0xc5a   :  { %2812 = vmatmul.mubr.bf16.vlgmr.msra.gmra.mrb[64].mxu0 %v2778_v5  ;;  %2853 = vmatmul.mubr.bf16.vlgmr.msra.gmra.mrb[64].mxu1 %v2778_v5  ;;  %v7891_v5 = vld [vmem:[%s9123_s3 + $0x168] ss:$16 sps:$4 sm:$0xff]  }
 0xc5b   :  { %2896 = vmatpush1.bf16.msra.mxu0 %v7257_v20  ;;  %2937 = vmatpush1.bf16.msra.mxu1 %v7262_v18  ;;  %v7783_v20 = vld [vmem:[%s9123_s3 + $0x104] ss:$16 sps:$4 sm:$0xff]   ;;  %v7789_v18 = vld [vmem:[%s9123_s3 + $0x10c] ss:$16 sps:$4 sm:$0xff]  }
 0xc5c   :  { %2897 = vmatprep.subr.bf16.mxu0 %v7271_v6  ;;  %2938 = vmatprep.subr.bf16.mxu1 %v7276_v22  ;;  %v9413_v6 = vld [vmem:[#allocation23_spill] sm:$0xff] }
 0xc5d   :  { %2927 = vmatprep.mubr.bf16.mxu0 %v9267_v44  ;;  %2968 = vmatprep.mubr.bf16.mxu1 %v9267_v44  ;;  %v1995_v22 = vadd.f32 %v9413_v6, %v7568_v42  ;;  %v7897_v6 = vld [vmem:[%s9123_s3 + $0x184] ss:$16 sps:$4 sm:$0xff]  }
 0xc5f   :  { %2898 = vmatpush1.bf16.msra.mxu0 %v7281_v8  ;;  %2939 = vmatpush1.bf16.msra.mxu1 %v7286_v9  ;;  %v9414_v8 = vld [vmem:[#allocation24_spill] sm:$0xff] }
 0xc60   :  { %2899 = vmatprep.subr.bf16.mxu0 %v7295_v11  ;;  %2940 = vmatprep.subr.bf16.mxu1 %v7300_v12  ;;  %v2068_v9 = vadd.f32 %v9414_v8, %v7571_v59  ;;  %v9415_v11 = vld [vmem:[#allocation22_spill] sm:$0xff] }
 0xc61   :  { %v1997_v12 = vadd.f32 %v9415_v11, %v7578_v27  ;;  %v7909_v8 = vld [vmem:[%s9123_s3 + $0x180] ss:$16 sps:$4 sm:$0xff]   ;;  %v7921_v11 = vld [vmem:[%s9123_s3 + $0x1a4] ss:$16 sps:$4 sm:$0xff]  }
 0xc63   :  { %2900 = vmatpush1.bf16.msra.mxu0 %v7305_v13  ;;  %2941 = vmatpush1.bf16.msra.mxu1 %v7310_v14  ;;  %v9416_v13 = vld [vmem:[#allocation26_spill] sm:$0xff] }
 0xc64   :  { %2901 = vmatprep.subr.bf16.mxu0 %v7319_v15  ;;  %2942 = vmatprep.subr.bf16.mxu1 %v7329_v19  ;;  %v2070_v14 = vadd.f32 %v9416_v13, %v7581_v57  ;;  %v7933_v13 = vld [vmem:[%s9123_s3 + $0x1a0] ss:$16 sps:$4 sm:$0xff]  }
 0xc67   :  { %2902 = vmatpush1.bf16.msra.mxu0 %v7324_v17  ;;  %2943 = vmatpush1.bf16.msra.mxu1 %v7334_v21 }
 0xc68   :  { %2903 = vmatprep.subr.bf16.mxu0 %v7343_v25  ;;  %2944 = vmatprep.subr.bf16.mxu1 %v7348_v23 }
 0xc6b   :  { %2904 = vmatpush1.bf16.msra.mxu0 %v7353_v34  ;;  %2945 = vmatpush1.bf16.msra.mxu1 %v7358_v50 }
 0xc6c   :  { %2905 = vmatprep.subr.bf16.mxu0 %v7367_v43  ;;  %2946 = vmatprep.subr.bf16.mxu1 %v7377_v39 }
 0xc6f   :  { %2906 = vmatpush1.bf16.msra.mxu0 %v7372_v37  ;;  %2947 = vmatpush1.bf16.msra.mxu1 %v7382_v41 }
 0xc70   :  { %2907 = vmatprep.subr.bf16.mxu0 %v7391_v38  ;;  %2948 = vmatprep.subr.bf16.mxu1 %v7396_v62 }
 0xc73   :  { %2908 = vmatpush1.bf16.msra.mxu0 %v7401_v49  ;;  %2949 = vmatpush1.bf16.msra.mxu1 %v7406_v60 }
 0xc74   :  { %2909 = vmatprep.subr.bf16.mxu0 %v7415_v1  ;;  %2950 = vmatprep.subr.bf16.mxu1 %v9389_v24 }
 0xc77   :  { %2910 = vmatpush1.bf16.msra.mxu0 %v9390_v61  ;;  %2951 = vmatpush1.bf16.msra.mxu1 %v9391_v31 }
 0xc78   :  { %3011 = vmatprep.subr.bf16.mxu0 %v7783_v20  ;;  %3052 = vmatprep.subr.bf16.mxu1 %v7789_v18 }
 0xd2d   :  { %v2813_v15 = vpop.f32.mrb[64].mxu0  ;;  %v2854_v17 = vpop.f32.mrb[64].mxu1 }
 0xd2e   :  { %v2861_v19 = vadd.f32 %v2813_v15, %v1995_v22  ;;  %v2863_v21 = vadd.f32 %v2854_v17, %v2068_v9  ;;  %v2815_v25 = vpop.f32.mrb[65].mxu0  ;;  %v2856_v23 = vpop.f32.mrb[65].mxu1  ;;  %v7903_v22 = vld [vmem:[%s9123_s3 + $0x18c] ss:$16 sps:$4 sm:$0xff]   ;;  %v7915_v9 = vld [vmem:[%s9123_s3 + $0x188] ss:$16 sps:$4 sm:$0xff]  }
 0xd2f   :  { %v2862_v34 = vadd.f32 %v2815_v25, %v1997_v12  ;;  %v2864_v50 = vadd.f32 %v2856_v23, %v2070_v14  ;;  %v2817_v43 = vpop.f32.mrb[66].mxu0  ;;  %v2858_v37 = vpop.f32.mrb[66].mxu1  ;;  %v7927_v12 = vld [vmem:[%s9123_s3 + $0x1ac] ss:$16 sps:$4 sm:$0xff]   ;;  %v7939_v14 = vld [vmem:[%s9123_s3 + $0x1a8] ss:$16 sps:$4 sm:$0xff]  }
 0xd30   :  { %v5178_v39 = vmul.f32 -1.442695, %v2861_v19  ;;  %v2818_v41 = vpop.f32.mrb[67].mxu0  ;;  %v2859_v38 = vpop.f32.mrb[67].mxu1  ;;  %v7945_v15 = vld [vmem:[%s9123_s3 + $0x1c4] ss:$16 sps:$4 sm:$0xff]  }
 0xd31   :  { %v5179_v62 = vmul.f32 -1.442695, %v2862_v34  ;;  %v5180_v49 = vmul.f32 -1.442695, %v2864_v50  ;;  %v7951_v17 = vld [vmem:[%s9123_s3 + $0x1cc] ss:$16 sps:$4 sm:$0xff]  }
 0xd32   :  { %5789 = vpow2.f32 %v5178_v39  ;;  %v7957_v19 = vld [vmem:[%s9123_s3 + $0x1c0] ss:$16 sps:$4 sm:$0xff]   ;;  %v7969_v25 = vld [vmem:[%s9123_s3 + $0x1e4] ss:$16 sps:$4 sm:$0xff]   ;;  %v7975_v23 = vld [vmem:[%s9123_s3 + $0x1ec] ss:$16 sps:$4 sm:$0xff]  }
 0xd33   :  { %5791 = vpow2.f32 %v5179_v62  ;;  %v7981_v34 = vld [vmem:[%s9123_s3 + $0x1e0] ss:$16 sps:$4 sm:$0xff]   ;;  %v7987_v50 = vld [vmem:[%s9123_s3 + $0x1e8] ss:$16 sps:$4 sm:$0xff]  }
 0xd34   :  { %5793 = vpow2.f32 %v5180_v49  ;;  %v9417_v43 = vld [vmem:[#allocation28_spill] sm:$0xff]  ;;  %v9418_v39 = vld [vmem:[#allocation25_spill] sm:$0xff] }
 0xd35   :  { %5795 = vtanh.f32 %v2863_v21  ;;  %v7963_v21 = vld [vmem:[%s9123_s3 + $0x1c8] ss:$16 sps:$4 sm:$0xff]   ;;  %v1999_v37 = vadd.f32 %v9417_v43, %v7568_v42  ;;  %v2072_v41 = vadd.f32 %v9418_v39, %v7571_v59 }
 0xd36   :  { %v9419_v38 = vld [vmem:[#allocation29_spill] sm:$0xff] }
 0xd37   :  { %v2001_v62 = vadd.f32 %v9419_v38, %v7578_v27  ;;  %v9420_v49 = vld [vmem:[#allocation21_spill] sm:$0xff] }
 0xd3c   :  { %v5790_v60 = vpop.eup %5789 }
 0xd3d   :  { %v5792_v1 = vpop.eup %5791  ;;  %v2868_v24 = vadd.f32 1.0, %v5790_v60  ;;  %v2074_v60 = vadd.f32 %v9420_v49, %v7581_v57 }
 0xd3e   :  { %v2874_v61 = vadd.f32 1.0, %v5792_v1  ;;  %v5794_v31 = vpop.eup %5793 }
 0xd3f   :  { %5797 = vrcp.f32 %v2868_v24  ;;  %v5796_v7 = vpop.eup %5795  ;;  %v2881_v3 = vadd.f32 1.0, %v5794_v31 }
 0xd40   :  { %5799 = vrcp.f32 %v2874_v61 }
 0xd41   :  { %5801 = vrcp.f32 %v2881_v3 }
 0xd49   :  { %v5798_v52 = vpop.eup %5797 }
 0xd4a   :  { %v5800_v51 = vpop.eup %5799  ;;  %v2885_v63 = vmul.f32 %v5798_v52, %v5796_v7 }
 0xd4b   :  { %v2884_v54 = vmul.f32 %v5800_v51, %v7741_v35  ;;  %v5802_v36 = vpop.eup %5801  ;;  %v7873_v35 = vld [vmem:[%s9123_s3 + $0x164] ss:$16 sps:$4 sm:$0xff]  }
 0xd4d   :  { %v7801_v0 = vadd.f32 %v2885_v63, %v2884_v54 }
 0xd4f   :  { %5803 = vtanh.f32 %v7801_v0 }
 0xd59   :  { %v5804_v47 = vpop.eup %5803 }
 0xd5a   :  { %v7804_v4 = vmul.f32 %v5804_v47, %v5802_v36 }
 0xd5c   :  { %v2894_v55 = vpack.c.bf16 %v7804_v4, %v7804_v4 }
 0xd5e   :  { %2928 = vmatmul.mubr.bf16.vlgmr.msra.gmra.mrb[68].mxu0 %v2894_v55  ;;  %2969 = vmatmul.mubr.bf16.vlgmr.msra.gmra.mrb[68].mxu1 %v2894_v55 }
 0xd5f   :  { %3012 = vmatpush1.bf16.msra.mxu0 %v7811_v48  ;;  %3053 = vmatpush1.bf16.msra.mxu1 %v7817_v29 }
 0xd60   :  { %3013 = vmatprep.subr.bf16.mxu0 %v7823_v45  ;;  %3054 = vmatprep.subr.bf16.mxu1 %v7829_v30 }
 0xd61   :  { %3043 = vmatprep.mubr.bf16.mxu0 %v9267_v44  ;;  %3084 = vmatprep.mubr.bf16.mxu1 %v9267_v44 }
 0xd63   :  { %3014 = vmatpush1.bf16.msra.mxu0 %v7837_v56  ;;  %3055 = vmatpush1.bf16.msra.mxu1 %v7843_v26 }
 0xd64   :  { %3015 = vmatprep.subr.bf16.mxu0 %v7849_v16  ;;  %3056 = vmatprep.subr.bf16.mxu1 %v7855_v53 }
 0xd67   :  { %3016 = vmatpush1.bf16.msra.mxu0 %v7861_v32  ;;  %3057 = vmatpush1.bf16.msra.mxu1 %v7867_v2 }
 0xd68   :  { %3017 = vmatprep.subr.bf16.mxu0 %v7873_v35  ;;  %3058 = vmatprep.subr.bf16.mxu1 %v7879_v58 }
 0xd6b   :  { %3018 = vmatpush1.bf16.msra.mxu0 %v7885_v33  ;;  %3059 = vmatpush1.bf16.msra.mxu1 %v7891_v5 }
 0xd6c   :  { %3019 = vmatprep.subr.bf16.mxu0 %v7897_v6  ;;  %3060 = vmatprep.subr.bf16.mxu1 %v7903_v22 }
 0xd6f   :  { %3020 = vmatpush1.bf16.msra.mxu0 %v7909_v8  ;;  %3061 = vmatpush1.bf16.msra.mxu1 %v7915_v9 }
 0xd70   :  { %3021 = vmatprep.subr.bf16.mxu0 %v7921_v11  ;;  %3062 = vmatprep.subr.bf16.mxu1 %v7927_v12 }
 0xd73   :  { %3022 = vmatpush1.bf16.msra.mxu0 %v7933_v13  ;;  %3063 = vmatpush1.bf16.msra.mxu1 %v7939_v14 }
 0xd74   :  { %3023 = vmatprep.subr.bf16.mxu0 %v7945_v15  ;;  %3064 = vmatprep.subr.bf16.mxu1 %v7951_v17 }
 0xd77   :  { %3024 = vmatpush1.bf16.msra.mxu0 %v7957_v19  ;;  %3065 = vmatpush1.bf16.msra.mxu1 %v7963_v21 }
 0xd78   :  { %3025 = vmatprep.subr.bf16.mxu0 %v7969_v25  ;;  %3066 = vmatprep.subr.bf16.mxu1 %v7975_v23 }
 0xd7b   :  { %3026 = vmatpush1.bf16.msra.mxu0 %v7981_v34  ;;  %3067 = vmatpush1.bf16.msra.mxu1 %v7987_v50 }
 0xd7c   :  { %3127 = vmatprep.subr.bf16.mxu0 %v7783_v20  ;;  %3168 = vmatprep.subr.bf16.mxu1 %v7789_v18 }
 0xe31   :  { %v2929_v1 = vpop.f32.mrb[68].mxu0  ;;  %v2970_v24 = vpop.f32.mrb[68].mxu1 }
 0xe32   :  { %v2977_v61 = vadd.f32 %v2929_v1, %v1999_v37  ;;  %v2979_v31 = vadd.f32 %v2970_v24, %v2072_v41  ;;  %v2931_v7 = vpop.f32.mrb[69].mxu0  ;;  %v2972_v20 = vpop.f32.mrb[69].mxu1 }
 0xe33   :  { %v2978_v52 = vadd.f32 %v2931_v7, %v2001_v62  ;;  %v2980_v18 = vadd.f32 %v2972_v20, %v2074_v60  ;;  %v2933_v51 = vpop.f32.mrb[70].mxu0  ;;  %v2974_v63 = vpop.f32.mrb[70].mxu1 }
 0xe34   :  { %v5181_v3 = vmul.f32 -1.442695, %v2977_v61  ;;  %v2934_v54 = vpop.f32.mrb[71].mxu0  ;;  %v2975_v36 = vpop.f32.mrb[71].mxu1 }
 0xe35   :  { %v5182_v47 = vmul.f32 -1.442695, %v2978_v52  ;;  %v5183_v55 = vmul.f32 -1.442695, %v2980_v18 }
 0xe36   :  { %5805 = vpow2.f32 %v5181_v3 }
 0xe37   :  { %5807 = vpow2.f32 %v5182_v47 }
 0xe38   :  { %5809 = vpow2.f32 %v5183_v55 }
 0xe39   :  { %5811 = vtanh.f32 %v2979_v31 }
 0xe40   :  { %v5806_v43 = vpop.eup %5805 }
 0xe41   :  { %v5808_v39 = vpop.eup %5807  ;;  %v2984_v38 = vadd.f32 1.0, %v5806_v43 }
 0xe42   :  { %v2990_v37 = vadd.f32 1.0, %v5808_v39  ;;  %v5810_v41 = vpop.eup %5809 }
 0xe43   :  { %5813 = vrcp.f32 %v2984_v38  ;;  %v5812_v62 = vpop.eup %5811  ;;  %v2997_v24 = vadd.f32 1.0, %v5810_v41  ;;  %v5501_v38 = vld [vmem:[%s9127_s2 + $0x100] ss:$16 sps:$4 sm:$0xff]  }
 0xe44   :  { %5815 = vrcp.f32 %v2990_v37  ;;  %v5504_v37 = vld [vmem:[%s9127_s2 + $0x108] ss:$16 sps:$4 sm:$0xff]  }
 0xe45   :  { %5817 = vrcp.f32 %v2997_v24  ;;  %v5515_v24 = vld [vmem:[%s9127_s2 + $0x144] ss:$16 sps:$4 sm:$0xff]  }
 0xe4d   :  { %v5814_v49 = vpop.eup %5813 }
 0xe4e   :  { %v5816_v60 = vpop.eup %5815  ;;  %v3001_v1 = vmul.f32 %v5814_v49, %v5812_v62  ;;  %v5509_v62 = vld [vmem:[%s9127_s2 + $0x124] ss:$16 sps:$4 sm:$0xff]   ;;  %v5512_v49 = vld [vmem:[%s9127_s2 + $0x12c] ss:$16 sps:$4 sm:$0xff]  }
 0xe4f   :  { %v3000_v61 = vmul.f32 %v5816_v60, %v7801_v0  ;;  %v5818_v20 = vpop.eup %5817  ;;  %v5503_v0 = vld [vmem:[%s9127_s2 + $0x104] ss:$16 sps:$4 sm:$0xff]   ;;  %v5507_v60 = vld [vmem:[%s9127_s2 + $0x120] ss:$16 sps:$4 sm:$0xff]  }
 0xe51   :  { %v8001_v7 = vadd.f32 %v3001_v1, %v3000_v61  ;;  %v5510_v1 = vld [vmem:[%s9127_s2 + $0x128] ss:$16 sps:$4 sm:$0xff]   ;;  %v5518_v61 = vld [vmem:[%s9127_s2 + $0x14c] ss:$16 sps:$4 sm:$0xff]  }
 0xe53   :  { %5819 = vtanh.f32 %v8001_v7 }
 0xe5d   :  { %v5820_v52 = vpop.eup %5819 }
 0xe5e   :  { %v8004_v18 = vmul.f32 %v5820_v52, %v5818_v20  ;;  %v5516_v20 = vld [vmem:[%s9127_s2 + $0x148] ss:$16 sps:$4 sm:$0xff]   ;;  %v5521_v52 = vld [vmem:[%s9127_s2 + $0x164] ss:$16 sps:$4 sm:$0xff]  }
 0xe60   :  { %v3010_v31 = vpack.c.bf16 %v8004_v18, %v8004_v18 }
 0xe62   :  { %3044 = vmatmul.mubr.bf16.vlgmr.msra.gmra.mrb[72].mxu0 %v3010_v31  ;;  %3085 = vmatmul.mubr.bf16.vlgmr.msra.gmra.mrb[72].mxu1 %v3010_v31  ;;  %v5524_v31 = vld [vmem:[%s9127_s2 + $0x16c] ss:$16 sps:$4 sm:$0xff]  }
 0xe63   :  { %3128 = vmatpush1.bf16.msra.mxu0 %v7811_v48  ;;  %3169 = vmatpush1.bf16.msra.mxu1 %v7817_v29  ;;  %v5506_v48 = vld [vmem:[%s9127_s2 + $0x10c] ss:$16 sps:$4 sm:$0xff]  }
 0xe64   :  { %3129 = vmatprep.subr.bf16.mxu0 %v7823_v45  ;;  %3170 = vmatprep.subr.bf16.mxu1 %v7829_v30  ;;  %v9421_v29 = vld [vmem:[#allocation27_spill] sm:$0xff]  ;;  %v9422_v30 = vld [vmem:[#allocation5_spill] sm:$0xff] }
 0xe65   :  { %3159 = vmatprep.mubr.bf16.mxu0 %v9267_v44  ;;  %3200 = vmatprep.mubr.bf16.mxu1 %v9267_v44  ;;  %v2005_v45 = vadd.f32 %v9421_v29, %v7568_v42  ;;  %v5527_v29 = vld [vmem:[%s9127_s2 + $0x184] ss:$16 sps:$4 sm:$0xff]  }
 0xe67   :  { %3130 = vmatpush1.bf16.msra.mxu0 %v7837_v56  ;;  %3171 = vmatpush1.bf16.msra.mxu1 %v7843_v26  ;;  %v2078_v56 = vadd.f32 %v9422_v30, %v7571_v59  ;;  %v9423_v26 = vld [vmem:[#allocation31_spill] sm:$0xff]  ;;  %v5525_v30 = vld [vmem:[%s9127_s2 + $0x180] ss:$16 sps:$4 sm:$0xff]  }
 0xe68   :  { %3131 = vmatprep.subr.bf16.mxu0 %v7849_v16  ;;  %3172 = vmatprep.subr.bf16.mxu1 %v7855_v53  ;;  %v2007_v16 = vadd.f32 %v9423_v26, %v7578_v27  ;;  %v9424_v53 = vld [vmem:[#allocation10_spill] sm:$0xff] }
 0xe69   :  { %v5533_v26 = vld [vmem:[%s9127_s2 + $0x1a4] ss:$16 sps:$4 sm:$0xff]  }
 0xe6b   :  { %3132 = vmatpush1.bf16.msra.mxu0 %v7861_v32  ;;  %3173 = vmatpush1.bf16.msra.mxu1 %v7867_v2  ;;  %v2080_v32 = vadd.f32 %v9424_v53, %v7581_v57  ;;  %v5531_v53 = vld [vmem:[%s9127_s2 + $0x1a0] ss:$16 sps:$4 sm:$0xff]  }
 0xe6c   :  { %3133 = vmatprep.subr.bf16.mxu0 %v7873_v35  ;;  %3174 = vmatprep.subr.bf16.mxu1 %v7879_v58 }
 0xe6f   :  { %3134 = vmatpush1.bf16.msra.mxu0 %v7885_v33  ;;  %3175 = vmatpush1.bf16.msra.mxu1 %v7891_v5 }
 0xe70   :  { %3135 = vmatprep.subr.bf16.mxu0 %v7897_v6  ;;  %3176 = vmatprep.subr.bf16.mxu1 %v7903_v22 }
 0xe73   :  { %3136 = vmatpush1.bf16.msra.mxu0 %v7909_v8  ;;  %3177 = vmatpush1.bf16.msra.mxu1 %v7915_v9 }
 0xe74   :  { %3137 = vmatprep.subr.bf16.mxu0 %v7921_v11  ;;  %3178 = vmatprep.subr.bf16.mxu1 %v7927_v12 }
 0xe77   :  { %3138 = vmatpush1.bf16.msra.mxu0 %v7933_v13  ;;  %3179 = vmatpush1.bf16.msra.mxu1 %v7939_v14 }
 0xe78   :  { %3139 = vmatprep.subr.bf16.mxu0 %v7945_v15  ;;  %3180 = vmatprep.subr.bf16.mxu1 %v7951_v17 }
 0xe7b   :  { %3140 = vmatpush1.bf16.msra.mxu0 %v7957_v19  ;;  %3181 = vmatpush1.bf16.msra.mxu1 %v7963_v21 }
 0xe7c   :  { %3141 = vmatprep.subr.bf16.mxu0 %v7969_v25  ;;  %3182 = vmatprep.subr.bf16.mxu1 %v7975_v23 }
 0xe7f   :  { %3142 = vmatpush1.bf16.msra.mxu0 %v7981_v34  ;;  %3183 = vmatpush1.bf16.msra.mxu1 %v7987_v50 }
 0xe80   :  { %3470 = vmatprep.subr.bf16.mxu0 %v5503_v0  ;;  %3543 = vmatprep.subr.bf16.mxu1 %v5506_v48  ;;  %v5519_v0 = vld [vmem:[%s9127_s2 + $0x160] ss:$16 sps:$4 sm:$0xff]   ;;  %v5522_v48 = vld [vmem:[%s9127_s2 + $0x168] ss:$16 sps:$4 sm:$0xff]  }
 0xf35   :  { %v3045_v2 = vpop.f32.mrb[72].mxu0  ;;  %v3086_v35 = vpop.f32.mrb[72].mxu1 }
 0xf36   :  { %v3093_v58 = vadd.f32 %v3045_v2, %v2005_v45  ;;  %v3095_v33 = vadd.f32 %v3086_v35, %v2078_v56  ;;  %v3047_v5 = vpop.f32.mrb[73].mxu0  ;;  %v3088_v6 = vpop.f32.mrb[73].mxu1  ;;  %v5530_v45 = vld [vmem:[%s9127_s2 + $0x18c] ss:$16 sps:$4 sm:$0xff]   ;;  %v5528_v56 = vld [vmem:[%s9127_s2 + $0x188] ss:$16 sps:$4 sm:$0xff]  }
 0xf37   :  { %v3094_v22 = vadd.f32 %v3047_v5, %v2007_v16  ;;  %v3096_v8 = vadd.f32 %v3088_v6, %v2080_v32  ;;  %v3049_v9 = vpop.f32.mrb[74].mxu0  ;;  %v3090_v11 = vpop.f32.mrb[74].mxu1  ;;  %v5536_v16 = vld [vmem:[%s9127_s2 + $0x1ac] ss:$16 sps:$4 sm:$0xff]   ;;  %v5534_v32 = vld [vmem:[%s9127_s2 + $0x1a8] ss:$16 sps:$4 sm:$0xff]  }
 0xf38   :  { %v5184_v12 = vmul.f32 -1.442695, %v3093_v58  ;;  %v3050_v13 = vpop.f32.mrb[75].mxu0  ;;  %v3091_v14 = vpop.f32.mrb[75].mxu1  ;;  %v5539_v2 = vld [vmem:[%s9127_s2 + $0x1c4] ss:$16 sps:$4 sm:$0xff]   ;;  %v3250_v9 = vpack.c.bf16 %v7644_v10, %v7594_v28  ;;  %v3251_v11 = vpack.c.bf16 %v7744_v46, %v7694_v40 }
 0xf39   :  { %v5185_v15 = vmul.f32 -1.442695, %v3094_v22  ;;  %v5186_v17 = vmul.f32 -1.442695, %v3096_v8  ;;  %v5542_v35 = vld [vmem:[%s9127_s2 + $0x1cc] ss:$16 sps:$4 sm:$0xff]  }
 0xf3a   :  { %5821 = vpow2.f32 %v5184_v12  ;;  %v5537_v58 = vld [vmem:[%s9127_s2 + $0x1c0] ss:$16 sps:$4 sm:$0xff]   ;;  %v5545_v5 = vld [vmem:[%s9127_s2 + $0x1e4] ss:$16 sps:$4 sm:$0xff]   ;;  %v5548_v6 = vld [vmem:[%s9127_s2 + $0x1ec] ss:$16 sps:$4 sm:$0xff]   ;;  %v3252_v12 = vpack.c.bf16 %v8004_v18, %v7804_v4 }
 0xf3b   :  { %5823 = vpow2.f32 %v5185_v15  ;;  %v5543_v22 = vld [vmem:[%s9127_s2 + $0x1e0] ss:$16 sps:$4 sm:$0xff]   ;;  %v5546_v8 = vld [vmem:[%s9127_s2 + $0x1e8] ss:$16 sps:$4 sm:$0xff]   ;;  %v8169_v28 = vld [vmem:[%s9123_s3 + $0x204] ss:$16 sps:$4 sm:$0xff]  }
 0xf3c   :  { %5825 = vpow2.f32 %v5186_v17  ;;  %v8174_v10 = vld [vmem:[%s9123_s3 + $0x20c] ss:$16 sps:$4 sm:$0xff]   ;;  %v8179_v40 = vld [vmem:[%s9123_s3 + $0x200] ss:$16 sps:$4 sm:$0xff]   ;;  %v8184_v46 = vld [vmem:[%s9123_s3 + $0x208] ss:$16 sps:$4 sm:$0xff]  }
 0xf3d   :  { %5827 = vtanh.f32 %v3095_v33  ;;  %v5540_v33 = vld [vmem:[%s9127_s2 + $0x1c8] ss:$16 sps:$4 sm:$0xff]   ;;  %v8193_v4 = vld [vmem:[%s9123_s3 + $0x224] ss:$16 sps:$4 sm:$0xff]   ;;  %v8198_v18 = vld [vmem:[%s9123_s3 + $0x22c] ss:$16 sps:$4 sm:$0xff]  }
 0xf3e   :  { %v8203_v13 = vld [vmem:[%s9123_s3 + $0x220] ss:$16 sps:$4 sm:$0xff]   ;;  %v8208_v14 = vld [vmem:[%s9123_s3 + $0x228] ss:$16 sps:$4 sm:$0xff]   ;;  %v8217_v15 = vld [vmem:[%s9123_s3 + $0x244] ss:$16 sps:$4 sm:$0xff]  }
 0xf3f   :  { %v8222_v17 = vld [vmem:[%s9123_s3 + $0x24c] ss:$16 sps:$4 sm:$0xff]  }
 0xf44   :  { %v5822_v19 = vpop.eup %5821 }
 0xf45   :  { %v5824_v21 = vpop.eup %5823  ;;  %v3100_v25 = vadd.f32 1.0, %v5822_v19  ;;  %v8227_v19 = vld [vmem:[%s9123_s3 + $0x240] ss:$16 sps:$4 sm:$0xff]  }
 0xf46   :  { %v3106_v23 = vadd.f32 1.0, %v5824_v21  ;;  %v5826_v34 = vpop.eup %5825  ;;  %v8232_v21 = vld [vmem:[%s9123_s3 + $0x248] ss:$16 sps:$4 sm:$0xff]  }
 0xf47   :  { %5829 = vrcp.f32 %v3100_v25  ;;  %v5828_v50 = vpop.eup %5827  ;;  %v3113_v54 = vadd.f32 1.0, %v5826_v34  ;;  %v8241_v25 = vld [vmem:[%s9123_s3 + $0x264] ss:$16 sps:$4 sm:$0xff]   ;;  %v8251_v34 = vld [vmem:[%s9123_s3 + $0x26c] ss:$16 sps:$4 sm:$0xff]  }
 0xf48   :  { %5831 = vrcp.f32 %v3106_v23  ;;  %v8246_v23 = vld [vmem:[%s9123_s3 + $0x260] ss:$16 sps:$4 sm:$0xff]  }
 0xf49   :  { %5833 = vrcp.f32 %v3113_v54  ;;  %v8280_v54 = vld [vmem:[%s9123_s3 + $0x288] ss:$16 sps:$4 sm:$0xff]  }
 0xf51   :  { %v5830_v51 = vpop.eup %5829 }
 0xf52   :  { %v5832_v63 = vpop.eup %5831  ;;  %v3117_v3 = vmul.f32 %v5830_v51, %v5828_v50  ;;  %v8256_v50 = vld [vmem:[%s9123_s3 + $0x268] ss:$16 sps:$4 sm:$0xff]   ;;  %v8265_v51 = vld [vmem:[%s9123_s3 + $0x284] ss:$16 sps:$4 sm:$0xff]  }
 0xf53   :  { %v3116_v36 = vmul.f32 %v5832_v63, %v8001_v7  ;;  %v5834_v55 = vpop.eup %5833  ;;  %v5513_v7 = vld [vmem:[%s9127_s2 + $0x140] ss:$16 sps:$4 sm:$0xff]   ;;  %v8270_v63 = vld [vmem:[%s9123_s3 + $0x28c] ss:$16 sps:$4 sm:$0xff]  }
 0xf55   :  { %v8055_v47 = vadd.f32 %v3117_v3, %v3116_v36  ;;  %v8275_v3 = vld [vmem:[%s9123_s3 + $0x280] ss:$16 sps:$4 sm:$0xff]   ;;  %v8289_v36 = vld [vmem:[%s9123_s3 + $0x2a4] ss:$16 sps:$4 sm:$0xff]  }
 0xf57   :  { %5835 = vtanh.f32 %v8055_v47 }
 0xf61   :  { %v5836_v43 = vpop.eup %5835 }
 0xf62   :  { %v8058_v39 = vmul.f32 %v5836_v43, %v5834_v55  ;;  %v8294_v55 = vld [vmem:[%s9123_s3 + $0x2a0] ss:$16 sps:$4 sm:$0xff]   ;;  %v8299_v43 = vld [vmem:[%s9123_s3 + $0x2ac] ss:$16 sps:$4 sm:$0xff]  }
 0xf64   :  { %v3126_v41 = vpack.c.bf16 %v8058_v39, %v8058_v39 }
 0xf66   :  { %3160 = vmatmul.mubr.bf16.vlgmr.msra.gmra.mrb[76].mxu0 %v3126_v41  ;;  %3201 = vmatmul.mubr.bf16.vlgmr.msra.gmra.mrb[76].mxu1 %v3126_v41  ;;  %v8318_v41 = vld [vmem:[%s9123_s3 + $0x2cc] ss:$16 sps:$4 sm:$0xff]  }
 0xf67   :  { %3471 = vmatpush1.bf16.msra.mxu0 %v5501_v38  ;;  %3544 = vmatpush1.bf16.msra.mxu1 %v5504_v37  ;;  %v8304_v38 = vld [vmem:[%s9123_s3 + $0x2a8] ss:$16 sps:$4 sm:$0xff]   ;;  %v8313_v37 = vld [vmem:[%s9123_s3 + $0x2c4] ss:$16 sps:$4 sm:$0xff]  }
 0xf68   :  { %3472 = vmatprep.subr.bf16.mxu0 %v5509_v62  ;;  %3545 = vmatprep.subr.bf16.mxu1 %v5512_v49  ;;  %v8323_v62 = vld [vmem:[%s9123_s3 + $0x2c0] ss:$16 sps:$4 sm:$0xff]   ;;  %v8328_v49 = vld [vmem:[%s9123_s3 + $0x2c8] ss:$16 sps:$4 sm:$0xff]  }
 0xf69   :  { %3502 = vmatprep.mubr.bf16.mxu0 %v9267_v44  ;;  %3575 = vmatprep.mubr.bf16.mxu1 %v9267_v44 }
 0xf6b   :  { %3473 = vmatpush1.bf16.msra.mxu0 %v5507_v60  ;;  %3546 = vmatpush1.bf16.msra.mxu1 %v5510_v1  ;;  %v8337_v60 = vld [vmem:[%s9123_s3 + $0x2e4] ss:$16 sps:$4 sm:$0xff]   ;;  %v8342_v1 = vld [vmem:[%s9123_s3 + $0x2e0] ss:$16 sps:$4 sm:$0xff]  }
 0xf6c   :  { %3474 = vmatprep.subr.bf16.mxu0 %v5515_v24  ;;  %3547 = vmatprep.subr.bf16.mxu1 %v5518_v61  ;;  %v8347_v24 = vld [vmem:[%s9123_s3 + $0x2ec] ss:$16 sps:$4 sm:$0xff]   ;;  %v8352_v61 = vld [vmem:[%s9123_s3 + $0x2e8] ss:$16 sps:$4 sm:$0xff]  }
 0xf6f   :  { %3475 = vmatpush1.bf16.msra.mxu0 %v5513_v7  ;;  %3548 = vmatpush1.bf16.msra.mxu1 %v5516_v20  ;;  %v9425_v7 = vld [vmem:[#allocation30_spill] sm:$0xff] }
 0xf70   :  { %3476 = vmatprep.subr.bf16.mxu0 %v5521_v52  ;;  %3549 = vmatprep.subr.bf16.mxu1 %v5524_v31  ;;  %v2009_v20 = vadd.f32 %v9425_v7, %v7568_v42  ;;  %v9426_v52 = vld [vmem:[#allocation11_spill] sm:$0xff] }
 0xf71   :  { %v2082_v31 = vadd.f32 %v9426_v52, %v7571_v59 }
 0xf73   :  { %3477 = vmatpush1.bf16.msra.mxu0 %v5519_v0  ;;  %3550 = vmatpush1.bf16.msra.mxu1 %v5522_v48  ;;  %v9427_v0 = vld [vmem:[#allocation7_spill] sm:$0xff] }
 0xf74   :  { %3478 = vmatprep.subr.bf16.mxu0 %v5527_v29  ;;  %3551 = vmatprep.subr.bf16.mxu1 %v5530_v45  ;;  %v2011_v48 = vadd.f32 %v9427_v0, %v7578_v27  ;;  %v9428_v29 = vld [vmem:[#allocation4_spill] sm:$0xff] }
 0xf75   :  { %v2084_v45 = vadd.f32 %v9428_v29, %v7581_v57 }
 0xf77   :  { %3479 = vmatpush1.bf16.msra.mxu0 %v5525_v30  ;;  %3552 = vmatpush1.bf16.msra.mxu1 %v5528_v56 }
 0xf78   :  { %3480 = vmatprep.subr.bf16.mxu0 %v5533_v26  ;;  %3553 = vmatprep.subr.bf16.mxu1 %v5536_v16 }
 0xf7b   :  { %3481 = vmatpush1.bf16.msra.mxu0 %v5531_v53  ;;  %3554 = vmatpush1.bf16.msra.mxu1 %v5534_v32 }
 0xf7c   :  { %3482 = vmatprep.subr.bf16.mxu0 %v5539_v2  ;;  %3555 = vmatprep.subr.bf16.mxu1 %v5542_v35 }
 0xf7f   :  { %3483 = vmatpush1.bf16.msra.mxu0 %v5537_v58  ;;  %3556 = vmatpush1.bf16.msra.mxu1 %v5540_v33 }
 0xf80   :  { %3484 = vmatprep.subr.bf16.mxu0 %v5545_v5  ;;  %3557 = vmatprep.subr.bf16.mxu1 %v5548_v6 }
 0xf83   :  { %3485 = vmatpush1.bf16.msra.mxu0 %v5543_v22  ;;  %3558 = vmatpush1.bf16.msra.mxu1 %v5546_v8 }
 0xf84   :  { %3845 = vmatprep.subr.bf16.mxu0 %v8169_v28  ;;  %3886 = vmatprep.subr.bf16.mxu1 %v8174_v10 }
 0xf86   :  { %3503 = vmatmul.mubr.bf16.vlgmr.msra.gmra.mrb[80].mxu0 %v3250_v9  ;;  %3576 = vmatmul.mubr.bf16.vlgmr.msra.gmra.mrb[80].mxu1 %v3250_v9 }
 0xf87   :  { %3512 = vmatprep.mubr.bf16.mxu0 %v9267_v44  ;;  %3585 = vmatprep.mubr.bf16.mxu1 %v9267_v44 }
 0xf88   :  { %3846 = vmatpush1.bf16.msra.mxu0 %v8179_v40  ;;  %3887 = vmatpush1.bf16.msra.mxu1 %v8184_v46 }
 0xf89   :  { %3847 = vmatprep.subr.bf16.mxu0 %v8193_v4  ;;  %3888 = vmatprep.subr.bf16.mxu1 %v8198_v18 }
 0xf8c   :  { %3848 = vmatpush1.bf16.msra.mxu0 %v8203_v13  ;;  %3889 = vmatpush1.bf16.msra.mxu1 %v8208_v14 }
 0xf8d   :  { %3849 = vmatprep.subr.bf16.mxu0 %v8217_v15  ;;  %3890 = vmatprep.subr.bf16.mxu1 %v8222_v17 }
 0xf8e   :  { %3513 = vmatmul.mubr.bf16.gmra.mrb[84].mxu0 %v3251_v11  ;;  %3586 = vmatmul.mubr.bf16.gmra.mrb[84].mxu1 %v3251_v11 }
 0xf8f   :  { %3522 = vmatprep.mubr.bf16.mxu0 %v9267_v44  ;;  %3595 = vmatprep.mubr.bf16.mxu1 %v9267_v44 }
 0xf90   :  { %3850 = vmatpush1.bf16.msra.mxu0 %v8227_v19  ;;  %3891 = vmatpush1.bf16.msra.mxu1 %v8232_v21 }
 0xf91   :  { %3851 = vmatprep.subr.bf16.mxu0 %v8241_v25  ;;  %3892 = vmatprep.subr.bf16.mxu1 %v8251_v34 }
 0xf94   :  { %3852 = vmatpush1.bf16.msra.mxu0 %v8246_v23  ;;  %3893 = vmatpush1.bf16.msra.mxu1 %v8256_v50 }
 0xf95   :  { %3853 = vmatprep.subr.bf16.mxu0 %v8265_v51  ;;  %3894 = vmatprep.subr.bf16.mxu1 %v8270_v63 }
 0xf96   :  { %3523 = vmatmul.mubr.bf16.gmra.mrb[88].mxu0 %v3252_v12  ;;  %3596 = vmatmul.mubr.bf16.gmra.mrb[88].mxu1 %v3252_v12 }
 0xf97   :  { %3532 = vmatprep.mubr.bf16.mxu0 %v9267_v44  ;;  %3605 = vmatprep.mubr.bf16.mxu1 %v9267_v44 }
 0xf98   :  { %3854 = vmatpush1.bf16.msra.mxu0 %v8275_v3  ;;  %3895 = vmatpush1.bf16.msra.mxu1 %v8280_v54 }
 0xf99   :  { %3855 = vmatprep.subr.bf16.mxu0 %v8289_v36  ;;  %3896 = vmatprep.subr.bf16.mxu1 %v8299_v43 }
 0xf9c   :  { %3856 = vmatpush1.bf16.msra.mxu0 %v8294_v55  ;;  %3897 = vmatpush1.bf16.msra.mxu1 %v8304_v38 }
 0xf9d   :  { %3857 = vmatprep.subr.bf16.mxu0 %v8313_v37  ;;  %3898 = vmatprep.subr.bf16.mxu1 %v8318_v41 }
 0xfa0   :  { %3858 = vmatpush1.bf16.msra.mxu0 %v8323_v62  ;;  %3899 = vmatpush1.bf16.msra.mxu1 %v8328_v49 }
 0xfa1   :  { %3859 = vmatprep.subr.bf16.mxu0 %v8337_v60  ;;  %3900 = vmatprep.subr.bf16.mxu1 %v8347_v24 }
 0xfa4   :  { %3860 = vmatpush1.bf16.msra.mxu0 %v8342_v1  ;;  %3901 = vmatpush1.bf16.msra.mxu1 %v8352_v61 }
 0xfa5   :  { %3961 = vmatprep.subr.bf16.mxu0 %v8169_v28  ;;  %4002 = vmatprep.subr.bf16.mxu1 %v8174_v10 }
0x1039   :  { %v3161_v30 = vpop.f32.mrb[76].mxu0  ;;  %v3202_v56 = vpop.f32.mrb[76].mxu1 }
0x103a   :  { %v3209_v26 = vadd.f32 %v3161_v30, %v2009_v20  ;;  %v3211_v16 = vadd.f32 %v3202_v56, %v2082_v31  ;;  %v3163_v53 = vpop.f32.mrb[77].mxu0  ;;  %v3204_v32 = vpop.f32.mrb[77].mxu1 }
0x103b   :  { %v3210_v2 = vadd.f32 %v3163_v53, %v2011_v48  ;;  %v3212_v35 = vadd.f32 %v3204_v32, %v2084_v45  ;;  %v3165_v58 = vpop.f32.mrb[78].mxu0  ;;  %v3206_v33 = vpop.f32.mrb[78].mxu1 }
0x103c   :  { %v5187_v42 = vmul.f32 -1.442695, %v3209_v26  ;;  %v3166_v5 = vpop.f32.mrb[79].mxu0  ;;  %v3207_v6 = vpop.f32.mrb[79].mxu1 }
0x103d   :  { %v5188_v59 = vmul.f32 -1.442695, %v3210_v2  ;;  %v5189_v27 = vmul.f32 -1.442695, %v3212_v35 }
0x103e   :  { %5837 = vpow2.f32 %v5187_v42 }
0x103f   :  { %5839 = vpow2.f32 %v5188_v59 }
0x1040   :  { %5841 = vpow2.f32 %v5189_v27 }
0x1041   :  { %5843 = vtanh.f32 %v3211_v16 }
0x1048   :  { %v5838_v22 = vpop.eup %5837 }
0x1049   :  { %v5840_v8 = vpop.eup %5839  ;;  %v3216_v57 = vadd.f32 1.0, %v5838_v22 }
0x104a   :  { %v3222_v9 = vadd.f32 1.0, %v5840_v8  ;;  %v5842_v11 = vpop.eup %5841 }
0x104b   :  { %5845 = vrcp.f32 %v3216_v57  ;;  %v5844_v12 = vpop.eup %5843  ;;  %v3229_v31 = vadd.f32 1.0, %v5842_v11 }
0x104c   :  { %5847 = vrcp.f32 %v3222_v9 }
0x104d   :  { %5849 = vrcp.f32 %v3229_v31  ;;  %v5224_v31 = vld [vmem:[%s9126_s4 + $0x8] sm:$0xf] }
0x1055   :  { %v5846_v7 = vpop.eup %5845 }
0x1056   :  { %v5848_v20 = vpop.eup %5847  ;;  %v3233_v52 = vmul.f32 %v5846_v7, %v5844_v12 }
0x1057   :  { %v3232_v0 = vmul.f32 %v5848_v20, %v8055_v47  ;;  %v5850_v5 = vpop.eup %5849 }
0x1059   :  { %v3234_v48 = vadd.f32 %v3233_v52, %v3232_v0  ;;  %v8369_v29 = vpop.f32.mrb[80].mxu0  ;;  %v8371_v45 = vpop.f32.mrb[80].mxu1 }
0x105a   :  { %v8373_v30 = vpop.f32.mrb[81].mxu0  ;;  %v8375_v56 = vpop.f32.mrb[81].mxu1 }
0x105b   :  { %5191 = vst [vmem:[%s9128_s9 + $0x8] sm:$0xff] %v3234_v48  ;;  %v8380_v26 = vpop.f32.mrb[82].mxu0  ;;  %v8382_v16 = vpop.f32.mrb[82].mxu1  ;;  %5851 = vtanh.f32 %v3234_v48 }
0x105c   :  { %v8384_v47 = vpop.f32.mrb[83].mxu0  ;;  %v8386_v53 = vpop.f32.mrb[83].mxu1 }
0x1061   :  { %v8388_v32 = vpop.f32.mrb[84].mxu0  ;;  %v8390_v2 = vpop.f32.mrb[84].mxu1 }
0x1062   :  { %9429 = vst [vmem:[#allocation12_spill] sm:$0xff] %v8388_v32  ;;  %9430 = vst [vmem:[#allocation13_spill] sm:$0xff] %v8390_v2  ;;  %v8392_v35 = vpop.f32.mrb[85].mxu0  ;;  %v8394_v58 = vpop.f32.mrb[85].mxu1 }
0x1063   :  { %9431 = vst [vmem:[#allocation15_spill] sm:$0xff] %v8392_v35  ;;  %9432 = vst [vmem:[#allocation16_spill] sm:$0xff] %v8394_v58  ;;  %v8396_v33 = vpop.f32.mrb[86].mxu0  ;;  %v8398_v42 = vpop.f32.mrb[86].mxu1 }
0x1064   :  { %9433 = vst [vmem:[#allocation19_spill] sm:$0xff] %v8396_v33  ;;  %9434 = vst [vmem:[#allocation18_spill] sm:$0xff] %v8398_v42  ;;  %v8400_v6 = vpop.f32.mrb[87].mxu0  ;;  %v8402_v59 = vpop.f32.mrb[87].mxu1 }
0x1065   :  { %9435 = vst [vmem:[#allocation20_spill] sm:$0xff] %v8400_v6  ;;  %9436 = vst [vmem:[#allocation23_spill] sm:$0xff] %v8402_v59  ;;  %v5852_v27 = vpop.eup %5851 }
0x1066   :  { %v3236_v22 = vmul.f32 %v5852_v27, %v5850_v5 }
0x1068   :  { %5190 = vst [vmem:[%s9129_s8 + $0x8] sm:$0xff] %v3236_v22  ;;  %v3253_v8 = vpack.c.bf16 %v3236_v22, %v8058_v39 }
0x1069   :  { %v8408_v57 = vpop.f32.mrb[88].mxu0  ;;  %v8410_v9 = vpop.f32.mrb[88].mxu1 }
0x106a   :  { %9437 = vst [vmem:[#allocation24_spill] sm:$0xff] %v8408_v57  ;;  %9438 = vst [vmem:[#allocation22_spill] sm:$0xff] %v8410_v9  ;;  %v8412_v11 = vpop.f32.mrb[89].mxu0  ;;  %v8414_v12 = vpop.f32.mrb[89].mxu1  ;;  %3533 = vmatmul.mubr.bf16.gmra.mrb[92].mxu0 %v3253_v8  ;;  %3606 = vmatmul.mubr.bf16.gmra.mrb[92].mxu1 %v3253_v8 }
0x106b   :  { %9439 = vst [vmem:[#allocation26_spill] sm:$0xff] %v8412_v11  ;;  %9440 = vst [vmem:[#allocation28_spill] sm:$0xff] %v8414_v12  ;;  %v8416_v7 = vpop.f32.mrb[90].mxu0  ;;  %v8418_v20 = vpop.f32.mrb[90].mxu1  ;;  %3877 = vmatprep.mubr.bf16.mxu0 %v9267_v44  ;;  %3918 = vmatprep.mubr.bf16.mxu1 %v9267_v44 }
0x106c   :  { %9441 = vst [vmem:[#allocation25_spill] sm:$0xff] %v8416_v7  ;;  %9442 = vst [vmem:[#allocation29_spill] sm:$0xff] %v8418_v20  ;;  %v8422_v52 = vpop.f32.mrb[91].mxu0  ;;  %v8424_v39 = vpop.f32.mrb[91].mxu1  ;;  %v9453_v20 = vld [vmem:[#allocation17_spill] sm:$0xff] }
0x106d   :  { %9443 = vst [vmem:[#allocation21_spill] sm:$0xff] %v8422_v52  ;;  %9444 = vst [vmem:[#allocation27_spill] sm:$0xff] %v8424_v39  ;;  %v9451_v39 = vld [vmem:[#allocation8_spill] sm:$0xff]  ;;  %v8481_v7 = vrot.slane %v5224_v31, %v9453_v20 }
0x106e   :  { %v8478_v52 = vrot.slane %v5224_v31, %v9451_v39 }
0x106f   :  { %9454 = vst [vmem:[#allocation8_spill] sm:$0xff] %v8481_v7  ;;  %v3578_v39 = vadd.f32 %v8371_v45, %v8481_v7 }
0x1070   :  { %9452 = vst [vmem:[#allocation4_spill] sm:$0xff] %v8478_v52 }
0x1072   :  { %3878 = vmatmul.mubr.bf16.vlgmr.msra.gmra.mrb[96].mxu0 %v9267_v44  ;;  %3919 = vmatmul.mubr.bf16.vlgmr.msra.gmra.mrb[96].mxu1 %v9267_v44 }
0x1073   :  { %3962 = vmatpush1.bf16.msra.mxu0 %v8179_v40  ;;  %4003 = vmatpush1.bf16.msra.mxu1 %v8184_v46 }
0x1074   :  { %3963 = vmatprep.subr.bf16.mxu0 %v8193_v4  ;;  %4004 = vmatprep.subr.bf16.mxu1 %v8198_v18 }
0x1075   :  { %3993 = vmatprep.mubr.bf16.mxu0 %v9267_v44  ;;  %4034 = vmatprep.mubr.bf16.mxu1 %v9267_v44 }
0x1077   :  { %3964 = vmatpush1.bf16.msra.mxu0 %v8203_v13  ;;  %4005 = vmatpush1.bf16.msra.mxu1 %v8208_v14 }
0x1078   :  { %3965 = vmatprep.subr.bf16.mxu0 %v8217_v15  ;;  %4006 = vmatprep.subr.bf16.mxu1 %v8222_v17 }
0x107b   :  { %3966 = vmatpush1.bf16.msra.mxu0 %v8227_v19  ;;  %4007 = vmatpush1.bf16.msra.mxu1 %v8232_v21 }
0x107c   :  { %3967 = vmatprep.subr.bf16.mxu0 %v8241_v25  ;;  %4008 = vmatprep.subr.bf16.mxu1 %v8251_v34 }
0x107f   :  { %3968 = vmatpush1.bf16.msra.mxu0 %v8246_v23  ;;  %4009 = vmatpush1.bf16.msra.mxu1 %v8256_v50 }
0x1080   :  { %3969 = vmatprep.subr.bf16.mxu0 %v8265_v51  ;;  %4010 = vmatprep.subr.bf16.mxu1 %v8270_v63 }
0x1083   :  { %3970 = vmatpush1.bf16.msra.mxu0 %v8275_v3  ;;  %4011 = vmatpush1.bf16.msra.mxu1 %v8280_v54 }
0x1084   :  { %3971 = vmatprep.subr.bf16.mxu0 %v8289_v36  ;;  %4012 = vmatprep.subr.bf16.mxu1 %v8299_v43 }
0x1087   :  { %3972 = vmatpush1.bf16.msra.mxu0 %v8294_v55  ;;  %4013 = vmatpush1.bf16.msra.mxu1 %v8304_v38 }
0x1088   :  { %3973 = vmatprep.subr.bf16.mxu0 %v8313_v37  ;;  %4014 = vmatprep.subr.bf16.mxu1 %v8318_v41 }
0x108b   :  { %3974 = vmatpush1.bf16.msra.mxu0 %v8323_v62  ;;  %4015 = vmatpush1.bf16.msra.mxu1 %v8328_v49 }
0x108c   :  { %3975 = vmatprep.subr.bf16.mxu0 %v8337_v60  ;;  %4016 = vmatprep.subr.bf16.mxu1 %v8347_v24 }
0x108f   :  { %3976 = vmatpush1.bf16.msra.mxu0 %v8342_v1  ;;  %4017 = vmatpush1.bf16.msra.mxu1 %v8352_v61 }
0x1090   :  { %4077 = vmatprep.subr.bf16.mxu0 %v8169_v28  ;;  %4118 = vmatprep.subr.bf16.mxu1 %v8174_v10 }
0x113d   :  { %v8465_v0 = vpop.f32.mrb[92].mxu0  ;;  %v8467_v48 = vpop.f32.mrb[92].mxu1 }
0x113e   :  { %9445 = vst [vmem:[#allocation5_spill] sm:$0xff] %v8465_v0  ;;  %9446 = vst [vmem:[#allocation31_spill] sm:$0xff] %v8467_v48  ;;  %v8469_v5 = vpop.f32.mrb[93].mxu0  ;;  %v8471_v27 = vpop.f32.mrb[93].mxu1  ;;  %v9457_v0 = vld [vmem:[#allocation9_spill] sm:$0xff] }
0x113f   :  { %9447 = vst [vmem:[#allocation10_spill] sm:$0xff] %v8469_v5  ;;  %9448 = vst [vmem:[#allocation30_spill] sm:$0xff] %v8471_v27  ;;  %v8473_v22 = vpop.f32.mrb[94].mxu0  ;;  %v8475_v8 = vpop.f32.mrb[94].mxu1  ;;  %v8488_v48 = vrot.slane %v5224_v31, %v9457_v0  ;;  %v9459_v5 = vld [vmem:[#allocation14_spill] sm:$0xff] }
0x1140   :  { %9449 = vst [vmem:[#allocation11_spill] sm:$0xff] %v8473_v22  ;;  %9450 = vst [vmem:[#allocation7_spill] sm:$0xff] %v8475_v8  ;;  %v8483_v12 = vpop.f32.mrb[95].mxu0  ;;  %v8485_v11 = vpop.f32.mrb[95].mxu1  ;;  %v8491_v9 = vrot.slane %v5224_v31, %v9459_v5  ;;  %v3505_v22 = vadd.f32 %v8369_v29, %v8478_v52 }
0x1141   :  { %9455 = vst [vmem:[#allocation17_spill] sm:$0xff] %v8483_v12  ;;  %9456 = vst [vmem:[#allocation32_spill] sm:$0xff] %v8485_v11  ;;  %v3507_v20 = vadd.f32 %v8373_v30, %v8488_v48 }
0x1142   :  { %9458 = vst [vmem:[#allocation9_spill] sm:$0xff] %v8488_v48  ;;  %v3580_v12 = vadd.f32 %v8375_v56, %v8491_v9 }
0x1145   :  { %v3879_v8 = vpop.f32.mrb[96].mxu0  ;;  %v3920_v11 = vpop.f32.mrb[96].mxu1 }
0x1146   :  { %v3927_v27 = vadd.f32 %v3879_v8, %v3505_v22  ;;  %v3929_v0 = vadd.f32 %v3920_v11, %v3578_v39  ;;  %v3881_v57 = vpop.f32.mrb[97].mxu0  ;;  %v3922_v59 = vpop.f32.mrb[97].mxu1 }
0x1147   :  { %v3928_v31 = vadd.f32 %v3881_v57, %v3507_v20  ;;  %v3930_v5 = vadd.f32 %v3922_v59, %v3580_v12  ;;  %v3883_v6 = vpop.f32.mrb[98].mxu0  ;;  %v3924_v42 = vpop.f32.mrb[98].mxu1 }
0x1148   :  { %v5321_v29 = vmul.f32 -1.442695, %v3927_v27  ;;  %v3884_v33 = vpop.f32.mrb[99].mxu0  ;;  %v3925_v58 = vpop.f32.mrb[99].mxu1 }
0x1149   :  { %v5322_v45 = vmul.f32 -1.442695, %v3928_v31  ;;  %v5323_v30 = vmul.f32 -1.442695, %v3930_v5  ;;  %v8522_v5 = vld [vmem:[%s9130_s5 + $0x2] ss:$0 sm:$0xff] }
0x114a   :  { %5853 = vpow2.f32 %v5321_v29 }
0x114b   :  { %5855 = vpow2.f32 %v5322_v45  ;;  %v8534_v45 = vld [vmem:[%s9130_s5 + $0x3] ss:$0 sm:$0xff] }
0x114c   :  { %5857 = vpow2.f32 %v5323_v30 }
0x114d   :  { %5859 = vtanh.f32 %v3929_v0  ;;  %v8513_v0 = vld [vmem:[%s9130_s5 + $0x1] ss:$0 sm:$0xff] }
0x1154   :  { %v5854_v35 = vpop.eup %5853 }
0x1155   :  { %v5856_v2 = vpop.eup %5855  ;;  %v3934_v56 = vadd.f32 1.0, %v5854_v35 }
0x1156   :  { %v3940_v22 = vadd.f32 1.0, %v5856_v2  ;;  %v5858_v11 = vpop.eup %5857  ;;  %v8507_v2 = vld [vmem:[%s9130_s5] ss:$0 sm:$0xff] }
0x1157   :  { %5861 = vrcp.f32 %v3934_v56  ;;  %v5860_v57 = vpop.eup %5859  ;;  %v3947_v12 = vadd.f32 1.0, %v5858_v11  ;;  %v3511_v11 = vadd.f32 %v8384_v47, %v8488_v48 }
0x1158   :  { %5863 = vrcp.f32 %v3940_v22  ;;  %v6083_v22 = vmov 0.0  }
0x1159   :  { %5865 = vrcp.f32 %v3947_v12 }
0x1161   :  { %v5862_v59 = vpop.eup %5861 }
0x1162   :  { %v5864_v6 = vpop.eup %5863  ;;  %v3951_v42 = vmul.f32 %v5862_v59, %v5860_v57  ;;  %v8564_v57 = vsel %vm186_vm3, 1.0, %v6083_v22 }
0x1163   :  { %v3950_v33 = vmul.f32 0.0, %v5864_v6  ;;  %v5866_v27 = vpop.eup %5865  ;;  %v8568_v6 = vsel %vm66_vm0, 1.0, %v6083_v22 }
0x1165   :  { %v8501_v58 = vadd.f32 %v3951_v42, %v3950_v33  ;;  %v8572_v42 = vsel %vm306_vm2, 1.0, %v6083_v22 }
0x1166   :  { %9461 = vst [vmem:[#allocation14_spill] sm:$0xff] %v8572_v42 }
0x1167   :  { %5867 = vtanh.f32 %v8501_v58 }
0x1171   :  { %v5868_v8 = vpop.eup %5867 }
0x1172   :  { %v3954_v35 = vmul.f32 %v5868_v8, %v5866_v27 }
0x1174   :  { %v4787_v39 = vmul.f32 %v8507_v2, %v3954_v35  ;;  %v3960_v20 = vpack.c.bf16 %v3954_v35, %v3954_v35  ;;  %v4836_v31 = vmul.f32 %v8513_v0, %v3954_v35  ;;  %v4885_v29 = vmul.f32 %v8522_v5, %v3954_v35 }
0x1175   :  { %v4934_v30 = vmul.f32 %v8534_v45, %v3954_v35  ;;  %v8579_v35 = vsel %vm426_vm4, 1.0, %v6083_v22  ;;  %v3582_v22 = vadd.f32 %v8382_v16, %v8481_v7 }
0x1176   :  { %4795 = vadd.xlane.f32.xlu0 %v4787_v39  ;;  %3994 = vmatmul.mubr.bf16.vlgmr.msra.gmra.mrb[100].mxu0 %v3960_v20  ;;  %9462 = vst [vmem:[#allocation6_spill] sm:$0xff] %v8579_v35 }
0x1177   :  { %4035 = vmatmul.mubr.bf16.vlgmr.msra.gmra.mrb[100].mxu1 %v3960_v20  ;;  %4078 = vmatpush1.bf16.msra.mxu0 %v8179_v40 }
0x1178   :  { %4119 = vmatpush1.bf16.msra.mxu1 %v8184_v46  ;;  %4079 = vmatprep.subr.bf16.mxu0 %v8193_v4 }
0x1179   :  { %4120 = vmatprep.subr.bf16.mxu1 %v8198_v18  ;;  %4109 = vmatprep.mubr.bf16.mxu0 %v9267_v44 }
0x117a   :  { %4844 = vadd.xlane.f32.xlu0 %v4836_v31  ;;  %4150 = vmatprep.mubr.bf16.mxu1 %v9267_v44 }
0x117b   :  { %4080 = vmatpush1.bf16.msra.mxu0 %v8203_v13 }
0x117c   :  { %4121 = vmatpush1.bf16.msra.mxu1 %v8208_v14  ;;  %4081 = vmatprep.subr.bf16.mxu0 %v8217_v15 }
0x117d   :  { %4122 = vmatprep.subr.bf16.mxu1 %v8222_v17 }
0x117e   :  { %4893 = vadd.xlane.f32.xlu0 %v4885_v29 }
0x117f   :  { %4082 = vmatpush1.bf16.msra.mxu0 %v8227_v19 }
0x1180   :  { %4123 = vmatpush1.bf16.msra.mxu1 %v8232_v21  ;;  %4083 = vmatprep.subr.bf16.mxu0 %v8241_v25 }
0x1181   :  { %4124 = vmatprep.subr.bf16.mxu1 %v8251_v34 }
0x1182   :  { %4942 = vadd.xlane.f32.xlu0 %v4934_v30  ;;  %v8585_v30 = vld [vmem:[%s9131_s6] ss:$0 sm:$0xff] }
0x1183   :  { %4084 = vmatpush1.bf16.msra.mxu0 %v8246_v23  ;;  %9463 = vst [vmem:[#allocation33_spill] sm:$0xff] %v8585_v30 }
0x1184   :  { %4125 = vmatpush1.bf16.msra.mxu1 %v8256_v50  ;;  %4085 = vmatprep.subr.bf16.mxu0 %v8265_v51 }
0x1185   :  { %4126 = vmatprep.subr.bf16.mxu1 %v8270_v63 }
0x1187   :  { %4086 = vmatpush1.bf16.msra.mxu0 %v8275_v3 }
0x1188   :  { %4127 = vmatpush1.bf16.msra.mxu1 %v8280_v54  ;;  %4087 = vmatprep.subr.bf16.mxu0 %v8289_v36 }
0x1189   :  { %4128 = vmatprep.subr.bf16.mxu1 %v8299_v43 }
0x118b   :  { %4088 = vmatpush1.bf16.msra.mxu0 %v8294_v55 }
0x118c   :  { %4129 = vmatpush1.bf16.msra.mxu1 %v8304_v38  ;;  %4089 = vmatprep.subr.bf16.mxu0 %v8313_v37 }
0x118d   :  { %4130 = vmatprep.subr.bf16.mxu1 %v8318_v41 }
0x118f   :  { %4090 = vmatpush1.bf16.msra.mxu0 %v8323_v62 }
0x1190   :  { %4131 = vmatpush1.bf16.msra.mxu1 %v8328_v49  ;;  %4091 = vmatprep.subr.bf16.mxu0 %v8337_v60 }
0x1191   :  { %4132 = vmatprep.subr.bf16.mxu1 %v8347_v24 }
0x1193   :  { %4092 = vmatpush1.bf16.msra.mxu0 %v8342_v1 }
0x1194   :  { %4133 = vmatpush1.bf16.msra.mxu1 %v8352_v61  ;;  %4193 = vmatprep.subr.bf16.mxu0 %v8169_v28 }
0x1195   :  { %4234 = vmatprep.subr.bf16.mxu1 %v8174_v10 }
0x1203   :  { %v4796_v56 = vpop.xlane.xlu0 %4795 }
0x1204   :  { %v4812_v27 = vmul.f32 %v8568_v6, %v4796_v56  ;;  %v3509_v56 = vadd.f32 %v8380_v26, %v8478_v52 }
0x1207   :  { %v4845_v59 = vpop.xlane.xlu0 %4844 }
0x1208   :  { %v4861_v12 = vmul.f32 %v8564_v57, %v4845_v59 }
0x120a   :  { %v4869_v39 = vadd.f32 %v4861_v12, %v4812_v27 }
0x120b   :  { %v4894_v33 = vpop.xlane.xlu0 %4893 }
0x120c   :  { %v4910_v8 = vmul.f32 %v8572_v42, %v4894_v33  ;;  %v3584_v33 = vadd.f32 %v8386_v53, %v8491_v9 }
0x120e   :  { %v4918_v31 = vadd.f32 %v4910_v8, %v4869_v39 }
0x120f   :  { %v4943_v20 = vpop.xlane.xlu0 %4942 }
0x1210   :  { %v4959_v29 = vmul.f32 %v8579_v35, %v4943_v20 }
0x1212   :  { %v4967_v59 = vadd.f32 %v4959_v29, %v4918_v31 }
0x1214   :  { %v4982_v32 = vadd.f32 %v8585_v30, %v4967_v59 }
0x1216   :  { %4990 = vst.msk [vmem:[%s9132_s7] sm:$0xff] %vm75_vm1, %v4982_v32 }
0x1249   :  { %v3995_v12 = vpop.f32.mrb[100].mxu0 }
0x124a   :  { %v4043_v27 = vadd.f32 %v3995_v12, %v3509_v56  ;;  %v4036_v8 = vpop.f32.mrb[100].mxu1  ;;  %v3997_v39 = vpop.f32.mrb[101].mxu0 }
0x124b   :  { %v4045_v20 = vadd.f32 %v4036_v8, %v3582_v22  ;;  %v4044_v31 = vadd.f32 %v3997_v39, %v3511_v11  ;;  %v4038_v29 = vpop.f32.mrb[101].mxu1  ;;  %v3999_v32 = vpop.f32.mrb[102].mxu0 }
0x124c   :  { %v5324_v59 = vmul.f32 -1.442695, %v4043_v27  ;;  %v4046_v30 = vadd.f32 %v4038_v29, %v3584_v33  ;;  %v4040_v26 = vpop.f32.mrb[102].mxu1  ;;  %v4000_v52 = vpop.f32.mrb[103].mxu0 }
0x124d   :  { %v5325_v35 = vmul.f32 -1.442695, %v4044_v31  ;;  %v4041_v16 = vpop.f32.mrb[103].mxu1 }
0x124e   :  { %5869 = vpow2.f32 %v5324_v59  ;;  %v5326_v47 = vmul.f32 -1.442695, %v4046_v30  ;;  %v9464_v16 = vld [vmem:[#allocation14_spill] sm:$0xff] }
0x124f   :  { %5871 = vpow2.f32 %v5325_v35 }
0x1250   :  { %5873 = vpow2.f32 %v5326_v47 }
0x1251   :  { %5875 = vtanh.f32 %v4045_v20 }
0x1258   :  { %v5870_v48 = vpop.eup %5869 }
0x1259   :  { %v5872_v7 = vpop.eup %5871  ;;  %v4050_v42 = vadd.f32 1.0, %v5870_v48 }
0x125a   :  { %v4056_v53 = vadd.f32 1.0, %v5872_v7  ;;  %v5874_v56 = vpop.eup %5873 }
0x125b   :  { %5877 = vrcp.f32 %v4050_v42  ;;  %v5876_v22 = vpop.eup %5875  ;;  %v4063_v27 = vadd.f32 1.0, %v5874_v56 }
0x125c   :  { %5879 = vrcp.f32 %v4056_v53 }
0x125d   :  { %5881 = vrcp.f32 %v4063_v27  ;;  %v9466_v27 = vld [vmem:[#allocation33_spill] sm:$0xff] }
0x1265   :  { %v5878_v11 = vpop.eup %5877 }
0x1266   :  { %v5880_v12 = vpop.eup %5879  ;;  %v4067_v33 = vmul.f32 %v5878_v11, %v5876_v22  ;;  %v9465_v11 = vld [vmem:[#allocation6_spill] sm:$0xff] }
0x1267   :  { %v4066_v52 = vmul.f32 %v5880_v12, %v8501_v58  ;;  %v5882_v35 = vpop.eup %5881 }
0x1269   :  { %v8601_v8 = vadd.f32 %v4067_v33, %v4066_v52 }
0x126b   :  { %5883 = vtanh.f32 %v8601_v8 }
0x1275   :  { %v5884_v48 = vpop.eup %5883 }
0x1276   :  { %v4070_v30 = vmul.f32 %v5884_v48, %v5882_v35  ;;  %v9467_v35 = vld [vmem:[#allocation4_spill] sm:$0xff] }
0x1277   :  { %v9468_v48 = vld [vmem:[#allocation12_spill] sm:$0xff] }
0x1278   :  { %v4788_v7 = vmul.f32 %v8507_v2, %v4070_v30  ;;  %v4076_v42 = vpack.c.bf16 %v4070_v30, %v4070_v30  ;;  %v4837_v39 = vmul.f32 %v8513_v0, %v4070_v30  ;;  %v4886_v58 = vmul.f32 %v8522_v5, %v4070_v30 }
0x1279   :  { %v4935_v20 = vmul.f32 %v8534_v45, %v4070_v30  ;;  %v3515_v30 = vadd.f32 %v9468_v48, %v9467_v35 }
0x127a   :  { %4797 = vadd.xlane.f32.xlu1 %v4788_v7  ;;  %4110 = vmatmul.mubr.bf16.vlgmr.msra.gmra.mrb[104].mxu0 %v4076_v42  ;;  %v9469_v7 = vld [vmem:[#allocation8_spill] sm:$0xff] }
0x127b   :  { %4151 = vmatmul.mubr.bf16.vlgmr.msra.gmra.mrb[104].mxu1 %v4076_v42  ;;  %4194 = vmatpush1.bf16.msra.mxu0 %v8179_v40  ;;  %v9470_v42 = vld [vmem:[#allocation13_spill] sm:$0xff] }
0x127c   :  { %4235 = vmatpush1.bf16.msra.mxu1 %v8184_v46  ;;  %4195 = vmatprep.subr.bf16.mxu0 %v8193_v4 }
0x127d   :  { %4236 = vmatprep.subr.bf16.mxu1 %v8198_v18  ;;  %4225 = vmatprep.mubr.bf16.mxu0 %v9267_v44 }
0x127e   :  { %4846 = vadd.xlane.f32.xlu1 %v4837_v39  ;;  %4266 = vmatprep.mubr.bf16.mxu1 %v9267_v44  ;;  %v3588_v39 = vadd.f32 %v9470_v42, %v9469_v7 }
0x127f   :  { %4196 = vmatpush1.bf16.msra.mxu0 %v8203_v13 }
0x1280   :  { %4237 = vmatpush1.bf16.msra.mxu1 %v8208_v14  ;;  %4197 = vmatprep.subr.bf16.mxu0 %v8217_v15 }
0x1281   :  { %4238 = vmatprep.subr.bf16.mxu1 %v8222_v17 }
0x1282   :  { %4895 = vadd.xlane.f32.xlu1 %v4886_v58  ;;  %v9471_v58 = vld [vmem:[#allocation9_spill] sm:$0xff] }
0x1283   :  { %4198 = vmatpush1.bf16.msra.mxu0 %v8227_v19 }
0x1284   :  { %4239 = vmatpush1.bf16.msra.mxu1 %v8232_v21  ;;  %4199 = vmatprep.subr.bf16.mxu0 %v8241_v25 }
0x1285   :  { %4240 = vmatprep.subr.bf16.mxu1 %v8251_v34 }
0x1286   :  { %4944 = vadd.xlane.f32.xlu1 %v4935_v20  ;;  %v9472_v20 = vld [vmem:[#allocation15_spill] sm:$0xff] }
0x1287   :  { %4200 = vmatpush1.bf16.msra.mxu0 %v8246_v23 }
0x1288   :  { %4241 = vmatpush1.bf16.msra.mxu1 %v8256_v50  ;;  %4201 = vmatprep.subr.bf16.mxu0 %v8265_v51 }
0x1289   :  { %4242 = vmatprep.subr.bf16.mxu1 %v8270_v63 }
0x128b   :  { %4202 = vmatpush1.bf16.msra.mxu0 %v8275_v3 }
0x128c   :  { %4243 = vmatpush1.bf16.msra.mxu1 %v8280_v54  ;;  %4203 = vmatprep.subr.bf16.mxu0 %v8289_v36 }
0x128d   :  { %4244 = vmatprep.subr.bf16.mxu1 %v8299_v43 }
0x128f   :  { %4204 = vmatpush1.bf16.msra.mxu0 %v8294_v55 }
0x1290   :  { %4245 = vmatpush1.bf16.msra.mxu1 %v8304_v38  ;;  %4205 = vmatprep.subr.bf16.mxu0 %v8313_v37 }
0x1291   :  { %4246 = vmatprep.subr.bf16.mxu1 %v8318_v41 }
0x1293   :  { %4206 = vmatpush1.bf16.msra.mxu0 %v8323_v62 }
0x1294   :  { %4247 = vmatpush1.bf16.msra.mxu1 %v8328_v49  ;;  %4207 = vmatprep.subr.bf16.mxu0 %v8337_v60 }
0x1295   :  { %4248 = vmatprep.subr.bf16.mxu1 %v8347_v24 }
0x1297   :  { %4208 = vmatpush1.bf16.msra.mxu0 %v8342_v1 }
0x1298   :  { %4249 = vmatpush1.bf16.msra.mxu1 %v8352_v61  ;;  %4309 = vmatprep.subr.bf16.mxu0 %v8169_v28 }
0x1299   :  { %4350 = vmatprep.subr.bf16.mxu1 %v8174_v10 }
0x1307   :  { %v4798_v31 = vpop.xlane.xlu1 %4797 }
0x1308   :  { %v4813_v26 = vmul.f32 %v8568_v6, %v4798_v31  ;;  %v3517_v31 = vadd.f32 %v9472_v20, %v9471_v58 }
0x130b   :  { %v4847_v29 = vpop.xlane.xlu1 %4846 }
0x130c   :  { %v4862_v32 = vmul.f32 %v8564_v57, %v4847_v29 }
0x130e   :  { %v4870_v53 = vadd.f32 %v4862_v32, %v4813_v26  ;;  %v9473_v32 = vld [vmem:[#allocation16_spill] sm:$0xff] }
0x130f   :  { %v4896_v59 = vpop.xlane.xlu1 %4895 }
0x1310   :  { %v4911_v47 = vmul.f32 %v9464_v16, %v4896_v59  ;;  %v3590_v59 = vadd.f32 %v9473_v32, %v8491_v9 }
0x1312   :  { %v4919_v22 = vadd.f32 %v4911_v47, %v4870_v53 }
0x1313   :  { %v4945_v56 = vpop.xlane.xlu1 %4944 }
0x1314   :  { %v4960_v12 = vmul.f32 %v9465_v11, %v4945_v56 }
0x1316   :  { %v4968_v33 = vadd.f32 %v4960_v12, %v4919_v22 }
0x1318   :  { %v4983_v52 = vadd.f32 %v9466_v27, %v4968_v33 }
0x131a   :  { %4991 = vst.msk [vmem:[%s9132_s7 + $0x8] sm:$0xff] %vm75_vm1, %v4983_v52 }
0x134d   :  { %v4111_v29 = vpop.f32.mrb[104].mxu0 }
0x134e   :  { %v4159_v26 = vadd.f32 %v4111_v29, %v3515_v30  ;;  %v4152_v47 = vpop.f32.mrb[104].mxu1  ;;  %v4113_v53 = vpop.f32.mrb[105].mxu0 }
0x134f   :  { %v4161_v56 = vadd.f32 %v4152_v47, %v3588_v39  ;;  %v4160_v22 = vadd.f32 %v4113_v53, %v3517_v31  ;;  %v4154_v12 = vpop.f32.mrb[105].mxu1  ;;  %v4115_v33 = vpop.f32.mrb[106].mxu0 }
0x1350   :  { %v5327_v52 = vmul.f32 -1.442695, %v4159_v26  ;;  %v4162_v27 = vadd.f32 %v4154_v12, %v3590_v59  ;;  %v4156_v48 = vpop.f32.mrb[106].mxu1  ;;  %v4116_v35 = vpop.f32.mrb[107].mxu0 }
0x1351   :  { %v5328_v11 = vmul.f32 -1.442695, %v4160_v22  ;;  %v4157_v42 = vpop.f32.mrb[107].mxu1 }
0x1352   :  { %5885 = vpow2.f32 %v5327_v52  ;;  %v5329_v20 = vmul.f32 -1.442695, %v4162_v27 }
0x1353   :  { %5887 = vpow2.f32 %v5328_v11 }
0x1354   :  { %5889 = vpow2.f32 %v5329_v20 }
0x1355   :  { %5891 = vtanh.f32 %v4161_v56 }
0x135c   :  { %v5886_v58 = vpop.eup %5885 }
0x135d   :  { %v5888_v7 = vpop.eup %5887  ;;  %v4166_v16 = vadd.f32 1.0, %v5886_v58 }
0x135e   :  { %v4172_v30 = vadd.f32 1.0, %v5888_v7  ;;  %v5890_v39 = vpop.eup %5889 }
0x135f   :  { %5893 = vrcp.f32 %v4166_v16  ;;  %v5892_v31 = vpop.eup %5891  ;;  %v4179_v26 = vadd.f32 1.0, %v5890_v39 }
0x1360   :  { %5895 = vrcp.f32 %v4172_v30 }
0x1361   :  { %5897 = vrcp.f32 %v4179_v26 }
0x1369   :  { %v5894_v29 = vpop.eup %5893 }
0x136a   :  { %v5896_v32 = vpop.eup %5895  ;;  %v4183_v59 = vmul.f32 %v5894_v29, %v5892_v31 }
0x136b   :  { %v4182_v35 = vmul.f32 %v5896_v32, %v8601_v8  ;;  %v5898_v11 = vpop.eup %5897 }
0x136d   :  { %v8660_v47 = vadd.f32 %v4183_v59, %v4182_v35 }
0x136f   :  { %5899 = vtanh.f32 %v8660_v47 }
0x1379   :  { %v5900_v27 = vpop.eup %5899 }
0x137a   :  { %v4186_v58 = vmul.f32 %v5900_v27, %v5898_v11 }
0x137c   :  { %v4789_v7 = vmul.f32 %v8507_v2, %v4186_v58  ;;  %v4192_v16 = vpack.c.bf16 %v4186_v58, %v4186_v58  ;;  %v4838_v53 = vmul.f32 %v8513_v0, %v4186_v58  ;;  %v4887_v8 = vmul.f32 %v8522_v5, %v4186_v58 }
0x137e   :  { %4799 = vadd.xlane.f32.xlu0 %v4789_v7  ;;  %4226 = vmatmul.mubr.bf16.vlgmr.msra.gmra.mrb[108].mxu0 %v4192_v16 }
0x137f   :  { %4267 = vmatmul.mubr.bf16.vlgmr.msra.gmra.mrb[108].mxu1 %v4192_v16  ;;  %4310 = vmatpush1.bf16.msra.mxu0 %v8179_v40  ;;  %v4936_v40 = vmul.f32 %v8534_v45, %v4186_v58 }
0x1380   :  { %4351 = vmatpush1.bf16.msra.mxu1 %v8184_v46  ;;  %4311 = vmatprep.subr.bf16.mxu0 %v8193_v4 }
0x1381   :  { %4352 = vmatprep.subr.bf16.mxu1 %v8198_v18  ;;  %4341 = vmatprep.mubr.bf16.mxu0 %v9267_v44 }
0x1382   :  { %4848 = vadd.xlane.f32.xlu0 %v4838_v53  ;;  %4382 = vmatprep.mubr.bf16.mxu1 %v9267_v44 }
0x1383   :  { %4312 = vmatpush1.bf16.msra.mxu0 %v8203_v13 }
0x1384   :  { %4353 = vmatpush1.bf16.msra.mxu1 %v8208_v14  ;;  %4313 = vmatprep.subr.bf16.mxu0 %v8217_v15  ;;  %v9474_v15 = vld [vmem:[#allocation14_spill] sm:$0xff] }
0x1385   :  { %4354 = vmatprep.subr.bf16.mxu1 %v8222_v17 }
0x1386   :  { %4897 = vadd.xlane.f32.xlu0 %v4887_v8 }
0x1387   :  { %4314 = vmatpush1.bf16.msra.mxu0 %v8227_v19 }
0x1388   :  { %4355 = vmatpush1.bf16.msra.mxu1 %v8232_v21  ;;  %4315 = vmatprep.subr.bf16.mxu0 %v8241_v25 }
0x1389   :  { %4356 = vmatprep.subr.bf16.mxu1 %v8251_v34 }
0x138a   :  { %4946 = vadd.xlane.f32.xlu0 %v4936_v40 }
0x138b   :  { %4316 = vmatpush1.bf16.msra.mxu0 %v8246_v23  ;;  %v9475_v23 = vld [vmem:[#allocation6_spill] sm:$0xff] }
0x138c   :  { %4357 = vmatpush1.bf16.msra.mxu1 %v8256_v50  ;;  %4317 = vmatprep.subr.bf16.mxu0 %v8265_v51  ;;  %v9476_v51 = vld [vmem:[#allocation33_spill] sm:$0xff] }
0x138d   :  { %4358 = vmatprep.subr.bf16.mxu1 %v8270_v63 }
0x138f   :  { %4318 = vmatpush1.bf16.msra.mxu0 %v8275_v3 }
0x1390   :  { %4359 = vmatpush1.bf16.msra.mxu1 %v8280_v54  ;;  %4319 = vmatprep.subr.bf16.mxu0 %v8289_v36  ;;  %v9479_v54 = vld [vmem:[#allocation8_spill] sm:$0xff]  ;;  %v9480_v36 = vld [vmem:[#allocation18_spill] sm:$0xff] }
0x1391   :  { %4360 = vmatprep.subr.bf16.mxu1 %v8299_v43  ;;  %v9481_v43 = vld [vmem:[#allocation9_spill] sm:$0xff] }
0x1393   :  { %4320 = vmatpush1.bf16.msra.mxu0 %v8294_v55  ;;  %v3592_v55 = vadd.f32 %v9480_v36, %v9479_v54  ;;  %v8785_v36 = vld [vmem:[%s9123_s3 + $0x248] ss:$16 sps:$4 sm:$0xff]  }
0x1394   :  { %4361 = vmatpush1.bf16.msra.mxu1 %v8304_v38  ;;  %4321 = vmatprep.subr.bf16.mxu0 %v8313_v37  ;;  %v9482_v38 = vld [vmem:[#allocation20_spill] sm:$0xff] }
0x1395   :  { %4362 = vmatprep.subr.bf16.mxu1 %v8318_v41  ;;  %v3521_v37 = vadd.f32 %v9482_v38, %v9481_v43  ;;  %v8797_v38 = vld [vmem:[%s9123_s3 + $0x26c] ss:$16 sps:$4 sm:$0xff]  }
0x1397   :  { %4322 = vmatpush1.bf16.msra.mxu0 %v8323_v62  ;;  %v9483_v62 = vld [vmem:[#allocation23_spill] sm:$0xff] }
0x1398   :  { %4363 = vmatpush1.bf16.msra.mxu1 %v8328_v49  ;;  %4323 = vmatprep.subr.bf16.mxu0 %v8337_v60  ;;  %v3594_v49 = vadd.f32 %v9483_v62, %v8491_v9  ;;  %v8815_v62 = vld [vmem:[%s9123_s3 + $0x284] ss:$16 sps:$4 sm:$0xff]  }
0x1399   :  { %4364 = vmatprep.subr.bf16.mxu1 %v8347_v24 }
0x139b   :  { %4324 = vmatpush1.bf16.msra.mxu0 %v8342_v1 }
0x139c   :  { %4365 = vmatpush1.bf16.msra.mxu1 %v8352_v61  ;;  %4425 = vmatprep.subr.bf16.mxu0 %v8169_v28  ;;  %v9477_v28 = vld [vmem:[#allocation4_spill] sm:$0xff] }
0x139d   :  { %4466 = vmatprep.subr.bf16.mxu1 %v8174_v10  ;;  %v9478_v10 = vld [vmem:[#allocation19_spill] sm:$0xff] }
0x139e   :  { %v3519_v3 = vadd.f32 %v9478_v10, %v9477_v28  ;;  %v8778_v10 = vld [vmem:[%s9123_s3 + $0x240] ss:$16 sps:$4 sm:$0xff]  }
0x140b   :  { %v4800_v46 = vpop.xlane.xlu0 %4799 }
0x140c   :  { %v4814_v14 = vmul.f32 %v8568_v6, %v4800_v46 }
0x140f   :  { %v4849_v4 = vpop.xlane.xlu0 %4848 }
0x1410   :  { %v4863_v18 = vmul.f32 %v8564_v57, %v4849_v4 }
0x1412   :  { %v4871_v19 = vadd.f32 %v4863_v18, %v4814_v14  ;;  %v8733_v14 = vld [vmem:[%s9123_s3 + $0x208] ss:$16 sps:$4 sm:$0xff]  }
0x1413   :  { %v4898_v13 = vpop.xlane.xlu0 %4897 }
0x1414   :  { %v4912_v17 = vmul.f32 %v9474_v15, %v4898_v13  ;;  %v8726_v13 = vld [vmem:[%s9123_s3 + $0x200] ss:$16 sps:$4 sm:$0xff]  }
0x1416   :  { %v4920_v25 = vadd.f32 %v4912_v17, %v4871_v19  ;;  %v8739_v17 = vld [vmem:[%s9123_s3 + $0x224] ss:$16 sps:$4 sm:$0xff]   ;;  %v8745_v19 = vld [vmem:[%s9123_s3 + $0x22c] ss:$16 sps:$4 sm:$0xff]  }
0x1417   :  { %v4947_v21 = vpop.xlane.xlu0 %4946 }
0x1418   :  { %v4961_v34 = vmul.f32 %v9475_v23, %v4947_v21  ;;  %v8753_v21 = vld [vmem:[%s9123_s3 + $0x220] ss:$16 sps:$4 sm:$0xff]  }
0x141a   :  { %v4969_v50 = vadd.f32 %v4961_v34, %v4920_v25  ;;  %v8760_v34 = vld [vmem:[%s9123_s3 + $0x228] ss:$16 sps:$4 sm:$0xff]  }
0x141c   :  { %v4984_v63 = vadd.f32 %v9476_v51, %v4969_v50  ;;  %v8766_v50 = vld [vmem:[%s9123_s3 + $0x244] ss:$16 sps:$4 sm:$0xff]  }
0x141e   :  { %4992 = vst.msk [vmem:[%s9132_s7 + $0x10] sm:$0xff] %vm75_vm1, %v4984_v63  ;;  %v8772_v63 = vld [vmem:[%s9123_s3 + $0x24c] ss:$16 sps:$4 sm:$0xff]  }
0x1451   :  { %v4227_v41 = vpop.f32.mrb[108].mxu0 }
0x1452   :  { %v4275_v60 = vadd.f32 %v4227_v41, %v3519_v3  ;;  %v4268_v1 = vpop.f32.mrb[108].mxu1  ;;  %v4229_v24 = vpop.f32.mrb[109].mxu0  ;;  %v8809_v41 = vld [vmem:[%s9123_s3 + $0x268] ss:$16 sps:$4 sm:$0xff]  }
0x1453   :  { %v4277_v61 = vadd.f32 %v4268_v1, %v3592_v55  ;;  %v4276_v56 = vadd.f32 %v4229_v24, %v3521_v37  ;;  %v4270_v22 = vpop.f32.mrb[109].mxu1  ;;  %v4231_v12 = vpop.f32.mrb[110].mxu0  ;;  %v8791_v55 = vld [vmem:[%s9123_s3 + $0x264] ss:$16 sps:$4 sm:$0xff]   ;;  %v8803_v37 = vld [vmem:[%s9123_s3 + $0x260] ss:$16 sps:$4 sm:$0xff]  }
0x1454   :  { %v5330_v33 = vmul.f32 -1.442695, %v4275_v60  ;;  %v4278_v52 = vadd.f32 %v4270_v22, %v3594_v49  ;;  %v4272_v48 = vpop.f32.mrb[110].mxu1  ;;  %v4232_v42 = vpop.f32.mrb[111].mxu0  ;;  %v8821_v49 = vld [vmem:[%s9123_s3 + $0x28c] ss:$16 sps:$4 sm:$0xff]  }
0x1455   :  { %v5331_v20 = vmul.f32 -1.442695, %v4276_v56  ;;  %v4273_v30 = vpop.f32.mrb[111].mxu1  ;;  %v8827_v60 = vld [vmem:[%s9123_s3 + $0x280] ss:$16 sps:$4 sm:$0xff]  }
0x1456   :  { %5901 = vpow2.f32 %v5330_v33  ;;  %v5332_v39 = vmul.f32 -1.442695, %v4278_v52  ;;  %v8833_v1 = vld [vmem:[%s9123_s3 + $0x288] ss:$16 sps:$4 sm:$0xff]   ;;  %v8839_v24 = vld [vmem:[%s9123_s3 + $0x2a4] ss:$16 sps:$4 sm:$0xff]  }
0x1457   :  { %5903 = vpow2.f32 %v5331_v20  ;;  %v8851_v56 = vld [vmem:[%s9123_s3 + $0x2a0] ss:$16 sps:$4 sm:$0xff]   ;;  %v8857_v22 = vld [vmem:[%s9123_s3 + $0x2a8] ss:$16 sps:$4 sm:$0xff]   ;;  %v8863_v12 = vld [vmem:[%s9123_s3 + $0x2c4] ss:$16 sps:$4 sm:$0xff]  }
0x1458   :  { %5905 = vpow2.f32 %v5332_v39  ;;  %v8869_v33 = vld [vmem:[%s9123_s3 + $0x2cc] ss:$16 sps:$4 sm:$0xff]   ;;  %v8875_v52 = vld [vmem:[%s9123_s3 + $0x2c0] ss:$16 sps:$4 sm:$0xff]   ;;  %v8881_v48 = vld [vmem:[%s9123_s3 + $0x2c8] ss:$16 sps:$4 sm:$0xff]  }
0x1459   :  { %5907 = vtanh.f32 %v4277_v61  ;;  %v8845_v61 = vld [vmem:[%s9123_s3 + $0x2ac] ss:$16 sps:$4 sm:$0xff]   ;;  %v8887_v42 = vld [vmem:[%s9123_s3 + $0x2e4] ss:$16 sps:$4 sm:$0xff]   ;;  %v8899_v30 = vld [vmem:[%s9123_s3 + $0x2e0] ss:$16 sps:$4 sm:$0xff]  }
0x145a   :  { %v8893_v20 = vld [vmem:[%s9123_s3 + $0x2ec] ss:$16 sps:$4 sm:$0xff]   ;;  %v8905_v39 = vld [vmem:[%s9123_s3 + $0x2e8] ss:$16 sps:$4 sm:$0xff]  }
0x1460   :  { %v5902_v31 = vpop.eup %5901 }
0x1461   :  { %v5904_v29 = vpop.eup %5903  ;;  %v4282_v32 = vadd.f32 1.0, %v5902_v31  ;;  %v8911_v31 = vld [vmem:[%s9123_s3 + $0x204] ss:$16 sps:$4 sm:$0xff]  }
0x1462   :  { %v4288_v59 = vadd.f32 1.0, %v5904_v29  ;;  %v5906_v26 = vpop.eup %5905  ;;  %v8917_v29 = vld [vmem:[%s9123_s3 + $0x20c] ss:$16 sps:$4 sm:$0xff]  }
0x1463   :  { %5909 = vrcp.f32 %v4282_v32  ;;  %v5908_v35 = vpop.eup %5907  ;;  %v4295_v7 = vadd.f32 1.0, %v5906_v26 }
0x1464   :  { %5911 = vrcp.f32 %v4288_v59 }
0x1465   :  { %5913 = vrcp.f32 %v4295_v7 }
0x146d   :  { %v5910_v11 = vpop.eup %5909 }
0x146e   :  { %v5912_v27 = vpop.eup %5911  ;;  %v4299_v58 = vmul.f32 %v5910_v11, %v5908_v35 }
0x146f   :  { %v4298_v16 = vmul.f32 %v5912_v27, %v8660_v47  ;;  %v5914_v8 = vpop.eup %5913 }
0x1471   :  { %v8719_v53 = vadd.f32 %v4299_v58, %v4298_v16 }
0x1473   :  { %5915 = vtanh.f32 %v8719_v53 }
0x147d   :  { %v5916_v40 = vpop.eup %5915 }
0x147e   :  { %v4302_v46 = vmul.f32 %v5916_v40, %v5914_v8 }
0x1480   :  { %v4790_v4 = vmul.f32 %v8507_v2, %v4302_v46  ;;  %v4308_v18 = vpack.c.bf16 %v4302_v46, %v4302_v46  ;;  %v4839_v47 = vmul.f32 %v8513_v0, %v4302_v46  ;;  %v4888_v25 = vmul.f32 %v8522_v5, %v4302_v46 }
0x1481   :  { %v4937_v3 = vmul.f32 %v8534_v45, %v4302_v46 }
0x1482   :  { %4801 = vadd.xlane.f32.xlu1 %v4790_v4  ;;  %4342 = vmatmul.mubr.bf16.vlgmr.msra.gmra.mrb[112].mxu0 %v4308_v18  ;;  %v9484_v4 = vld [vmem:[#allocation24_spill] sm:$0xff] }
0x1483   :  { %4383 = vmatmul.mubr.bf16.vlgmr.msra.gmra.mrb[112].mxu1 %v4308_v18  ;;  %4426 = vmatpush1.bf16.msra.mxu0 %v8726_v13  ;;  %v3525_v18 = vadd.f32 %v9484_v4, %v9477_v28 }
0x1484   :  { %4467 = vmatpush1.bf16.msra.mxu1 %v8733_v14  ;;  %4427 = vmatprep.subr.bf16.mxu0 %v8739_v17 }
0x1485   :  { %4468 = vmatprep.subr.bf16.mxu1 %v8745_v19  ;;  %4457 = vmatprep.mubr.bf16.mxu0 %v9267_v44 }
0x1486   :  { %4850 = vadd.xlane.f32.xlu1 %v4839_v47  ;;  %4498 = vmatprep.mubr.bf16.mxu1 %v9267_v44  ;;  %v9485_v47 = vld [vmem:[#allocation22_spill] sm:$0xff] }
0x1487   :  { %4428 = vmatpush1.bf16.msra.mxu0 %v8753_v21 }
0x1488   :  { %4469 = vmatpush1.bf16.msra.mxu1 %v8760_v34  ;;  %4429 = vmatprep.subr.bf16.mxu0 %v8766_v50 }
0x1489   :  { %4470 = vmatprep.subr.bf16.mxu1 %v8772_v63 }
0x148a   :  { %4899 = vadd.xlane.f32.xlu1 %v4888_v25  ;;  %v3598_v25 = vadd.f32 %v9485_v47, %v9479_v54 }
0x148b   :  { %4430 = vmatpush1.bf16.msra.mxu0 %v8778_v10 }
0x148c   :  { %4471 = vmatpush1.bf16.msra.mxu1 %v8785_v36  ;;  %4431 = vmatprep.subr.bf16.mxu0 %v8791_v55 }
0x148d   :  { %4472 = vmatprep.subr.bf16.mxu1 %v8797_v38 }
0x148e   :  { %4948 = vadd.xlane.f32.xlu1 %v4937_v3  ;;  %v9486_v3 = vld [vmem:[#allocation26_spill] sm:$0xff] }
0x148f   :  { %4432 = vmatpush1.bf16.msra.mxu0 %v8803_v37 }
0x1490   :  { %4473 = vmatpush1.bf16.msra.mxu1 %v8809_v41  ;;  %4433 = vmatprep.subr.bf16.mxu0 %v8815_v62 }
0x1491   :  { %4474 = vmatprep.subr.bf16.mxu1 %v8821_v49 }
0x1493   :  { %4434 = vmatpush1.bf16.msra.mxu0 %v8827_v60 }
0x1494   :  { %4475 = vmatpush1.bf16.msra.mxu1 %v8833_v1  ;;  %4435 = vmatprep.subr.bf16.mxu0 %v8839_v24 }
0x1495   :  { %4476 = vmatprep.subr.bf16.mxu1 %v8845_v61 }
0x1497   :  { %4436 = vmatpush1.bf16.msra.mxu0 %v8851_v56 }
0x1498   :  { %4477 = vmatpush1.bf16.msra.mxu1 %v8857_v22  ;;  %4437 = vmatprep.subr.bf16.mxu0 %v8863_v12 }
0x1499   :  { %4478 = vmatprep.subr.bf16.mxu1 %v8869_v33 }
0x149b   :  { %4438 = vmatpush1.bf16.msra.mxu0 %v8875_v52 }
0x149c   :  { %4479 = vmatpush1.bf16.msra.mxu1 %v8881_v48  ;;  %4439 = vmatprep.subr.bf16.mxu0 %v8887_v42 }
0x149d   :  { %4480 = vmatprep.subr.bf16.mxu1 %v8893_v20 }
0x149f   :  { %4440 = vmatpush1.bf16.msra.mxu0 %v8899_v30 }
0x14a0   :  { %4481 = vmatpush1.bf16.msra.mxu1 %v8905_v39  ;;  %4541 = vmatprep.subr.bf16.mxu0 %v8911_v31 }
0x14a1   :  { %4582 = vmatprep.subr.bf16.mxu1 %v8917_v29 }
0x150f   :  { %v4802_v32 = vpop.xlane.xlu1 %4801 }
0x1510   :  { %v4815_v11 = vmul.f32 %v8568_v6, %v4802_v32  ;;  %v3527_v32 = vadd.f32 %v9486_v3, %v9481_v43 }
0x1513   :  { %v4851_v59 = vpop.xlane.xlu1 %4850 }
0x1514   :  { %v4864_v26 = vmul.f32 %v8564_v57, %v4851_v59 }
0x1516   :  { %v4872_v58 = vadd.f32 %v4864_v26, %v4815_v11  ;;  %v9487_v26 = vld [vmem:[#allocation28_spill] sm:$0xff] }
0x1517   :  { %v4900_v35 = vpop.xlane.xlu1 %4899 }
0x1518   :  { %v4913_v27 = vmul.f32 %v9474_v15, %v4900_v35  ;;  %v3600_v35 = vadd.f32 %v9487_v26, %v8491_v9 }
0x151a   :  { %v4921_v16 = vadd.f32 %v4913_v27, %v4872_v58 }
0x151b   :  { %v4949_v7 = vpop.xlane.xlu1 %4948 }
0x151c   :  { %v4962_v8 = vmul.f32 %v9475_v23, %v4949_v7 }
0x151e   :  { %v4970_v40 = vadd.f32 %v4962_v8, %v4921_v16 }
0x1520   :  { %v4985_v46 = vadd.f32 %v9476_v51, %v4970_v40 }
0x1522   :  { %4993 = vst.msk [vmem:[%s9132_s7 + $0x18] sm:$0xff] %vm75_vm1, %v4985_v46 }
0x1555   :  { %v4343_v59 = vpop.f32.mrb[112].mxu0 }
0x1556   :  { %v4391_v11 = vadd.f32 %v4343_v59, %v3525_v18  ;;  %v4384_v27 = vpop.f32.mrb[112].mxu1  ;;  %v4345_v58 = vpop.f32.mrb[113].mxu0 }
0x1557   :  { %v4393_v7 = vadd.f32 %v4384_v27, %v3598_v25  ;;  %v4392_v16 = vadd.f32 %v4345_v58, %v3527_v32  ;;  %v4386_v8 = vpop.f32.mrb[113].mxu1  ;;  %v4347_v40 = vpop.f32.mrb[114].mxu0 }
0x1558   :  { %v5333_v46 = vmul.f32 -1.442695, %v4391_v11  ;;  %v4394_v51 = vadd.f32 %v4386_v8, %v3600_v35  ;;  %v4388_v4 = vpop.f32.mrb[114].mxu1  ;;  %v4348_v28 = vpop.f32.mrb[115].mxu0  ;;  %v9488_v8 = vld [vmem:[#allocation14_spill] sm:$0xff] }
0x1559   :  { %v5334_v23 = vmul.f32 -1.442695, %v4392_v16  ;;  %v4389_v47 = vpop.f32.mrb[115].mxu1 }
0x155a   :  { %5917 = vpow2.f32 %v5333_v46  ;;  %v5335_v3 = vmul.f32 -1.442695, %v4394_v51 }
0x155b   :  { %5919 = vpow2.f32 %v5334_v23 }
0x155c   :  { %5921 = vpow2.f32 %v5335_v3  ;;  %v9489_v3 = vld [vmem:[#allocation6_spill] sm:$0xff] }
0x155d   :  { %5923 = vtanh.f32 %v4393_v7 }
0x1564   :  { %v5918_v43 = vpop.eup %5917 }
0x1565   :  { %v5920_v54 = vpop.eup %5919  ;;  %v4398_v15 = vadd.f32 1.0, %v5918_v43 }
0x1566   :  { %v4404_v18 = vadd.f32 1.0, %v5920_v54  ;;  %v5922_v25 = vpop.eup %5921 }
0x1567   :  { %5925 = vrcp.f32 %v4398_v15  ;;  %v5924_v32 = vpop.eup %5923  ;;  %v4411_v11 = vadd.f32 1.0, %v5922_v25 }
0x1568   :  { %5927 = vrcp.f32 %v4404_v18 }
0x1569   :  { %5929 = vrcp.f32 %v4411_v11  ;;  %v9494_v11 = vld [vmem:[#allocation29_spill] sm:$0xff] }
0x1571   :  { %v5926_v59 = vpop.eup %5925 }
0x1572   :  { %v5928_v26 = vpop.eup %5927  ;;  %v4415_v35 = vmul.f32 %v5926_v59, %v5924_v32  ;;  %v9490_v32 = vld [vmem:[#allocation33_spill] sm:$0xff] }
0x1573   :  { %v4414_v28 = vmul.f32 %v5928_v26, %v8719_v53  ;;  %v5930_v23 = vpop.eup %5929 }
0x1575   :  { %v8938_v27 = vadd.f32 %v4415_v35, %v4414_v28  ;;  %v9493_v35 = vld [vmem:[#allocation8_spill] sm:$0xff] }
0x1576   :  { %v3602_v28 = vadd.f32 %v9494_v11, %v9493_v35 }
0x1577   :  { %5931 = vtanh.f32 %v8938_v27 }
0x1581   :  { %v5932_v51 = vpop.eup %5931 }
0x1582   :  { %v4418_v43 = vmul.f32 %v5932_v51, %v5930_v23  ;;  %v9495_v23 = vld [vmem:[#allocation9_spill] sm:$0xff] }
0x1583   :  { %v9496_v51 = vld [vmem:[#allocation21_spill] sm:$0xff] }
0x1584   :  { %v4791_v54 = vmul.f32 %v8507_v2, %v4418_v43  ;;  %v4424_v15 = vpack.c.bf16 %v4418_v43, %v4418_v43  ;;  %v4840_v58 = vmul.f32 %v8513_v0, %v4418_v43  ;;  %v4889_v2 = vmul.f32 %v8522_v5, %v4418_v43 }
0x1585   :  { %v4938_v0 = vmul.f32 %v8534_v45, %v4418_v43  ;;  %v3531_v43 = vadd.f32 %v9496_v51, %v9495_v23 }
0x1586   :  { %4803 = vadd.xlane.f32.xlu0 %v4791_v54  ;;  %4458 = vmatmul.mubr.bf16.vlgmr.msra.gmra.mrb[116].mxu0 %v4424_v15 }
0x1587   :  { %4499 = vmatmul.mubr.bf16.vlgmr.msra.gmra.mrb[116].mxu1 %v4424_v15  ;;  %4542 = vmatpush1.bf16.msra.mxu0 %v8726_v13  ;;  %v9497_v15 = vld [vmem:[#allocation27_spill] sm:$0xff] }
0x1588   :  { %4583 = vmatpush1.bf16.msra.mxu1 %v8733_v14  ;;  %4543 = vmatprep.subr.bf16.mxu0 %v8739_v17 }
0x1589   :  { %4584 = vmatprep.subr.bf16.mxu1 %v8745_v19  ;;  %4573 = vmatprep.mubr.bf16.mxu0 %v9267_v44 }
0x158a   :  { %4852 = vadd.xlane.f32.xlu0 %v4840_v58  ;;  %4614 = vmatprep.mubr.bf16.mxu1 %v9267_v44  ;;  %v3604_v58 = vadd.f32 %v9497_v15, %v8491_v9 }
0x158b   :  { %4544 = vmatpush1.bf16.msra.mxu0 %v8753_v21 }
0x158c   :  { %4585 = vmatpush1.bf16.msra.mxu1 %v8760_v34  ;;  %4545 = vmatprep.subr.bf16.mxu0 %v8766_v50 }
0x158d   :  { %4586 = vmatprep.subr.bf16.mxu1 %v8772_v63 }
0x158e   :  { %4901 = vadd.xlane.f32.xlu0 %v4889_v2 }
0x158f   :  { %4546 = vmatpush1.bf16.msra.mxu0 %v8778_v10 }
0x1590   :  { %4587 = vmatpush1.bf16.msra.mxu1 %v8785_v36  ;;  %4547 = vmatprep.subr.bf16.mxu0 %v8791_v55 }
0x1591   :  { %4588 = vmatprep.subr.bf16.mxu1 %v8797_v38 }
0x1592   :  { %4950 = vadd.xlane.f32.xlu0 %v4938_v0 }
0x1593   :  { %4548 = vmatpush1.bf16.msra.mxu0 %v8803_v37 }
0x1594   :  { %4589 = vmatpush1.bf16.msra.mxu1 %v8809_v41  ;;  %4549 = vmatprep.subr.bf16.mxu0 %v8815_v62 }
0x1595   :  { %4590 = vmatprep.subr.bf16.mxu1 %v8821_v49 }
0x1597   :  { %4550 = vmatpush1.bf16.msra.mxu0 %v8827_v60 }
0x1598   :  { %4591 = vmatpush1.bf16.msra.mxu1 %v8833_v1  ;;  %4551 = vmatprep.subr.bf16.mxu0 %v8839_v24 }
0x1599   :  { %4592 = vmatprep.subr.bf16.mxu1 %v8845_v61 }
0x159b   :  { %4552 = vmatpush1.bf16.msra.mxu0 %v8851_v56 }
0x159c   :  { %4593 = vmatpush1.bf16.msra.mxu1 %v8857_v22  ;;  %4553 = vmatprep.subr.bf16.mxu0 %v8863_v12 }
0x159d   :  { %4594 = vmatprep.subr.bf16.mxu1 %v8869_v33 }
0x159f   :  { %4554 = vmatpush1.bf16.msra.mxu0 %v8875_v52 }
0x15a0   :  { %4595 = vmatpush1.bf16.msra.mxu1 %v8881_v48  ;;  %4555 = vmatprep.subr.bf16.mxu0 %v8887_v42 }
0x15a1   :  { %4596 = vmatprep.subr.bf16.mxu1 %v8893_v20 }
0x15a3   :  { %4556 = vmatpush1.bf16.msra.mxu0 %v8899_v30 }
0x15a4   :  { %4597 = vmatpush1.bf16.msra.mxu1 %v8905_v39  ;;  %4657 = vmatprep.subr.bf16.mxu0 %v8911_v31  ;;  %v9491_v31 = vld [vmem:[#allocation4_spill] sm:$0xff] }
0x15a5   :  { %4698 = vmatprep.subr.bf16.mxu1 %v8917_v29  ;;  %v9492_v29 = vld [vmem:[#allocation25_spill] sm:$0xff] }
0x15a6   :  { %v3529_v26 = vadd.f32 %v9492_v29, %v9491_v31 }
0x1613   :  { %v4804_v5 = vpop.xlane.xlu0 %4803 }
0x1614   :  { %v4816_v16 = vmul.f32 %v8568_v6, %v4804_v5 }
0x1617   :  { %v4853_v45 = vpop.xlane.xlu0 %4852 }
0x1618   :  { %v4865_v53 = vmul.f32 %v8564_v57, %v4853_v45 }
0x161a   :  { %v4873_v46 = vadd.f32 %v4865_v53, %v4816_v16 }
0x161b   :  { %v4902_v7 = vpop.xlane.xlu0 %4901 }
0x161c   :  { %v4914_v40 = vmul.f32 %v9488_v8, %v4902_v7 }
0x161e   :  { %v4922_v47 = vadd.f32 %v4914_v40, %v4873_v46 }
0x161f   :  { %v4951_v4 = vpop.xlane.xlu0 %4950 }
0x1620   :  { %v4963_v18 = vmul.f32 %v9489_v3, %v4951_v4 }
0x1622   :  { %v4971_v25 = vadd.f32 %v4963_v18, %v4922_v47 }
0x1624   :  { %v4986_v59 = vadd.f32 %v9490_v32, %v4971_v25 }
0x1626   :  { %4994 = vst.msk [vmem:[%s9132_s7 + $0x20] sm:$0xff] %vm75_vm1, %v4986_v59 }
0x1659   :  { %v4459_v54 = vpop.f32.mrb[116].mxu0 }
0x165a   :  { %v4507_v2 = vadd.f32 %v4459_v54, %v3529_v26  ;;  %v4500_v0 = vpop.f32.mrb[116].mxu1  ;;  %v4461_v5 = vpop.f32.mrb[117].mxu0 }
0x165b   :  { %v4509_v45 = vadd.f32 %v4500_v0, %v3602_v28  ;;  %v4508_v53 = vadd.f32 %v4461_v5, %v3531_v43  ;;  %v4502_v7 = vpop.f32.mrb[117].mxu1  ;;  %v4463_v16 = vpop.f32.mrb[118].mxu0 }
0x165c   :  { %v5336_v40 = vmul.f32 -1.442695, %v4507_v2  ;;  %v4510_v46 = vadd.f32 %v4502_v7, %v3604_v58  ;;  %v4504_v4 = vpop.f32.mrb[118].mxu1  ;;  %v4464_v47 = vpop.f32.mrb[119].mxu0 }
0x165d   :  { %v5337_v18 = vmul.f32 -1.442695, %v4508_v53  ;;  %v4505_v25 = vpop.f32.mrb[119].mxu1 }
0x165e   :  { %5933 = vpow2.f32 %v5336_v40  ;;  %v5338_v59 = vmul.f32 -1.442695, %v4510_v46 }
0x165f   :  { %5935 = vpow2.f32 %v5337_v18 }
0x1660   :  { %5937 = vpow2.f32 %v5338_v59 }
0x1661   :  { %5939 = vtanh.f32 %v4509_v45  ;;  %v9003_v45 = vld [vmem:[%s9130_s5] ss:$0 sm:$0xff] }
0x1668   :  { %v5934_v29 = vpop.eup %5933 }
0x1669   :  { %v5936_v11 = vpop.eup %5935  ;;  %v4514_v51 = vadd.f32 1.0, %v5934_v29 }
0x166a   :  { %v4520_v26 = vadd.f32 1.0, %v5936_v11  ;;  %v5938_v28 = vpop.eup %5937 }
0x166b   :  { %5941 = vrcp.f32 %v4514_v51  ;;  %v5940_v43 = vpop.eup %5939  ;;  %v4527_v2 = vadd.f32 1.0, %v5938_v28 }
0x166c   :  { %5943 = vrcp.f32 %v4520_v26 }
0x166d   :  { %5945 = vrcp.f32 %v4527_v2 }
0x1675   :  { %v5942_v54 = vpop.eup %5941 }
0x1676   :  { %v5944_v15 = vpop.eup %5943  ;;  %v4531_v58 = vmul.f32 %v5942_v54, %v5940_v43 }
0x1677   :  { %v4530_v0 = vmul.f32 %v5944_v15, %v8938_v27  ;;  %v5946_v53 = vpop.eup %5945  ;;  %v9010_v27 = vld [vmem:[%s9130_s5 + $0x1] ss:$0 sm:$0xff] }
0x1679   :  { %v8997_v5 = vadd.f32 %v4531_v58, %v4530_v0 }
0x167b   :  { %5947 = vtanh.f32 %v8997_v5 }
0x1685   :  { %v5948_v7 = vpop.eup %5947 }
0x1686   :  { %v4534_v16 = vmul.f32 %v5948_v7, %v5946_v53 }
0x1688   :  { %v4792_v40 = vmul.f32 %v9003_v45, %v4534_v16  ;;  %v4540_v46 = vpack.c.bf16 %v4534_v16, %v4534_v16  ;;  %v4841_v4 = vmul.f32 %v9010_v27, %v4534_v16 }
0x168a   :  { %4805 = vadd.xlane.f32.xlu1 %v4792_v40  ;;  %4574 = vmatmul.mubr.bf16.vlgmr.msra.gmra.mrb[120].mxu0 %v4540_v46 }
0x168b   :  { %4615 = vmatmul.mubr.bf16.vlgmr.msra.gmra.mrb[120].mxu1 %v4540_v46  ;;  %4658 = vmatpush1.bf16.msra.mxu0 %v8726_v13  ;;  %v9022_v13 = vld [vmem:[%s9130_s5 + $0x2] ss:$0 sm:$0xff] }
0x168c   :  { %4699 = vmatpush1.bf16.msra.mxu1 %v8733_v14  ;;  %4659 = vmatprep.subr.bf16.mxu0 %v8739_v17  ;;  %v4890_v47 = vmul.f32 %v9022_v13, %v4534_v16 }
0x168d   :  { %4700 = vmatprep.subr.bf16.mxu1 %v8745_v19  ;;  %4689 = vmatprep.mubr.bf16.mxu0 %v9267_v44 }
0x168e   :  { %4854 = vadd.xlane.f32.xlu1 %v4841_v4  ;;  %4730 = vmatprep.mubr.bf16.mxu1 %v9267_v44  ;;  %v9032_v44 = vld [vmem:[%s9130_s5 + $0x3] ss:$0 sm:$0xff] }
0x168f   :  { %4660 = vmatpush1.bf16.msra.mxu0 %v8753_v21  ;;  %v4939_v14 = vmul.f32 %v9032_v44, %v4534_v16 }
0x1690   :  { %4701 = vmatpush1.bf16.msra.mxu1 %v8760_v34  ;;  %4661 = vmatprep.subr.bf16.mxu0 %v8766_v50 }
0x1691   :  { %4702 = vmatprep.subr.bf16.mxu1 %v8772_v63 }
0x1692   :  { %4903 = vadd.xlane.f32.xlu1 %v4890_v47 }
0x1693   :  { %4662 = vmatpush1.bf16.msra.mxu0 %v8778_v10 }
0x1694   :  { %4703 = vmatpush1.bf16.msra.mxu1 %v8785_v36  ;;  %4663 = vmatprep.subr.bf16.mxu0 %v8791_v55 }
0x1695   :  { %4704 = vmatprep.subr.bf16.mxu1 %v8797_v38 }
0x1696   :  { %4952 = vadd.xlane.f32.xlu1 %v4939_v14 }
0x1697   :  { %4664 = vmatpush1.bf16.msra.mxu0 %v8803_v37 }
0x1698   :  { %4705 = vmatpush1.bf16.msra.mxu1 %v8809_v41  ;;  %4665 = vmatprep.subr.bf16.mxu0 %v8815_v62  ;;  %v9498_v62 = vld [vmem:[#allocation5_spill] sm:$0xff] }
0x1699   :  { %4706 = vmatprep.subr.bf16.mxu1 %v8821_v49  ;;  %v3535_v49 = vadd.f32 %v9498_v62, %v9491_v31 }
0x169b   :  { %4666 = vmatpush1.bf16.msra.mxu0 %v8827_v60  ;;  %v9499_v60 = vld [vmem:[#allocation31_spill] sm:$0xff] }
0x169c   :  { %4707 = vmatpush1.bf16.msra.mxu1 %v8833_v1  ;;  %4667 = vmatprep.subr.bf16.mxu0 %v8839_v24  ;;  %v3608_v1 = vadd.f32 %v9499_v60, %v9493_v35  ;;  %v9500_v24 = vld [vmem:[#allocation10_spill] sm:$0xff]  ;;  %v9088_v60 = vld [vmem:[%s9131_s6] ss:$0 sm:$0xff] }
0x169d   :  { %4708 = vmatprep.subr.bf16.mxu1 %v8845_v61  ;;  %v3537_v61 = vadd.f32 %v9500_v24, %v9495_v23  ;;  %v9502_v24 = vld [vmem:[#allocation11_spill] sm:$0xff] }
0x169f   :  { %4668 = vmatpush1.bf16.msra.mxu0 %v8851_v56 }
0x16a0   :  { %4709 = vmatpush1.bf16.msra.mxu1 %v8857_v22  ;;  %4669 = vmatprep.subr.bf16.mxu0 %v8863_v12  ;;  %v9501_v22 = vld [vmem:[#allocation30_spill] sm:$0xff] }
0x16a1   :  { %4710 = vmatprep.subr.bf16.mxu1 %v8869_v33  ;;  %v3610_v12 = vadd.f32 %v9501_v22, %v8491_v9 }
0x16a3   :  { %4670 = vmatpush1.bf16.msra.mxu0 %v8875_v52 }
0x16a4   :  { %4711 = vmatpush1.bf16.msra.mxu1 %v8881_v48  ;;  %4671 = vmatprep.subr.bf16.mxu0 %v8887_v42 }
0x16a5   :  { %4712 = vmatprep.subr.bf16.mxu1 %v8893_v20 }
0x16a7   :  { %4672 = vmatpush1.bf16.msra.mxu0 %v8899_v30 }
0x16a8   :  { %4713 = vmatpush1.bf16.msra.mxu1 %v8905_v39 }
0x1717   :  { %v4806_v17 = vpop.xlane.xlu1 %4805 }
0x1718   :  { %v4817_v50 = vmul.f32 %v8568_v6, %v4806_v17 }
0x171b   :  { %v4855_v19 = vpop.xlane.xlu1 %4854 }
0x171c   :  { %v4866_v21 = vmul.f32 %v8564_v57, %v4855_v19 }
0x171e   :  { %v4874_v10 = vadd.f32 %v4866_v21, %v4817_v50 }
0x171f   :  { %v4904_v34 = vpop.xlane.xlu1 %4903 }
0x1720   :  { %v4915_v63 = vmul.f32 %v9488_v8, %v4904_v34 }
0x1722   :  { %v4923_v55 = vadd.f32 %v4915_v63, %v4874_v10 }
0x1723   :  { %v4953_v36 = vpop.xlane.xlu1 %4952 }
0x1724   :  { %v4964_v38 = vmul.f32 %v9489_v3, %v4953_v36 }
0x1726   :  { %v4972_v37 = vadd.f32 %v4964_v38, %v4923_v55 }
0x1728   :  { %v4987_v41 = vadd.f32 %v9490_v32, %v4972_v37 }
0x172a   :  { %4995 = vst.msk [vmem:[%s9132_s7 + $0x28] sm:$0xff] %vm75_vm1, %v4987_v41 }
0x175d   :  { %v4575_v56 = vpop.f32.mrb[120].mxu0 }
0x175e   :  { %v4623_v33 = vadd.f32 %v4575_v56, %v3535_v49  ;;  %v4616_v52 = vpop.f32.mrb[120].mxu1  ;;  %v4577_v48 = vpop.f32.mrb[121].mxu0  ;;  %v9503_v56 = vld [vmem:[#allocation7_spill] sm:$0xff] }
0x175f   :  { %v4625_v42 = vadd.f32 %v4616_v52, %v3608_v1  ;;  %v4624_v20 = vadd.f32 %v4577_v48, %v3537_v61  ;;  %v4618_v30 = vpop.f32.mrb[121].mxu1  ;;  %v4579_v39 = vpop.f32.mrb[122].mxu0  ;;  %v3539_v61 = vadd.f32 %v9502_v24, %v9491_v31  ;;  %v3612_v22 = vadd.f32 %v9503_v56, %v9493_v35  ;;  %v9505_v48 = vld [vmem:[#allocation32_spill] sm:$0xff] }
0x1760   :  { %v5339_v32 = vmul.f32 -1.442695, %v4623_v33  ;;  %v4626_v18 = vadd.f32 %v4618_v30, %v3610_v12  ;;  %v4620_v25 = vpop.f32.mrb[122].mxu1  ;;  %v4580_v59 = vpop.f32.mrb[123].mxu0  ;;  %v9504_v12 = vld [vmem:[#allocation17_spill] sm:$0xff] }
0x1761   :  { %v5340_v29 = vmul.f32 -1.442695, %v4624_v20  ;;  %v4621_v11 = vpop.f32.mrb[123].mxu1  ;;  %v3541_v33 = vadd.f32 %v9504_v12, %v9495_v23 }
0x1762   :  { %5949 = vpow2.f32 %v5339_v32  ;;  %v5341_v51 = vmul.f32 -1.442695, %v4626_v18 }
0x1763   :  { %5951 = vpow2.f32 %v5340_v29 }
0x1764   :  { %5953 = vpow2.f32 %v5341_v51 }
0x1765   :  { %5955 = vtanh.f32 %v4625_v42  ;;  %v3614_v42 = vadd.f32 %v9505_v48, %v8491_v9 }
0x176c   :  { %v5950_v26 = vpop.eup %5949 }
0x176d   :  { %v5952_v28 = vpop.eup %5951  ;;  %v4630_v43 = vadd.f32 1.0, %v5950_v26 }
0x176e   :  { %v4636_v54 = vadd.f32 1.0, %v5952_v28  ;;  %v5954_v15 = vpop.eup %5953 }
0x176f   :  { %5957 = vrcp.f32 %v4630_v43  ;;  %v5956_v58 = vpop.eup %5955  ;;  %v4643_v7 = vadd.f32 1.0, %v5954_v15 }
0x1770   :  { %5959 = vrcp.f32 %v4636_v54 }
0x1771   :  { %5961 = vrcp.f32 %v4643_v7 }
0x1779   :  { %v5958_v2 = vpop.eup %5957 }
0x177a   :  { %v5960_v0 = vpop.eup %5959  ;;  %v4647_v53 = vmul.f32 %v5958_v2, %v5956_v58 }
0x177b   :  { %v4646_v16 = vmul.f32 %v5960_v0, %v8997_v5  ;;  %v5962_v46 = vpop.eup %5961 }
0x177d   :  { %v9074_v40 = vadd.f32 %v4647_v53, %v4646_v16 }
0x177f   :  { %5963 = vtanh.f32 %v9074_v40 }
0x1789   :  { %v5964_v4 = vpop.eup %5963 }
0x178a   :  { %v4650_v47 = vmul.f32 %v5964_v4, %v5962_v46 }
0x178c   :  { %v4793_v14 = vmul.f32 %v9003_v45, %v4650_v47  ;;  %v4656_v17 = vpack.c.bf16 %v4650_v47, %v4650_v47  ;;  %v4842_v19 = vmul.f32 %v9010_v27, %v4650_v47  ;;  %v4891_v21 = vmul.f32 %v9022_v13, %v4650_v47 }
0x178d   :  { %v4940_v5 = vmul.f32 %v9032_v44, %v4650_v47 }
0x178e   :  { %4807 = vadd.xlane.f32.xlu0 %v4793_v14  ;;  %4690 = vmatmul.mubr.bf16.vlgmr.msra.gmra.mrb[124].mxu0 %v4656_v17 }
0x178f   :  { %4731 = vmatmul.mubr.bf16.vlgmr.msra.gmra.mrb[124].mxu1 %v4656_v17 }
0x1792   :  { %4856 = vadd.xlane.f32.xlu0 %v4842_v19 }
0x1796   :  { %4905 = vadd.xlane.f32.xlu0 %v4891_v21 }
0x179a   :  { %4954 = vadd.xlane.f32.xlu0 %v4940_v5 }
0x181b   :  { %v4808_v34 = vpop.xlane.xlu0 %4807 }
0x181c   :  { %v4818_v36 = vmul.f32 %v8568_v6, %v4808_v34 }
0x181f   :  { %v4857_v50 = vpop.xlane.xlu0 %4856 }
0x1820   :  { %v4867_v63 = vmul.f32 %v8564_v57, %v4857_v50 }
0x1822   :  { %v4875_v38 = vadd.f32 %v4867_v63, %v4818_v36 }
0x1823   :  { %v4906_v10 = vpop.xlane.xlu0 %4905 }
0x1824   :  { %v4916_v55 = vmul.f32 %v9488_v8, %v4906_v10 }
0x1826   :  { %v4924_v41 = vadd.f32 %v4916_v55, %v4875_v38 }
0x1827   :  { %v4955_v37 = vpop.xlane.xlu0 %4954 }
0x1828   :  { %v4965_v62 = vmul.f32 %v9489_v3, %v4955_v37 }
0x182a   :  { %v4973_v49 = vadd.f32 %v4965_v62, %v4924_v41 }
0x182c   :  { %v4988_v1 = vadd.f32 %v9088_v60, %v4973_v49 }
0x182e   :  { %4996 = vst.msk [vmem:[%s9132_s7 + $0x30] sm:$0xff] %vm75_vm1, %v4988_v1 }
0x1861   :  { %v4691_v52 = vpop.f32.mrb[124].mxu0 }
0x1862   :  { %v4739_v20 = vadd.f32 %v4691_v52, %v3539_v61  ;;  %v4732_v30 = vpop.f32.mrb[124].mxu1  ;;  %v4693_v39 = vpop.f32.mrb[125].mxu0 }
0x1863   :  { %v4741_v32 = vadd.f32 %v4732_v30, %v3612_v22  ;;  %v4740_v18 = vadd.f32 %v4693_v39, %v3541_v33  ;;  %v4734_v25 = vpop.f32.mrb[125].mxu1  ;;  %v4695_v59 = vpop.f32.mrb[126].mxu0 }
0x1864   :  { %v5342_v29 = vmul.f32 -1.442695, %v4739_v20  ;;  %v4742_v11 = vadd.f32 %v4734_v25, %v3614_v42  ;;  %v4736_v31 = vpop.f32.mrb[126].mxu1  ;;  %v4696_v51 = vpop.f32.mrb[127].mxu0 }
0x1865   :  { %v5343_v26 = vmul.f32 -1.442695, %v4740_v18  ;;  %v4737_v35 = vpop.f32.mrb[127].mxu1 }
0x1866   :  { %5965 = vpow2.f32 %v5342_v29  ;;  %v5344_v23 = vmul.f32 -1.442695, %v4742_v11 }
0x1867   :  { %5967 = vpow2.f32 %v5343_v26 }
0x1868   :  { %5969 = vpow2.f32 %v5344_v23 }
0x1869   :  { %5971 = vtanh.f32 %v4741_v32 }
0x1870   :  { %v5966_v28 = vpop.eup %5965 }
0x1871   :  { %v5968_v43 = vpop.eup %5967  ;;  %v4746_v54 = vadd.f32 1.0, %v5966_v28 }
0x1872   :  { %v4752_v9 = vadd.f32 1.0, %v5968_v43  ;;  %v5970_v15 = vpop.eup %5969 }
0x1873   :  { %5973 = vrcp.f32 %v4746_v54  ;;  %v5972_v58 = vpop.eup %5971  ;;  %v4759_v7 = vadd.f32 1.0, %v5970_v15 }
0x1874   :  { %5975 = vrcp.f32 %v4752_v9 }
0x1875   :  { %5977 = vrcp.f32 %v4759_v7 }
0x187d   :  { %v5974_v2 = vpop.eup %5973 }
0x187e   :  { %v5976_v0 = vpop.eup %5975  ;;  %v4763_v53 = vmul.f32 %v5974_v2, %v5972_v58 }
0x187f   :  { %v4762_v16 = vmul.f32 %v5976_v0, %v9074_v40  ;;  %v5978_v4 = vpop.eup %5977 }
0x1881   :  { %v4764_v46 = vadd.f32 %v4763_v53, %v4762_v16 }
0x1883   :  { %5979 = vtanh.f32 %v4764_v46  ;;  %5346 = vst [vmem:[%s9128_s9 + $0x10] sm:$0xff] %v4764_v46 }
0x188d   :  { %v5980_v47 = vpop.eup %5979 }
0x188e   :  { %v4766_v14 = vmul.f32 %v5980_v47, %v5978_v4 }
0x1890   :  { %v4794_v17 = vmul.f32 %v9003_v45, %v4766_v14  ;;  %5345 = vst [vmem:[%s9129_s8 + $0x10] sm:$0xff] %v4766_v14  ;;  %v4843_v19 = vmul.f32 %v9010_v27, %v4766_v14  ;;  %v4892_v40 = vmul.f32 %v9022_v13, %v4766_v14  ;;  %v4941_v21 = vmul.f32 %v9032_v44, %v4766_v14 }
0x1892   :  { %4809 = vadd.xlane.f32.xlu1 %v4794_v17 }
0x1896   :  { %4858 = vadd.xlane.f32.xlu1 %v4843_v19 }
0x189a   :  { %4907 = vadd.xlane.f32.xlu1 %v4892_v40 }
0x189e   :  { %4956 = vadd.xlane.f32.xlu1 %v4941_v21 }
0x191f   :  { %v4810_v5 = vpop.xlane.xlu1 %4809 }
0x1920   :  { %v4819_v45 = vmul.f32 %v8568_v6, %v4810_v5 }
0x1923   :  { %v4859_v34 = vpop.xlane.xlu1 %4858 }
0x1924   :  { %v4868_v50 = vmul.f32 %v8564_v57, %v4859_v34 }
0x1926   :  { %v4876_v36 = vadd.f32 %v4868_v50, %v4819_v45 }
0x1927   :  { %v4908_v63 = vpop.xlane.xlu1 %4907 }
0x1928   :  { %v4917_v10 = vmul.f32 %v9488_v8, %v4908_v63 }
0x192a   :  { %v4925_v38 = vadd.f32 %v4917_v10, %v4876_v36 }
0x192b   :  { %v4957_v55 = vpop.xlane.xlu1 %4956 }
0x192c   :  { %v4966_v27 = vmul.f32 %v9489_v3, %v4957_v55 }
0x192e   :  { %v4974_v37 = vadd.f32 %v4966_v27, %v4925_v38 }
0x1930   :  { %v4989_v13 = vadd.f32 %v9088_v60, %v4974_v37 }
0x1932   :  { %4997 = vst.msk [vmem:[%s9132_s7 + $0x38] sm:$0xff] %vm75_vm1, %v4989_v13 }

</bundles_post_ra>
